<compile_context>
chip_gen: v5e
topology: v5e:2x2
jax: 0.10.0
libtpu: 0.0.40
codegen_flags: <defaults>
</compile_context>

<pallas_src>
import functools
import math

import numpy as np

import jax
import jax.numpy as jnp
from jax.experimental import pallas as pl
from jax.experimental.pallas import tpu as pltpu


# ----------------------------------------------------------------------------
# Fused Pallas kernel: attention + residual + LayerNorm + MLP + residual
# ----------------------------------------------------------------------------
_UNROLL_SEQ_VIEW = 64  # below this, build per-sequence views with static slices


def _to_seq_view(tok2d, blk, seq_len):
    """(blk*P, D) -> (blk, P, D) per-sequence view of a token-flat value."""
    if blk <= _UNROLL_SEQ_VIEW:
        return jnp.stack(
            [tok2d[b * seq_len:(b + 1) * seq_len, :] for b in range(blk)], axis=0)
    return tok2d.reshape(blk, seq_len, tok2d.shape[-1])


def _to_token_view(seq3d):
    """(blk, P, D) -> (blk*P, D) token-flat view of a per-sequence value."""
    blk, seq_len, d = seq3d.shape
    if blk <= _UNROLL_SEQ_VIEW:
        return jnp.concatenate([seq3d[b] for b in range(blk)], axis=0)
    return seq3d.reshape(blk * seq_len, d)


def _ccblock_fused_kernel(x_ref, wqkv_ref, bqkv_ref, wproj_ref, bproj_ref,
                          rpe_ref, ln_g_ref, ln_b_ref,
                          w1_ref, b1_ref, w2_ref, b2_ref,
                          o_ref, *, seq_len, num_heads, head_dim, scale):
    P, H, hd = seq_len, num_heads, head_dim
    C = H * hd
    T = x_ref.shape[0]          # blk * P tokens in this block
    blk = T // P

    # (blk*P, C) token slab: every linear is one full-height 2-D MXU matmul.
    x = x_ref[...].astype(jnp.float32)                              # (T, C)

    # ---- fused qkv projection ----
    qkv = jnp.dot(x, wqkv_ref[...], preferred_element_type=jnp.float32)
    qkv = qkv + bqkv_ref[...]                                        # (T, 3C)

    # ---- multi-head self-attention (all heads in one batched einsum pair) ----
    qkv3 = _to_seq_view(qkv, blk, P)                                 # (blk, P, 3C)

    def heads(base):                                                 # -> (H*blk, P, hd)
        parts = [qkv3[:, :, base + h * hd: base + (h + 1) * hd] for h in range(H)]
        return jnp.stack(parts, axis=0).reshape(H * blk, P, hd)

    q = heads(0) * scale
    k = heads(C)
    v = heads(2 * C)

    s = jnp.einsum("bpd,bqd->bpq", q, k, preferred_element_type=jnp.float32)
    s = s.reshape(H, blk, P, P) + rpe_ref[...][:, None]              # per-head RPE bias
    s = s - jnp.max(s, axis=-1, keepdims=True)                       # stable softmax
    e = jnp.exp(s)
    p = e * pl.reciprocal(jnp.sum(e, axis=-1, keepdims=True), approx=True)

    ctx = jnp.einsum("bpq,bqd->bpd", p.reshape(H * blk, P, P), v,
                     preferred_element_type=jnp.float32)             # (H*blk, P, hd)
    ctx = ctx.reshape(H, blk, P, hd)
    ctx = jnp.concatenate([ctx[h] for h in range(H)], axis=-1)       # (blk, P, C)
    ctx = _to_token_view(ctx)                                        # (T, C)

    attn = jnp.dot(ctx, wproj_ref[...], preferred_element_type=jnp.float32)
    attn = attn + bproj_ref[...]
    x1 = x + attn                                                    # residual 1

    # ---- LayerNorm (eps = torch default 1e-5) ----
    mu = jnp.mean(x1, axis=-1, keepdims=True)
    var = jnp.mean(jnp.square(x1 - mu), axis=-1, keepdims=True)
    xn = (x1 - mu) * jax.lax.rsqrt(var + 1e-5)
    xn = xn * ln_g_ref[...] + ln_b_ref[...]

    # ---- MLP: Linear -> ReLU -> Linear ----
    h1 = jnp.dot(xn, w1_ref[...], preferred_element_type=jnp.float32) + b1_ref[...]
    h1 = jnp.maximum(h1, 0.0)
    out = x1 + jnp.dot(h1, w2_ref[...], preferred_element_type=jnp.float32) + b2_ref[...]

    o_ref[...] = out.astype(o_ref.dtype)


# ----------------------------------------------------------------------------
# Generation-aware block sizing and pallas_call wrapper
# ----------------------------------------------------------------------------
def _vmem_budget_bytes():
    cap = 64 * 1024 * 1024                       # conservative fallback (v7x-sized)
    try:
        cap = int(pltpu.get_tpu_info().vmem_capacity_bytes)
    except Exception:
        pass
    return (cap * 3) // 4                        # ~48 MiB on v7x, ~96 MiB on v5e/v6e


def _choose_blk(BN, P, C, hid, num_heads):
    """Largest #sequences per grid step that conservatively fits the VMEM budget."""
    f32 = 4
    # VMEM-resident weights/biases/RPE (double-buffered by the pipeline).
    w_bytes = 2 * f32 * (3 * C * C + C * C + 2 * C * hid
                         + 5 * C + hid + num_heads * P * P)
    # Live f32 intermediates per sequence + double-buffered in/out DMA blocks.
    per_seq = f32 * (P * (16 * C + 2 * hid) + 2 * num_heads * P * P + 4 * P * C)
    budget = _vmem_budget_bytes()
    blk_cap = max(1, (budget - w_bytes) // (2 * per_seq))   # 2x headroom
    if BN <= blk_cap:
        return BN, budget                       # whole problem in one block -> grid=(1,)
    blk = max(8, (blk_cap // 8) * 8)            # keep blk*P sublane extent 8-aligned
    n = -(-BN // blk)
    if n > 1 and n % 2:                         # even grid keeps both v7x TCs busy
        blk = max(8, ((-(-BN // (n + 1)) + 7) // 8) * 8)
    return blk, budget


def _transformer_block_pallas(x_seq, params, rpe_bias, *, num_heads):
    BN, P, C = x_seq.shape
    head_dim = C // num_heads
    hid = params["w1"].shape[1]

    blk, vmem_budget = _choose_blk(BN, P, C, hid, num_heads)

    x_tok = x_seq.reshape(BN * P, C)            # flat token slab
    pad = (-BN) % blk
    if pad:                                     # zero sequences stay finite; sliced off
        x_tok = jnp.pad(x_tok, ((0, pad * P), (0, 0)))
    BNp = BN + pad
    grid = (BNp // blk,)

    kernel = functools.partial(
        _ccblock_fused_kernel, seq_len=P, num_heads=num_heads,
        head_dim=head_dim, scale=float(head_dim) ** -0.5)

    def resident(shape):                        # constant index_map -> stays in VMEM
        zeros = (0,) * len(shape)
        return pl.BlockSpec(shape, lambda i, _z=zeros: _z)

    out = pl.pallas_call(
        kernel,
        out_shape=jax.ShapeDtypeStruct((BNp * P, C), x_seq.dtype),
        grid=grid,
        in_specs=[
            pl.BlockSpec((blk * P, C), lambda i: (i, 0)),
            resident((C, 3 * C)), resident((1, 3 * C)),
            resident((C, C)), resident((1, C)),
            resident((num_heads, P, P)),
            resident((1, C)), resident((1, C)),
            resident((C, hid)), resident((1, hid)),
            resident((hid, C)), resident((1, C)),
        ],
        out_specs=pl.BlockSpec((blk * P, C), lambda i: (i, 0)),
        compiler_params=pltpu.CompilerParams(
            dimension_semantics=("parallel",),
            vmem_limit_bytes=int(vmem_budget)),
    )(
        x_tok,
        params["wqkv"], params["bqkv"].reshape(1, -1),
        params["wproj"], params["bproj"].reshape(1, -1),
        rpe_bias,
        params["ln_g"].reshape(1, -1), params["ln_b"].reshape(1, -1),
        params["w1"], params["b1"].reshape(1, -1),
        params["w2"], params["b2"].reshape(1, -1),
    )
    if pad:
        out = out[: BN * P]
    return out.reshape(BN, P, C)


# ----------------------------------------------------------------------------
# Layout glue (mirrors CCBlock.unfolding / .folding exactly; plain JAX)
# ----------------------------------------------------------------------------
def _unfold(x_nchw, ps):
    B, C, H, W = x_nchw.shape
    nh, nw = H // ps, W // ps
    N, P = nh * nw, ps * ps
    x = x_nchw.reshape(B, C, nh, ps, nw, ps)
    x = jnp.transpose(x, (0, 1, 2, 4, 3, 5))            # torch .transpose(3, 4)
    x = x.reshape(B, C, N, P)
    x = jnp.transpose(x, (0, 3, 2, 1))                  # .transpose(1, 3) -> (B, P, N, C)
    x = jnp.transpose(x, (0, 2, 1, 3)).reshape(B * N, P, C)   # swattn: (B*N, P, C)
    return x, (B, C, H, W, nh, nw, N, P)


def _fold(y_seq, dims):
    B, C, H, W, nh, nw, N, P = dims
    ps = H // nh
    y = y_seq.reshape(B, N, P, C)
    y = jnp.transpose(y, (0, 2, 1, 3))                  # .transpose(1, 2) -> (B, P, N, C)
    y = jnp.transpose(y, (0, 2, 1, 3))                  # folding: .transpose(1, 2)
    y = y.reshape(B, nh, nw, ps, ps, C)
    y = jnp.transpose(y, (0, 1, 3, 2, 4, 5))            # .transpose(2, 3)
    y = y.reshape(B, H, W, C)
    y = jnp.transpose(y, (0, 2, 1, 3))                  # .transpose(1, 2)
    y = jnp.transpose(y, (0, 3, 2, 1))                  # .transpose(1, 3) -> (B, C, H, W)
    return y


def _relative_position_index(ps):
    coords = np.stack(np.meshgrid(np.arange(ps), np.arange(ps), indexing="ij"))
    flat = coords.reshape(2, -1)
    rel = flat[:, :, None] - flat[:, None, :]
    rel = np.transpose(rel, (1, 2, 0)).copy()
    rel[:, :, 0] += ps - 1
    rel[:, :, 1] += ps - 1
    rel[:, :, 0] *= 2 * ps - 1
    return rel.sum(-1).astype(np.int32)                 # (P, P)


def _rpe_bias(params, ps, num_heads):
    P = ps * ps
    idx = _relative_position_index(ps).reshape(-1)
    bias = jnp.take(params["rpe_table"], idx, axis=0)   # (P*P, heads)
    bias = bias.reshape(P, P, num_heads)
    return jnp.transpose(bias, (2, 0, 1))               # (heads, P, P)


# ----------------------------------------------------------------------------
# Parameters (PyTorch-style init, deterministic)
# ----------------------------------------------------------------------------
def init_params(key, in_c, num_heads, patch_size=3):
    assert in_c % num_heads == 0
    C = in_c
    ks = jax.random.split(key, 5)

    def linear(k, fin, fout):
        kw, kb = jax.random.split(k)
        bound = 1.0 / math.sqrt(fin)
        w = jax.random.uniform(kw, (fin, fout), jnp.float32, -bound, bound)
        b = jax.random.uniform(kb, (fout,), jnp.float32, -bound, bound)
        return w, b

    p = {}
    p["wqkv"], p["bqkv"] = linear(ks[0], C, 3 * C)
    p["wproj"], p["bproj"] = linear(ks[1], C, C)
    p["w1"], p["b1"] = linear(ks[2], C, 2 * C)          # Mlp(hidden = 2*C, ReLU)
    p["w2"], p["b2"] = linear(ks[3], 2 * C, C)
    p["ln_g"] = jnp.ones((C,), jnp.float32)
    p["ln_b"] = jnp.zeros((C,), jnp.float32)
    n_rel = (2 * patch_size - 1) ** 2
    p["rpe_table"] = 0.02 * jax.random.normal(ks[4], (n_rel, num_heads), jnp.float32)
    return p


# ----------------------------------------------------------------------------
# Full forward (input/output NCHW, mirrors CCBlock.forward, swattn branch)
# ----------------------------------------------------------------------------
@functools.partial(jax.jit, static_argnames=("num_heads", "patch_size"))
def ccblock_forward(x, params, *, num_heads, patch_size=3):
    xs, dims = _unfold(x, patch_size)
    rpe = _rpe_bias(params, patch_size, num_heads)
    ys = _transformer_block_pallas(xs, params, rpe, num_heads=num_heads)
    return _fold(ys, dims)


# Pure-JAX reference (no Pallas) for correctness checking.
def _transformer_ref(x, params, rpe_bias, num_heads):
    BN, P, C = x.shape
    hd = C // num_heads
    scale = float(hd) ** -0.5
    qkv = x @ params["wqkv"] + params["bqkv"]
    qkv = qkv.reshape(BN, P, 3, num_heads, hd)
    q = jnp.transpose(qkv[:, :, 0], (0, 2, 1, 3)) * scale
    k = jnp.transpose(qkv[:, :, 1], (0, 2, 1, 3))
    v = jnp.transpose(qkv[:, :, 2], (0, 2, 1, 3))
    att = jnp.einsum("bhpd,bhqd->bhpq", q, k) + rpe_bias[None]
    att = jax.nn.softmax(att, axis=-1)
    o = jnp.einsum("bhpq,bhqd->bhpd", att, v)
    o = jnp.transpose(o, (0, 2, 1, 3)).reshape(BN, P, C)
    o = o @ params["wproj"] + params["bproj"]
    x1 = x + o
    mu = x1.mean(-1, keepdims=True)
    var = ((x1 - mu) ** 2).mean(-1, keepdims=True)
    xn = (x1 - mu) / jnp.sqrt(var + 1e-5) * params["ln_g"] + params["ln_b"]
    h = jnp.maximum(xn @ params["w1"] + params["b1"], 0.0)
    return x1 + h @ params["w2"] + params["b2"]


@functools.partial(jax.jit, static_argnames=("num_heads", "patch_size"))
def ccblock_forward_ref(x, params, *, num_heads, patch_size=3):
    xs, dims = _unfold(x, patch_size)
    rpe = _rpe_bias(params, patch_size, num_heads)
    ys = _transformer_ref(xs, params, rpe, num_heads)
    return _fold(ys, dims)


if __name__ == "__main__":
    key = jax.random.PRNGKey(0)
    kx, kp = jax.random.split(key)

    # H = W = 9 matches the module default size=9 (must be divisible by patch_size=3)
    B, in_c, H, W = 2, 16, 9, 9
    num_heads, patch_size = 4, 3

    x = jax.random.normal(kx, (B, in_c, H, W), jnp.float32)
    params = init_params(kp, in_c, num_heads, patch_size)

    # layout round-trip sanity check: fold(unfold(x)) == x
    xs, dims = _unfold(x, patch_size)
    assert bool(jnp.array_equal(_fold(xs, dims), x))

    y = ccblock_forward(x, params, num_heads=num_heads, patch_size=patch_size)
    jax.block_until_ready(y)
    assert y.shape == (B, in_c, H, W)
    assert bool(jnp.all(jnp.isfinite(y)))

    y_ref = ccblock_forward_ref(x, params, num_heads=num_heads, patch_size=patch_size)
    err = float(jnp.max(jnp.abs(y - y_ref)))
    # approx EUP reciprocal in the softmax introduces ~1e-3-level relative error
    assert err < 5e-3, f"mismatch vs reference: {err}"

    print("KERNEL_OK")
</pallas_src>

<mosaic_0001>
module attributes {stable_mosaic.version = 11 : i64} {
  func.func @_ccblock_fused_kernel(%arg0: i32, %arg1: memref<162x16xf32, #tpu.memory_space<vmem>>, %arg2: memref<16x48xf32, #tpu.memory_space<vmem>>, %arg3: memref<1x48xf32, #tpu.memory_space<vmem>>, %arg4: memref<16x16xf32, #tpu.memory_space<vmem>>, %arg5: memref<1x16xf32, #tpu.memory_space<vmem>>, %arg6: memref<4x9x9xf32, #tpu.memory_space<vmem>>, %arg7: memref<1x16xf32, #tpu.memory_space<vmem>>, %arg8: memref<1x16xf32, #tpu.memory_space<vmem>>, %arg9: memref<16x32xf32, #tpu.memory_space<vmem>>, %arg10: memref<1x32xf32, #tpu.memory_space<vmem>>, %arg11: memref<32x16xf32, #tpu.memory_space<vmem>>, %arg12: memref<1x16xf32, #tpu.memory_space<vmem>>, %arg13: memref<162x16xf32, #tpu.memory_space<vmem>>) attributes {dimension_semantics = [#tpu.dimension_semantics<parallel>], iteration_bounds = array<i64: 1>, scalar_prefetch = 0 : i64, scratch_operands = 0 : i64, tpu.core_type = #tpu.core_type<tc>, window_params = [{transform_indices = @transform_0, window_bounds = array<i64: 162, 16>}, {pipeline_mode = #tpu.pipeline_mode<synchronous>, transform_indices = @transform_1, window_bounds = array<i64: 16, 48>}, {pipeline_mode = #tpu.pipeline_mode<synchronous>, transform_indices = @transform_2, window_bounds = array<i64: 1, 48>}, {pipeline_mode = #tpu.pipeline_mode<synchronous>, transform_indices = @transform_3, window_bounds = array<i64: 16, 16>}, {pipeline_mode = #tpu.pipeline_mode<synchronous>, transform_indices = @transform_4, window_bounds = array<i64: 1, 16>}, {pipeline_mode = #tpu.pipeline_mode<synchronous>, transform_indices = @transform_5, window_bounds = array<i64: 4, 9, 9>}, {pipeline_mode = #tpu.pipeline_mode<synchronous>, transform_indices = @transform_6, window_bounds = array<i64: 1, 16>}, {pipeline_mode = #tpu.pipeline_mode<synchronous>, transform_indices = @transform_7, window_bounds = array<i64: 1, 16>}, {pipeline_mode = #tpu.pipeline_mode<synchronous>, transform_indices = @transform_8, window_bounds = array<i64: 16, 32>}, {pipeline_mode = #tpu.pipeline_mode<synchronous>, transform_indices = @transform_9, window_bounds = array<i64: 1, 32>}, {pipeline_mode = #tpu.pipeline_mode<synchronous>, transform_indices = @transform_10, window_bounds = array<i64: 32, 16>}, {pipeline_mode = #tpu.pipeline_mode<synchronous>, transform_indices = @transform_11, window_bounds = array<i64: 1, 16>}, {transform_indices = @transform_12, window_bounds = array<i64: 162, 16>}]} {
    %c0 = arith.constant 0 : index
    %c0_0 = arith.constant 0 : index
    %0 = vector.load %arg1[%c0, %c0_0] : memref<162x16xf32, #tpu.memory_space<vmem>>, vector<162x16xf32>
    %c0_1 = arith.constant 0 : index
    %c0_2 = arith.constant 0 : index
    %1 = vector.load %arg2[%c0_1, %c0_2] : memref<16x48xf32, #tpu.memory_space<vmem>>, vector<16x48xf32>
    %cst = arith.constant dense<0.000000e+00> : vector<162x48xf32>
    %2 = tpu.matmul %0, %1, %cst {dimension_numbers = #tpu.dot_dimension_numbers<[1], [0], [0], [1], [0, 0, 1, 1], [], []>} : vector<162x16xf32>, vector<16x48xf32>, vector<162x48xf32> -> vector<162x48xf32>
    %c0_3 = arith.constant 0 : index
    %c0_4 = arith.constant 0 : index
    %3 = vector.load %arg3[%c0_3, %c0_4] : memref<1x48xf32, #tpu.memory_space<vmem>>, vector<1x48xf32>
    %4 = vector.broadcast %3 : vector<1x48xf32> to vector<162x48xf32>
    %5 = arith.addf %2, %4 : vector<162x48xf32>
    %6 = vector.extract_strided_slice %5 {offsets = [0, 0], sizes = [9, 48], strides = [1, 1]} : vector<162x48xf32> to vector<9x48xf32>
    %7 = vector.extract_strided_slice %5 {offsets = [9, 0], sizes = [9, 48], strides = [1, 1]} : vector<162x48xf32> to vector<9x48xf32>
    %8 = vector.extract_strided_slice %5 {offsets = [18, 0], sizes = [9, 48], strides = [1, 1]} : vector<162x48xf32> to vector<9x48xf32>
    %9 = vector.extract_strided_slice %5 {offsets = [27, 0], sizes = [9, 48], strides = [1, 1]} : vector<162x48xf32> to vector<9x48xf32>
    %10 = vector.extract_strided_slice %5 {offsets = [36, 0], sizes = [9, 48], strides = [1, 1]} : vector<162x48xf32> to vector<9x48xf32>
    %11 = vector.extract_strided_slice %5 {offsets = [45, 0], sizes = [9, 48], strides = [1, 1]} : vector<162x48xf32> to vector<9x48xf32>
    %12 = vector.extract_strided_slice %5 {offsets = [54, 0], sizes = [9, 48], strides = [1, 1]} : vector<162x48xf32> to vector<9x48xf32>
    %13 = vector.extract_strided_slice %5 {offsets = [63, 0], sizes = [9, 48], strides = [1, 1]} : vector<162x48xf32> to vector<9x48xf32>
    %14 = vector.extract_strided_slice %5 {offsets = [72, 0], sizes = [9, 48], strides = [1, 1]} : vector<162x48xf32> to vector<9x48xf32>
    %15 = vector.extract_strided_slice %5 {offsets = [81, 0], sizes = [9, 48], strides = [1, 1]} : vector<162x48xf32> to vector<9x48xf32>
    %16 = vector.extract_strided_slice %5 {offsets = [90, 0], sizes = [9, 48], strides = [1, 1]} : vector<162x48xf32> to vector<9x48xf32>
    %17 = vector.extract_strided_slice %5 {offsets = [99, 0], sizes = [9, 48], strides = [1, 1]} : vector<162x48xf32> to vector<9x48xf32>
    %18 = vector.extract_strided_slice %5 {offsets = [108, 0], sizes = [9, 48], strides = [1, 1]} : vector<162x48xf32> to vector<9x48xf32>
    %19 = vector.extract_strided_slice %5 {offsets = [117, 0], sizes = [9, 48], strides = [1, 1]} : vector<162x48xf32> to vector<9x48xf32>
    %20 = vector.extract_strided_slice %5 {offsets = [126, 0], sizes = [9, 48], strides = [1, 1]} : vector<162x48xf32> to vector<9x48xf32>
    %21 = vector.extract_strided_slice %5 {offsets = [135, 0], sizes = [9, 48], strides = [1, 1]} : vector<162x48xf32> to vector<9x48xf32>
    %22 = vector.extract_strided_slice %5 {offsets = [144, 0], sizes = [9, 48], strides = [1, 1]} : vector<162x48xf32> to vector<9x48xf32>
    %23 = vector.extract_strided_slice %5 {offsets = [153, 0], sizes = [9, 48], strides = [1, 1]} : vector<162x48xf32> to vector<9x48xf32>
    %24 = vector.shape_cast %6 : vector<9x48xf32> to vector<1x9x48xf32>
    %25 = vector.shape_cast %7 : vector<9x48xf32> to vector<1x9x48xf32>
    %26 = vector.shape_cast %8 : vector<9x48xf32> to vector<1x9x48xf32>
    %27 = vector.shape_cast %9 : vector<9x48xf32> to vector<1x9x48xf32>
    %28 = vector.shape_cast %10 : vector<9x48xf32> to vector<1x9x48xf32>
    %29 = vector.shape_cast %11 : vector<9x48xf32> to vector<1x9x48xf32>
    %30 = vector.shape_cast %12 : vector<9x48xf32> to vector<1x9x48xf32>
    %31 = vector.shape_cast %13 : vector<9x48xf32> to vector<1x9x48xf32>
    %32 = vector.shape_cast %14 : vector<9x48xf32> to vector<1x9x48xf32>
    %33 = vector.shape_cast %15 : vector<9x48xf32> to vector<1x9x48xf32>
    %34 = vector.shape_cast %16 : vector<9x48xf32> to vector<1x9x48xf32>
    %35 = vector.shape_cast %17 : vector<9x48xf32> to vector<1x9x48xf32>
    %36 = vector.shape_cast %18 : vector<9x48xf32> to vector<1x9x48xf32>
    %37 = vector.shape_cast %19 : vector<9x48xf32> to vector<1x9x48xf32>
    %38 = vector.shape_cast %20 : vector<9x48xf32> to vector<1x9x48xf32>
    %39 = vector.shape_cast %21 : vector<9x48xf32> to vector<1x9x48xf32>
    %40 = vector.shape_cast %22 : vector<9x48xf32> to vector<1x9x48xf32>
    %41 = vector.shape_cast %23 : vector<9x48xf32> to vector<1x9x48xf32>
    %42 = tpu.concatenate %24, %25, %26, %27, %28, %29, %30, %31, %32, %33, %34, %35, %36, %37, %38, %39 in 0 : vector<1x9x48xf32>, vector<1x9x48xf32>, vector<1x9x48xf32>, vector<1x9x48xf32>, vector<1x9x48xf32>, vector<1x9x48xf32>, vector<1x9x48xf32>, vector<1x9x48xf32>, vector<1x9x48xf32>, vector<1x9x48xf32>, vector<1x9x48xf32>, vector<1x9x48xf32>, vector<1x9x48xf32>, vector<1x9x48xf32>, vector<1x9x48xf32>, vector<1x9x48xf32> -> vector<16x9x48xf32>
    %43 = tpu.concatenate %40, %41 in 0 : vector<1x9x48xf32>, vector<1x9x48xf32> -> vector<2x9x48xf32>
    %44 = tpu.concatenate %42, %43 in 0 : vector<16x9x48xf32>, vector<2x9x48xf32> -> vector<18x9x48xf32>
    %45 = vector.extract_strided_slice %44 {offsets = [0, 0, 0], sizes = [18, 9, 4], strides = [1, 1, 1]} : vector<18x9x48xf32> to vector<18x9x4xf32>
    %46 = vector.extract_strided_slice %44 {offsets = [0, 0, 4], sizes = [18, 9, 4], strides = [1, 1, 1]} : vector<18x9x48xf32> to vector<18x9x4xf32>
    %47 = vector.extract_strided_slice %44 {offsets = [0, 0, 8], sizes = [18, 9, 4], strides = [1, 1, 1]} : vector<18x9x48xf32> to vector<18x9x4xf32>
    %48 = vector.extract_strided_slice %44 {offsets = [0, 0, 12], sizes = [18, 9, 4], strides = [1, 1, 1]} : vector<18x9x48xf32> to vector<18x9x4xf32>
    %49 = vector.shape_cast %45 : vector<18x9x4xf32> to vector<1x18x9x4xf32>
    %50 = vector.shape_cast %46 : vector<18x9x4xf32> to vector<1x18x9x4xf32>
    %51 = vector.shape_cast %47 : vector<18x9x4xf32> to vector<1x18x9x4xf32>
    %52 = vector.shape_cast %48 : vector<18x9x4xf32> to vector<1x18x9x4xf32>
    %53 = tpu.concatenate %49, %50, %51, %52 in 0 : vector<1x18x9x4xf32>, vector<1x18x9x4xf32>, vector<1x18x9x4xf32>, vector<1x18x9x4xf32> -> vector<4x18x9x4xf32>
    %54 = vector.shape_cast %53 : vector<4x18x9x4xf32> to vector<72x9x4xf32>
    %cst_5 = arith.constant 5.000000e-01 : f32
    %55 = vector.broadcast %cst_5 : f32 to vector<72x9x4xf32>
    %56 = arith.mulf %54, %55 : vector<72x9x4xf32>
    %57 = vector.extract_strided_slice %44 {offsets = [0, 0, 16], sizes = [18, 9, 4], strides = [1, 1, 1]} : vector<18x9x48xf32> to vector<18x9x4xf32>
    %58 = vector.extract_strided_slice %44 {offsets = [0, 0, 20], sizes = [18, 9, 4], strides = [1, 1, 1]} : vector<18x9x48xf32> to vector<18x9x4xf32>
    %59 = vector.extract_strided_slice %44 {offsets = [0, 0, 24], sizes = [18, 9, 4], strides = [1, 1, 1]} : vector<18x9x48xf32> to vector<18x9x4xf32>
    %60 = vector.extract_strided_slice %44 {offsets = [0, 0, 28], sizes = [18, 9, 4], strides = [1, 1, 1]} : vector<18x9x48xf32> to vector<18x9x4xf32>
    %61 = vector.shape_cast %57 : vector<18x9x4xf32> to vector<1x18x9x4xf32>
    %62 = vector.shape_cast %58 : vector<18x9x4xf32> to vector<1x18x9x4xf32>
    %63 = vector.shape_cast %59 : vector<18x9x4xf32> to vector<1x18x9x4xf32>
    %64 = vector.shape_cast %60 : vector<18x9x4xf32> to vector<1x18x9x4xf32>
    %65 = tpu.concatenate %61, %62, %63, %64 in 0 : vector<1x18x9x4xf32>, vector<1x18x9x4xf32>, vector<1x18x9x4xf32>, vector<1x18x9x4xf32> -> vector<4x18x9x4xf32>
    %66 = vector.shape_cast %65 : vector<4x18x9x4xf32> to vector<72x9x4xf32>
    %67 = vector.extract_strided_slice %44 {offsets = [0, 0, 32], sizes = [18, 9, 4], strides = [1, 1, 1]} : vector<18x9x48xf32> to vector<18x9x4xf32>
    %68 = vector.extract_strided_slice %44 {offsets = [0, 0, 36], sizes = [18, 9, 4], strides = [1, 1, 1]} : vector<18x9x48xf32> to vector<18x9x4xf32>
    %69 = vector.extract_strided_slice %44 {offsets = [0, 0, 40], sizes = [18, 9, 4], strides = [1, 1, 1]} : vector<18x9x48xf32> to vector<18x9x4xf32>
    %70 = vector.extract_strided_slice %44 {offsets = [0, 0, 44], sizes = [18, 9, 4], strides = [1, 1, 1]} : vector<18x9x48xf32> to vector<18x9x4xf32>
    %71 = vector.shape_cast %67 : vector<18x9x4xf32> to vector<1x18x9x4xf32>
    %72 = vector.shape_cast %68 : vector<18x9x4xf32> to vector<1x18x9x4xf32>
    %73 = vector.shape_cast %69 : vector<18x9x4xf32> to vector<1x18x9x4xf32>
    %74 = vector.shape_cast %70 : vector<18x9x4xf32> to vector<1x18x9x4xf32>
    %75 = tpu.concatenate %71, %72, %73, %74 in 0 : vector<1x18x9x4xf32>, vector<1x18x9x4xf32>, vector<1x18x9x4xf32>, vector<1x18x9x4xf32> -> vector<4x18x9x4xf32>
    %76 = vector.shape_cast %75 : vector<4x18x9x4xf32> to vector<72x9x4xf32>
    "tpu.trace_start"() <{level = 10 : i32, message = "bpd,bqd->bpq"}> : () -> ()
    %cst_6 = arith.constant dense<0.000000e+00> : vector<72x9x9xf32>
    %77 = tpu.matmul %56, %66, %cst_6 {dimension_numbers = #tpu.dot_dimension_numbers<[2], [2], [1], [1], [0, 0, 0, 1, 1, 1], [0], [0]>} : vector<72x9x4xf32>, vector<72x9x4xf32>, vector<72x9x9xf32> -> vector<72x9x9xf32>
    "tpu.trace_stop"() : () -> ()
    %78 = vector.shape_cast %77 : vector<72x9x9xf32> to vector<4x18x9x9xf32>
    %c0_7 = arith.constant 0 : index
    %c0_8 = arith.constant 0 : index
    %c0_9 = arith.constant 0 : index
    %79 = vector.load %arg6[%c0_7, %c0_8, %c0_9] : memref<4x9x9xf32, #tpu.memory_space<vmem>>, vector<4x9x9xf32>
    %80 = vector.shape_cast %79 : vector<4x9x9xf32> to vector<4x1x9x9xf32>
    %81 = vector.broadcast %80 : vector<4x1x9x9xf32> to vector<4x18x9x9xf32>
    %82 = arith.addf %78, %81 : vector<4x18x9x9xf32>
    %cst_10 = arith.constant dense<0xFF800000> : vector<4x18x9xf32>
    %83 = vector.multi_reduction <maximumf>, %82, %cst_10 [3] : vector<4x18x9x9xf32> to vector<4x18x9xf32>
    %84 = vector.shape_cast %83 : vector<4x18x9xf32> to vector<4x18x9x1xf32>
    %85 = vector.broadcast %84 : vector<4x18x9x1xf32> to vector<4x18x9x9xf32>
    %86 = arith.subf %82, %85 : vector<4x18x9x9xf32>
    %87 = math.exp %86 : vector<4x18x9x9xf32>
    %cst_11 = arith.constant dense<0.000000e+00> : vector<4x18x9xf32>
    %88 = vector.multi_reduction <add>, %87, %cst_11 [3] : vector<4x18x9x9xf32> to vector<4x18x9xf32>
    %89 = vector.shape_cast %88 : vector<4x18x9xf32> to vector<4x18x9x1xf32>
    %90 = tpu.reciprocal %89 {approx = true} : vector<4x18x9x1xf32> -> vector<4x18x9x1xf32>
    %91 = vector.broadcast %90 : vector<4x18x9x1xf32> to vector<4x18x9x9xf32>
    %92 = arith.mulf %87, %91 : vector<4x18x9x9xf32>
    %93 = vector.shape_cast %92 : vector<4x18x9x9xf32> to vector<72x9x9xf32>
    "tpu.trace_start"() <{level = 10 : i32, message = "bpq,bqd->bpd"}> : () -> ()
    %cst_12 = arith.constant dense<0.000000e+00> : vector<72x9x4xf32>
    %94 = tpu.matmul %93, %76, %cst_12 {dimension_numbers = #tpu.dot_dimension_numbers<[2], [1], [1], [2], [0, 0, 0, 1, 1, 2], [0], [0]>} : vector<72x9x9xf32>, vector<72x9x4xf32>, vector<72x9x4xf32> -> vector<72x9x4xf32>
    "tpu.trace_stop"() : () -> ()
    %95 = vector.shape_cast %94 : vector<72x9x4xf32> to vector<4x18x9x4xf32>
    %96 = vector.extract_strided_slice %95 {offsets = [0, 0, 0, 0], sizes = [1, 18, 9, 4], strides = [1, 1, 1, 1]} : vector<4x18x9x4xf32> to vector<1x18x9x4xf32>
    %97 = vector.shape_cast %96 : vector<1x18x9x4xf32> to vector<18x9x4xf32>
    %98 = vector.extract_strided_slice %95 {offsets = [1, 0, 0, 0], sizes = [1, 18, 9, 4], strides = [1, 1, 1, 1]} : vector<4x18x9x4xf32> to vector<1x18x9x4xf32>
    %99 = vector.shape_cast %98 : vector<1x18x9x4xf32> to vector<18x9x4xf32>
    %100 = vector.extract_strided_slice %95 {offsets = [2, 0, 0, 0], sizes = [1, 18, 9, 4], strides = [1, 1, 1, 1]} : vector<4x18x9x4xf32> to vector<1x18x9x4xf32>
    %101 = vector.shape_cast %100 : vector<1x18x9x4xf32> to vector<18x9x4xf32>
    %102 = vector.extract_strided_slice %95 {offsets = [3, 0, 0, 0], sizes = [1, 18, 9, 4], strides = [1, 1, 1, 1]} : vector<4x18x9x4xf32> to vector<1x18x9x4xf32>
    %103 = vector.shape_cast %102 : vector<1x18x9x4xf32> to vector<18x9x4xf32>
    %104 = tpu.concatenate %97, %99, %101, %103 in 2 : vector<18x9x4xf32>, vector<18x9x4xf32>, vector<18x9x4xf32>, vector<18x9x4xf32> -> vector<18x9x16xf32>
    %105 = vector.extract_strided_slice %104 {offsets = [0, 0, 0], sizes = [1, 9, 16], strides = [1, 1, 1]} : vector<18x9x16xf32> to vector<1x9x16xf32>
    %106 = vector.shape_cast %105 : vector<1x9x16xf32> to vector<9x16xf32>
    %107 = vector.extract_strided_slice %104 {offsets = [1, 0, 0], sizes = [1, 9, 16], strides = [1, 1, 1]} : vector<18x9x16xf32> to vector<1x9x16xf32>
    %108 = vector.shape_cast %107 : vector<1x9x16xf32> to vector<9x16xf32>
    %109 = vector.extract_strided_slice %104 {offsets = [2, 0, 0], sizes = [1, 9, 16], strides = [1, 1, 1]} : vector<18x9x16xf32> to vector<1x9x16xf32>
    %110 = vector.shape_cast %109 : vector<1x9x16xf32> to vector<9x16xf32>
    %111 = vector.extract_strided_slice %104 {offsets = [3, 0, 0], sizes = [1, 9, 16], strides = [1, 1, 1]} : vector<18x9x16xf32> to vector<1x9x16xf32>
    %112 = vector.shape_cast %111 : vector<1x9x16xf32> to vector<9x16xf32>
    %113 = vector.extract_strided_slice %104 {offsets = [4, 0, 0], sizes = [1, 9, 16], strides = [1, 1, 1]} : vector<18x9x16xf32> to vector<1x9x16xf32>
    %114 = vector.shape_cast %113 : vector<1x9x16xf32> to vector<9x16xf32>
    %115 = vector.extract_strided_slice %104 {offsets = [5, 0, 0], sizes = [1, 9, 16], strides = [1, 1, 1]} : vector<18x9x16xf32> to vector<1x9x16xf32>
    %116 = vector.shape_cast %115 : vector<1x9x16xf32> to vector<9x16xf32>
    %117 = vector.extract_strided_slice %104 {offsets = [6, 0, 0], sizes = [1, 9, 16], strides = [1, 1, 1]} : vector<18x9x16xf32> to vector<1x9x16xf32>
    %118 = vector.shape_cast %117 : vector<1x9x16xf32> to vector<9x16xf32>
    %119 = vector.extract_strided_slice %104 {offsets = [7, 0, 0], sizes = [1, 9, 16], strides = [1, 1, 1]} : vector<18x9x16xf32> to vector<1x9x16xf32>
    %120 = vector.shape_cast %119 : vector<1x9x16xf32> to vector<9x16xf32>
    %121 = vector.extract_strided_slice %104 {offsets = [8, 0, 0], sizes = [1, 9, 16], strides = [1, 1, 1]} : vector<18x9x16xf32> to vector<1x9x16xf32>
    %122 = vector.shape_cast %121 : vector<1x9x16xf32> to vector<9x16xf32>
    %123 = vector.extract_strided_slice %104 {offsets = [9, 0, 0], sizes = [1, 9, 16], strides = [1, 1, 1]} : vector<18x9x16xf32> to vector<1x9x16xf32>
    %124 = vector.shape_cast %123 : vector<1x9x16xf32> to vector<9x16xf32>
    %125 = vector.extract_strided_slice %104 {offsets = [10, 0, 0], sizes = [1, 9, 16], strides = [1, 1, 1]} : vector<18x9x16xf32> to vector<1x9x16xf32>
    %126 = vector.shape_cast %125 : vector<1x9x16xf32> to vector<9x16xf32>
    %127 = vector.extract_strided_slice %104 {offsets = [11, 0, 0], sizes = [1, 9, 16], strides = [1, 1, 1]} : vector<18x9x16xf32> to vector<1x9x16xf32>
    %128 = vector.shape_cast %127 : vector<1x9x16xf32> to vector<9x16xf32>
    %129 = vector.extract_strided_slice %104 {offsets = [12, 0, 0], sizes = [1, 9, 16], strides = [1, 1, 1]} : vector<18x9x16xf32> to vector<1x9x16xf32>
    %130 = vector.shape_cast %129 : vector<1x9x16xf32> to vector<9x16xf32>
    %131 = vector.extract_strided_slice %104 {offsets = [13, 0, 0], sizes = [1, 9, 16], strides = [1, 1, 1]} : vector<18x9x16xf32> to vector<1x9x16xf32>
    %132 = vector.shape_cast %131 : vector<1x9x16xf32> to vector<9x16xf32>
    %133 = vector.extract_strided_slice %104 {offsets = [14, 0, 0], sizes = [1, 9, 16], strides = [1, 1, 1]} : vector<18x9x16xf32> to vector<1x9x16xf32>
    %134 = vector.shape_cast %133 : vector<1x9x16xf32> to vector<9x16xf32>
    %135 = vector.extract_strided_slice %104 {offsets = [15, 0, 0], sizes = [1, 9, 16], strides = [1, 1, 1]} : vector<18x9x16xf32> to vector<1x9x16xf32>
    %136 = vector.shape_cast %135 : vector<1x9x16xf32> to vector<9x16xf32>
    %137 = vector.extract_strided_slice %104 {offsets = [16, 0, 0], sizes = [1, 9, 16], strides = [1, 1, 1]} : vector<18x9x16xf32> to vector<1x9x16xf32>
    %138 = vector.shape_cast %137 : vector<1x9x16xf32> to vector<9x16xf32>
    %139 = vector.extract_strided_slice %104 {offsets = [17, 0, 0], sizes = [1, 9, 16], strides = [1, 1, 1]} : vector<18x9x16xf32> to vector<1x9x16xf32>
    %140 = vector.shape_cast %139 : vector<1x9x16xf32> to vector<9x16xf32>
    %141 = tpu.concatenate %106, %108, %110, %112, %114, %116, %118, %120, %122, %124, %126, %128, %130, %132, %134, %136 in 0 : vector<9x16xf32>, vector<9x16xf32>, vector<9x16xf32>, vector<9x16xf32>, vector<9x16xf32>, vector<9x16xf32>, vector<9x16xf32>, vector<9x16xf32>, vector<9x16xf32>, vector<9x16xf32>, vector<9x16xf32>, vector<9x16xf32>, vector<9x16xf32>, vector<9x16xf32>, vector<9x16xf32>, vector<9x16xf32> -> vector<144x16xf32>
    %142 = tpu.concatenate %138, %140 in 0 : vector<9x16xf32>, vector<9x16xf32> -> vector<18x16xf32>
    %143 = tpu.concatenate %141, %142 in 0 : vector<144x16xf32>, vector<18x16xf32> -> vector<162x16xf32>
    %c0_13 = arith.constant 0 : index
    %c0_14 = arith.constant 0 : index
    %144 = vector.load %arg4[%c0_13, %c0_14] : memref<16x16xf32, #tpu.memory_space<vmem>>, vector<16x16xf32>
    %cst_15 = arith.constant dense<0.000000e+00> : vector<162x16xf32>
    %145 = tpu.matmul %143, %144, %cst_15 {dimension_numbers = #tpu.dot_dimension_numbers<[1], [0], [0], [1], [0, 0, 1, 1], [], []>} : vector<162x16xf32>, vector<16x16xf32>, vector<162x16xf32> -> vector<162x16xf32>
    %c0_16 = arith.constant 0 : index
    %c0_17 = arith.constant 0 : index
    %146 = vector.load %arg5[%c0_16, %c0_17] : memref<1x16xf32, #tpu.memory_space<vmem>>, vector<1x16xf32>
    %147 = vector.broadcast %146 : vector<1x16xf32> to vector<162x16xf32>
    %148 = arith.addf %145, %147 : vector<162x16xf32>
    %149 = arith.addf %0, %148 : vector<162x16xf32>
    %cst_18 = arith.constant dense<0.000000e+00> : vector<162xf32>
    %150 = vector.multi_reduction <add>, %149, %cst_18 [1] : vector<162x16xf32> to vector<162xf32>
    %151 = vector.shape_cast %150 : vector<162xf32> to vector<162x1xf32>
    %cst_19 = arith.constant 1.600000e+01 : f32
    %152 = vector.broadcast %cst_19 : f32 to vector<162x1xf32>
    %153 = arith.divf %151, %152 : vector<162x1xf32>
    %154 = vector.broadcast %153 : vector<162x1xf32> to vector<162x16xf32>
    %155 = arith.subf %149, %154 : vector<162x16xf32>
    %156 = arith.mulf %155, %155 : vector<162x16xf32>
    %cst_20 = arith.constant dense<0.000000e+00> : vector<162xf32>
    %157 = vector.multi_reduction <add>, %156, %cst_20 [1] : vector<162x16xf32> to vector<162xf32>
    %158 = vector.shape_cast %157 : vector<162xf32> to vector<162x1xf32>
    %cst_21 = arith.constant 1.600000e+01 : f32
    %159 = vector.broadcast %cst_21 : f32 to vector<162x1xf32>
    %160 = arith.divf %158, %159 : vector<162x1xf32>
    %161 = vector.broadcast %153 : vector<162x1xf32> to vector<162x16xf32>
    %162 = arith.subf %149, %161 : vector<162x16xf32>
    %cst_22 = arith.constant 9.99999974E-6 : f32
    %163 = vector.broadcast %cst_22 : f32 to vector<162x1xf32>
    %164 = arith.addf %160, %163 : vector<162x1xf32>
    %165 = math.rsqrt %164 : vector<162x1xf32>
    %166 = vector.broadcast %165 : vector<162x1xf32> to vector<162x16xf32>
    %167 = arith.mulf %162, %166 : vector<162x16xf32>
    %c0_23 = arith.constant 0 : index
    %c0_24 = arith.constant 0 : index
    %168 = vector.load %arg7[%c0_23, %c0_24] : memref<1x16xf32, #tpu.memory_space<vmem>>, vector<1x16xf32>
    %169 = vector.broadcast %168 : vector<1x16xf32> to vector<162x16xf32>
    %170 = arith.mulf %167, %169 : vector<162x16xf32>
    %c0_25 = arith.constant 0 : index
    %c0_26 = arith.constant 0 : index
    %171 = vector.load %arg8[%c0_25, %c0_26] : memref<1x16xf32, #tpu.memory_space<vmem>>, vector<1x16xf32>
    %172 = vector.broadcast %171 : vector<1x16xf32> to vector<162x16xf32>
    %173 = arith.addf %170, %172 : vector<162x16xf32>
    %c0_27 = arith.constant 0 : index
    %c0_28 = arith.constant 0 : index
    %174 = vector.load %arg9[%c0_27, %c0_28] : memref<16x32xf32, #tpu.memory_space<vmem>>, vector<16x32xf32>
    %cst_29 = arith.constant dense<0.000000e+00> : vector<162x32xf32>
    %175 = tpu.matmul %173, %174, %cst_29 {dimension_numbers = #tpu.dot_dimension_numbers<[1], [0], [0], [1], [0, 0, 1, 1], [], []>} : vector<162x16xf32>, vector<16x32xf32>, vector<162x32xf32> -> vector<162x32xf32>
    %c0_30 = arith.constant 0 : index
    %c0_31 = arith.constant 0 : index
    %176 = vector.load %arg10[%c0_30, %c0_31] : memref<1x32xf32, #tpu.memory_space<vmem>>, vector<1x32xf32>
    %177 = vector.broadcast %176 : vector<1x32xf32> to vector<162x32xf32>
    %178 = arith.addf %175, %177 : vector<162x32xf32>
    %cst_32 = arith.constant 0.000000e+00 : f32
    %179 = vector.broadcast %cst_32 : f32 to vector<162x32xf32>
    %180 = arith.maximumf %178, %179 : vector<162x32xf32>
    %c0_33 = arith.constant 0 : index
    %c0_34 = arith.constant 0 : index
    %181 = vector.load %arg11[%c0_33, %c0_34] : memref<32x16xf32, #tpu.memory_space<vmem>>, vector<32x16xf32>
    %cst_35 = arith.constant dense<0.000000e+00> : vector<162x16xf32>
    %182 = tpu.matmul %180, %181, %cst_35 {dimension_numbers = #tpu.dot_dimension_numbers<[1], [0], [0], [1], [0, 0, 1, 1], [], []>} : vector<162x32xf32>, vector<32x16xf32>, vector<162x16xf32> -> vector<162x16xf32>
    %183 = arith.addf %149, %182 : vector<162x16xf32>
    %c0_36 = arith.constant 0 : index
    %c0_37 = arith.constant 0 : index
    %184 = vector.load %arg12[%c0_36, %c0_37] : memref<1x16xf32, #tpu.memory_space<vmem>>, vector<1x16xf32>
    %185 = vector.broadcast %184 : vector<1x16xf32> to vector<162x16xf32>
    %186 = arith.addf %183, %185 : vector<162x16xf32>
    %c0_38 = arith.constant 0 : index
    %c0_39 = arith.constant 0 : index
    %187 = vector.load %arg13[%c0_38, %c0_39] : memref<162x16xf32, #tpu.memory_space<vmem>>, vector<162x16xf32>
    tpu.vector_store %arg13[%c0_38, %c0_39], %186 {strides = array<i32>} : memref<162x16xf32, #tpu.memory_space<vmem>>, vector<162x16xf32>,
    return
  }
  func.func @transform_0(%arg0: i32) -> (i32, i32) {
    %c0_i32 = arith.constant 0 : i32
    %c0_i32_0 = arith.constant 0 : i32
    return %arg0, %c0_i32 : i32, i32
  }
  func.func @transform_1(%arg0: i32) -> (i32, i32) {
    %c0_i32 = arith.constant 0 : i32
    %c0_i32_0 = arith.constant 0 : i32
    %c0_i32_1 = arith.constant 0 : i32
    return %c0_i32, %c0_i32_0 : i32, i32
  }
  func.func @transform_2(%arg0: i32) -> (i32, i32) {
    %c0_i32 = arith.constant 0 : i32
    %c0_i32_0 = arith.constant 0 : i32
    %c0_i32_1 = arith.constant 0 : i32
    return %c0_i32, %c0_i32_0 : i32, i32
  }
  func.func @transform_3(%arg0: i32) -> (i32, i32) {
    %c0_i32 = arith.constant 0 : i32
    %c0_i32_0 = arith.constant 0 : i32
    %c0_i32_1 = arith.constant 0 : i32
    return %c0_i32, %c0_i32_0 : i32, i32
  }
  func.func @transform_4(%arg0: i32) -> (i32, i32) {
    %c0_i32 = arith.constant 0 : i32
    %c0_i32_0 = arith.constant 0 : i32
    %c0_i32_1 = arith.constant 0 : i32
    return %c0_i32, %c0_i32_0 : i32, i32
  }
  func.func @transform_5(%arg0: i32) -> (i32, i32, i32) {
    %c0_i32 = arith.constant 0 : i32
    %c0_i32_0 = arith.constant 0 : i32
    %c0_i32_1 = arith.constant 0 : i32
    %c0_i32_2 = arith.constant 0 : i32
    return %c0_i32, %c0_i32_0, %c0_i32_1 : i32, i32, i32
  }
  func.func @transform_6(%arg0: i32) -> (i32, i32) {
    %c0_i32 = arith.constant 0 : i32
    %c0_i32_0 = arith.constant 0 : i32
    %c0_i32_1 = arith.constant 0 : i32
    return %c0_i32, %c0_i32_0 : i32, i32
  }
  func.func @transform_7(%arg0: i32) -> (i32, i32) {
    %c0_i32 = arith.constant 0 : i32
    %c0_i32_0 = arith.constant 0 : i32
    %c0_i32_1 = arith.constant 0 : i32
    return %c0_i32, %c0_i32_0 : i32, i32
  }
  func.func @transform_8(%arg0: i32) -> (i32, i32) {
    %c0_i32 = arith.constant 0 : i32
    %c0_i32_0 = arith.constant 0 : i32
    %c0_i32_1 = arith.constant 0 : i32
    return %c0_i32, %c0_i32_0 : i32, i32
  }
  func.func @transform_9(%arg0: i32) -> (i32, i32) {
    %c0_i32 = arith.constant 0 : i32
    %c0_i32_0 = arith.constant 0 : i32
    %c0_i32_1 = arith.constant 0 : i32
    return %c0_i32, %c0_i32_0 : i32, i32
  }
  func.func @transform_10(%arg0: i32) -> (i32, i32) {
    %c0_i32 = arith.constant 0 : i32
    %c0_i32_0 = arith.constant 0 : i32
    %c0_i32_1 = arith.constant 0 : i32
    return %c0_i32, %c0_i32_0 : i32, i32
  }
  func.func @transform_11(%arg0: i32) -> (i32, i32) {
    %c0_i32 = arith.constant 0 : i32
    %c0_i32_0 = arith.constant 0 : i32
    %c0_i32_1 = arith.constant 0 : i32
    return %c0_i32, %c0_i32_0 : i32, i32
  }
  func.func @transform_12(%arg0: i32) -> (i32, i32) {
    %c0_i32 = arith.constant 0 : i32
    %c0_i32_0 = arith.constant 0 : i32
    return %arg0, %c0_i32 : i32, i32
  }
}

</mosaic_0001>

<bundles_post_ra>
// kernel: ccblock_forward.1
= control target key start
LH: loop header
LB: loop body
LE: loop exit
PB: predicated region body
PF: predicated region fallthrough
CT: control target
= control target key end

     0   :  { %vm68_vm0 = vcmask 130048   ;;  %s10951_s13 = smov 116   ;;  %vm214_vm1 = vcmask 1046528   ;;  %vm221_vm2 = vcmask 1045504   ;;  %vm228_vm3 = vcmask 1044480   ;;  %s10952_s14 = smov 112   ;;  %s16685_s1 = inlined_call_operand.vmem [shape: f32[16,48], index: 1, kind: input, shape index: {}]   ;;  %s16686_s0 = inlined_call_operand.vmem [shape: f32[162,16], index: 0, kind: input, shape index: {}]   ;;  %s16687_s2 = inlined_call_operand.vmem [shape: f32[1,48], index: 2, kind: input, shape index: {}]   ;;  %s16688_s5 = inlined_call_operand.vmem [shape: f32[4,9,9], index: 5, kind: input, shape index: {}]   ;;  %s16689_s3 = inlined_call_operand.vmem [shape: f32[16,16], index: 3, kind: input, shape index: {}]   ;;  %s16690_s4 = inlined_call_operand.vmem [shape: f32[1,16], index: 4, kind: input, shape index: {}]   ;;  %s16691_s6 = inlined_call_operand.vmem [shape: f32[1,16], index: 6, kind: input, shape index: {}]   ;;  %s16692_s7 = inlined_call_operand.vmem [shape: f32[1,16], index: 7, kind: input, shape index: {}]   ;;  %s16693_s8 = inlined_call_operand.vmem [shape: f32[16,32], index: 8, kind: input, shape index: {}]   ;;  %s16694_s9 = inlined_call_operand.vmem [shape: f32[1,32], index: 9, kind: input, shape index: {}]   ;;  %s16695_s10 = inlined_call_operand.vmem [shape: f32[32,16], index: 10, kind: input, shape index: {}]   ;;  %s16696_s11 = inlined_call_operand.vmem [shape: f32[1,16], index: 11, kind: input, shape index: {}]   ;;  %s16697_s12 = inlined_call_operand.vmem [shape: f32[162,16], index: 12, kind: output, shape index: {}]  }
   0x1   :  { %v63_v0 = vld [vmem:[%s16685_s1 + $0x8] sm:$0xff]  ;;  %v62_v1 = vld [vmem:[%s16685_s1] sm:$0xff]  ;;  %v59_v5 = vld [vmem:[%s16686_s0 + $0x90] sm:$0xff]  ;;  %s10949_s1 = smov 124   ;;  %vm235_vm4 = vcmask 1043456   ;;  %vm242_vm5 = vcmask 1042432  }
   0x2   :  { %146 = vmatpush.msra.mxu0 %v63_v0  ;;  %10101 = vmatpush.msra.mxu2 %v63_v0  ;;  %v41_v2 = vld [vmem:[%s16686_s0] sm:$0xff]  ;;  %v58_v3 = vld [vmem:[%s16686_s0 + $0x88] sm:$0xff]  ;;  %v43_v6 = vld [vmem:[%s16686_s0 + $0x10] sm:$0xff]  ;;  %vm249_vm6 = vcmask 1041408   ;;  %vm256_vm7 = vcmask 1040384   ;;  %vm787_vm8 = vcmask 31744  }
   0x3   :  { %v42_v4 = vld [vmem:[%s16686_s0 + $0x8] sm:$0xff]  ;;  %v60_v7 = vld [vmem:[%s16686_s0 + $0x98] sm:$0xff]  ;;  %v61_v9 = vld [vmem:[%s16686_s0 + $0xa0] sm:$0x3]  ;;  %vm3600_vm9 = vcmask 72704   ;;  %vm3604_vm10 = vcmask 65536  }
   0x4   :  { %147 = vmatpush.msra.mxu0 %v62_v1  ;;  %10102 = vmatpush.msra.mxu2 %v62_v1  ;;  %v44_v8 = vld [vmem:[%s16686_s0 + $0x18] sm:$0xff]  ;;  %v45_v10 = vld [vmem:[%s16686_s0 + $0x20] sm:$0xff]  ;;  %v46_v11 = vld [vmem:[%s16686_s0 + $0x28] sm:$0xff]  ;;  %vm8246_vm11 = vcmask 64512   ;;  %vm8283_vm12 = vcmask 97280  }
   0x5   :  { %9513 = vmatmul.msk.f32.vlgmr.msra.gmra.mxu0 %vm68_vm0, %v41_v2  ;;  %9530 = vmatmul.msk.f32.vlgmr.msra.gmra.mxu2 %vm68_vm0, %v58_v3  ;;  %v47_v12 = vld [vmem:[%s16686_s0 + $0x30] sm:$0xff]  ;;  %v48_v13 = vld [vmem:[%s16686_s0 + $0x38] sm:$0xff]  ;;  %v49_v14 = vld [vmem:[%s16686_s0 + $0x40] sm:$0xff] }
   0x6   :  { %v50_v15 = vld [vmem:[%s16686_s0 + $0x48] sm:$0xff]  ;;  %v51_v16 = vld [vmem:[%s16686_s0 + $0x50] sm:$0xff]  ;;  %v52_v17 = vld [vmem:[%s16686_s0 + $0x58] sm:$0xff] }
   0x7   :  { %v53_v18 = vld [vmem:[%s16686_s0 + $0x60] sm:$0xff]  ;;  %v54_v19 = vld [vmem:[%s16686_s0 + $0x68] sm:$0xff]  ;;  %v55_v20 = vld [vmem:[%s16686_s0 + $0x70] sm:$0xff] }
   0x8   :  { %v56_v21 = vld [vmem:[%s16686_s0 + $0x78] sm:$0xff]  ;;  %v11112_v22 = vld [vmem:[%s16687_s2] ss:$0 sm:$0xff]  ;;  %s10950_s2 = smov 120  }
   0x9   :  { %v57_v24 = vld [vmem:[%s16686_s0 + $0x80] sm:$0xff] }
   0xd   :  { %9514 = vmatmul.msk.f32.gmra.mxu0 %vm68_vm0, %v42_v4  ;;  %9531 = vmatmul.msk.f32.gmra.mxu2 %vm68_vm0, %v59_v5 }
  0x15   :  { %9515 = vmatmul.msk.f32.gmra.mxu0 %vm68_vm0, %v43_v6  ;;  %9532 = vmatmul.msk.f32.gmra.mxu2 %vm68_vm0, %v60_v7 }
  0x1d   :  { %9516 = vmatmul.msk.f32.gmra.mxu0 %vm68_vm0, %v44_v8  ;;  %9533 = vmatmul.msk.f32.gmra.mxu2 %vm68_vm0, %v61_v9 }
  0x25   :  { %9517 = vmatmul.msk.f32.gmra.mxu0 %vm68_vm0, %v45_v10 }
  0x2d   :  { %9518 = vmatmul.msk.f32.gmra.mxu0 %vm68_vm0, %v46_v11 }
  0x35   :  { %9519 = vmatmul.msk.f32.gmra.mxu0 %vm68_vm0, %v47_v12 }
  0x3d   :  { %9520 = vmatmul.msk.f32.gmra.mxu0 %vm68_vm0, %v48_v13 }
  0x45   :  { %9521 = vmatmul.msk.f32.gmra.mxu0 %vm68_vm0, %v49_v14 }
  0x4d   :  { %9522 = vmatmul.msk.f32.gmra.mxu0 %vm68_vm0, %v50_v15 }
  0x55   :  { %9523 = vmatmul.msk.f32.gmra.mxu0 %vm68_vm0, %v51_v16 }
  0x5d   :  { %9524 = vmatmul.msk.f32.gmra.mxu0 %vm68_vm0, %v52_v17 }
  0x65   :  { %9525 = vmatmul.msk.f32.gmra.mxu0 %vm68_vm0, %v53_v18 }
  0x6d   :  { %9526 = vmatmul.msk.f32.gmra.mxu0 %vm68_vm0, %v54_v19 }
  0x75   :  { %9527 = vmatmul.msk.f32.gmra.mxu0 %vm68_vm0, %v55_v20 }
  0x7d   :  { %9528 = vmatmul.msk.f32.gmra.mxu0 %vm68_vm0, %v56_v21 }
  0x82   :  { %v149_v23 = vpop.f32.mrf.mxu0 }
  0x83   :  { %v11118_v25 = vadd.f32 %v11112_v22, %v149_v23 }
  0x85   :  { %17091 = vst [vmem:[#allocation2_spill] sm:$0xff] %v11118_v25  ;;  %9529 = vmatmul.msk.f32.gmra.mxu0 %vm68_vm0, %v57_v24  ;;  %315 = vrot.lane.b32.xlu0 %v11118_v25, %s10949_s1 }
  0x88   :  { %v200_v26 = vpop.f32.mrf.mxu2 }
  0x89   :  { %v201_v27 = vadd.f32 %v11112_v22, %v200_v26 }
  0x8a   :  { %v152_v29 = vpop.f32.mrf.mxu0 }
  0x8b   :  { %v11124_v28 = vrot.slane %v201_v27, 7  ;;  %v11131_v31 = vadd.f32 %v11112_v22, %v152_v29 }
  0x8d   :  { %17092 = vst [vmem:[#allocation3_spill] sm:$0xff] %v11124_v28  ;;  %377 = vrot.lane.b32.xlu1 %v11124_v28, %s10949_s1  ;;  %423 = vrot.lane.b32.xlu0 %v11118_v25, %s10950_s2  ;;  %v215_v36 = vrot.slane %v11131_v31, 1 }
  0x8e   :  { %17093 = vst [vmem:[#allocation4_spill] sm:$0xff] %v11131_v31 }
  0x90   :  { %v203_v30 = vpop.f32.mrf.mxu2 }
  0x91   :  { %v11134_v32 = vadd.f32 %v11112_v22, %v203_v30 }
  0x92   :  { %v155_v33 = vpop.f32.mrf.mxu0 }
  0x93   :  { %17094 = vst [vmem:[#allocation5_spill] sm:$0xff] %v11134_v32  ;;  %379 = vrot.lane.b32.xlu2 %v11134_v32, %s10949_s1  ;;  %v156_v34 = vadd.f32 %v11112_v22, %v155_v33 }
  0x95   :  { %425 = vrot.lane.b32.xlu1 %v11131_v31, %s10950_s2  ;;  %531 = vrot.lane.b32.xlu0 %v11118_v25, %s10951_s13  ;;  %v11149_v35 = vrot.slane %v156_v34, 1  ;;  %v222_v43 = vrot.slane %v156_v34, 2 }
  0x97   :  { %17095 = vst [vmem:[#allocation6_spill] sm:$0xff] %v11149_v35  ;;  %v11154_v37 = vsel %vm214_vm1, %v215_v36, %v11149_v35 }
  0x98   :  { %17096 = vst [vmem:[#allocation7_spill] sm:$0xff] %v11154_v37  ;;  %v206_v40 = vpop.f32.mrf.mxu2 }
  0x99   :  { %v11172_v42 = vadd.f32 %v11112_v22, %v206_v40 }
  0x9a   :  { %v158_v38 = vpop.f32.mrf.mxu0 }
  0x9b   :  { %487 = vrot.lane.b32.xlu2 %v11134_v32, %s10950_s2  ;;  %v159_v39 = vadd.f32 %v11112_v22, %v158_v38  ;;  %17098 = vst [vmem:[#allocation9_spill] sm:$0xff] %v11172_v42  ;;  %v307_v53 = vrot.slane %v11172_v42, 1 }
  0x9d   :  { %485 = vrot.lane.b32.xlu1 %v11124_v28, %s10950_s2  ;;  %317 = vrot.lane.b32.xlu0 %v11131_v31, %s10949_s1  ;;  %v11169_v41 = vrot.slane %v159_v39, 2  ;;  %v229_v47 = vrot.slane %v159_v39, 3 }
  0x9f   :  { %17097 = vst [vmem:[#allocation8_spill] sm:$0xff] %v11169_v41  ;;  %v11185_v46 = vsel %vm221_vm2, %v222_v43, %v11169_v41 }
  0xa0   :  { %17099 = vst [vmem:[#allocation10_spill] sm:$0xff] %v11185_v46  ;;  %v209_v49 = vpop.f32.mrf.mxu2 }
  0xa1   :  { %v210_v50 = vadd.f32 %v11112_v22, %v209_v49 }
  0xa2   :  { %v161_v44 = vpop.f32.mrf.mxu0 }
  0xa3   :  { %427 = vrot.lane.b32.xlu2 %v11154_v37, %s10950_s2  ;;  %v162_v45 = vadd.f32 %v11112_v22, %v161_v44  ;;  %v11204_v52 = vrot.slane %v210_v50, 1 }
  0xa5   :  { %533 = vrot.lane.b32.xlu1 %v11131_v31, %s10951_s13  ;;  %429 = vrot.lane.b32.xlu0 %v11149_v35, %s10950_s2  ;;  %v11191_v48 = vrot.slane %v162_v45, 3  ;;  %17102 = vst [vmem:[#allocation13_spill] sm:$0xff] %v11204_v52  ;;  %v11211_v54 = vsel %vm214_vm1, %v307_v53, %v11204_v52  ;;  %v236_v58 = vrot.slane %v162_v45, 4 }
  0xa6   :  { %17103 = vst [vmem:[#allocation14_spill] sm:$0xff] %v11211_v54 }
  0xa7   :  { %17100 = vst [vmem:[#allocation11_spill] sm:$0xff] %v11191_v48  ;;  %v11198_v51 = vsel %vm228_vm3, %v229_v47, %v11191_v48 }
  0xa8   :  { %17101 = vst [vmem:[#allocation12_spill] sm:$0xff] %v11198_v51 }
  0xaa   :  { %v164_v55 = vpop.f32.mrf.mxu0 }
  0xab   :  { %535 = vrot.lane.b32.xlu2 %v11154_v37, %s10951_s13  ;;  %v165_v56 = vadd.f32 %v11112_v22, %v164_v55 }
  0xad   :  { %321 = vrot.lane.b32.xlu1 %v11149_v35, %s10949_s1  ;;  %537 = vrot.lane.b32.xlu0 %v11149_v35, %s10951_s13  ;;  %v11224_v57 = vrot.slane %v165_v56, 4  ;;  %v243_v1 = vrot.slane %v165_v56, 5 }
  0xaf   :  { %17104 = vst [vmem:[#allocation15_spill] sm:$0xff] %v11224_v57  ;;  %v11234_v59 = vsel %vm235_vm4, %v236_v58, %v11224_v57 }
  0xb0   :  { %17105 = vst [vmem:[#allocation16_spill] sm:$0xff] %v11234_v59 }
  0xb2   :  { %v167_v60 = vpop.f32.mrf.mxu0 }
  0xb3   :  { %325 = vrot.lane.b32.xlu2 %v11169_v41, %s10949_s1  ;;  %v168_v61 = vadd.f32 %v11112_v22, %v167_v60 }
  0xb5   :  { %319 = vrot.lane.b32.xlu1 %v11154_v37, %s10949_s1  ;;  %381 = vrot.lane.b32.xlu0 %v11172_v42, %s10949_s1  ;;  %v11252_v2 = vrot.slane %v168_v61, 5  ;;  %v250_v3 = vrot.slane %v168_v61, 6 }
  0xb7   :  { %17107 = vst [vmem:[#allocation18_spill] sm:$0xff] %v11252_v2  ;;  %v11260_v5 = vsel %vm242_vm5, %v243_v1, %v11252_v2 }
  0xb8   :  { %17109 = vst [vmem:[#allocation20_spill] sm:$0xff] %v11260_v5 }
  0xba   :  { %v170_v62 = vpop.f32.mrf.mxu0 }
  0xbb   :  { %433 = vrot.lane.b32.xlu2 %v11169_v41, %s10950_s2  ;;  %v171_v0 = vadd.f32 %v11112_v22, %v170_v62 }
  0xbd   :  { %431 = vrot.lane.b32.xlu1 %v11185_v46, %s10950_s2  ;;  %489 = vrot.lane.b32.xlu0 %v11172_v42, %s10950_s2  ;;  %v11254_v4 = vrot.slane %v171_v0, 6  ;;  %v257_v20 = vrot.slane %v171_v0, 7 }
  0xbf   :  { %17108 = vst [vmem:[#allocation19_spill] sm:$0xff] %v11254_v4  ;;  %v11264_v6 = vsel %vm249_vm6, %v250_v3, %v11254_v4 }
  0xc0   :  { %17110 = vst [vmem:[#allocation21_spill] sm:$0xff] %v11264_v6 }
  0xc2   :  { %v173_v9 = vpop.f32.mrf.mxu0 }
  0xc3   :  { %541 = vrot.lane.b32.xlu2 %v11169_v41, %s10951_s13  ;;  %v174_v15 = vadd.f32 %v11112_v22, %v173_v9 }
  0xc5   :  { %539 = vrot.lane.b32.xlu1 %v11185_v46, %s10951_s13  ;;  %327 = vrot.lane.b32.xlu0 %v11198_v51, %s10949_s1  ;;  %v11299_v18 = vrot.slane %v174_v15, 7 }
  0xc7   :  { %17119 = vst [vmem:[#allocation30_spill] sm:$0xff] %v11299_v18  ;;  %v11315_v26 = vsel %vm256_vm7, %v257_v20, %v11299_v18 }
  0xc8   :  { %17123 = vst [vmem:[#allocation34_spill] sm:$0xff] %v11315_v26 }
  0xca   :  { %v176_v14 = vpop.f32.mrf.mxu0 }
  0xcb   :  { %323 = vrot.lane.b32.xlu2 %v11185_v46, %s10949_s1  ;;  %v11349_v45 = vadd.f32 %v11112_v22, %v176_v14 }
  0xcd   :  { %383 = vrot.lane.b32.xlu1 %v11211_v54, %s10949_s1  ;;  %435 = vrot.lane.b32.xlu0 %v11198_v51, %s10950_s2  ;;  %17132 = vst [vmem:[#allocation43_spill] sm:$0xff] %v11349_v45 }
  0xd2   :  { %v179_v24 = vpop.f32.mrf.mxu0 }
  0xd3   :  { %385 = vrot.lane.b32.xlu2 %v11204_v52, %s10949_s1  ;;  %v11332_v34 = vadd.f32 %v11112_v22, %v179_v24 }
  0xd5   :  { %491 = vrot.lane.b32.xlu1 %v11211_v54, %s10950_s2  ;;  %543 = vrot.lane.b32.xlu0 %v11198_v51, %s10951_s13  ;;  %17127 = vst [vmem:[#allocation38_spill] sm:$0xff] %v11332_v34  ;;  %v264_v44 = vrot.slane %v11332_v34, 1 }
  0xda   :  { %v182_v33 = vpop.f32.mrf.mxu0 }
  0xdb   :  { %493 = vrot.lane.b32.xlu2 %v11204_v52, %s10950_s2  ;;  %v183_v36 = vadd.f32 %v11112_v22, %v182_v33 }
  0xdd   :  { %329 = vrot.lane.b32.xlu1 %v11191_v48, %s10949_s1  ;;  %333 = vrot.lane.b32.xlu0 %v11224_v57, %s10949_s1  ;;  %v11345_v43 = vrot.slane %v183_v36, 1  ;;  %v270_v14 = vrot.slane %v183_v36, 2 }
  0xdf   :  { %17131 = vst [vmem:[#allocation42_spill] sm:$0xff] %v11345_v43  ;;  %v11355_v47 = vsel %vm214_vm1, %v264_v44, %v11345_v43 }
  0xe0   :  { %17133 = vst [vmem:[#allocation44_spill] sm:$0xff] %v11355_v47 }
  0xe2   :  { %v185_v61 = vpop.f32.mrf.mxu0 }
  0xe3   :  { %331 = vrot.lane.b32.xlu2 %v11234_v59, %s10949_s1  ;;  %v186_v1 = vadd.f32 %v11112_v22, %v185_v61 }
  0xe5   :  { %437 = vrot.lane.b32.xlu1 %v11191_v48, %s10950_s2  ;;  %441 = vrot.lane.b32.xlu0 %v11224_v57, %s10950_s2  ;;  %v11392_v3 = vrot.slane %v186_v1, 2 }
  0xe7   :  { %17143 = vst [vmem:[#allocation54_spill] sm:$0xff] %v11392_v3  ;;  %v11408_v33 = vsel %vm221_vm2, %v270_v14, %v11392_v3 }
  0xe8   :  { %17147 = vst [vmem:[#allocation58_spill] sm:$0xff] %v11408_v33 }
  0xea   :  { %v188_v24 = vpop.f32.mrf.mxu0 }
  0xeb   :  { %439 = vrot.lane.b32.xlu2 %v11234_v59, %s10950_s2  ;;  %v189_v14 = vadd.f32 %v11112_v22, %v188_v24 }
  0xed   :  { %v11245_v63 = vpop.permute.xlu2 %379  ;;  %545 = vrot.lane.b32.xlu1 %v11191_v48, %s10951_s13  ;;  %549 = vrot.lane.b32.xlu0 %v11224_v57, %s10951_s13 }
  0xee   :  { %17106 = vst [vmem:[#allocation17_spill] sm:$0xff] %v11245_v63 }
  0xf3   :  { %547 = vrot.lane.b32.xlu2 %v11234_v59, %s10951_s13 }
  0xf5   :  { %v11266_v7 = vpop.permute.xlu2 %487  ;;  %335 = vrot.lane.b32.xlu1 %v11260_v5, %s10949_s1  ;;  %339 = vrot.lane.b32.xlu0 %v11264_v6, %s10949_s1 }
  0xf6   :  { %17111 = vst [vmem:[#allocation22_spill] sm:$0xff] %v11266_v7 }
  0xf7   :  { %v11272_v8 = vpop.permute.xlu0 %315 }
  0xf8   :  { %17112 = vst [vmem:[#allocation23_spill] sm:$0xff] %v11272_v8 }
  0xfb   :  { %337 = vrot.lane.b32.xlu2 %v11252_v2, %s10949_s1 }
  0xfd   :  { %v11276_v10 = vpop.permute.xlu2 %427  ;;  %443 = vrot.lane.b32.xlu1 %v11260_v5, %s10950_s2  ;;  %447 = vrot.lane.b32.xlu0 %v11264_v6, %s10950_s2 }
  0xfe   :  { %17113 = vst [vmem:[#allocation24_spill] sm:$0xff] %v11276_v10 }
  0xff   :  { %v11282_v11 = vpop.permute.xlu1 %377  ;;  %v11284_v12 = vpop.permute.xlu0 %423 }
 0x100   :  { %17114 = vst [vmem:[#allocation25_spill] sm:$0xff] %v11282_v11 }
 0x101   :  { %17115 = vst [vmem:[#allocation26_spill] sm:$0xff] %v11284_v12 }
 0x103   :  { %445 = vrot.lane.b32.xlu2 %v11252_v2, %s10950_s2 }
 0x105   :  { %v11288_v13 = vpop.permute.xlu2 %535  ;;  %551 = vrot.lane.b32.xlu1 %v11260_v5, %s10951_s13  ;;  %555 = vrot.lane.b32.xlu0 %v11264_v6, %s10951_s13 }
 0x106   :  { %17116 = vst [vmem:[#allocation27_spill] sm:$0xff] %v11288_v13 }
 0x107   :  { %v11295_v16 = vpop.permute.xlu1 %425  ;;  %v11297_v17 = vpop.permute.xlu0 %531 }
 0x108   :  { %17117 = vst [vmem:[#allocation28_spill] sm:$0xff] %v11295_v16 }
 0x109   :  { %17118 = vst [vmem:[#allocation29_spill] sm:$0xff] %v11297_v17  ;;  %v282_v17 = vrot.slane %v189_v14, 4 }
 0x10b   :  { %553 = vrot.lane.b32.xlu2 %v11252_v2, %s10951_s13 }
 0x10d   :  { %v11303_v19 = vpop.permute.xlu2 %325  ;;  %341 = vrot.lane.b32.xlu1 %v11254_v4, %s10949_s1  ;;  %345 = vrot.lane.b32.xlu0 %v11299_v18, %s10949_s1 }
 0x10e   :  { %17120 = vst [vmem:[#allocation31_spill] sm:$0xff] %v11303_v19 }
 0x10f   :  { %v11309_v21 = vpop.permute.xlu1 %485  ;;  %v11311_v23 = vpop.permute.xlu0 %317 }
 0x110   :  { %17121 = vst [vmem:[#allocation32_spill] sm:$0xff] %v11309_v21 }
 0x111   :  { %17122 = vst [vmem:[#allocation33_spill] sm:$0xff] %v11311_v23 }
 0x113   :  { %343 = vrot.lane.b32.xlu2 %v11315_v26, %s10949_s1 }
 0x115   :  { %v11319_v27 = vpop.permute.xlu2 %433  ;;  %449 = vrot.lane.b32.xlu1 %v11254_v4, %s10950_s2  ;;  %453 = vrot.lane.b32.xlu0 %v11299_v18, %s10950_s2 }
 0x116   :  { %17124 = vst [vmem:[#allocation35_spill] sm:$0xff] %v11319_v27 }
 0x117   :  { %v11325_v29 = vpop.permute.xlu1 %533  ;;  %v11327_v30 = vpop.permute.xlu0 %429 }
 0x118   :  { %17125 = vst [vmem:[#allocation36_spill] sm:$0xff] %v11325_v29 }
 0x119   :  { %17126 = vst [vmem:[#allocation37_spill] sm:$0xff] %v11327_v30 }
 0x11b   :  { %451 = vrot.lane.b32.xlu2 %v11315_v26, %s10950_s2 }
 0x11d   :  { %v11335_v38 = vpop.permute.xlu2 %541  ;;  %557 = vrot.lane.b32.xlu1 %v11254_v4, %s10951_s13  ;;  %561 = vrot.lane.b32.xlu0 %v11299_v18, %s10951_s13 }
 0x11e   :  { %17128 = vst [vmem:[#allocation39_spill] sm:$0xff] %v11335_v38  ;;  %v191_v38 = vpop.f32.mrf.mxu0 }
 0x11f   :  { %v11341_v39 = vpop.permute.xlu1 %321  ;;  %v11343_v40 = vpop.permute.xlu0 %537 }
 0x120   :  { %17129 = vst [vmem:[#allocation40_spill] sm:$0xff] %v11341_v39 }
 0x121   :  { %17130 = vst [vmem:[#allocation41_spill] sm:$0xff] %v11343_v40 }
 0x123   :  { %559 = vrot.lane.b32.xlu2 %v11315_v26, %s10951_s13 }
 0x125   :  { %v11357_v49 = vpop.permute.xlu2 %323  ;;  %347 = vrot.lane.b32.xlu1 %v11349_v45, %s10949_s1  ;;  %351 = vrot.lane.b32.xlu0 %v11355_v47, %s10949_s1 }
 0x126   :  { %17134 = vst [vmem:[#allocation45_spill] sm:$0xff] %v11357_v49  ;;  %v194_v21 = vpop.f32.mrf.mxu0 }
 0x127   :  { %v11363_v50 = vpop.permute.xlu1 %319  ;;  %v11365_v53 = vpop.permute.xlu0 %381 }
 0x128   :  { %17135 = vst [vmem:[#allocation46_spill] sm:$0xff] %v11363_v50 }
 0x129   :  { %17136 = vst [vmem:[#allocation47_spill] sm:$0xff] %v11365_v53 }
 0x12b   :  { %349 = vrot.lane.b32.xlu2 %v11332_v34, %s10949_s1 }
 0x12d   :  { %v11369_v55 = vpop.permute.xlu2 %385  ;;  %455 = vrot.lane.b32.xlu1 %v11349_v45, %s10950_s2  ;;  %459 = vrot.lane.b32.xlu0 %v11355_v47, %s10950_s2 }
 0x12e   :  { %17137 = vst [vmem:[#allocation48_spill] sm:$0xff] %v11369_v55 }
 0x12f   :  { %v11375_v56 = vpop.permute.xlu1 %431  ;;  %v11377_v58 = vpop.permute.xlu0 %489 }
 0x130   :  { %17138 = vst [vmem:[#allocation49_spill] sm:$0xff] %v11375_v56 }
 0x131   :  { %17139 = vst [vmem:[#allocation50_spill] sm:$0xff] %v11377_v58 }
 0x133   :  { %457 = vrot.lane.b32.xlu2 %v11332_v34, %s10950_s2 }
 0x135   :  { %v11381_v60 = vpop.permute.xlu2 %493  ;;  %563 = vrot.lane.b32.xlu1 %v11349_v45, %s10951_s13  ;;  %567 = vrot.lane.b32.xlu0 %v11355_v47, %s10951_s13 }
 0x136   :  { %17140 = vst [vmem:[#allocation51_spill] sm:$0xff] %v11381_v60  ;;  %v11436_v60 = vrot.slane %v189_v14, 3 }
 0x137   :  { %v11387_v62 = vpop.permute.xlu1 %539  ;;  %v11389_v0 = vpop.permute.xlu0 %327 }
 0x138   :  { %17141 = vst [vmem:[#allocation52_spill] sm:$0xff] %v11387_v62  ;;  %v192_v62 = vadd.f32 %v11112_v22, %v191_v38 }
 0x139   :  { %17142 = vst [vmem:[#allocation53_spill] sm:$0xff] %v11389_v0 }
 0x13a   :  { %17154 = vst [vmem:[#allocation65_spill] sm:$0xff] %v11436_v60 }
 0x13b   :  { %565 = vrot.lane.b32.xlu2 %v11332_v34, %s10951_s13 }
 0x13d   :  { %v11396_v9 = vpop.permute.xlu2 %331  ;;  %353 = vrot.lane.b32.xlu1 %v11345_v43, %s10949_s1  ;;  %357 = vrot.lane.b32.xlu0 %v11392_v3, %s10949_s1 }
 0x13e   :  { %17144 = vst [vmem:[#allocation55_spill] sm:$0xff] %v11396_v9 }
 0x13f   :  { %v11402_v15 = vpop.permute.xlu1 %383  ;;  %v11404_v20 = vpop.permute.xlu0 %435 }
 0x140   :  { %17145 = vst [vmem:[#allocation56_spill] sm:$0xff] %v11402_v15 }
 0x141   :  { %17146 = vst [vmem:[#allocation57_spill] sm:$0xff] %v11404_v20 }
 0x143   :  { %355 = vrot.lane.b32.xlu2 %v11408_v33, %s10949_s1 }
 0x145   :  { %v11412_v44 = vpop.permute.xlu2 %439  ;;  %461 = vrot.lane.b32.xlu1 %v11345_v43, %s10950_s2  ;;  %465 = vrot.lane.b32.xlu0 %v11392_v3, %s10950_s2 }
 0x146   :  { %17148 = vst [vmem:[#allocation59_spill] sm:$0xff] %v11412_v44 }
 0x147   :  { %v11418_v36 = vpop.permute.xlu1 %491  ;;  %v11420_v61 = vpop.permute.xlu0 %543 }
 0x148   :  { %17149 = vst [vmem:[#allocation60_spill] sm:$0xff] %v11418_v36  ;;  %v11438_v36 = vrot.slane %v192_v62, 4 }
 0x149   :  { %17150 = vst [vmem:[#allocation61_spill] sm:$0xff] %v11420_v61  ;;  %v276_v61 = vrot.slane %v186_v1, 3 }
 0x14a   :  { %17155 = vst [vmem:[#allocation66_spill] sm:$0xff] %v11438_v36  ;;  %v11448_v24 = vsel %vm235_vm4, %v282_v17, %v11438_v36 }
 0x14b   :  { %463 = vrot.lane.b32.xlu2 %v11408_v33, %s10950_s2  ;;  %v11444_v38 = vsel %vm228_vm3, %v276_v61, %v11436_v60  ;;  %17157 = vst [vmem:[#allocation68_spill] sm:$0xff] %v11448_v24 }
 0x14c   :  { %17156 = vst [vmem:[#allocation67_spill] sm:$0xff] %v11444_v38 }
 0x14d   :  { %v11426_v13 = vpop.permute.xlu2 %547  ;;  %569 = vrot.lane.b32.xlu1 %v11345_v43, %s10951_s13  ;;  %573 = vrot.lane.b32.xlu0 %v11392_v3, %s10951_s13 }
 0x14e   :  { %17151 = vst [vmem:[#allocation62_spill] sm:$0xff] %v11426_v13 }
 0x14f   :  { %v11432_v40 = vpop.permute.xlu1 %329  ;;  %v11434_v29 = vpop.permute.xlu0 %333 }
 0x150   :  { %17152 = vst [vmem:[#allocation63_spill] sm:$0xff] %v11432_v40 }
 0x151   :  { %17153 = vst [vmem:[#allocation64_spill] sm:$0xff] %v11434_v29 }
 0x153   :  { %571 = vrot.lane.b32.xlu2 %v11408_v33, %s10951_s13 }
 0x155   :  { %v11450_v13 = vpop.permute.xlu2 %337  ;;  %359 = vrot.lane.b32.xlu1 %v11444_v38, %s10949_s1  ;;  %363 = vrot.lane.b32.xlu0 %v11448_v24, %s10949_s1 }
 0x156   :  { %17158 = vst [vmem:[#allocation69_spill] sm:$0xff] %v11450_v13 }
 0x157   :  { %v11456_v1 = vpop.permute.xlu1 %437  ;;  %v11458_v14 = vpop.permute.xlu0 %441 }
 0x158   :  { %17159 = vst [vmem:[#allocation70_spill] sm:$0xff] %v11456_v1 }
 0x159   :  { %17160 = vst [vmem:[#allocation71_spill] sm:$0xff] %v11458_v14 }
 0x15b   :  { %361 = vrot.lane.b32.xlu2 %v11436_v60, %s10949_s1 }
 0x15d   :  { %v11462_v61 = vpop.permute.xlu2 %445  ;;  %467 = vrot.lane.b32.xlu1 %v11444_v38, %s10950_s2  ;;  %471 = vrot.lane.b32.xlu0 %v11448_v24, %s10950_s2 }
 0x15e   :  { %17161 = vst [vmem:[#allocation72_spill] sm:$0xff] %v11462_v61  ;;  %v195_v61 = vadd.f32 %v11112_v22, %v194_v21 }
 0x15f   :  { %v11468_v17 = vpop.permute.xlu1 %545  ;;  %v11470_v7 = vpop.permute.xlu0 %549 }
 0x160   :  { %17162 = vst [vmem:[#allocation73_spill] sm:$0xff] %v11468_v17  ;;  %v11485_v17 = vrot.slane %v195_v61, 5 }
 0x161   :  { %17163 = vst [vmem:[#allocation74_spill] sm:$0xff] %v11470_v7 }
 0x162   :  { %17167 = vst [vmem:[#allocation78_spill] sm:$0xff] %v11485_v17 }
 0x163   :  { %469 = vrot.lane.b32.xlu2 %v11436_v60, %s10950_s2 }
 0x165   :  { %v11474_v58 = vpop.permute.xlu2 %553  ;;  %575 = vrot.lane.b32.xlu1 %v11444_v38, %s10951_s13  ;;  %579 = vrot.lane.b32.xlu0 %v11448_v24, %s10951_s13 }
 0x166   :  { %17164 = vst [vmem:[#allocation75_spill] sm:$0xff] %v11474_v58  ;;  %v288_v58 = vrot.slane %v192_v62, 5 }
 0x167   :  { %v11481_v44 = vpop.permute.xlu1 %335  ;;  %v11483_v14 = vpop.permute.xlu0 %339 }
 0x168   :  { %17165 = vst [vmem:[#allocation76_spill] sm:$0xff] %v11481_v44  ;;  %v11501_v27 = vsel %vm242_vm5, %v288_v58, %v11485_v17 }
 0x169   :  { %17166 = vst [vmem:[#allocation77_spill] sm:$0xff] %v11483_v14 }
 0x16a   :  { %17171 = vst [vmem:[#allocation82_spill] sm:$0xff] %v11501_v27 }
 0x16b   :  { %577 = vrot.lane.b32.xlu2 %v11436_v60, %s10951_s13 }
 0x16d   :  { %v11489_v7 = vpop.permute.xlu2 %343  ;;  %365 = vrot.lane.b32.xlu1 %v11438_v36, %s10949_s1  ;;  %369 = vrot.lane.b32.xlu0 %v11485_v17, %s10949_s1 }
 0x16e   :  { %17168 = vst [vmem:[#allocation79_spill] sm:$0xff] %v11489_v7 }
 0x16f   :  { %v11495_v1 = vpop.permute.xlu1 %443  ;;  %v11497_v21 = vpop.permute.xlu0 %447 }
 0x170   :  { %17169 = vst [vmem:[#allocation80_spill] sm:$0xff] %v11495_v1 }
 0x171   :  { %17170 = vst [vmem:[#allocation81_spill] sm:$0xff] %v11497_v21  ;;  %v197_v21 = vpop.f32.mrf.mxu0 }
 0x172   :  { %v198_v58 = vadd.f32 %v11112_v22, %v197_v21 }
 0x173   :  { %367 = vrot.lane.b32.xlu2 %v11501_v27, %s10949_s1 }
 0x174   :  { %v300_v30 = vrot.slane %v198_v58, 7 }
 0x175   :  { %v11505_v20 = vpop.permute.xlu2 %451  ;;  %473 = vrot.lane.b32.xlu1 %v11438_v36, %s10950_s2  ;;  %477 = vrot.lane.b32.xlu0 %v11485_v17, %s10950_s2 }
 0x176   :  { %17172 = vst [vmem:[#allocation83_spill] sm:$0xff] %v11505_v20  ;;  %v11534_v22 = vsel %vm256_vm7, %v300_v30, %v11124_v28 }
 0x177   :  { %v11511_v62 = vpop.permute.xlu1 %551  ;;  %v11513_v1 = vpop.permute.xlu0 %555  ;;  %17179 = vst [vmem:[#allocation90_spill] sm:$0xff] %v11534_v22 }
 0x178   :  { %17173 = vst [vmem:[#allocation84_spill] sm:$0xff] %v11511_v62  ;;  %v294_v62 = vrot.slane %v195_v61, 6 }
 0x179   :  { %17174 = vst [vmem:[#allocation85_spill] sm:$0xff] %v11513_v1  ;;  %v11528_v1 = vrot.slane %v198_v58, 6 }
 0x17b   :  { %475 = vrot.lane.b32.xlu2 %v11501_v27, %s10950_s2  ;;  %17178 = vst [vmem:[#allocation89_spill] sm:$0xff] %v11528_v1  ;;  %v11538_v21 = vsel %vm249_vm6, %v294_v62, %v11528_v1 }
 0x17c   :  { %17180 = vst [vmem:[#allocation91_spill] sm:$0xff] %v11538_v21 }
 0x17d   :  { %v11518_v56 = vpop.permute.xlu2 %559  ;;  %581 = vrot.lane.b32.xlu1 %v11438_v36, %s10951_s13  ;;  %585 = vrot.lane.b32.xlu0 %v11485_v17, %s10951_s13 }
 0x17e   :  { %17175 = vst [vmem:[#allocation86_spill] sm:$0xff] %v11518_v56 }
 0x17f   :  { %v11524_v20 = vpop.permute.xlu1 %341  ;;  %v11526_v10 = vpop.permute.xlu0 %345 }
 0x180   :  { %17176 = vst [vmem:[#allocation87_spill] sm:$0xff] %v11524_v20 }
 0x181   :  { %17177 = vst [vmem:[#allocation88_spill] sm:$0xff] %v11526_v10 }
 0x183   :  { %583 = vrot.lane.b32.xlu2 %v11501_v27, %s10951_s13 }
 0x185   :  { %v11540_v56 = vpop.permute.xlu2 %349  ;;  %371 = vrot.lane.b32.xlu1 %v11538_v21, %s10949_s1  ;;  %375 = vrot.lane.b32.xlu0 %v11534_v22, %s10949_s1 }
 0x186   :  { %17181 = vst [vmem:[#allocation92_spill] sm:$0xff] %v11540_v56 }
 0x187   :  { %v11546_v61 = vpop.permute.xlu1 %449  ;;  %v11548_v58 = vpop.permute.xlu0 %453 }
 0x188   :  { %17182 = vst [vmem:[#allocation93_spill] sm:$0xff] %v11546_v61 }
 0x189   :  { %17183 = vst [vmem:[#allocation94_spill] sm:$0xff] %v11548_v58 }
 0x18b   :  { %373 = vrot.lane.b32.xlu2 %v11528_v1, %s10949_s1  ;;  %s10954_s1 = smov 8  }
 0x18d   :  { %v11552_v30 = vpop.permute.xlu2 %457  ;;  %479 = vrot.lane.b32.xlu1 %v11538_v21, %s10950_s2  ;;  %483 = vrot.lane.b32.xlu0 %v11534_v22, %s10950_s2 }
 0x18e   :  { %17184 = vst [vmem:[#allocation95_spill] sm:$0xff] %v11552_v30 }
 0x18f   :  { %v11558_v62 = vpop.permute.xlu1 %557  ;;  %v11560_v16 = vpop.permute.xlu0 %561 }
 0x190   :  { %17185 = vst [vmem:[#allocation96_spill] sm:$0xff] %v11558_v62 }
 0x191   :  { %17186 = vst [vmem:[#allocation97_spill] sm:$0xff] %v11560_v16 }
 0x193   :  { %481 = vrot.lane.b32.xlu2 %v11528_v1, %s10950_s2  ;;  %s10955_s2 = smov 4  }
 0x195   :  { %v11564_v61 = vpop.permute.xlu2 %565  ;;  %587 = vrot.lane.b32.xlu1 %v11538_v21, %s10951_s13  ;;  %591 = vrot.lane.b32.xlu0 %v11534_v22, %s10951_s13 }
 0x196   :  { %17187 = vst [vmem:[#allocation98_spill] sm:$0xff] %v11564_v61 }
 0x197   :  { %v11570_v30 = vpop.permute.xlu1 %347  ;;  %v11572_v58 = vpop.permute.xlu0 %351 }
 0x198   :  { %17188 = vst [vmem:[#allocation99_spill] sm:$0xff] %v11570_v30 }
 0x199   :  { %17189 = vst [vmem:[#allocation100_spill] sm:$0xff] %v11572_v58 }
 0x19b   :  { %589 = vrot.lane.b32.xlu2 %v11528_v1, %s10951_s13 }
 0x19d   :  { %v11576_v62 = vpop.permute.xlu2 %355  ;;  %593 = vrot.lane.b32.xlu1 %v11124_v28, %s10951_s13  ;;  %597 = vrot.lane.b32.xlu0 %v11172_v42, %s10951_s13 }
 0x19e   :  { %17190 = vst [vmem:[#allocation101_spill] sm:$0xff] %v11576_v62 }
 0x19f   :  { %v11582_v61 = vpop.permute.xlu1 %455  ;;  %v11584_v16 = vpop.permute.xlu0 %459 }
 0x1a0   :  { %17191 = vst [vmem:[#allocation102_spill] sm:$0xff] %v11582_v61 }
 0x1a1   :  { %17192 = vst [vmem:[#allocation103_spill] sm:$0xff] %v11584_v16 }
 0x1a3   :  { %595 = vrot.lane.b32.xlu2 %v11134_v32, %s10951_s13 }
 0x1a5   :  { %v11588_v55 = vpop.permute.xlu2 %463  ;;  %599 = vrot.lane.b32.xlu1 %v11211_v54, %s10951_s13  ;;  %783 = vrot.lane.b32.xlu0 %v11118_v25, %s10952_s14 }
 0x1a6   :  { %17193 = vst [vmem:[#allocation104_spill] sm:$0xff] %v11588_v55 }
 0x1a7   :  { %v11594_v12 = vpop.permute.xlu1 %563  ;;  %v11596_v15 = vpop.permute.xlu0 %567 }
 0x1a8   :  { %17194 = vst [vmem:[#allocation105_spill] sm:$0xff] %v11594_v12 }
 0x1a9   :  { %17195 = vst [vmem:[#allocation106_spill] sm:$0xff] %v11596_v15 }
 0x1ab   :  { %601 = vrot.lane.b32.xlu2 %v11204_v52, %s10951_s13  ;;  %s10956_s13 = smov 12  }
 0x1ad   :  { %v11600_v16 = vpop.permute.xlu2 %571  ;;  %785 = vrot.lane.b32.xlu1 %v11131_v31, %s10952_s14  ;;  %823 = vrot.lane.b32.xlu0 %v11149_v35, %s10952_s14 }
 0x1ae   :  { %17196 = vst [vmem:[#allocation107_spill] sm:$0xff] %v11600_v16 }
 0x1af   :  { %v11606_v55 = vpop.permute.xlu1 %353  ;;  %v11608_v61 = vpop.permute.xlu0 %357 }
 0x1b0   :  { %17197 = vst [vmem:[#allocation108_spill] sm:$0xff] %v11606_v55 }
 0x1b1   :  { %17198 = vst [vmem:[#allocation109_spill] sm:$0xff] %v11608_v61 }
 0x1b3   :  { %821 = vrot.lane.b32.xlu2 %v11154_v37, %s10952_s14 }
 0x1b5   :  { %v11612_v12 = vpop.permute.xlu2 %361  ;;  %858 = vrot.lane.b32.xlu1 %v11185_v46, %s10952_s14  ;;  %895 = vrot.lane.b32.xlu0 %v11198_v51, %s10952_s14 }
 0x1b6   :  { %17199 = vst [vmem:[#allocation110_spill] sm:$0xff] %v11612_v12 }
 0x1b7   :  { %v11618_v16 = vpop.permute.xlu1 %461  ;;  %v11620_v15 = vpop.permute.xlu0 %465 }
 0x1b8   :  { %17200 = vst [vmem:[#allocation111_spill] sm:$0xff] %v11618_v16 }
 0x1b9   :  { %17201 = vst [vmem:[#allocation112_spill] sm:$0xff] %v11620_v15 }
 0x1bb   :  { %860 = vrot.lane.b32.xlu2 %v11169_v41, %s10952_s14 }
 0x1bd   :  { %v11624_v63 = vpop.permute.xlu2 %469  ;;  %897 = vrot.lane.b32.xlu1 %v11191_v48, %s10952_s14  ;;  %934 = vrot.lane.b32.xlu0 %v11224_v57, %s10952_s14 }
 0x1be   :  { %17202 = vst [vmem:[#allocation113_spill] sm:$0xff] %v11624_v63 }
 0x1bf   :  { %v11630_v53 = vpop.permute.xlu1 %569  ;;  %v11632_v11 = vpop.permute.xlu0 %573 }
 0x1c0   :  { %17203 = vst [vmem:[#allocation114_spill] sm:$0xff] %v11630_v53 }
 0x1c1   :  { %17204 = vst [vmem:[#allocation115_spill] sm:$0xff] %v11632_v11 }
 0x1c3   :  { %932 = vrot.lane.b32.xlu2 %v11234_v59, %s10952_s14 }
 0x1c5   :  { %v11636_v16 = vpop.permute.xlu2 %577  ;;  %969 = vrot.lane.b32.xlu1 %v11260_v5, %s10952_s14  ;;  %1006 = vrot.lane.b32.xlu0 %v11264_v6, %s10952_s14 }
 0x1c6   :  { %17205 = vst [vmem:[#allocation116_spill] sm:$0xff] %v11636_v16 }
 0x1c7   :  { %v11642_v63 = vpop.permute.xlu1 %359  ;;  %v11644_v15 = vpop.permute.xlu0 %363 }
 0x1c8   :  { %17206 = vst [vmem:[#allocation117_spill] sm:$0xff] %v11642_v63 }
 0x1c9   :  { %17207 = vst [vmem:[#allocation118_spill] sm:$0xff] %v11644_v15 }
 0x1cb   :  { %971 = vrot.lane.b32.xlu2 %v11252_v2, %s10952_s14 }
 0x1cd   :  { %v11648_v53 = vpop.permute.xlu2 %367  ;;  %1008 = vrot.lane.b32.xlu1 %v11254_v4, %s10952_s14  ;;  %1045 = vrot.lane.b32.xlu0 %v11299_v18, %s10952_s14 }
 0x1ce   :  { %17208 = vst [vmem:[#allocation119_spill] sm:$0xff] %v11648_v53 }
 0x1cf   :  { %v11654_v16 = vpop.permute.xlu1 %467  ;;  %v11656_v11 = vpop.permute.xlu0 %471 }
 0x1d0   :  { %17209 = vst [vmem:[#allocation120_spill] sm:$0xff] %v11654_v16 }
 0x1d1   :  { %17210 = vst [vmem:[#allocation121_spill] sm:$0xff] %v11656_v11 }
 0x1d3   :  { %1043 = vrot.lane.b32.xlu2 %v11315_v26, %s10952_s14 }
 0x1d5   :  { %v11660_v12 = vpop.permute.xlu2 %475  ;;  %1080 = vrot.lane.b32.xlu1 %v11349_v45, %s10952_s14  ;;  %1117 = vrot.lane.b32.xlu0 %v11355_v47, %s10952_s14 }
 0x1d6   :  { %17211 = vst [vmem:[#allocation122_spill] sm:$0xff] %v11660_v12 }
 0x1d7   :  { %v11666_v53 = vpop.permute.xlu1 %575  ;;  %v11668_v4 = vpop.permute.xlu0 %579 }
 0x1d8   :  { %17212 = vst [vmem:[#allocation123_spill] sm:$0xff] %v11666_v53 }
 0x1d9   :  { %17213 = vst [vmem:[#allocation124_spill] sm:$0xff] %v11668_v4 }
 0x1db   :  { %1082 = vrot.lane.b32.xlu2 %v11332_v34, %s10952_s14 }
 0x1dd   :  { %v11672_v16 = vpop.permute.xlu2 %583  ;;  %1119 = vrot.lane.b32.xlu1 %v11345_v43, %s10952_s14  ;;  %1156 = vrot.lane.b32.xlu0 %v11392_v3, %s10952_s14 }
 0x1de   :  { %17214 = vst [vmem:[#allocation125_spill] sm:$0xff] %v11672_v16 }
 0x1df   :  { %v11678_v12 = vpop.permute.xlu1 %365  ;;  %v11680_v11 = vpop.permute.xlu0 %369 }
 0x1e0   :  { %17215 = vst [vmem:[#allocation126_spill] sm:$0xff] %v11678_v12 }
 0x1e1   :  { %17216 = vst [vmem:[#allocation127_spill] sm:$0xff] %v11680_v11 }
 0x1e3   :  { %1154 = vrot.lane.b32.xlu2 %v11408_v33, %s10952_s14 }
 0x1e5   :  { %v11684_v53 = vpop.permute.xlu2 %373  ;;  %1191 = vrot.lane.b32.xlu1 %v11444_v38, %s10952_s14  ;;  %1228 = vrot.lane.b32.xlu0 %v11448_v24, %s10952_s14 }
 0x1e6   :  { %17217 = vst [vmem:[#allocation128_spill] sm:$0xff] %v11684_v53 }
 0x1e7   :  { %v11690_v16 = vpop.permute.xlu1 %473  ;;  %v11692_v4 = vpop.permute.xlu0 %477 }
 0x1e8   :  { %17218 = vst [vmem:[#allocation129_spill] sm:$0xff] %v11690_v16 }
 0x1e9   :  { %17219 = vst [vmem:[#allocation130_spill] sm:$0xff] %v11692_v4 }
 0x1eb   :  { %1193 = vrot.lane.b32.xlu2 %v11436_v60, %s10952_s14 }
 0x1ed   :  { %v11696_v43 = vpop.permute.xlu2 %481  ;;  %1230 = vrot.lane.b32.xlu1 %v11438_v36, %s10952_s14  ;;  %1267 = vrot.lane.b32.xlu0 %v11485_v17, %s10952_s14 }
 0x1ee   :  { %17220 = vst [vmem:[#allocation131_spill] sm:$0xff] %v11696_v43 }
 0x1ef   :  { %v11702_v3 = vpop.permute.xlu1 %581  ;;  %v11704_v53 = vpop.permute.xlu0 %585 }
 0x1f0   :  { %17221 = vst [vmem:[#allocation132_spill] sm:$0xff] %v11702_v3 }
 0x1f1   :  { %17222 = vst [vmem:[#allocation133_spill] sm:$0xff] %v11704_v53 }
 0x1f3   :  { %1265 = vrot.lane.b32.xlu2 %v11501_v27, %s10952_s14 }
 0x1f5   :  { %v11708_v16 = vpop.permute.xlu2 %589  ;;  %1302 = vrot.lane.b32.xlu1 %v11538_v21, %s10952_s14  ;;  %1339 = vrot.lane.b32.xlu0 %v11534_v22, %s10952_s14 }
 0x1f6   :  { %17223 = vst [vmem:[#allocation134_spill] sm:$0xff] %v11708_v16 }
 0x1f7   :  { %v11714_v43 = vpop.permute.xlu1 %371  ;;  %v11716_v4 = vpop.permute.xlu0 %375 }
 0x1f8   :  { %17224 = vst [vmem:[#allocation135_spill] sm:$0xff] %v11714_v43 }
 0x1f9   :  { %17225 = vst [vmem:[#allocation136_spill] sm:$0xff] %v11716_v4 }
 0x1fb   :  { %1304 = vrot.lane.b32.xlu2 %v11528_v1, %s10952_s14 }
 0x1fd   :  { %v11720_v3 = vpop.permute.xlu2 %595  ;;  %1341 = vrot.lane.b32.xlu1 %v11124_v28, %s10952_s14  ;;  %1378 = vrot.lane.b32.xlu0 %v11172_v42, %s10952_s14 }
 0x1fe   :  { %17226 = vst [vmem:[#allocation137_spill] sm:$0xff] %v11720_v3 }
 0x1ff   :  { %v11726_v16 = vpop.permute.xlu1 %479  ;;  %v11728_v53 = vpop.permute.xlu0 %483 }
 0x200   :  { %17227 = vst [vmem:[#allocation138_spill] sm:$0xff] %v11726_v16 }
 0x201   :  { %17228 = vst [vmem:[#allocation139_spill] sm:$0xff] %v11728_v53 }
 0x203   :  { %1376 = vrot.lane.b32.xlu2 %v11134_v32, %s10952_s14 }
 0x205   :  { %v11732_v22 = vpop.permute.xlu2 %601  ;;  %1413 = vrot.lane.b32.xlu1 %v11211_v54, %s10952_s14  ;;  %1450 = vrot.lane.b32.xlu0 %v11272_v8, %s10952_s14 }
 0x206   :  { %17229 = vst [vmem:[#allocation140_spill] sm:$0xff] %v11732_v22 }
 0x207   :  { %v11738_v3 = vpop.permute.xlu1 %587  ;;  %v11740_v28 = vpop.permute.xlu0 %591 }
 0x208   :  { %17230 = vst [vmem:[#allocation141_spill] sm:$0xff] %v11738_v3 }
 0x209   :  { %17231 = vst [vmem:[#allocation142_spill] sm:$0xff] %v11740_v28 }
 0x20b   :  { %1415 = vrot.lane.b32.xlu2 %v11204_v52, %s10952_s14 }
 0x20d   :  { %v822_v16 = vpop.permute.xlu2 %821  ;;  %1489 = vrot.lane.b32.xlu0 %v11341_v39, %s10952_s14  ;;  %1452 = vrot.lane.b32.xlu1 %v11311_v23, %s10952_s14 }
 0x20f   :  { %v11748_v22 = vpop.permute.xlu1 %593  ;;  %v11750_v53 = vpop.permute.xlu0 %597 }
 0x210   :  { %17232 = vst [vmem:[#allocation143_spill] sm:$0xff] %v11748_v22 }
 0x211   :  { %17233 = vst [vmem:[#allocation144_spill] sm:$0xff] %v11750_v53 }
 0x213   :  { %1487 = vrot.lane.b32.xlu2 %v11363_v50, %s10952_s14 }
 0x215   :  { %v861_v3 = vpop.permute.xlu2 %860  ;;  %1524 = vrot.lane.b32.xlu1 %v11357_v49, %s10952_s14  ;;  %1561 = vrot.lane.b32.xlu0 %v11389_v0, %s10952_s14 }
 0x216   :  { %9542 = vmatpush.xpose.msk.msra.mxu3 %vm787_vm8, %v861_v3 }
 0x217   :  { %v11759_v28 = vpop.permute.xlu1 %599  ;;  %v784_v23 = vpop.permute.xlu0 %783 }
 0x218   :  { %17234 = vst [vmem:[#allocation145_spill] sm:$0xff] %v11759_v28  ;;  %v641_v28 = vmul.f32 0.5, %v11154_v37 }
 0x21b   :  { %1526 = vrot.lane.b32.xlu2 %v11303_v19, %s10952_s14 }
 0x21d   :  { %v933_v53 = vpop.permute.xlu2 %932  ;;  %1563 = vrot.lane.b32.xlu1 %v11432_v40, %s10952_s14  ;;  %1600 = vrot.lane.b32.xlu0 %v11434_v29, %s10952_s14 }
 0x21f   :  { %v786_v22 = vpop.permute.xlu1 %785  ;;  %v824_v39 = vpop.permute.xlu0 %823 }
 0x220   :  { %9534 = vmatpush.xpose.msk.msra.mxu1 %vm787_vm8, %v786_v22  ;;  %9538 = vmatpush.xpose.msk.msrb.mxu2 %vm787_vm8, %v824_v39  ;;  %v639_v22 = vmul.f32 0.5, %v11118_v25 }
 0x223   :  { %1598 = vrot.lane.b32.xlu2 %v11396_v9, %s10952_s14 }
 0x224   :  { %9535 = vmatpush.xpose.msk.msra.mxu1 %vm787_vm8, %v784_v23  ;;  %9539 = vmatpush.xpose.msk.msrb.mxu2 %vm787_vm8, %v822_v16  ;;  %v643_v16 = vmul.f32 0.5, %v11185_v46 }
 0x225   :  { %v972_v3 = vpop.permute.xlu2 %971  ;;  %1635 = vrot.lane.b32.xlu1 %v11481_v44, %s10952_s14  ;;  %1672 = vrot.lane.b32.xlu0 %v11483_v14, %s10952_s14 }
 0x227   :  { %v859_v40 = vpop.permute.xlu1 %858  ;;  %9540 = vmatmul.msk.f32.vlgmr.msrb.gmra.mxu2 %vm787_vm8, %v641_v28  ;;  %v896_v39 = vpop.permute.xlu0 %895  ;;  %9536 = vmatmul.msk.f32.vlgmr.msra.gmra.mxu1 %vm787_vm8, %v639_v22  ;;  %v642_v28 = vmul.f32 0.5, %v11149_v35 }
 0x228   :  { %9543 = vmatpush.xpose.msk.msra.mxu3 %vm787_vm8, %v859_v40  ;;  %v640_v40 = vmul.f32 0.5, %v11131_v31 }
 0x22b   :  { %1637 = vrot.lane.b32.xlu2 %v11450_v13, %s10952_s14  ;;  %9544 = vmatmul.msk.f32.vlgmr.msra.gmra.mxu3 %vm787_vm8, %v643_v16  ;;  %v644_v16 = vmul.f32 0.5, %v11169_v41 }
 0x22c   :  { %9554 = vmatpush.xpose.msk.msrb.mxu3 %vm787_vm8, %v972_v3 }
 0x22d   :  { %v1044_v23 = vpop.permute.xlu2 %1043  ;;  %1674 = vrot.lane.b32.xlu1 %v11524_v20, %s10952_s14  ;;  %1711 = vrot.lane.b32.xlu0 %v11526_v10, %s10952_s14 }
 0x22f   :  { %v898_v22 = vpop.permute.xlu1 %897  ;;  %9541 = vmatmul.msk.f32.gmra.mxu2 %vm787_vm8, %v642_v28  ;;  %v935_v3 = vpop.permute.xlu0 %934  ;;  %9537 = vmatmul.msk.f32.gmra.mxu1 %vm787_vm8, %v640_v40  ;;  %v647_v28 = vmul.f32 0.5, %v11234_v59  ;;  %v645_v40 = vmul.f32 0.5, %v11198_v51  ;;  %v17264_v59 = vld [vmem:[#allocation33_spill] sm:$0xff] }
 0x230   :  { %9546 = vmatpush.xpose.msk.msrb.mxu1 %vm787_vm8, %v898_v22  ;;  %9550 = vmatpush.xpose.msk.msra.mxu2 %vm787_vm8, %v935_v3 }
 0x233   :  { %1709 = vrot.lane.b32.xlu2 %v11489_v7, %s10952_s14  ;;  %9545 = vmatmul.msk.f32.gmra.mxu3 %vm787_vm8, %v644_v16  ;;  %v648_v16 = vmul.f32 0.5, %v11224_v57  ;;  %v17302_v57 = vld [vmem:[#allocation86_spill] sm:$0xff] }
 0x234   :  { %9547 = vmatpush.xpose.msk.msrb.mxu1 %vm787_vm8, %v896_v39  ;;  %9551 = vmatpush.xpose.msk.msra.mxu2 %vm787_vm8, %v933_v53  ;;  %v649_v53 = vmul.f32 0.5, %v11260_v5 }
 0x235   :  { %v1083_v35 = vpop.permute.xlu2 %1082  ;;  %1746 = vrot.lane.b32.xlu1 %v11570_v30, %s10952_s14  ;;  %1783 = vrot.lane.b32.xlu0 %v11572_v58, %s10952_s14 }
 0x237   :  { %v970_v22 = vpop.permute.xlu1 %969  ;;  %9552 = vmatmul.msk.f32.vlgmr.msra.gmra.mxu2 %vm787_vm8, %v647_v28  ;;  %v1007_v3 = vpop.permute.xlu0 %1006  ;;  %9548 = vmatmul.msk.f32.vlgmr.msrb.gmra.mxu1 %vm787_vm8, %v645_v40  ;;  %v646_v28 = vmul.f32 0.5, %v11191_v48 }
 0x238   :  { %9555 = vmatpush.xpose.msk.msrb.mxu3 %vm787_vm8, %v970_v22  ;;  %v650_v22 = vmul.f32 0.5, %v11252_v2 }
 0x23b   :  { %1748 = vrot.lane.b32.xlu2 %v11540_v56, %s10952_s14  ;;  %9556 = vmatmul.msk.f32.vlgmr.msrb.gmra.mxu3 %vm787_vm8, %v649_v53 }
 0x23c   :  { %9566 = vmatpush.xpose.msk.msra.mxu3 %vm787_vm8, %v1083_v35 }
 0x23d   :  { %v1155_v39 = vpop.permute.xlu2 %1154  ;;  %1785 = vrot.lane.b32.xlu1 %v11606_v55, %s10952_s14  ;;  %1822 = vrot.lane.b32.xlu0 %v11608_v61, %s10952_s14 }
 0x23f   :  { %v1009_v40 = vpop.permute.xlu1 %1008  ;;  %9553 = vmatmul.msk.f32.gmra.mxu2 %vm787_vm8, %v648_v16  ;;  %v1046_v35 = vpop.permute.xlu0 %1045  ;;  %9549 = vmatmul.msk.f32.gmra.mxu1 %vm787_vm8, %v646_v28  ;;  %v653_v16 = vmul.f32 0.5, %v11315_v26  ;;  %v651_v28 = vmul.f32 0.5, %v11264_v6  ;;  %v17242_v6 = vld [vmem:[#allocation42_spill] sm:$0xff] }
 0x240   :  { %9558 = vmatpush.xpose.msk.msra.mxu1 %vm787_vm8, %v1009_v40  ;;  %9562 = vmatpush.xpose.msk.msrb.mxu2 %vm787_vm8, %v1046_v35 }
 0x243   :  { %1820 = vrot.lane.b32.xlu2 %v11576_v62, %s10952_s14  ;;  %9557 = vmatmul.msk.f32.gmra.mxu3 %vm787_vm8, %v650_v22 }
 0x244   :  { %9559 = vmatpush.xpose.msk.msra.mxu1 %vm787_vm8, %v1007_v3  ;;  %9563 = vmatpush.xpose.msk.msrb.mxu2 %vm787_vm8, %v1044_v23  ;;  %v655_v23 = vmul.f32 0.5, %v11349_v45  ;;  %v17235_v3 = vld [vmem:[#allocation110_spill] sm:$0xff]  ;;  %v17237_v45 = vld [vmem:[#allocation119_spill] sm:$0xff] }
 0x245   :  { %v1194_v53 = vpop.permute.xlu2 %1193  ;;  %1857 = vrot.lane.b32.xlu1 %v11642_v63, %s10952_s14  ;;  %1894 = vrot.lane.b32.xlu0 %v11644_v15, %s10952_s14 }
 0x247   :  { %v1081_v40 = vpop.permute.xlu1 %1080  ;;  %9564 = vmatmul.msk.f32.vlgmr.msrb.gmra.mxu2 %vm787_vm8, %v653_v16  ;;  %v1118_v35 = vpop.permute.xlu0 %1117  ;;  %9560 = vmatmul.msk.f32.vlgmr.msra.gmra.mxu1 %vm787_vm8, %v651_v28  ;;  %v654_v16 = vmul.f32 0.5, %v11299_v18  ;;  %v17236_v28 = vld [vmem:[#allocation19_spill] sm:$0xff] }
 0x248   :  { %9567 = vmatpush.xpose.msk.msra.mxu3 %vm787_vm8, %v1081_v40  ;;  %v652_v40 = vmul.f32 0.5, %v17236_v28 }
 0x24b   :  { %1859 = vrot.lane.b32.xlu2 %v17235_v3, %s10952_s14  ;;  %9568 = vmatmul.msk.f32.vlgmr.msra.gmra.mxu3 %vm787_vm8, %v655_v23  ;;  %v656_v23 = vmul.f32 0.5, %v11332_v34 }
 0x24c   :  { %9578 = vmatpush.xpose.msk.msrb.mxu3 %vm787_vm8, %v1194_v53 }
 0x24d   :  { %v1266_v22 = vpop.permute.xlu2 %1265  ;;  %1896 = vrot.lane.b32.xlu1 %v11678_v12, %s10952_s14  ;;  %1933 = vrot.lane.b32.xlu0 %v11680_v11, %s10952_s14 }
 0x24f   :  { %v1120_v2 = vpop.permute.xlu1 %1119  ;;  %9565 = vmatmul.msk.f32.gmra.mxu2 %vm787_vm8, %v654_v16  ;;  %v1157_v53 = vpop.permute.xlu0 %1156  ;;  %9561 = vmatmul.msk.f32.gmra.mxu1 %vm787_vm8, %v652_v40  ;;  %v657_v16 = vmul.f32 0.5, %v11355_v47  ;;  %v17239_v47 = vld [vmem:[#allocation25_spill] sm:$0xff] }
 0x250   :  { %9570 = vmatpush.xpose.msk.msrb.mxu1 %vm787_vm8, %v1120_v2  ;;  %9574 = vmatpush.xpose.msk.msra.mxu2 %vm787_vm8, %v1157_v53  ;;  %v659_v2 = vmul.f32 0.5, %v11408_v33  ;;  %v17241_v33 = vld [vmem:[#allocation54_spill] sm:$0xff] }
 0x253   :  { %1931 = vrot.lane.b32.xlu2 %v17237_v45, %s10952_s14  ;;  %9569 = vmatmul.msk.f32.gmra.mxu3 %vm787_vm8, %v656_v23 }
 0x254   :  { %9571 = vmatpush.xpose.msk.msrb.mxu1 %vm787_vm8, %v1118_v35  ;;  %9575 = vmatpush.xpose.msk.msra.mxu2 %vm787_vm8, %v1155_v39  ;;  %v661_v39 = vmul.f32 0.5, %v11444_v38  ;;  %v17238_v35 = vld [vmem:[#allocation128_spill] sm:$0xff]  ;;  %v17243_v38 = vld [vmem:[#allocation17_spill] sm:$0xff] }
 0x255   :  { %v1305_v5 = vpop.permute.xlu2 %1304  ;;  %1968 = vrot.lane.b32.xlu1 %v11714_v43, %s10952_s14  ;;  %2005 = vrot.lane.b32.xlu0 %v11716_v4, %s10952_s14 }
 0x257   :  { %v1192_v40 = vpop.permute.xlu1 %1191  ;;  %9576 = vmatmul.msk.f32.vlgmr.msra.gmra.mxu2 %vm787_vm8, %v659_v2  ;;  %v1229_v53 = vpop.permute.xlu0 %1228  ;;  %9572 = vmatmul.msk.f32.vlgmr.msrb.gmra.mxu1 %vm787_vm8, %v657_v16  ;;  %v17240_v2 = vld [vmem:[#allocation47_spill] sm:$0xff]  ;;  %v660_v16 = vmul.f32 0.5, %v17241_v33 }
 0x258   :  { %9579 = vmatpush.xpose.msk.msrb.mxu3 %vm787_vm8, %v1192_v40  ;;  %v658_v40 = vmul.f32 0.5, %v17242_v6 }
 0x25b   :  { %1970 = vrot.lane.b32.xlu2 %v17238_v35, %s10952_s14  ;;  %9580 = vmatmul.msk.f32.vlgmr.msrb.gmra.mxu3 %vm787_vm8, %v661_v39  ;;  %v662_v39 = vmul.f32 0.5, %v11436_v60 }
 0x25c   :  { %9590 = vmatpush.xpose.msk.msra.mxu3 %vm787_vm8, %v1305_v5 }
 0x25d   :  { %v1377_v23 = vpop.permute.xlu2 %1376  ;;  %2007 = vrot.lane.b32.xlu1 %v17239_v47, %s10952_s14  ;;  %2044 = vrot.lane.b32.xlu0 %v17240_v2, %s10952_s14 }
 0x25f   :  { %v1231_v34 = vpop.permute.xlu1 %1230  ;;  %9577 = vmatmul.msk.f32.gmra.mxu2 %vm787_vm8, %v660_v16  ;;  %v1268_v5 = vpop.permute.xlu0 %1267  ;;  %9573 = vmatmul.msk.f32.gmra.mxu1 %vm787_vm8, %v658_v40  ;;  %v17244_v16 = vld [vmem:[#allocation56_spill] sm:$0xff]  ;;  %v17245_v40 = vld [vmem:[#allocation26_spill] sm:$0xff] }
 0x260   :  { %9582 = vmatpush.xpose.msk.msra.mxu1 %vm787_vm8, %v1231_v34  ;;  %9586 = vmatpush.xpose.msk.msrb.mxu2 %vm787_vm8, %v1268_v5  ;;  %v665_v34 = vmul.f32 0.5, %v11501_v27  ;;  %v663_v5 = vmul.f32 0.5, %v11448_v24  ;;  %v17247_v27 = vld [vmem:[#allocation28_spill] sm:$0xff] }
 0x263   :  { %2042 = vrot.lane.b32.xlu2 %v17243_v38, %s10952_s14  ;;  %9581 = vmatmul.msk.f32.gmra.mxu3 %vm787_vm8, %v662_v39 }
 0x264   :  { %9583 = vmatpush.xpose.msk.msra.mxu1 %vm787_vm8, %v1229_v53  ;;  %9587 = vmatpush.xpose.msk.msrb.mxu2 %vm787_vm8, %v1266_v22  ;;  %v667_v22 = vmul.f32 0.5, %v11538_v21  ;;  %v17246_v53 = vld [vmem:[#allocation48_spill] sm:$0xff] }
 0x265   :  { %v1416_v6 = vpop.permute.xlu2 %1415  ;;  %2079 = vrot.lane.b32.xlu1 %v17244_v16, %s10952_s14  ;;  %2116 = vrot.lane.b32.xlu0 %v17245_v40, %s10952_s14  ;;  %v17249_v21 = vld [vmem:[#allocation24_spill] sm:$0xff] }
 0x267   :  { %v1303_v60 = vpop.permute.xlu1 %1302  ;;  %9588 = vmatmul.msk.f32.vlgmr.msrb.gmra.mxu2 %vm787_vm8, %v665_v34  ;;  %v1340_v33 = vpop.permute.xlu0 %1339  ;;  %9584 = vmatmul.msk.f32.vlgmr.msra.gmra.mxu1 %vm787_vm8, %v663_v5  ;;  %v17248_v34 = vld [vmem:[#allocation37_spill] sm:$0xff]  ;;  %v666_v5 = vmul.f32 0.5, %v11485_v17 }
 0x268   :  { %9591 = vmatpush.xpose.msk.msra.mxu3 %vm787_vm8, %v1303_v60  ;;  %v664_v60 = vmul.f32 0.5, %v11438_v36 }
 0x26b   :  { %2081 = vrot.lane.b32.xlu2 %v17246_v53, %s10952_s14  ;;  %9592 = vmatmul.msk.f32.vlgmr.msra.gmra.mxu3 %vm787_vm8, %v667_v22  ;;  %v668_v22 = vmul.f32 0.5, %v11528_v1 }
 0x26c   :  { %9602 = vmatpush.xpose.msk.msrb.mxu3 %vm787_vm8, %v1416_v6 }
 0x26d   :  { %v1488_v39 = vpop.permute.xlu2 %1487  ;;  %2118 = vrot.lane.b32.xlu1 %v17247_v27, %s10952_s14  ;;  %2155 = vrot.lane.b32.xlu0 %v17248_v34, %s10952_s14 }
 0x26f   :  { %v1342_v24 = vpop.permute.xlu1 %1341  ;;  %9589 = vmatmul.msk.f32.gmra.mxu2 %vm787_vm8, %v666_v5  ;;  %v1379_v6 = vpop.permute.xlu0 %1378  ;;  %9585 = vmatmul.msk.f32.gmra.mxu1 %vm787_vm8, %v664_v60  ;;  %v17250_v5 = vld [vmem:[#allocation49_spill] sm:$0xff] }
 0x270   :  { %9594 = vmatpush.xpose.msk.msrb.mxu1 %vm787_vm8, %v1342_v24  ;;  %9598 = vmatpush.xpose.msk.msra.mxu2 %vm787_vm8, %v1379_v6  ;;  %v17251_v60 = vld [vmem:[#allocation57_spill] sm:$0xff]  ;;  %v671_v24 = vmul.f32 0.5, %v11134_v32  ;;  %v17252_v6 = vld [vmem:[#allocation90_spill] sm:$0xff] }
 0x271   :  { %v669_v1 = vmul.f32 0.5, %v17252_v6  ;;  %v17254_v32 = vld [vmem:[#allocation70_spill] sm:$0xff]  ;;  %v17256_v6 = vld [vmem:[#allocation3_spill] sm:$0xff] }
 0x273   :  { %2153 = vrot.lane.b32.xlu2 %v17249_v21, %s10952_s14  ;;  %9593 = vmatmul.msk.f32.gmra.mxu3 %vm787_vm8, %v668_v22 }
 0x274   :  { %9595 = vmatpush.xpose.msk.msrb.mxu1 %vm787_vm8, %v1340_v33  ;;  %9599 = vmatpush.xpose.msk.msra.mxu2 %vm787_vm8, %v1377_v23  ;;  %v673_v33 = vmul.f32 0.5, %v11211_v54  ;;  %v17253_v23 = vld [vmem:[#allocation35_spill] sm:$0xff] }
 0x275   :  { %v1527_v17 = vpop.permute.xlu2 %1526  ;;  %2190 = vrot.lane.b32.xlu1 %v17250_v5, %s10952_s14  ;;  %2227 = vrot.lane.b32.xlu0 %v17251_v60, %s10952_s14  ;;  %v17257_v54 = vld [vmem:[#allocation59_spill] sm:$0xff] }
 0x277   :  { %v1414_v36 = vpop.permute.xlu1 %1413  ;;  %9600 = vmatmul.msk.f32.vlgmr.msra.gmra.mxu2 %vm787_vm8, %v671_v24  ;;  %v1451_v18 = vpop.permute.xlu0 %1450  ;;  %9596 = vmatmul.msk.f32.vlgmr.msrb.gmra.mxu1 %vm787_vm8, %v669_v1  ;;  %v17255_v24 = vld [vmem:[#allocation71_spill] sm:$0xff]  ;;  %v672_v1 = vmul.f32 0.5, %v11172_v42  ;;  %v677_v42 = vmul.f32 0.5, %v11363_v50  ;;  %v17263_v50 = vld [vmem:[#allocation40_spill] sm:$0xff] }
 0x278   :  { %9603 = vmatpush.xpose.msk.msrb.mxu3 %vm787_vm8, %v1414_v36  ;;  %v670_v36 = vmul.f32 0.5, %v17256_v6  ;;  %v720_v41 = vmul.f32 0.5, %v17255_v24 }
 0x27b   :  { %2192 = vrot.lane.b32.xlu2 %v17253_v23, %s10952_s14  ;;  %9604 = vmatmul.msk.f32.vlgmr.msrb.gmra.mxu3 %vm787_vm8, %v673_v33  ;;  %v674_v33 = vmul.f32 0.5, %v11204_v52 }
 0x27c   :  { %9614 = vmatpush.xpose.msk.msra.mxu3 %vm787_vm8, %v1527_v17 }
 0x27d   :  { %v1599_v22 = vpop.permute.xlu2 %1598  ;;  %2229 = vrot.lane.b32.xlu1 %v17254_v32, %s10952_s14  ;;  %2266 = vrot.lane.b32.xlu0 %v17255_v24, %s10952_s14  ;;  %v17308_v24 = vld [vmem:[#allocation107_spill] sm:$0xff] }
 0x27f   :  { %v1453_v26 = vpop.permute.xlu1 %1452  ;;  %9601 = vmatmul.msk.f32.gmra.mxu2 %vm787_vm8, %v672_v1  ;;  %v1490_v17 = vpop.permute.xlu0 %1489  ;;  %9597 = vmatmul.msk.f32.gmra.mxu1 %vm787_vm8, %v670_v36  ;;  %v675_v1 = vmul.f32 0.5, %v11272_v8  ;;  %v17261_v8 = vld [vmem:[#allocation93_spill] sm:$0xff] }
 0x280   :  { %9606 = vmatpush.xpose.msk.msra.mxu1 %vm787_vm8, %v1453_v26  ;;  %9610 = vmatpush.xpose.msk.msrb.mxu2 %vm787_vm8, %v1490_v17  ;;  %v17258_v26 = vld [vmem:[#allocation80_spill] sm:$0xff]  ;;  %v17259_v17 = vld [vmem:[#allocation81_spill] sm:$0xff] }
 0x283   :  { %2264 = vrot.lane.b32.xlu2 %v17257_v54, %s10952_s14  ;;  %9605 = vmatmul.msk.f32.gmra.mxu3 %vm787_vm8, %v674_v33 }
 0x284   :  { %9607 = vmatpush.xpose.msk.msra.mxu1 %vm787_vm8, %v1451_v18  ;;  %9611 = vmatpush.xpose.msk.msrb.mxu2 %vm787_vm8, %v1488_v39  ;;  %v679_v18 = vmul.f32 0.5, %v11357_v49  ;;  %v17260_v39 = vld [vmem:[#allocation72_spill] sm:$0xff]  ;;  %v17265_v49 = vld [vmem:[#allocation83_spill] sm:$0xff] }
 0x285   :  { %v1638_v36 = vpop.permute.xlu2 %1637  ;;  %2301 = vrot.lane.b32.xlu1 %v17258_v26, %s10952_s14  ;;  %2338 = vrot.lane.b32.xlu0 %v17259_v17, %s10952_s14 }
 0x287   :  { %v1525_v52 = vpop.permute.xlu1 %1524  ;;  %9612 = vmatmul.msk.f32.vlgmr.msrb.gmra.mxu2 %vm787_vm8, %v677_v42  ;;  %v1562_v6 = vpop.permute.xlu0 %1561  ;;  %9608 = vmatmul.msk.f32.vlgmr.msra.gmra.mxu1 %vm787_vm8, %v675_v1  ;;  %v17262_v42 = vld [vmem:[#allocation94_spill] sm:$0xff]  ;;  %v678_v1 = vmul.f32 0.5, %v17263_v50  ;;  %v683_v50 = vmul.f32 0.5, %v11396_v9  ;;  %v17271_v9 = vld [vmem:[#allocation63_spill] sm:$0xff] }
 0x288   :  { %9615 = vmatpush.xpose.msk.msra.mxu3 %vm787_vm8, %v1525_v52  ;;  %v676_v52 = vmul.f32 0.5, %v17264_v59 }
 0x28b   :  { %2303 = vrot.lane.b32.xlu2 %v17260_v39, %s10952_s14  ;;  %9616 = vmatmul.msk.f32.vlgmr.msra.gmra.mxu3 %vm787_vm8, %v679_v18  ;;  %v680_v18 = vmul.f32 0.5, %v11303_v19 }
 0x28c   :  { %9626 = vmatpush.xpose.msk.msrb.mxu3 %vm787_vm8, %v1638_v36 }
 0x28d   :  { %v1710_v33 = vpop.permute.xlu2 %1709  ;;  %2340 = vrot.lane.b32.xlu1 %v17261_v8, %s10952_s14  ;;  %2377 = vrot.lane.b32.xlu0 %v17262_v42, %s10952_s14 }
 0x28f   :  { %v1564_v28 = vpop.permute.xlu1 %1563  ;;  %9613 = vmatmul.msk.f32.gmra.mxu2 %vm787_vm8, %v678_v1  ;;  %v1601_v36 = vpop.permute.xlu0 %1600  ;;  %9609 = vmatmul.msk.f32.gmra.mxu1 %vm787_vm8, %v676_v52  ;;  %v681_v1 = vmul.f32 0.5, %v11389_v0  ;;  %v17269_v0 = vld [vmem:[#allocation111_spill] sm:$0xff] }
 0x290   :  { %9618 = vmatpush.xpose.msk.msrb.mxu1 %vm787_vm8, %v1564_v28  ;;  %9622 = vmatpush.xpose.msk.msra.mxu2 %vm787_vm8, %v1601_v36  ;;  %v17266_v28 = vld [vmem:[#allocation102_spill] sm:$0xff]  ;;  %v17267_v36 = vld [vmem:[#allocation103_spill] sm:$0xff] }
 0x293   :  { %2375 = vrot.lane.b32.xlu2 %v17265_v49, %s10952_s14  ;;  %9617 = vmatmul.msk.f32.gmra.mxu3 %vm787_vm8, %v680_v18 }
 0x294   :  { %9619 = vmatpush.xpose.msk.msrb.mxu1 %vm787_vm8, %v1562_v6  ;;  %9623 = vmatpush.xpose.msk.msra.mxu2 %vm787_vm8, %v1599_v22  ;;  %v685_v6 = vmul.f32 0.5, %v11481_v44  ;;  %v17268_v22 = vld [vmem:[#allocation95_spill] sm:$0xff]  ;;  %v17272_v44 = vld [vmem:[#allocation104_spill] sm:$0xff] }
 0x295   :  { %v1749_v52 = vpop.permute.xlu2 %1748  ;;  %2412 = vrot.lane.b32.xlu1 %v17266_v28, %s10952_s14  ;;  %2449 = vrot.lane.b32.xlu0 %v17267_v36, %s10952_s14 }
 0x297   :  { %v1636_v19 = vpop.permute.xlu1 %1635  ;;  %9624 = vmatmul.msk.f32.vlgmr.msra.gmra.mxu2 %vm787_vm8, %v683_v50  ;;  %v1673_v59 = vpop.permute.xlu0 %1672  ;;  %9620 = vmatmul.msk.f32.vlgmr.msrb.gmra.mxu1 %vm787_vm8, %v681_v1  ;;  %v17270_v50 = vld [vmem:[#allocation112_spill] sm:$0xff]  ;;  %v684_v1 = vmul.f32 0.5, %v11434_v29 }
 0x298   :  { %9627 = vmatpush.xpose.msk.msrb.mxu3 %vm787_vm8, %v1636_v19  ;;  %v682_v19 = vmul.f32 0.5, %v17271_v9  ;;  %v689_v9 = vmul.f32 0.5, %v11489_v7  ;;  %v17276_v7 = vld [vmem:[#allocation129_spill] sm:$0xff] }
 0x29b   :  { %2414 = vrot.lane.b32.xlu2 %v17268_v22, %s10952_s14  ;;  %9628 = vmatmul.msk.f32.vlgmr.msrb.gmra.mxu3 %vm787_vm8, %v685_v6  ;;  %v686_v6 = vmul.f32 0.5, %v11450_v13 }
 0x29c   :  { %9638 = vmatpush.xpose.msk.msra.mxu3 %vm787_vm8, %v1749_v52 }
 0x29d   :  { %v1821_v18 = vpop.permute.xlu2 %1820  ;;  %2451 = vrot.lane.b32.xlu1 %v17269_v0, %s10952_s14  ;;  %2488 = vrot.lane.b32.xlu0 %v17270_v50, %s10952_s14 }
 0x29f   :  { %v1675_v37 = vpop.permute.xlu1 %1674  ;;  %9625 = vmatmul.msk.f32.gmra.mxu2 %vm787_vm8, %v684_v1  ;;  %v1712_v52 = vpop.permute.xlu0 %1711  ;;  %9621 = vmatmul.msk.f32.gmra.mxu1 %vm787_vm8, %v682_v19  ;;  %v687_v1 = vmul.f32 0.5, %v11483_v14 }
 0x2a0   :  { %9630 = vmatpush.xpose.msk.msra.mxu1 %vm787_vm8, %v1675_v37  ;;  %9634 = vmatpush.xpose.msk.msrb.mxu2 %vm787_vm8, %v1712_v52  ;;  %v17273_v37 = vld [vmem:[#allocation120_spill] sm:$0xff]  ;;  %v17274_v52 = vld [vmem:[#allocation121_spill] sm:$0xff] }
 0x2a3   :  { %2486 = vrot.lane.b32.xlu2 %v17272_v44, %s10952_s14  ;;  %9629 = vmatmul.msk.f32.gmra.mxu3 %vm787_vm8, %v686_v6 }
 0x2a4   :  { %9631 = vmatpush.xpose.msk.msra.mxu1 %vm787_vm8, %v1673_v59  ;;  %9635 = vmatpush.xpose.msk.msrb.mxu2 %vm787_vm8, %v1710_v33  ;;  %v691_v59 = vmul.f32 0.5, %v11570_v30  ;;  %v17275_v33 = vld [vmem:[#allocation113_spill] sm:$0xff]  ;;  %v17278_v30 = vld [vmem:[#allocation122_spill] sm:$0xff] }
 0x2a5   :  { %v1860_v19 = vpop.permute.xlu2 %1859  ;;  %2523 = vrot.lane.b32.xlu1 %v17273_v37, %s10952_s14  ;;  %2560 = vrot.lane.b32.xlu0 %v17274_v52, %s10952_s14 }
 0x2a7   :  { %v1747_v13 = vpop.permute.xlu1 %1746  ;;  %9636 = vmatmul.msk.f32.vlgmr.msrb.gmra.mxu2 %vm787_vm8, %v689_v9  ;;  %v1784_v29 = vpop.permute.xlu0 %1783  ;;  %9632 = vmatmul.msk.f32.vlgmr.msra.gmra.mxu1 %vm787_vm8, %v687_v1  ;;  %v17277_v9 = vld [vmem:[#allocation130_spill] sm:$0xff]  ;;  %v690_v1 = vmul.f32 0.5, %v11526_v10  ;;  %v695_v10 = vmul.f32 0.5, %v11576_v62  ;;  %v17282_v62 = vld [vmem:[#allocation32_spill] sm:$0xff] }
 0x2a8   :  { %9639 = vmatpush.xpose.msk.msra.mxu3 %vm787_vm8, %v1747_v13  ;;  %v688_v13 = vmul.f32 0.5, %v11524_v20 }
 0x2ab   :  { %2525 = vrot.lane.b32.xlu2 %v17275_v33, %s10952_s14  ;;  %9640 = vmatmul.msk.f32.vlgmr.msra.gmra.mxu3 %vm787_vm8, %v691_v59  ;;  %v692_v59 = vmul.f32 0.5, %v11540_v56 }
 0x2ac   :  { %9650 = vmatpush.xpose.msk.msrb.mxu3 %vm787_vm8, %v1860_v19 }
 0x2ad   :  { %v1932_v6 = vpop.permute.xlu2 %1931  ;;  %2562 = vrot.lane.b32.xlu1 %v17276_v7, %s10952_s14  ;;  %2599 = vrot.lane.b32.xlu0 %v17277_v9, %s10952_s14 }
 0x2ae   :  { %v12170_v48 = vpop.f32.mrf.mxu3 }
 0x2af   :  { %v1786_v14 = vpop.permute.xlu1 %1785  ;;  %9637 = vmatmul.msk.f32.gmra.mxu2 %vm787_vm8, %v690_v1  ;;  %v1823_v19 = vpop.permute.xlu0 %1822  ;;  %9633 = vmatmul.msk.f32.gmra.mxu1 %vm787_vm8, %v688_v13  ;;  %v693_v1 = vmul.f32 0.5, %v11572_v58 }
 0x2b0   :  { %9642 = vmatpush.xpose.msk.msrb.mxu1 %vm787_vm8, %v1786_v14  ;;  %9646 = vmatpush.xpose.msk.msra.mxu2 %vm787_vm8, %v1823_v19  ;;  %v17279_v14 = vld [vmem:[#allocation138_spill] sm:$0xff]  ;;  %v17280_v19 = vld [vmem:[#allocation139_spill] sm:$0xff] }
 0x2b3   :  { %2597 = vrot.lane.b32.xlu2 %v17278_v30, %s10952_s14  ;;  %9641 = vmatmul.msk.f32.gmra.mxu3 %vm787_vm8, %v692_v59 }
 0x2b4   :  { %9643 = vmatpush.xpose.msk.msrb.mxu1 %vm787_vm8, %v1784_v29  ;;  %9647 = vmatpush.xpose.msk.msra.mxu2 %vm787_vm8, %v1821_v18  ;;  %v697_v29 = vmul.f32 0.5, %v11642_v63  ;;  %v17281_v18 = vld [vmem:[#allocation131_spill] sm:$0xff]  ;;  %v17284_v63 = vld [vmem:[#allocation22_spill] sm:$0xff] }
 0x2b5   :  { %v1971_v13 = vpop.permute.xlu2 %1970  ;;  %2634 = vrot.lane.b32.xlu1 %v17279_v14, %s10952_s14  ;;  %2671 = vrot.lane.b32.xlu0 %v17280_v19, %s10952_s14 }
 0x2b7   :  { %v1858_v56 = vpop.permute.xlu1 %1857  ;;  %9648 = vmatmul.msk.f32.vlgmr.msra.gmra.mxu2 %vm787_vm8, %v695_v10  ;;  %v1895_v20 = vpop.permute.xlu0 %1894  ;;  %9644 = vmatmul.msk.f32.vlgmr.msrb.gmra.mxu1 %vm787_vm8, %v693_v1  ;;  %v17283_v10 = vld [vmem:[#allocation50_spill] sm:$0xff]  ;;  %v696_v1 = vmul.f32 0.5, %v11608_v61  ;;  %v701_v61 = vmul.f32 0.5, %v17237_v45  ;;  %v17288_v45 = vld [vmem:[#allocation36_spill] sm:$0xff] }
 0x2b8   :  { %9651 = vmatpush.xpose.msk.msrb.mxu3 %vm787_vm8, %v1858_v56  ;;  %v694_v56 = vmul.f32 0.5, %v11606_v55 }
 0x2bb   :  { %2636 = vrot.lane.b32.xlu2 %v17281_v18, %s10952_s14  ;;  %9652 = vmatmul.msk.f32.vlgmr.msrb.gmra.mxu3 %vm787_vm8, %v697_v29  ;;  %v698_v29 = vmul.f32 0.5, %v17235_v3 }
 0x2bc   :  { %9662 = vmatpush.xpose.msk.msra.mxu3 %vm787_vm8, %v1971_v13 }
 0x2bd   :  { %v2043_v59 = vpop.permute.xlu2 %2042  ;;  %2673 = vrot.lane.b32.xlu1 %v17282_v62, %s10952_s14  ;;  %2710 = vrot.lane.b32.xlu0 %v17283_v10, %s10952_s14 }
 0x2bf   :  { %v1897_v58 = vpop.permute.xlu1 %1896  ;;  %9649 = vmatmul.msk.f32.gmra.mxu2 %vm787_vm8, %v696_v1  ;;  %v1934_v13 = vpop.permute.xlu0 %1933  ;;  %9645 = vmatmul.msk.f32.gmra.mxu1 %vm787_vm8, %v694_v56  ;;  %v699_v1 = vmul.f32 0.5, %v11644_v15 }
 0x2c0   :  { %9654 = vmatpush.xpose.msk.msra.mxu1 %vm787_vm8, %v1897_v58  ;;  %9658 = vmatpush.xpose.msk.msrb.mxu2 %vm787_vm8, %v1934_v13  ;;  %v17285_v58 = vld [vmem:[#allocation60_spill] sm:$0xff]  ;;  %v17286_v13 = vld [vmem:[#allocation29_spill] sm:$0xff] }
 0x2c3   :  { %2708 = vrot.lane.b32.xlu2 %v17284_v63, %s10952_s14  ;;  %9653 = vmatmul.msk.f32.gmra.mxu3 %vm787_vm8, %v698_v29  ;;  %v702_v29 = vmul.f32 0.5, %v11680_v11  ;;  %v17292_v11 = vld [vmem:[#allocation61_spill] sm:$0xff] }
 0x2c4   :  { %9655 = vmatpush.xpose.msk.msra.mxu1 %vm787_vm8, %v1895_v20  ;;  %9659 = vmatpush.xpose.msk.msrb.mxu2 %vm787_vm8, %v1932_v6  ;;  %v703_v20 = vmul.f32 0.5, %v11714_v43  ;;  %v17287_v6 = vld [vmem:[#allocation51_spill] sm:$0xff] }
 0x2c5   :  { %v2082_v56 = vpop.permute.xlu2 %2081  ;;  %2745 = vrot.lane.b32.xlu1 %v17285_v58, %s10952_s14  ;;  %2782 = vrot.lane.b32.xlu0 %v17286_v13, %s10952_s14  ;;  %v17290_v43 = vld [vmem:[#allocation27_spill] sm:$0xff] }
 0x2c7   :  { %v1969_v3 = vpop.permute.xlu1 %1968  ;;  %9660 = vmatmul.msk.f32.vlgmr.msrb.gmra.mxu2 %vm787_vm8, %v701_v61  ;;  %v2006_v55 = vpop.permute.xlu0 %2005  ;;  %9656 = vmatmul.msk.f32.vlgmr.msra.gmra.mxu1 %vm787_vm8, %v699_v1  ;;  %v17289_v61 = vld [vmem:[#allocation41_spill] sm:$0xff]  ;;  %v700_v1 = vmul.f32 0.5, %v11678_v12 }
 0x2c8   :  { %9663 = vmatpush.xpose.msk.msra.mxu3 %vm787_vm8, %v1969_v3  ;;  %v12135_v12 = vpop.f32.mrf.mxu2 }
 0x2cb   :  { %2747 = vrot.lane.b32.xlu2 %v17287_v6, %s10952_s14  ;;  %9664 = vmatmul.msk.f32.vlgmr.msra.gmra.mxu3 %vm787_vm8, %v703_v20  ;;  %v704_v20 = vmul.f32 0.5, %v17238_v35  ;;  %v706_v35 = vmul.f32 0.5, %v17239_v47 }
 0x2cd   :  { %v2154_v15 = vpop.permute.xlu2 %2153  ;;  %2784 = vrot.lane.b32.xlu1 %v17288_v45, %s10952_s14  ;;  %2821 = vrot.lane.b32.xlu0 %v17289_v61, %s10952_s14 }
 0x2cf   :  { %v2008_v46 = vpop.permute.xlu1 %2007  ;;  %9661 = vmatmul.msk.f32.gmra.mxu2 %vm787_vm8, %v702_v29  ;;  %v2045_v3 = vpop.permute.xlu0 %2044  ;;  %9657 = vmatmul.msk.f32.gmra.mxu1 %vm787_vm8, %v700_v1  ;;  %v705_v29 = vmul.f32 0.5, %v11716_v4  ;;  %v17294_v4 = vld [vmem:[#allocation73_spill] sm:$0xff] }
 0x2d0   :  { %9666 = vmatpush.xpose.msk.msrb.mxu0 %vm787_vm8, %v2008_v46  ;;  %10103 = vmatpush.xpose.msk.msra.mxu2 %vm787_vm8, %v2008_v46  ;;  %v17291_v46 = vld [vmem:[#allocation52_spill] sm:$0xff]  ;;  %v12159_v31 = vpop.f32.mrf.mxu2 }
 0x2d1   :  { %9670 = vmatpush.xpose.msk.msrb.mxu1 %vm787_vm8, %v2045_v3  ;;  %v707_v3 = vmul.f32 0.5, %v17243_v38 }
 0x2d3   :  { %2819 = vrot.lane.b32.xlu2 %v17290_v43, %s10952_s14  ;;  %9665 = vmatmul.msk.f32.gmra.mxu3 %vm787_vm8, %v704_v20 }
 0x2d4   :  { %9667 = vmatpush.xpose.msk.msrb.mxu0 %vm787_vm8, %v2006_v55  ;;  %10104 = vmatpush.xpose.msk.msra.mxu2 %vm787_vm8, %v2006_v55 }
 0x2d5   :  { %9671 = vmatpush.xpose.msk.msrb.mxu1 %vm787_vm8, %v2043_v59  ;;  %v2193_v1 = vpop.permute.xlu2 %2192  ;;  %2856 = vrot.lane.b32.xlu1 %v17291_v46, %s10952_s14  ;;  %v17293_v59 = vld [vmem:[#allocation39_spill] sm:$0xff] }
 0x2d6   :  { %2893 = vrot.lane.b32.xlu0 %v17292_v11, %s10952_s14 }
 0x2d7   :  { %v2080_v55 = vpop.permute.xlu1 %2079  ;;  %9668 = vmatmul.msk.f32.vlgmr.msrb.gmra.mxu0 %vm787_vm8, %v705_v29  ;;  %v2117_v20 = vpop.permute.xlu0 %2116  ;;  %9669 = vmatmul.msk.f32.vlgmr.msra.gmra.mxu2 %vm787_vm8, %v706_v35  ;;  %v708_v29 = vmul.f32 0.5, %v17240_v2  ;;  %v710_v2 = vmul.f32 0.5, %v17246_v53  ;;  %v17299_v53 = vld [vmem:[#allocation75_spill] sm:$0xff] }
 0x2d8   :  { %9674 = vmatpush.xpose.msk.msrb.mxu2 %vm787_vm8, %v2082_v56  ;;  %9672 = vmatmul.msk.f32.vlgmr.msrb.gmra.mxu1 %vm787_vm8, %v707_v3  ;;  %v709_v56 = vmul.f32 0.5, %v17244_v16  ;;  %v17296_v3 = vld [vmem:[#allocation62_spill] sm:$0xff]  ;;  %v711_v16 = vmul.f32 0.5, %v17245_v40  ;;  %v12148_v40 = vpop.f32.mrf.mxu1 }
 0x2d9   :  { %9686 = vmatpush.xpose.msk.msra.mxu1 %vm787_vm8, %v2193_v1  ;;  %v17295_v1 = vld [vmem:[#allocation74_spill] sm:$0xff] }
 0x2db   :  { %2858 = vrot.lane.b32.xlu2 %v17293_v59, %s10952_s14 }
 0x2dc   :  { %9675 = vmatpush.xpose.msk.msrb.mxu2 %vm787_vm8, %v2080_v55 }
 0x2dd   :  { %v2265_v47 = vpop.permute.xlu2 %2264  ;;  %2895 = vrot.lane.b32.xlu1 %v17294_v4, %s10952_s14 }
 0x2de   :  { %2932 = vrot.lane.b32.xlu0 %v17295_v1, %s10952_s14 }
 0x2df   :  { %v2119_v38 = vpop.permute.xlu1 %2118  ;;  %v2156_v35 = vpop.permute.xlu0 %2155  ;;  %9676 = vmatmul.msk.f32.vlgmr.msrb.gmra.mxu2 %vm787_vm8, %v709_v56  ;;  %v17297_v56 = vld [vmem:[#allocation84_spill] sm:$0xff] }
 0x2e0   :  { %9673 = vmatmul.msk.f32.gmra.mxu1 %vm787_vm8, %v708_v29  ;;  %9678 = vmatpush.xpose.msk.msrb.mxu3 %vm787_vm8, %v2119_v38  ;;  %v17298_v38 = vld [vmem:[#allocation85_spill] sm:$0xff]  ;;  %v713_v29 = vmul.f32 0.5, %v17249_v21  ;;  %v17300_v21 = vld [vmem:[#allocation96_spill] sm:$0xff] }
 0x2e1   :  { %9682 = vmatpush.xpose.msk.msra.mxu0 %vm787_vm8, %v2156_v35 }
 0x2e3   :  { %2930 = vrot.lane.b32.xlu2 %v17296_v3, %s10952_s14 }
 0x2e4   :  { %9679 = vmatpush.xpose.msk.msrb.mxu3 %vm787_vm8, %v2117_v20 }
 0x2e5   :  { %9683 = vmatpush.xpose.msk.msra.mxu0 %vm787_vm8, %v2154_v15  ;;  %v2304_v55 = vpop.permute.xlu2 %2303  ;;  %2967 = vrot.lane.b32.xlu1 %v17297_v56, %s10952_s14  ;;  %v715_v15 = vmul.f32 0.5, %v17250_v5 }
 0x2e6   :  { %3004 = vrot.lane.b32.xlu0 %v17298_v38, %s10952_s14 }
 0x2e7   :  { %v2191_v20 = vpop.permute.xlu1 %2190  ;;  %v2228_v35 = vpop.permute.xlu0 %2227  ;;  %9677 = vmatmul.msk.f32.gmra.mxu2 %vm787_vm8, %v710_v2  ;;  %9680 = vmatmul.msk.f32.vlgmr.msrb.gmra.mxu3 %vm787_vm8, %v711_v16  ;;  %v17301_v2 = vld [vmem:[#allocation97_spill] sm:$0xff]  ;;  %v712_v16 = vmul.f32 0.5, %v17247_v27 }
 0x2e8   :  { %9684 = vmatmul.msk.f32.vlgmr.msra.gmra.mxu0 %vm787_vm8, %v713_v29  ;;  %9687 = vmatpush.xpose.msk.msra.mxu1 %vm787_vm8, %v2191_v20  ;;  %v714_v20 = vmul.f32 0.5, %v17248_v34  ;;  %v12168_v27 = vpop.f32.mrf.mxu1  ;;  %v17304_v34 = vld [vmem:[#allocation106_spill] sm:$0xff] }
 0x2e9   :  { %9698 = vmatpush.xpose.msk.msrb.mxu0 %vm787_vm8, %v2304_v55 }
 0x2eb   :  { %2969 = vrot.lane.b32.xlu2 %v17299_v53, %s10952_s14  ;;  %9688 = vmatmul.msk.f32.vlgmr.msra.gmra.mxu1 %vm787_vm8, %v715_v15  ;;  %v716_v15 = vmul.f32 0.5, %v17253_v23 }
 0x2ed   :  { %v2376_v55 = vpop.permute.xlu2 %2375  ;;  %3006 = vrot.lane.b32.xlu1 %v17300_v21, %s10952_s14 }
 0x2ee   :  { %3043 = vrot.lane.b32.xlu0 %v17301_v2, %s10952_s14 }
 0x2ef   :  { %v2230_v29 = vpop.permute.xlu1 %2229  ;;  %v2267_v5 = vpop.permute.xlu0 %2266  ;;  %9681 = vmatmul.msk.f32.gmra.mxu3 %vm787_vm8, %v712_v16  ;;  %v717_v16 = vmul.f32 0.5, %v17251_v60  ;;  %v718_v60 = vmul.f32 0.5, %v17254_v32 }
 0x2f0   :  { %9690 = vmatpush.xpose.msk.msra.mxu2 %vm787_vm8, %v2230_v29  ;;  %9685 = vmatmul.msk.f32.gmra.mxu0 %vm787_vm8, %v714_v20  ;;  %v17303_v20 = vld [vmem:[#allocation105_spill] sm:$0xff]  ;;  %v12200_v25 = vpop.f32.mrf.mxu1 }
 0x2f1   :  { %9694 = vmatpush.xpose.msk.msra.mxu3 %vm787_vm8, %v2267_v5  ;;  %v719_v5 = vmul.f32 0.5, %v17257_v54  ;;  %v17305_v54 = vld [vmem:[#allocation98_spill] sm:$0xff] }
 0x2f3   :  { %3041 = vrot.lane.b32.xlu2 %v17302_v57, %s10952_s14  ;;  %9689 = vmatmul.msk.f32.gmra.mxu1 %vm787_vm8, %v716_v15 }
 0x2f4   :  { %9691 = vmatpush.xpose.msk.msra.mxu2 %vm787_vm8, %v2228_v35  ;;  %v12186_v35 = vpop.f32.mrf.mxu2 }
 0x2f5   :  { %9695 = vmatpush.xpose.msk.msra.mxu3 %vm787_vm8, %v2265_v47  ;;  %v2415_v29 = vpop.permute.xlu2 %2414  ;;  %3078 = vrot.lane.b32.xlu1 %v17303_v20, %s10952_s14  ;;  %v721_v47 = vmul.f32 0.5, %v17258_v26 }
 0x2f6   :  { %3115 = vrot.lane.b32.xlu0 %v17304_v34, %s10952_s14 }
 0x2f7   :  { %v2302_v23 = vpop.permute.xlu1 %2301  ;;  %9692 = vmatmul.msk.f32.vlgmr.msra.gmra.mxu2 %vm787_vm8, %v717_v16  ;;  %v2339_v15 = vpop.permute.xlu0 %2338 }
 0x2f8   :  { %9696 = vmatmul.msk.f32.vlgmr.msra.gmra.mxu3 %vm787_vm8, %v719_v5  ;;  %9699 = vmatpush.xpose.msk.msrb.mxu0 %vm787_vm8, %v2302_v23  ;;  %v12193_v16 = vpop.f32.mrf.mxu3  ;;  %v17306_v5 = vld [vmem:[#allocation114_spill] sm:$0xff]  ;;  %v17307_v23 = vld [vmem:[#allocation115_spill] sm:$0xff] }
 0x2f9   :  { %9710 = vmatpush.xpose.msk.msrb.mxu3 %vm787_vm8, %v2415_v29 }
 0x2fb   :  { %3080 = vrot.lane.b32.xlu2 %v17305_v54, %s10952_s14  ;;  %9700 = vmatmul.msk.f32.vlgmr.msrb.gmra.mxu0 %vm787_vm8, %v721_v47  ;;  %v722_v47 = vmul.f32 0.5, %v17260_v39  ;;  %v17309_v39 = vld [vmem:[#allocation123_spill] sm:$0xff] }
 0x2fc   :  { %v12209_v32 = vpop.f32.mrf.mxu2 }
 0x2fd   :  { %v2487_v29 = vpop.permute.xlu2 %2486  ;;  %3117 = vrot.lane.b32.xlu1 %v17306_v5, %s10952_s14 }
 0x2fe   :  { %3154 = vrot.lane.b32.xlu0 %v17307_v23, %s10952_s14 }
 0x2ff   :  { %v2341_v26 = vpop.permute.xlu1 %2340  ;;  %9693 = vmatmul.msk.f32.gmra.mxu2 %vm787_vm8, %v718_v60  ;;  %v2378_v51 = vpop.permute.xlu0 %2377  ;;  %v723_v60 = vmul.f32 0.5, %v17259_v17 }
 0x300   :  { %9697 = vmatmul.msk.f32.gmra.mxu3 %vm787_vm8, %v720_v41  ;;  %9702 = vmatpush.xpose.msk.msrb.mxu1 %vm787_vm8, %v2341_v26  ;;  %v725_v26 = vmul.f32 0.5, %v17265_v49  ;;  %v12226_v17 = vpop.f32.mrf.mxu1  ;;  %v17311_v49 = vld [vmem:[#allocation116_spill] sm:$0xff] }
 0x301   :  { %9706 = vmatpush.xpose.msk.msrb.mxu2 %vm787_vm8, %v2378_v51  ;;  %v17310_v51 = vld [vmem:[#allocation124_spill] sm:$0xff] }
 0x303   :  { %3152 = vrot.lane.b32.xlu2 %v17308_v24, %s10952_s14  ;;  %9701 = vmatmul.msk.f32.gmra.mxu0 %vm787_vm8, %v722_v47 }
 0x304   :  { %9703 = vmatpush.xpose.msk.msrb.mxu1 %vm787_vm8, %v2339_v15  ;;  %v12224_v15 = vpop.f32.mrf.mxu3  ;;  %v12233_v5 = vpop.f32.mrf.mxu2 }
 0x305   :  { %9707 = vmatpush.xpose.msk.msrb.mxu2 %vm787_vm8, %v2376_v55  ;;  %v2526_v41 = vpop.permute.xlu2 %2525  ;;  %3189 = vrot.lane.b32.xlu1 %v17309_v39, %s10952_s14  ;;  %v727_v55 = vmul.f32 0.5, %v17266_v28 }
 0x306   :  { %3226 = vrot.lane.b32.xlu0 %v17310_v51, %s10952_s14 }
 0x307   :  { %v2413_v47 = vpop.permute.xlu1 %2412  ;;  %v2450_v23 = vpop.permute.xlu0 %2449  ;;  %9704 = vmatmul.msk.f32.vlgmr.msrb.gmra.mxu1 %vm787_vm8, %v723_v60  ;;  %v726_v60 = vmul.f32 0.5, %v17262_v42 }
 0x308   :  { %9708 = vmatmul.msk.f32.vlgmr.msrb.gmra.mxu2 %vm787_vm8, %v725_v26  ;;  %9711 = vmatpush.xpose.msk.msrb.mxu3 %vm787_vm8, %v2413_v47  ;;  %v17312_v26 = vld [vmem:[#allocation132_spill] sm:$0xff]  ;;  %v17313_v47 = vld [vmem:[#allocation133_spill] sm:$0xff] }
 0x309   :  { %9722 = vmatpush.xpose.msk.msra.mxu2 %vm787_vm8, %v2526_v41  ;;  %v724_v41 = vmul.f32 0.5, %v17261_v8  ;;  %v17314_v8 = vld [vmem:[#allocation125_spill] sm:$0xff] }
 0x30b   :  { %3191 = vrot.lane.b32.xlu2 %v17311_v49, %s10952_s14  ;;  %9712 = vmatmul.msk.f32.vlgmr.msrb.gmra.mxu3 %vm787_vm8, %v727_v55  ;;  %v728_v55 = vmul.f32 0.5, %v17268_v22  ;;  %v17316_v22 = vld [vmem:[#allocation142_spill] sm:$0xff] }
 0x30c   :  { %v12244_v42 = vpop.f32.mrf.mxu3 }
 0x30d   :  { %v2598_v51 = vpop.permute.xlu2 %2597  ;;  %3228 = vrot.lane.b32.xlu1 %v17312_v26, %s10952_s14 }
 0x30e   :  { %3265 = vrot.lane.b32.xlu0 %v17313_v47, %s10952_s14  ;;  %v12249_v47 = vpop.f32.mrf.mxu1 }
 0x30f   :  { %v2452_v28 = vpop.permute.xlu1 %2451  ;;  %v2489_v39 = vpop.permute.xlu0 %2488  ;;  %9705 = vmatmul.msk.f32.gmra.mxu1 %vm787_vm8, %v724_v41  ;;  %v729_v41 = vmul.f32 0.5, %v17267_v36  ;;  %v17317_v36 = vld [vmem:[#allocation134_spill] sm:$0xff] }
 0x310   :  { %9709 = vmatmul.msk.f32.gmra.mxu2 %vm787_vm8, %v726_v60  ;;  %9714 = vmatpush.xpose.msk.msra.mxu0 %vm787_vm8, %v2452_v28  ;;  %v731_v60 = vmul.f32 0.5, %v17272_v44 }
 0x311   :  { %9718 = vmatpush.xpose.msk.msra.mxu1 %vm787_vm8, %v2489_v39  ;;  %v17315_v39 = vld [vmem:[#allocation141_spill] sm:$0xff] }
 0x313   :  { %3263 = vrot.lane.b32.xlu2 %v17314_v8, %s10952_s14  ;;  %9713 = vmatmul.msk.f32.gmra.mxu3 %vm787_vm8, %v728_v55 }
 0x314   :  { %9715 = vmatpush.xpose.msk.msra.mxu0 %vm787_vm8, %v2450_v23  ;;  %v12264_v23 = vpop.f32.mrf.mxu2 }
 0x315   :  { %9719 = vmatpush.xpose.msk.msra.mxu1 %vm787_vm8, %v2487_v29  ;;  %v2637_v28 = vpop.permute.xlu2 %2636  ;;  %3300 = vrot.lane.b32.xlu1 %v17315_v39, %s10952_s14  ;;  %v733_v29 = vmul.f32 0.5, %v17273_v37 }
 0x316   :  { %3337 = vrot.lane.b32.xlu0 %v17316_v22, %s10952_s14  ;;  %v732_v22 = vmul.f32 0.5, %v17270_v50 }
 0x317   :  { %v2524_v55 = vpop.permute.xlu1 %2523  ;;  %9716 = vmatmul.msk.f32.vlgmr.msra.gmra.mxu0 %vm787_vm8, %v729_v41  ;;  %v2561_v26 = vpop.permute.xlu0 %2560 }
 0x318   :  { %9720 = vmatmul.msk.f32.vlgmr.msra.gmra.mxu1 %vm787_vm8, %v731_v60  ;;  %9723 = vmatpush.xpose.msk.msra.mxu2 %vm787_vm8, %v2524_v55  ;;  %v12271_v41 = vpop.f32.mrf.mxu1  ;;  %v17318_v60 = vld [vmem:[#allocation143_spill] sm:$0xff]  ;;  %v17319_v55 = vld [vmem:[#allocation144_spill] sm:$0xff] }
 0x319   :  { %9734 = vmatpush.xpose.msk.msrb.mxu1 %vm787_vm8, %v2637_v28  ;;  %v730_v28 = vmul.f32 0.5, %v17269_v0  ;;  %v12282_v0 = vpop.f32.mrf.mxu3 }
 0x31b   :  { %3302 = vrot.lane.b32.xlu2 %v17317_v36, %s10952_s14  ;;  %9724 = vmatmul.msk.f32.vlgmr.msra.gmra.mxu2 %vm787_vm8, %v733_v29  ;;  %v734_v29 = vmul.f32 0.5, %v17275_v33 }
 0x31c   :  { %v12284_v50 = vpop.f32.mrf.mxu2 }
 0x31d   :  { %v2709_v44 = vpop.permute.xlu2 %2708  ;;  %3339 = vrot.lane.b32.xlu1 %v17318_v60, %s10952_s14  ;;  %v17320_v60 = vld [vmem:[#allocation137_spill] sm:$0xff] }
 0x31e   :  { %3376 = vrot.lane.b32.xlu0 %v17319_v55, %s10952_s14 }
 0x31f   :  { %v2563_v37 = vpop.permute.xlu1 %2562  ;;  %9717 = vmatmul.msk.f32.gmra.mxu0 %vm787_vm8, %v730_v28  ;;  %v2600_v39 = vpop.permute.xlu0 %2599  ;;  %v735_v28 = vmul.f32 0.5, %v17274_v52 }
 0x320   :  { %9721 = vmatmul.msk.f32.gmra.mxu1 %vm787_vm8, %v732_v22  ;;  %9726 = vmatpush.xpose.msk.msra.mxu3 %vm787_vm8, %v2563_v37  ;;  %v737_v37 = vmul.f32 0.5, %v17278_v30 }
 0x321   :  { %9730 = vmatpush.xpose.msk.msrb.mxu0 %vm787_vm8, %v2600_v39  ;;  %v17321_v39 = vld [vmem:[#allocation145_spill] sm:$0xff]  ;;  %v12305_v30 = vpop.f32.mrf.mxu3 }
 0x323   :  { %3374 = vrot.lane.b32.xlu2 %v17320_v60, %s10952_s14  ;;  %9725 = vmatmul.msk.f32.gmra.mxu2 %vm787_vm8, %v734_v29  ;;  %v12300_v29 = vpop.f32.mrf.mxu1 }
 0x324   :  { %9727 = vmatpush.xpose.msk.msra.mxu3 %vm787_vm8, %v2561_v26  ;;  %v739_v26 = vmul.f32 0.5, %v17279_v14 }
 0x325   :  { %9731 = vmatpush.xpose.msk.msrb.mxu0 %vm787_vm8, %v2598_v51  ;;  %v2748_v22 = vpop.permute.xlu2 %2747  ;;  %3411 = vrot.lane.b32.xlu1 %v17321_v39, %s10952_s14  ;;  %v17322_v51 = vld [vmem:[#allocation140_spill] sm:$0xff] }
 0x327   :  { %v2635_v33 = vpop.permute.xlu1 %2634  ;;  %9728 = vmatmul.msk.f32.vlgmr.msra.gmra.mxu3 %vm787_vm8, %v735_v28  ;;  %v2672_v55 = vpop.permute.xlu0 %2671  ;;  %v738_v28 = vmul.f32 0.5, %v17277_v9  ;;  %v741_v9 = vmul.f32 0.5, %v17280_v19 }
 0x328   :  { %9732 = vmatmul.msk.f32.vlgmr.msrb.gmra.mxu0 %vm787_vm8, %v737_v37  ;;  %9735 = vmatpush.xpose.msk.msrb.mxu1 %vm787_vm8, %v2635_v33  ;;  %v740_v37 = vmul.f32 0.5, %v17281_v18 }
 0x329   :  { %9746 = vmatpush.xpose.msk.msra.mxu0 %vm787_vm8, %v2748_v22  ;;  %v736_v22 = vmul.f32 0.5, %v17276_v7 }
 0x32b   :  { %3413 = vrot.lane.b32.xlu2 %v17322_v51, %s10952_s14  ;;  %9736 = vmatmul.msk.f32.vlgmr.msrb.gmra.mxu1 %vm787_vm8, %v739_v26  ;;  %v12314_v26 = vpop.f32.mrf.mxu2  ;;  %v12316_v14 = vpop.f32.mrf.mxu1 }
 0x32d   :  { %v2820_v52 = vpop.permute.xlu2 %2819 }
 0x32f   :  { %v2674_v39 = vpop.permute.xlu1 %2673  ;;  %9729 = vmatmul.msk.f32.gmra.mxu3 %vm787_vm8, %v736_v22  ;;  %v2711_v33 = vpop.permute.xlu0 %2710 }
 0x330   :  { %9733 = vmatmul.msk.f32.gmra.mxu0 %vm787_vm8, %v738_v28  ;;  %9738 = vmatpush.xpose.msk.msrb.mxu2 %vm787_vm8, %v2674_v39  ;;  %v743_v28 = vmul.f32 0.5, %v17284_v63  ;;  %v12323_v39 = vpop.f32.mrf.mxu3 }
 0x331   :  { %9742 = vmatpush.xpose.msk.msrb.mxu3 %vm787_vm8, %v2711_v33 }
 0x333   :  { %9737 = vmatmul.msk.f32.gmra.mxu1 %vm787_vm8, %v740_v37  ;;  %v742_v37 = vmul.f32 0.5, %v17282_v62 }
 0x334   :  { %9739 = vmatpush.xpose.msk.msrb.mxu2 %vm787_vm8, %v2672_v55  ;;  %v745_v55 = vmul.f32 0.5, %v17285_v58  ;;  %v12348_v58 = vpop.f32.mrf.mxu1 }
 0x335   :  { %9743 = vmatpush.xpose.msk.msrb.mxu3 %vm787_vm8, %v2709_v44  ;;  %v2859_v22 = vpop.permute.xlu2 %2858  ;;  %v12331_v44 = vpop.f32.mrf.mxu2 }
 0x337   :  { %v2746_v33 = vpop.permute.xlu1 %2745  ;;  %9740 = vmatmul.msk.f32.vlgmr.msrb.gmra.mxu2 %vm787_vm8, %v741_v9  ;;  %v2783_v18 = vpop.permute.xlu0 %2782 }
 0x338   :  { %9744 = vmatmul.msk.f32.vlgmr.msrb.gmra.mxu3 %vm787_vm8, %v743_v28  ;;  %9747 = vmatpush.xpose.msk.msra.mxu0 %vm787_vm8, %v2746_v33  ;;  %v12341_v28 = vld [vmem:[%s16688_s5] sm:$0xff]  ;;  %v12343_v33 = vpop.f32.mrf.mxu3 }
 0x339   :  { %9758 = vmatpush.xpose.msk.msra.mxu3 %vm787_vm8, %v2859_v22  ;;  %v744_v22 = vmul.f32 0.5, %v17283_v10  ;;  %v747_v10 = vmul.f32 0.5, %v17286_v13  ;;  %v12378_v13 = vadd.f32 %v12341_v28, %v12170_v48 }
 0x33b   :  { %9748 = vmatmul.msk.f32.vlgmr.msra.gmra.mxu0 %vm787_vm8, %v745_v55  ;;  %v746_v55 = vmul.f32 0.5, %v17287_v6  ;;  %v3614_v62 = vsel %vm3600_vm9, %v12378_v13, -inf }
 0x33d   :  { %v12334_v63 = vpop.permute.xlu2 %2930  ;;  %v12360_v6 = vpop.f32.mrf.mxu2 }
 0x33f   :  { %v2785_v19 = vpop.permute.xlu1 %2784  ;;  %9741 = vmatmul.msk.f32.gmra.mxu2 %vm787_vm8, %v742_v37  ;;  %v2822_v9 = vpop.permute.xlu0 %2821  ;;  %v12353_v37 = vadd.f32 %v12341_v28, %v12148_v40 }
 0x340   :  { %9745 = vmatmul.msk.f32.gmra.mxu3 %vm787_vm8, %v744_v22  ;;  %9750 = vmatpush.xpose.msk.msra.mxu1 %vm787_vm8, %v2785_v19  ;;  %v749_v22 = vmul.f32 0.5, %v17290_v43 }
 0x341   :  { %9754 = vmatpush.xpose.msk.msra.mxu2 %vm787_vm8, %v2822_v9  ;;  %v3601_v40 = vsel %vm3600_vm9, %v12353_v37, -inf }
 0x343   :  { %9749 = vmatmul.msk.f32.gmra.mxu0 %vm787_vm8, %v746_v55  ;;  %v751_v55 = vmul.f32 0.5, %v17291_v46  ;;  %v12393_v46 = vadd.f32 %v12341_v28, %v12135_v12  ;;  %v752_v12 = vmul.f32 0.5, %v17293_v59  ;;  %v17334_v59 = vld [vmem:[#allocation133_spill] sm:$0xff] }
 0x344   :  { %9751 = vmatpush.xpose.msk.msra.mxu1 %vm787_vm8, %v2783_v18 }
 0x345   :  { %9755 = vmatpush.xpose.msk.msra.mxu2 %vm787_vm8, %v2820_v52  ;;  %v2970_v19 = vpop.permute.xlu2 %2969  ;;  %v12370_v52 = vld [vmem:[%s16688_s5 + $0x8] sm:$0x1] }
 0x347   :  { %v2857_v9 = vpop.permute.xlu1 %2856  ;;  %9752 = vmatmul.msk.f32.vlgmr.msra.gmra.mxu1 %vm787_vm8, %v747_v10  ;;  %v12380_v10 = vpop.f32.mrf.mxu1 }
 0x348   :  { %9756 = vmatmul.msk.f32.vlgmr.msra.gmra.mxu2 %vm787_vm8, %v749_v22  ;;  %v2894_v18 = vpop.permute.xlu0 %2893  ;;  %3602 = vmax.xlane.f32.xlu0 %v3601_v40  ;;  %v12384_v22 = vadd.f32 %v12370_v52, %v12168_v27  ;;  %v748_v40 = vmul.f32 0.5, %v17288_v45  ;;  %v12398_v27 = vpop.f32.mrf.mxu2 }
 0x349   :  { %9770 = vmatpush.xpose.msk.msrb.mxu2 %vm787_vm8, %v2970_v19  ;;  %9759 = vmatpush.xpose.msk.msra.mxu3 %vm787_vm8, %v2857_v9  ;;  %v12374_v19 = vpop.f32.mrf.mxu3  ;;  %v750_v9 = vmul.f32 0.5, %v17289_v61  ;;  %v12408_v61 = vadd.f32 %v12370_v52, %v12226_v17  ;;  %v753_v17 = vmul.f32 0.5, %v17292_v11 }
 0x34a   :  { %v3605_v45 = vsel %vm3604_vm10, %v12384_v22, -inf }
 0x34c   :  { %9760 = vmatmul.msk.f32.vlgmr.msra.gmra.mxu3 %vm787_vm8, %v751_v55 }
 0x34d   :  { %v12388_v43 = vpop.permute.xlu2 %3041 }
 0x34f   :  { %v2896_v48 = vpop.permute.xlu1 %2895  ;;  %9753 = vmatmul.msk.f32.gmra.mxu1 %vm787_vm8, %v748_v40  ;;  %3606 = vmax.xlane.f32.xlu1 %v3605_v45  ;;  %v3608_v40 = vsel %vm3600_vm9, %v12393_v46, -inf  ;;  %v12419_v45 = vpop.f32.mrf.mxu1 }
 0x350   :  { %9757 = vmatmul.msk.f32.gmra.mxu2 %vm787_vm8, %v750_v9  ;;  %v2933_v55 = vpop.permute.xlu0 %2932  ;;  %3615 = vmax.xlane.f32.xlu0 %v3614_v62  ;;  %v12414_v62 = vadd.f32 %v12370_v52, %v12193_v16  ;;  %v12428_v16 = vadd.f32 %v12370_v52, %v12159_v31  ;;  %v757_v31 = vmul.f32 0.5, %v17297_v56 }
 0x351   :  { %9762 = vmatpush.xpose.msk.msrb.mxu0 %vm787_vm8, %v2896_v48  ;;  %9766 = vmatpush.xpose.msk.msrb.mxu1 %vm787_vm8, %v2933_v55  ;;  %v12416_v9 = vpop.f32.mrf.mxu3  ;;  %v755_v55 = vmul.f32 0.5, %v17296_v3  ;;  %v12449_v3 = vadd.f32 %v12341_v28, %v12186_v35 }
 0x352   :  { %v3617_v11 = vsel %vm3604_vm10, %v12414_v62, -inf }
 0x354   :  { %9761 = vmatmul.msk.f32.gmra.mxu3 %vm787_vm8, %v752_v12  ;;  %3609 = vmax.xlane.f32.xlu2 %v3608_v40  ;;  %v3623_v12 = vsel %vm3604_vm10, %v12408_v61, -inf }
 0x355   :  { %9763 = vmatpush.xpose.msk.msrb.mxu0 %vm787_vm8, %v2894_v18  ;;  %v3081_v48 = vpop.permute.xlu2 %3080  ;;  %9767 = vmatpush.xpose.msk.msrb.mxu1 %vm787_vm8, %v12334_v63  ;;  %v12441_v63 = vadd.f32 %v12341_v28, %v12224_v15  ;;  %v12458_v15 = vadd.f32 %v12341_v28, %v12200_v25  ;;  %v758_v25 = vmul.f32 0.5, %v17299_v53 }
 0x357   :  { %v2968_v40 = vpop.permute.xlu1 %2967  ;;  %3618 = vmax.xlane.f32.xlu1 %v3617_v11  ;;  %v3632_v56 = vsel %vm3600_vm9, %v12441_v63, -inf }
 0x358   :  { %9764 = vmatmul.msk.f32.vlgmr.msrb.gmra.mxu0 %vm787_vm8, %v753_v17  ;;  %v3005_v18 = vpop.permute.xlu0 %3004  ;;  %3624 = vmax.xlane.f32.xlu0 %v3623_v12  ;;  %v3611_v17 = vsel %vm3604_vm10, %v12428_v16, -inf  ;;  %v756_v12 = vmul.f32 0.5, %v17295_v1  ;;  %v12475_v1 = vadd.f32 %v12370_v52, %v12271_v41  ;;  %v759_v41 = vmul.f32 0.5, %v17298_v38 }
 0x359   :  { %9782 = vmatpush.xpose.msk.msra.mxu1 %vm787_vm8, %v3081_v48  ;;  %9771 = vmatpush.xpose.msk.msrb.mxu2 %vm787_vm8, %v2968_v40  ;;  %v12443_v48 = vpop.f32.mrf.mxu2  ;;  %v12460_v40 = vpop.f32.mrf.mxu1 }
 0x35a   :  { %9768 = vmatmul.msk.f32.vlgmr.msrb.gmra.mxu1 %vm787_vm8, %v755_v55  ;;  %v754_v55 = vmul.f32 0.5, %v17294_v4  ;;  %v12467_v4 = vpop.f32.mrf.mxu3 }
 0x35c   :  { %3612 = vmax.xlane.f32.xlu2 %v3611_v17  ;;  %9772 = vmatmul.msk.f32.vlgmr.msrb.gmra.mxu2 %vm787_vm8, %v757_v31  ;;  %v3626_v31 = vsel %vm3600_vm9, %v12449_v3, -inf }
 0x35d   :  { %v12452_v11 = vpop.permute.xlu2 %3152 }
 0x35f   :  { %v3007_v35 = vpop.permute.xlu1 %3006  ;;  %3627 = vmax.xlane.f32.xlu1 %v3626_v31 }
 0x360   :  { %9765 = vmatmul.msk.f32.gmra.mxu0 %vm787_vm8, %v754_v55  ;;  %v3044_v17 = vpop.permute.xlu0 %3043  ;;  %3633 = vmax.xlane.f32.xlu0 %v3632_v56  ;;  %v3620_v55 = vsel %vm3600_vm9, %v12458_v15, -inf  ;;  %v12481_v56 = vadd.f32 %v12370_v52, %v12244_v42  ;;  %v3641_v42 = vsel %vm3604_vm10, %v12475_v1, -inf }
 0x361   :  { %9774 = vmatpush.xpose.msk.msrb.mxu3 %vm787_vm8, %v3007_v35  ;;  %9778 = vmatpush.xpose.msk.msra.mxu0 %vm787_vm8, %v3044_v17  ;;  %v12483_v31 = vpop.f32.mrf.mxu2  ;;  %v761_v35 = vmul.f32 0.5, %v17302_v57  ;;  %v12493_v17 = vadd.f32 %v12370_v52, %v12209_v32  ;;  %v763_v32 = vmul.f32 0.5, %v17303_v20 }
 0x362   :  { %9769 = vmatmul.msk.f32.gmra.mxu1 %vm787_vm8, %v756_v12  ;;  %v12510_v57 = vpop.f32.mrf.mxu3 }
 0x364   :  { %3621 = vmax.xlane.f32.xlu2 %v3620_v55  ;;  %9773 = vmatmul.msk.f32.gmra.mxu2 %vm787_vm8, %v758_v25 }
 0x365   :  { %v3192_v12 = vpop.permute.xlu2 %3191  ;;  %9775 = vmatpush.xpose.msk.msrb.mxu3 %vm787_vm8, %v3005_v18  ;;  %9779 = vmatpush.xpose.msk.msra.mxu0 %vm787_vm8, %v12388_v43  ;;  %v3635_v43 = vsel %vm3604_vm10, %v12481_v56, -inf  ;;  %v12502_v18 = vpop.f32.mrf.mxu1 }
 0x367   :  { %v3079_v25 = vpop.permute.xlu1 %3078  ;;  %3636 = vmax.xlane.f32.xlu1 %v3635_v43  ;;  %v762_v43 = vmul.f32 0.5, %v17301_v2  ;;  %v12539_v2 = vadd.f32 %v12370_v52, %v12316_v14  ;;  %v765_v14 = vmul.f32 0.5, %v17304_v34 }
 0x368   :  { %v3116_v55 = vpop.permute.xlu0 %3115  ;;  %3642 = vmax.xlane.f32.xlu0 %v3641_v42  ;;  %9776 = vmatmul.msk.f32.vlgmr.msrb.gmra.mxu3 %vm787_vm8, %v759_v41  ;;  %v3629_v41 = vsel %vm3604_vm10, %v12493_v17, -inf }
 0x369   :  { %9794 = vmatpush.xpose.msk.msrb.mxu0 %vm787_vm8, %v3192_v12  ;;  %9783 = vmatpush.xpose.msk.msra.mxu1 %vm787_vm8, %v3079_v25  ;;  %v12508_v12 = vadd.f32 %v12341_v28, %v12282_v0  ;;  %v760_v25 = vmul.f32 0.5, %v17300_v21  ;;  %v12525_v0 = vadd.f32 %v12341_v28, %v12249_v47  ;;  %v764_v47 = vmul.f32 0.5, %v17305_v54  ;;  %v17325_v21 = vld [vmem:[#allocation115_spill] sm:$0xff] }
 0x36a   :  { %9780 = vmatmul.msk.f32.vlgmr.msra.gmra.mxu0 %vm787_vm8, %v761_v35  ;;  %v12516_v35 = vadd.f32 %v12341_v28, %v12233_v5  ;;  %v12529_v5 = vpop.f32.mrf.mxu2 }
 0x36b   :  { %v3650_v20 = vsel %vm3600_vm9, %v12508_v12, -inf }
 0x36c   :  { %3630 = vmax.xlane.f32.xlu2 %v3629_v41  ;;  %9784 = vmatmul.msk.f32.vlgmr.msra.gmra.mxu1 %vm787_vm8, %v763_v32  ;;  %v3644_v32 = vsel %vm3600_vm9, %v12516_v35, -inf }
 0x36d   :  { %v12519_v42 = vpop.permute.xlu2 %3263 }
 0x36f   :  { %v3118_v41 = vpop.permute.xlu1 %3117  ;;  %3645 = vmax.xlane.f32.xlu1 %v3644_v32  ;;  %v12550_v32 = vpop.f32.mrf.mxu3 }
 0x370   :  { %v3155_v38 = vpop.permute.xlu0 %3154  ;;  %3651 = vmax.xlane.f32.xlu0 %v3650_v20  ;;  %9777 = vmatmul.msk.f32.gmra.mxu3 %vm787_vm8, %v760_v25  ;;  %v3638_v20 = vsel %vm3600_vm9, %v12525_v0, -inf  ;;  %v12544_v25 = vpop.f32.mrf.mxu1 }
 0x371   :  { %9786 = vmatpush.xpose.msk.msra.mxu2 %vm787_vm8, %v3118_v41  ;;  %9790 = vmatpush.xpose.msk.msra.mxu3 %vm787_vm8, %v3155_v38  ;;  %v12557_v38 = vadd.f32 %v12370_v52, %v12264_v23  ;;  %v17323_v23 = vld [vmem:[#allocation123_spill] sm:$0xff] }
 0x372   :  { %9781 = vmatmul.msk.f32.gmra.mxu0 %vm787_vm8, %v762_v43  ;;  %v12548_v43 = vadd.f32 %v12370_v52, %v12305_v30  ;;  %v3659_v30 = vsel %vm3604_vm10, %v12539_v2, -inf  ;;  %v769_v34 = vmul.f32 0.5, %v17323_v23 }
 0x374   :  { %3639 = vmax.xlane.f32.xlu2 %v3638_v20  ;;  %9785 = vmatmul.msk.f32.gmra.mxu1 %vm787_vm8, %v764_v47  ;;  %v767_v20 = vmul.f32 0.5, %v17308_v24 }
 0x375   :  { %v3303_v41 = vpop.permute.xlu2 %3302  ;;  %9787 = vmatpush.xpose.msk.msra.mxu2 %vm787_vm8, %v3116_v55  ;;  %9791 = vmatpush.xpose.msk.msra.mxu3 %vm787_vm8, %v12452_v11  ;;  %v3653_v55 = vsel %vm3604_vm10, %v12548_v43, -inf  ;;  %v12573_v11 = vadd.f32 %v12341_v28, %v12323_v39  ;;  %v12589_v39 = vadd.f32 %v12341_v28, %v12300_v29  ;;  %v770_v29 = vmul.f32 0.5, %v17311_v49 }
 0x377   :  { %v3190_v47 = vpop.permute.xlu1 %3189  ;;  %3654 = vmax.xlane.f32.xlu1 %v3653_v55  ;;  %v12591_v23 = vpop.f32.mrf.mxu3  ;;  %v3668_v24 = vsel %vm3600_vm9, %v12573_v11, -inf }
 0x378   :  { %v3227_v54 = vpop.permute.xlu0 %3226  ;;  %3660 = vmax.xlane.f32.xlu0 %v3659_v30  ;;  %9788 = vmatmul.msk.f32.vlgmr.msra.gmra.mxu2 %vm787_vm8, %v765_v14  ;;  %v3647_v30 = vsel %vm3604_vm10, %v12557_v38, -inf  ;;  %v12582_v14 = vadd.f32 %v12341_v28, %v12284_v50 }
 0x379   :  { %9806 = vmatpush.xpose.msk.msrb.mxu3 %vm787_vm8, %v3303_v41  ;;  %9795 = vmatpush.xpose.msk.msrb.mxu0 %vm787_vm8, %v3190_v47  ;;  %v12575_v41 = vpop.f32.mrf.mxu2 }
 0x37a   :  { %9792 = vmatmul.msk.f32.vlgmr.msra.gmra.mxu3 %vm787_vm8, %v767_v20  ;;  %v17324_v20 = vld [vmem:[#allocation114_spill] sm:$0xff]  ;;  %v3662_v50 = vsel %vm3600_vm9, %v12582_v14, -inf }
 0x37b   :  { %v766_v55 = vmul.f32 0.5, %v17324_v20  ;;  %v12604_v20 = vadd.f32 %v12370_v52, %v12380_v10 }
 0x37c   :  { %9796 = vmatmul.msk.f32.vlgmr.msrb.gmra.mxu0 %vm787_vm8, %v769_v34  ;;  %3648 = vmax.xlane.f32.xlu2 %v3647_v30  ;;  %v768_v34 = vmul.f32 0.5, %v17325_v21 }
 0x37d   :  { %v12584_v47 = vpop.permute.xlu2 %3374 }
 0x37f   :  { %v3229_v30 = vpop.permute.xlu1 %3228  ;;  %3663 = vmax.xlane.f32.xlu1 %v3662_v50  ;;  %v17327_v50 = vld [vmem:[#allocation124_spill] sm:$0xff] }
 0x380   :  { %v3266_v53 = vpop.permute.xlu0 %3265  ;;  %3669 = vmax.xlane.f32.xlu0 %v3668_v24  ;;  %9789 = vmatmul.msk.f32.gmra.mxu2 %vm787_vm8, %v766_v55  ;;  %v3656_v24 = vsel %vm3600_vm9, %v12589_v39, -inf  ;;  %v12609_v55 = vpop.f32.mrf.mxu1  ;;  %v771_v49 = vmul.f32 0.5, %v17327_v50 }
 0x381   :  { %9798 = vmatpush.xpose.msk.msrb.mxu1 %vm787_vm8, %v3229_v30  ;;  %9802 = vmatpush.xpose.msk.msrb.mxu2 %vm787_vm8, %v3266_v53  ;;  %v12614_v30 = vadd.f32 %v12370_v52, %v12343_v33  ;;  %v12622_v53 = vadd.f32 %v12370_v52, %v12314_v26  ;;  %v773_v33 = vmul.f32 0.5, %v17314_v8  ;;  %v17329_v26 = vld [vmem:[#allocation141_spill] sm:$0xff] }
 0x382   :  { %9793 = vmatmul.msk.f32.gmra.mxu3 %vm787_vm8, %v768_v34  ;;  %v12616_v34 = vpop.f32.mrf.mxu2  ;;  %v775_v50 = vmul.f32 0.5, %v17329_v26  ;;  %v17332_v26 = vld [vmem:[#allocation132_spill] sm:$0xff] }
 0x383   :  { %17326 = vst [vmem:[#allocation146_spill] sm:$0xff] %v12614_v30  ;;  %v772_v8 = vmul.f32 0.5, %v17332_v26  ;;  %v12669_v26 = vadd.f32 %v12370_v52, %v12460_v40  ;;  %v12685_v40 = vadd.f32 %v12370_v52, %v12360_v6  ;;  %v17339_v6 = vld [vmem:[#allocation145_spill] sm:$0xff] }
 0x384   :  { %9797 = vmatmul.msk.f32.gmra.mxu0 %vm787_vm8, %v770_v29  ;;  %3657 = vmax.xlane.f32.xlu2 %v3656_v24  ;;  %17328 = vst [vmem:[#allocation147_spill] sm:$0xff] %v12622_v53  ;;  %v3677_v29 = vsel %vm3604_vm10, %v12604_v20, -inf }
 0x385   :  { %9799 = vmatpush.xpose.msk.msrb.mxu1 %vm787_vm8, %v3227_v54  ;;  %v3414_v10 = vpop.permute.xlu2 %3413  ;;  %9803 = vmatpush.xpose.msk.msrb.mxu2 %vm787_vm8, %v12519_v42  ;;  %v3671_v54 = vsel %vm3604_vm10, %v12614_v30, -inf  ;;  %v12635_v42 = vpop.f32.mrf.mxu3  ;;  %17335 = vst [vmem:[#allocation151_spill] sm:$0xff] %v12669_v26 }
 0x386   :  { %17338 = vst [vmem:[#allocation153_spill] sm:$0xff] %v12685_v40 }
 0x387   :  { %v3301_v24 = vpop.permute.xlu1 %3300  ;;  %3672 = vmax.xlane.f32.xlu1 %v3671_v54 }
 0x388   :  { %v3338_v21 = vpop.permute.xlu0 %3337  ;;  %3678 = vmax.xlane.f32.xlu0 %v3677_v29  ;;  %9800 = vmatmul.msk.f32.vlgmr.msrb.gmra.mxu1 %vm787_vm8, %v771_v49  ;;  %v3665_v29 = vsel %vm3604_vm10, %v12622_v53, -inf  ;;  %v12647_v49 = vadd.f32 %v12341_v28, %v12331_v44 }
 0x389   :  { %9818 = vmatpush.xpose.msk.msra.mxu2 %vm787_vm8, %v3414_v10  ;;  %9807 = vmatpush.xpose.msk.msrb.mxu3 %vm787_vm8, %v3301_v24  ;;  %v12640_v10 = vadd.f32 %v12341_v28, %v12374_v19  ;;  %v12649_v24 = vpop.f32.mrf.mxu1 }
 0x38a   :  { %9804 = vmatmul.msk.f32.vlgmr.msrb.gmra.mxu2 %vm787_vm8, %v773_v33  ;;  %17331 = vst [vmem:[#allocation149_spill] sm:$0xff] %v12647_v49  ;;  %v12654_v33 = vadd.f32 %v12341_v28, %v12348_v58  ;;  %v12656_v19 = vpop.f32.mrf.mxu2  ;;  %v3680_v44 = vsel %vm3600_vm9, %v12647_v49, -inf  ;;  %v776_v58 = vmul.f32 0.5, %v17317_v36 }
 0x38b   :  { %17330 = vst [vmem:[#allocation148_spill] sm:$0xff] %v12640_v10  ;;  %v3686_v54 = vsel %vm3600_vm9, %v12640_v10, -inf }
 0x38c   :  { %9808 = vmatmul.msk.f32.vlgmr.msrb.gmra.mxu3 %vm787_vm8, %v775_v50  ;;  %3666 = vmax.xlane.f32.xlu2 %v3665_v29  ;;  %17333 = vst [vmem:[#allocation150_spill] sm:$0xff] %v12654_v33  ;;  %v774_v50 = vmul.f32 0.5, %v17334_v59 }
 0x38d   :  { %v12674_v59 = vpop.f32.mrf.mxu3 }
 0x38f   :  { %v3340_v29 = vpop.permute.xlu1 %3339  ;;  %3681 = vmax.xlane.f32.xlu1 %v3680_v44  ;;  %v779_v44 = vmul.f32 0.5, %v17320_v60 }
 0x390   :  { %v3377_v7 = vpop.permute.xlu0 %3376  ;;  %3687 = vmax.xlane.f32.xlu0 %v3686_v54  ;;  %9801 = vmatmul.msk.f32.gmra.mxu1 %vm787_vm8, %v772_v8  ;;  %v3674_v54 = vsel %vm3600_vm9, %v12654_v33, -inf  ;;  %v12679_v8 = vadd.f32 %v12370_v52, %v12416_v9 }
 0x391   :  { %9810 = vmatpush.xpose.msk.msra.mxu0 %vm787_vm8, %v3340_v29  ;;  %9814 = vmatpush.xpose.msk.msra.mxu1 %vm787_vm8, %v3377_v7  ;;  %v3695_v7 = vsel %vm3604_vm10, %v12669_v26, -inf  ;;  %v2036_v26 = vpop.f32.mrf.mxu0 }
 0x392   :  { %9805 = vmatmul.msk.f32.gmra.mxu2 %vm787_vm8, %v774_v50  ;;  %17336 = vst [vmem:[#allocation152_spill] sm:$0xff] %v12679_v8  ;;  %v17337_v50 = vld [vmem:[#allocation142_spill] sm:$0xff] }
 0x393   :  { %v777_v29 = vmul.f32 0.5, %v17337_v50  ;;  %v12699_v50 = vpop.f32.mrf.mxu2 }
 0x394   :  { %9809 = vmatmul.msk.f32.gmra.mxu3 %vm787_vm8, %v776_v58  ;;  %3675 = vmax.xlane.f32.xlu2 %v3674_v54  ;;  %v12692_v58 = vpop.f32.mrf.mxu1  ;;  %v781_v54 = vmul.f32 0.5, %v17339_v6 }
 0x395   :  { %9811 = vmatpush.xpose.msk.msra.mxu0 %vm787_vm8, %v3338_v21  ;;  %9815 = vmatpush.xpose.msk.msra.mxu1 %vm787_vm8, %v12584_v47  ;;  %v3689_v21 = vsel %vm3604_vm10, %v12679_v8, -inf  ;;  %v12704_v47 = vadd.f32 %v12341_v28, %v12467_v4 }
 0x397   :  { %v3412_v9 = vpop.permute.xlu1 %3411  ;;  %3690 = vmax.xlane.f32.xlu1 %v3689_v21  ;;  %17340 = vst [vmem:[#allocation154_spill] sm:$0xff] %v12704_v47  ;;  %v12716_v21 = vadd.f32 %v12341_v28, %v12419_v45  ;;  %v3704_v4 = vsel %vm3600_vm9, %v12704_v47, -inf }
 0x398   :  { %9812 = vmatmul.msk.f32.vlgmr.msra.gmra.mxu0 %vm787_vm8, %v777_v29  ;;  %3696 = vmax.xlane.f32.xlu0 %v3695_v7  ;;  %v3683_v29 = vsel %vm3604_vm10, %v12685_v40, -inf  ;;  %v12711_v7 = vadd.f32 %v12341_v28, %v12398_v27 }
 0x399   :  { %9819 = vmatpush.xpose.msk.msra.mxu2 %vm787_vm8, %v3412_v9  ;;  %9816 = vmatmul.msk.f32.vlgmr.msra.gmra.mxu1 %vm787_vm8, %v779_v44  ;;  %v17342_v9 = vld [vmem:[#allocation143_spill] sm:$0xff]  ;;  %17343 = vst [vmem:[#allocation156_spill] sm:$0xff] %v12716_v21  ;;  %v17344_v44 = vld [vmem:[#allocation144_spill] sm:$0xff] }
 0x39a   :  { %17341 = vst [vmem:[#allocation155_spill] sm:$0xff] %v12711_v7  ;;  %v778_v6 = vmul.f32 0.5, %v17342_v9  ;;  %v780_v60 = vmul.f32 0.5, %v17344_v44  ;;  %v3698_v27 = vsel %vm3600_vm9, %v12711_v7, -inf  ;;  %v3692_v44 = vsel %vm3600_vm9, %v12716_v21, -inf }
 0x39b   :  { %v12737_v9 = vpop.f32.mrf.mxu2 }
 0x39c   :  { %9820 = vmatmul.msk.f32.vlgmr.msra.gmra.mxu2 %vm787_vm8, %v781_v54  ;;  %3684 = vmax.xlane.f32.xlu2 %v3683_v29  ;;  %v12724_v54 = vld [vmem:[%s16688_s5 + $0x18] sm:$0x1]  ;;  %v782_v29 = vmul.f32 0.5, %v17322_v51  ;;  %v1706_v28 = vpop.f32.mrf.mxu1 }
 0x39d   :  { %v12733_v45 = vadd.f32 %v12724_v54, %v12544_v25  ;;  %v12814_v36 = vadd.f32 %v12724_v54, %v1706_v28 }
 0x39f   :  { %3699 = vmax.xlane.f32.xlu1 %v3698_v27  ;;  %17345 = vst [vmem:[#allocation157_spill] sm:$0xff] %v12733_v45  ;;  %v12755_v27 = vld [vmem:[%s16688_s5 + $0x10] sm:$0xff]  ;;  %v3749_v28 = vsel %vm3604_vm10, %v12814_v36, -inf }
 0x3a0   :  { %9813 = vmatmul.msk.f32.gmra.mxu0 %vm787_vm8, %v778_v6  ;;  %3705 = vmax.xlane.f32.xlu0 %v3704_v4  ;;  %v12742_v6 = vadd.f32 %v12370_v52, %v12510_v57  ;;  %v12746_v4 = vadd.f32 %v12370_v52, %v12443_v48  ;;  %v12759_v57 = vadd.f32 %v12755_v27, %v12550_v32 }
 0x3a1   :  { %9817 = vmatmul.msk.f32.gmra.mxu1 %vm787_vm8, %v780_v60  ;;  %v3713_v60 = vsel %vm3604_vm10, %v12733_v45, -inf  ;;  %v12765_v48 = vadd.f32 %v12755_v27, %v12483_v31  ;;  %17357 = vst [vmem:[#allocation169_spill] sm:$0xff] %v12814_v36 }
 0x3a2   :  { %17346 = vst [vmem:[#allocation158_spill] sm:$0xff] %v12742_v6  ;;  %v3707_v25 = vsel %vm3604_vm10, %v12742_v6, -inf  ;;  %v3701_v52 = vsel %vm3604_vm10, %v12746_v4, -inf }
 0x3a3   :  { %17347 = vst [vmem:[#allocation159_spill] sm:$0xff] %v12746_v4  ;;  %v3716_v32 = vsel %vm3600_vm9, %v12765_v48, -inf  ;;  %v12890_v4 = vadd.f32 %v12755_v27, %v12737_v9 }
 0x3a4   :  { %9821 = vmatmul.msk.f32.gmra.mxu2 %vm787_vm8, %v782_v29  ;;  %3693 = vmax.xlane.f32.xlu2 %v3692_v44  ;;  %17348 = vst [vmem:[#allocation160_spill] sm:$0xff] %v12759_v57  ;;  %v12769_v44 = vadd.f32 %v12755_v27, %v12502_v18  ;;  %v3722_v29 = vsel %vm3600_vm9, %v12759_v57, -inf  ;;  %v12783_v18 = vadd.f32 %v12724_v54, %v12591_v23 }
 0x3a5   :  { %17349 = vst [vmem:[#allocation161_spill] sm:$0xff] %v12765_v48 }
 0x3a6   :  { %17350 = vst [vmem:[#allocation162_spill] sm:$0xff] %v12769_v44  ;;  %v3710_v31 = vsel %vm3600_vm9, %v12769_v44, -inf }
 0x3a7   :  { %3708 = vmax.xlane.f32.xlu1 %v3707_v25  ;;  %17352 = vst [vmem:[#allocation164_spill] sm:$0xff] %v12783_v18  ;;  %v12787_v25 = vadd.f32 %v12724_v54, %v12529_v5  ;;  %v12803_v5 = vadd.f32 %v12755_v27, %v12575_v41 }
 0x3a8   :  { %3714 = vmax.xlane.f32.xlu0 %v3713_v60  ;;  %v12777_v60 = vadd.f32 %v12724_v54, %v12649_v24  ;;  %v3725_v24 = vsel %vm3604_vm10, %v12783_v18, -inf  ;;  %v1854_v18 = vpop.f32.mrf.mxu2  ;;  %17367 = vst [vmem:[#allocation179_spill] sm:$0xff] %v12890_v4 }
 0x3a9   :  { %17353 = vst [vmem:[#allocation165_spill] sm:$0xff] %v12787_v25  ;;  %v3719_v23 = vsel %vm3604_vm10, %v12787_v25, -inf  ;;  %v3734_v51 = vsel %vm3600_vm9, %v12803_v5, -inf }
 0x3aa   :  { %17351 = vst [vmem:[#allocation163_spill] sm:$0xff] %v12777_v60 }
 0x3ab   :  { %17355 = vst [vmem:[#allocation167_spill] sm:$0xff] %v12803_v5  ;;  %v12828_v5 = vadd.f32 %v12724_v54, %v12616_v34 }
 0x3ac   :  { %3702 = vmax.xlane.f32.xlu2 %v3701_v52  ;;  %v3731_v52 = vsel %vm3604_vm10, %v12777_v60, -inf }
 0x3ad   :  { %17359 = vst [vmem:[#allocation171_spill] sm:$0xff] %v12828_v5  ;;  %v3737_v34 = vsel %vm3604_vm10, %v12828_v5, -inf }
 0x3af   :  { %3717 = vmax.xlane.f32.xlu1 %v3716_v32 }
 0x3b0   :  { %3723 = vmax.xlane.f32.xlu0 %v3722_v29  ;;  %v12795_v29 = vadd.f32 %v12755_v27, %v12635_v42  ;;  %v1814_v42 = vpop.f32.mrf.mxu1 }
 0x3b2   :  { %17354 = vst [vmem:[#allocation166_spill] sm:$0xff] %v12795_v29 }
 0x3b4   :  { %3711 = vmax.xlane.f32.xlu2 %v3710_v31  ;;  %v1777_v31 = vpop.f32.mrf.mxu3 }
 0x3b7   :  { %3726 = vmax.xlane.f32.xlu1 %v3725_v24  ;;  %v3740_v24 = vsel %vm3600_vm9, %v12795_v29, -inf }
 0x3b8   :  { %3732 = vmax.xlane.f32.xlu0 %v3731_v52  ;;  %v12807_v52 = vadd.f32 %v12755_v27, %v12609_v55  ;;  %v12824_v55 = vadd.f32 %v12724_v54, %v12674_v59  ;;  %v1817_v59 = vpop.f32.mrf.mxu1 }
 0x3ba   :  { %17356 = vst [vmem:[#allocation168_spill] sm:$0xff] %v12807_v52  ;;  %v3728_v41 = vsel %vm3600_vm9, %v12807_v52, -inf  ;;  %v3743_v52 = vsel %vm3604_vm10, %v12824_v55, -inf }
 0x3bb   :  { %v12797_v32 = vpop.xlane.xlu0 %3602  ;;  %17358 = vst [vmem:[#allocation170_spill] sm:$0xff] %v12824_v55 }
 0x3bc   :  { %3720 = vmax.xlane.f32.xlu2 %v3719_v23 }
 0x3bf   :  { %3735 = vmax.xlane.f32.xlu1 %v3734_v51 }
 0x3c0   :  { %3741 = vmax.xlane.f32.xlu0 %v3740_v24  ;;  %v1780_v24 = vpop.f32.mrf.mxu3 }
 0x3c1   :  { %v12869_v48 = vadd.f32 %v12724_v54, %v1780_v24 }
 0x3c2   :  { %v12820_v25 = vpop.xlane.xlu1 %3606 }
 0x3c3   :  { %v12816_v23 = vpop.xlane.xlu0 %3615  ;;  %17364 = vst [vmem:[#allocation176_spill] sm:$0xff] %v12869_v48 }
 0x3c4   :  { %3729 = vmax.xlane.f32.xlu2 %v3728_v41  ;;  %v12837_v41 = vadd.f32 %v12755_v27, %v1777_v31 }
 0x3c6   :  { %17360 = vst [vmem:[#allocation172_spill] sm:$0xff] %v12837_v41  ;;  %v3758_v55 = vsel %vm3600_vm9, %v12837_v41, -inf  ;;  %v1925_v41 = vpop.f32.mrf.mxu1 }
 0x3c7   :  { %v12830_v51 = vpop.xlane.xlu2 %3609  ;;  %3744 = vmax.xlane.f32.xlu1 %v3743_v52  ;;  %v12851_v52 = vadd.f32 %v12755_v27, %v12692_v58 }
 0x3c8   :  { %3750 = vmax.xlane.f32.xlu0 %v3749_v28  ;;  %v12847_v28 = vadd.f32 %v12755_v27, %v12656_v19  ;;  %v1888_v36 = vpop.f32.mrf.mxu3 }
 0x3c9   :  { %17362 = vst [vmem:[#allocation174_spill] sm:$0xff] %v12851_v52  ;;  %v3746_v58 = vsel %vm3600_vm9, %v12851_v52, -inf  ;;  %v3761_v52 = vsel %vm3604_vm10, %v12869_v48, -inf  ;;  %v12882_v24 = vadd.f32 %v12755_v27, %v1888_v36 }
 0x3ca   :  { %v12843_v60 = vpop.xlane.xlu1 %3618  ;;  %17361 = vst [vmem:[#allocation173_spill] sm:$0xff] %v12847_v28  ;;  %v3752_v5 = vsel %vm3600_vm9, %v12847_v28, -inf  ;;  %v12873_v28 = vadd.f32 %v12724_v54, %v12699_v50 }
 0x3cb   :  { %v12839_v29 = vpop.xlane.xlu0 %3624  ;;  %17366 = vst [vmem:[#allocation178_spill] sm:$0xff] %v12882_v24  ;;  %v3776_v36 = vsel %vm3600_vm9, %v12882_v24, -inf }
 0x3cc   :  { %3738 = vmax.xlane.f32.xlu2 %v3737_v34  ;;  %v12860_v34 = vadd.f32 %v12724_v54, %v1817_v59  ;;  %17365 = vst [vmem:[#allocation177_spill] sm:$0xff] %v12873_v28  ;;  %v3755_v50 = vsel %vm3604_vm10, %v12873_v28, -inf }
 0x3ce   :  { %17363 = vst [vmem:[#allocation175_spill] sm:$0xff] %v12860_v34  ;;  %v3767_v59 = vsel %vm3604_vm10, %v12860_v34, -inf }
 0x3cf   :  { %v12853_v31 = vpop.xlane.xlu2 %3612  ;;  %3753 = vmax.xlane.f32.xlu1 %v3752_v5 }
 0x3d0   :  { %3759 = vmax.xlane.f32.xlu0 %v3758_v55  ;;  %v1962_v55 = vpop.f32.mrf.mxu2  ;;  %v1891_v57 = vpop.f32.mrf.mxu3 }
 0x3d1   :  { %v12911_v21 = vadd.f32 %v12724_v54, %v1891_v57  ;;  %v12932_v7 = vadd.f32 %v12755_v27, %v1962_v55 }
 0x3d2   :  { %v12866_v44 = vpop.xlane.xlu1 %3627 }
 0x3d3   :  { %v12862_v19 = vpop.xlane.xlu0 %3633  ;;  %17370 = vst [vmem:[#allocation182_spill] sm:$0xff] %v12911_v21 }
 0x3d4   :  { %3747 = vmax.xlane.f32.xlu2 %v3746_v58  ;;  %17373 = vst [vmem:[#allocation185_spill] sm:$0xff] %v12932_v7 }
 0x3d7   :  { %v12875_v5 = vpop.xlane.xlu2 %3621  ;;  %3762 = vmax.xlane.f32.xlu1 %v3761_v52  ;;  %v1928_v52 = vpop.f32.mrf.mxu1 }
 0x3d8   :  { %3768 = vmax.xlane.f32.xlu0 %v3767_v59  ;;  %v12895_v59 = vadd.f32 %v12755_v27, %v1814_v42  ;;  %v1965_v6 = vpop.f32.mrf.mxu2  ;;  %v12904_v9 = vadd.f32 %v12724_v54, %v1928_v52  ;;  %v1999_v45 = vpop.f32.mrf.mxu3 }
 0x3da   :  { %v12892_v34 = vpop.xlane.xlu1 %3636  ;;  %17368 = vst [vmem:[#allocation180_spill] sm:$0xff] %v12895_v59  ;;  %v3764_v42 = vsel %vm3600_vm9, %v12895_v59, -inf  ;;  %v3785_v52 = vsel %vm3604_vm10, %v12904_v9, -inf }
 0x3db   :  { %v12884_v58 = vpop.xlane.xlu0 %3642  ;;  %17369 = vst [vmem:[#allocation181_spill] sm:$0xff] %v12904_v9  ;;  %v12937_v9 = vadd.f32 %v12755_v27, %v1925_v41 }
 0x3dc   :  { %3756 = vmax.xlane.f32.xlu2 %v3755_v50  ;;  %v3770_v50 = vsel %vm3600_vm9, %v12890_v4, -inf }
 0x3dd   :  { %17374 = vst [vmem:[#allocation186_spill] sm:$0xff] %v12937_v9  ;;  %v3782_v41 = vsel %vm3600_vm9, %v12937_v9, -inf }
 0x3df   :  { %v12897_v48 = vpop.xlane.xlu2 %3630  ;;  %3771 = vmax.xlane.f32.xlu1 %v3770_v50  ;;  %v3779_v50 = vsel %vm3604_vm10, %v12911_v21, -inf }
 0x3e0   :  { %3777 = vmax.xlane.f32.xlu0 %v3776_v36  ;;  %v12916_v36 = vadd.f32 %v12724_v54, %v1854_v18  ;;  %v2039_v59 = vpop.f32.mrf.mxu2 }
 0x3e1   :  { %v12946_v55 = vadd.f32 %v12724_v54, %v2039_v59 }
 0x3e2   :  { %v12913_v24 = vpop.xlane.xlu1 %3645  ;;  %17371 = vst [vmem:[#allocation183_spill] sm:$0xff] %v12916_v36  ;;  %v3773_v18 = vsel %vm3604_vm10, %v12916_v36, -inf  ;;  %v2073_v36 = vpop.f32.mrf.mxu1 }
 0x3e3   :  { %v12906_v28 = vpop.xlane.xlu0 %3651  ;;  %17375 = vst [vmem:[#allocation187_spill] sm:$0xff] %v12946_v55  ;;  %v3803_v59 = vsel %vm3604_vm10, %v12946_v55, -inf  ;;  %v12974_v49 = vadd.f32 %v12755_v27, %v2073_v36  ;;  %v12990_v36 = vld [vmem:[%s16688_s5 + $0x28] sm:$0x1] }
 0x3e4   :  { %3765 = vmax.xlane.f32.xlu2 %v3764_v42  ;;  %v12925_v42 = vadd.f32 %v12755_v27, %v1999_v45 }
 0x3e5   :  { %17379 = vst [vmem:[#allocation191_spill] sm:$0xff] %v12974_v49 }
 0x3e6   :  { %17372 = vst [vmem:[#allocation184_spill] sm:$0xff] %v12925_v42  ;;  %v3794_v45 = vsel %vm3600_vm9, %v12925_v42, -inf }
 0x3e7   :  { %v12918_v4 = vpop.xlane.xlu2 %3639  ;;  %3780 = vmax.xlane.f32.xlu1 %v3779_v50  ;;  %v3788_v50 = vsel %vm3600_vm9, %v12932_v7, -inf  ;;  %v12958_v7 = vadd.f32 %v12724_v54, %v1965_v6 }
 0x3e8   :  { %3786 = vmax.xlane.f32.xlu0 %v3785_v52  ;;  %v2002_v52 = vpop.f32.mrf.mxu3  ;;  %v2110_v40 = vpop.f32.mrf.mxu2 }
 0x3e9   :  { %v12953_v8 = vadd.f32 %v12724_v54, %v2002_v52  ;;  %17377 = vst [vmem:[#allocation189_spill] sm:$0xff] %v12958_v7  ;;  %v12967_v52 = vadd.f32 %v12755_v27, %v2110_v40  ;;  %v3791_v6 = vsel %vm3604_vm10, %v12958_v7, -inf  ;;  %v3806_v7 = vsel %vm3600_vm9, %v12974_v49, -inf }
 0x3ea   :  { %v12934_v47 = vpop.xlane.xlu1 %3654  ;;  %v2076_v33 = vpop.f32.mrf.mxu1 }
 0x3eb   :  { %v12927_v57 = vpop.xlane.xlu0 %3660  ;;  %17376 = vst [vmem:[#allocation188_spill] sm:$0xff] %v12953_v8  ;;  %v3797_v9 = vsel %vm3604_vm10, %v12953_v8, -inf  ;;  %v12979_v8 = vadd.f32 %v12755_v27, %v2036_v26  ;;  %v3812_v40 = vsel %vm3600_vm9, %v12967_v52, -inf  ;;  %v13005_v30 = vadd.f32 %v12724_v54, %v2076_v33 }
 0x3ec   :  { %3774 = vmax.xlane.f32.xlu2 %v3773_v18  ;;  %17378 = vst [vmem:[#allocation190_spill] sm:$0xff] %v12967_v52 }
 0x3ed   :  { %17380 = vst [vmem:[#allocation192_spill] sm:$0xff] %v12979_v8  ;;  %v3800_v52 = vsel %vm3600_vm9, %v12979_v8, -inf }
 0x3ee   :  { %17386 = vst [vmem:[#allocation198_spill] sm:$0xff] %v13005_v30 }
 0x3ef   :  { %v12939_v21 = vpop.xlane.xlu2 %3648  ;;  %3789 = vmax.xlane.f32.xlu1 %v3788_v50 }
 0x3f0   :  { %3795 = vmax.xlane.f32.xlu0 %v3794_v45  ;;  %v2147_v45 = vpop.f32.mrf.mxu3 }
 0x3f2   :  { %v12955_v42 = vpop.xlane.xlu1 %3663  ;;  %v2221_v53 = vpop.f32.mrf.mxu1 }
 0x3f3   :  { %v12948_v18 = vpop.xlane.xlu0 %3669 }
 0x3f4   :  { %3783 = vmax.xlane.f32.xlu2 %v3782_v41 }
 0x3f7   :  { %v12960_v50 = vpop.xlane.xlu2 %3657  ;;  %3798 = vmax.xlane.f32.xlu1 %v3797_v9 }
 0x3f8   :  { %3804 = vmax.xlane.f32.xlu0 %v3803_v59  ;;  %v2113_v59 = vpop.f32.mrf.mxu2  ;;  %v2150_v10 = vpop.f32.mrf.mxu3 }
 0x3f9   :  { %v12993_v26 = vadd.f32 %v12990_v36, %v2150_v10 }
 0x3fa   :  { %v12976_v55 = vpop.xlane.xlu1 %3672 }
 0x3fb   :  { %v12969_v41 = vpop.xlane.xlu0 %3678  ;;  %17382 = vst [vmem:[#allocation194_spill] sm:$0xff] %v12993_v26  ;;  %v3821_v10 = vsel %vm3604_vm10, %v12993_v26, -inf  ;;  %v2224_v26 = vpop.f32.mrf.mxu1 }
 0x3fc   :  { %3792 = vmax.xlane.f32.xlu2 %v3791_v6  ;;  %v2184_v6 = vpop.f32.mrf.mxu0 }
 0x3ff   :  { %v12981_v9 = vpop.xlane.xlu2 %3666  ;;  %3807 = vmax.xlane.f32.xlu1 %v3806_v7 }
 0x400   :  { %17381 = vst [vmem:[#allocation193_spill] sm:$0xff] %v12981_v9  ;;  %3813 = vmax.xlane.f32.xlu0 %v3812_v40  ;;  %v13000_v40 = vadd.f32 %v12724_v54, %v2113_v59  ;;  %v2258_v9 = vpop.f32.mrf.mxu2  ;;  %v3809_v54 = vsel %vm3604_vm10, %v13005_v30, -inf }
 0x402   :  { %17384 = vst [vmem:[#allocation196_spill] sm:$0xff] %v13000_v40  ;;  %v13002_v49 = vpop.xlane.xlu1 %3681  ;;  %v3815_v8 = vsel %vm3604_vm10, %v13000_v40, -inf }
 0x403   :  { %v12995_v27 = vpop.xlane.xlu0 %3687  ;;  %17385 = vst [vmem:[#allocation197_spill] sm:$0xff] %v13002_v49 }
 0x404   :  { %17383 = vst [vmem:[#allocation195_spill] sm:$0xff] %v12995_v27  ;;  %3801 = vmax.xlane.f32.xlu2 %v3800_v52  ;;  %v13016_v52 = vld [vmem:[%s16688_s5 + $0x20] sm:$0xff] }
 0x405   :  { %v13019_v59 = vadd.f32 %v13016_v52, %v2221_v53  ;;  %v13031_v49 = vadd.f32 %v13016_v52, %v2147_v45 }
 0x407   :  { %v13007_v7 = vpop.xlane.xlu2 %3675  ;;  %3816 = vmax.xlane.f32.xlu1 %v3815_v8  ;;  %17388 = vst [vmem:[#allocation200_spill] sm:$0xff] %v13019_v59  ;;  %v3830_v53 = vsel %vm3600_vm9, %v13019_v59, -inf  ;;  %v3818_v45 = vsel %vm3600_vm9, %v13031_v49, -inf }
 0x408   :  { %17387 = vst [vmem:[#allocation199_spill] sm:$0xff] %v13007_v7  ;;  %3822 = vmax.xlane.f32.xlu0 %v3821_v10  ;;  %v2187_v7 = vpop.f32.mrf.mxu0  ;;  %v13026_v10 = vadd.f32 %v13016_v52, %v2184_v6 }
 0x409   :  { %17392 = vst [vmem:[#allocation204_spill] sm:$0xff] %v13031_v49 }
 0x40a   :  { %17390 = vst [vmem:[#allocation202_spill] sm:$0xff] %v13026_v10  ;;  %v13028_v40 = vpop.xlane.xlu1 %3690  ;;  %v3824_v30 = vsel %vm3600_vm9, %v13026_v10, -inf  ;;  %v13052_v10 = vadd.f32 %v12990_v36, %v2187_v7 }
 0x40b   :  { %v13021_v33 = vpop.xlane.xlu0 %3696  ;;  %17391 = vst [vmem:[#allocation203_spill] sm:$0xff] %v13028_v40 }
 0x40c   :  { %17389 = vst [vmem:[#allocation201_spill] sm:$0xff] %v13021_v33  ;;  %3810 = vmax.xlane.f32.xlu2 %v3809_v54  ;;  %v2261_v33 = vpop.f32.mrf.mxu2  ;;  %v2295_v54 = vpop.f32.mrf.mxu3 }
 0x40d   :  { %v13040_v6 = vadd.f32 %v12990_v36, %v2261_v33  ;;  %17398 = vst [vmem:[#allocation210_spill] sm:$0xff] %v13052_v10 }
 0x40f   :  { %v13033_v8 = vpop.xlane.xlu2 %3684  ;;  %3825 = vmax.xlane.f32.xlu1 %v3824_v30  ;;  %17394 = vst [vmem:[#allocation206_spill] sm:$0xff] %v13040_v6  ;;  %v3839_v30 = vsel %vm3604_vm10, %v13040_v6, -inf }
 0x410   :  { %17393 = vst [vmem:[#allocation205_spill] sm:$0xff] %v13033_v8  ;;  %3831 = vmax.xlane.f32.xlu0 %v3830_v53  ;;  %v2332_v27 = vpop.f32.mrf.mxu0  ;;  %v13047_v8 = vadd.f32 %v12990_v36, %v2224_v26  ;;  %v2369_v53 = vpop.f32.mrf.mxu1 }
 0x412   :  { %17396 = vst [vmem:[#allocation208_spill] sm:$0xff] %v13047_v8  ;;  %v13049_v59 = vpop.xlane.xlu1 %3699  ;;  %v3833_v49 = vsel %vm3604_vm10, %v13047_v8, -inf }
 0x413   :  { %v13042_v40 = vpop.xlane.xlu0 %3705  ;;  %17397 = vst [vmem:[#allocation209_spill] sm:$0xff] %v13049_v59  ;;  %v3827_v59 = vsel %vm3604_vm10, %v13052_v10, -inf }
 0x414   :  { %17395 = vst [vmem:[#allocation207_spill] sm:$0xff] %v13042_v40  ;;  %3819 = vmax.xlane.f32.xlu2 %v3818_v45  ;;  %v13061_v45 = vadd.f32 %v13016_v52, %v2332_v27  ;;  %v2298_v7 = vpop.f32.mrf.mxu3  ;;  %v13068_v40 = vadd.f32 %v13016_v52, %v2295_v54 }
 0x416   :  { %17400 = vst [vmem:[#allocation212_spill] sm:$0xff] %v13061_v45  ;;  %v3842_v10 = vsel %vm3600_vm9, %v13068_v40, -inf }
 0x417   :  { %v13056_v33 = vpop.xlane.xlu2 %3693  ;;  %3834 = vmax.xlane.f32.xlu1 %v3833_v49  ;;  %17402 = vst [vmem:[#allocation214_spill] sm:$0xff] %v13068_v40  ;;  %v3848_v49 = vsel %vm3600_vm9, %v13061_v45, -inf  ;;  %v13094_v40 = vadd.f32 %v12990_v36, %v2298_v7 }
 0x418   :  { %17399 = vst [vmem:[#allocation211_spill] sm:$0xff] %v13056_v33  ;;  %3840 = vmax.xlane.f32.xlu0 %v3839_v30  ;;  %v2335_v30 = vpop.f32.mrf.mxu0  ;;  %v13073_v33 = vadd.f32 %v13016_v52, %v2258_v9  ;;  %v2372_v27 = vpop.f32.mrf.mxu1 }
 0x419   :  { %v13082_v54 = vadd.f32 %v12990_v36, %v2372_v27  ;;  %v13089_v45 = vadd.f32 %v12990_v36, %v2335_v30  ;;  %17410 = vst [vmem:[#allocation222_spill] sm:$0xff] %v13094_v40 }
 0x41a   :  { %v13070_v6 = vpop.xlane.xlu1 %3708  ;;  %17404 = vst [vmem:[#allocation216_spill] sm:$0xff] %v13073_v33  ;;  %v3836_v9 = vsel %vm3600_vm9, %v13073_v33, -inf }
 0x41b   :  { %v13063_v26 = vpop.xlane.xlu0 %3714  ;;  %17403 = vst [vmem:[#allocation215_spill] sm:$0xff] %v13070_v6  ;;  %v3851_v33 = vsel %vm3604_vm10, %v13089_v45, -inf }
 0x41c   :  { %17401 = vst [vmem:[#allocation213_spill] sm:$0xff] %v13063_v26  ;;  %3828 = vmax.xlane.f32.xlu2 %v3827_v59  ;;  %v2406_v59 = vpop.f32.mrf.mxu2  ;;  %v2443_v26 = vpop.f32.mrf.mxu3 }
 0x41d   :  { %17406 = vst [vmem:[#allocation218_spill] sm:$0xff] %v13082_v54 }
 0x41e   :  { %17408 = vst [vmem:[#allocation220_spill] sm:$0xff] %v13089_v45 }
 0x41f   :  { %v13077_v8 = vpop.xlane.xlu2 %3702  ;;  %3843 = vmax.xlane.f32.xlu1 %v3842_v10  ;;  %v3857_v10 = vsel %vm3604_vm10, %v13082_v54, -inf }
 0x420   :  { %17405 = vst [vmem:[#allocation217_spill] sm:$0xff] %v13077_v8  ;;  %3849 = vmax.xlane.f32.xlu0 %v3848_v49  ;;  %v2480_v49 = vpop.f32.mrf.mxu0 }
 0x422   :  { %v13091_v8 = vpop.xlane.xlu1 %3717 }
 0x423   :  { %v13084_v6 = vpop.xlane.xlu0 %3723  ;;  %17409 = vst [vmem:[#allocation221_spill] sm:$0xff] %v13091_v8  ;;  %v3845_v8 = vsel %vm3604_vm10, %v13094_v40, -inf }
 0x424   :  { %17407 = vst [vmem:[#allocation219_spill] sm:$0xff] %v13084_v6  ;;  %3837 = vmax.xlane.f32.xlu2 %v3836_v9  ;;  %v13103_v9 = vadd.f32 %v13016_v52, %v2443_v26  ;;  %v2409_v7 = vpop.f32.mrf.mxu2  ;;  %v13110_v6 = vadd.f32 %v13016_v52, %v2406_v59 }
 0x426   :  { %17412 = vst [vmem:[#allocation224_spill] sm:$0xff] %v13103_v9  ;;  %v3860_v40 = vsel %vm3600_vm9, %v13110_v6, -inf }
 0x427   :  { %v13098_v27 = vpop.xlane.xlu2 %3711  ;;  %3852 = vmax.xlane.f32.xlu1 %v3851_v33  ;;  %17414 = vst [vmem:[#allocation226_spill] sm:$0xff] %v13110_v6  ;;  %v3866_v33 = vsel %vm3600_vm9, %v13103_v9, -inf  ;;  %v13136_v6 = vadd.f32 %v12990_v36, %v2409_v7 }
 0x428   :  { %17411 = vst [vmem:[#allocation223_spill] sm:$0xff] %v13098_v27  ;;  %3858 = vmax.xlane.f32.xlu0 %v3857_v10  ;;  %v2446_v10 = vpop.f32.mrf.mxu3  ;;  %v13115_v27 = vadd.f32 %v13016_v52, %v2369_v53  ;;  %v2483_v26 = vpop.f32.mrf.mxu0 }
 0x429   :  { %v13124_v59 = vadd.f32 %v12990_v36, %v2483_v26  ;;  %v13131_v9 = vadd.f32 %v12990_v36, %v2446_v10  ;;  %17422 = vst [vmem:[#allocation234_spill] sm:$0xff] %v13136_v6 }
 0x42a   :  { %v13112_v54 = vpop.xlane.xlu1 %3726  ;;  %17416 = vst [vmem:[#allocation228_spill] sm:$0xff] %v13115_v27  ;;  %v3854_v53 = vsel %vm3600_vm9, %v13115_v27, -inf }
 0x42b   :  { %v13105_v30 = vpop.xlane.xlu0 %3732  ;;  %17415 = vst [vmem:[#allocation227_spill] sm:$0xff] %v13112_v54  ;;  %v3869_v27 = vsel %vm3604_vm10, %v13131_v9, -inf }
 0x42c   :  { %17413 = vst [vmem:[#allocation225_spill] sm:$0xff] %v13105_v30  ;;  %3846 = vmax.xlane.f32.xlu2 %v3845_v8  ;;  %v2517_v8 = vpop.f32.mrf.mxu1  ;;  %v2554_v30 = vpop.f32.mrf.mxu2 }
 0x42d   :  { %17418 = vst [vmem:[#allocation230_spill] sm:$0xff] %v13124_v59 }
 0x42e   :  { %17420 = vst [vmem:[#allocation232_spill] sm:$0xff] %v13131_v9 }
 0x42f   :  { %v13119_v45 = vpop.xlane.xlu2 %3720  ;;  %3861 = vmax.xlane.f32.xlu1 %v3860_v40  ;;  %v3875_v40 = vsel %vm3604_vm10, %v13124_v59, -inf }
 0x430   :  { %17417 = vst [vmem:[#allocation229_spill] sm:$0xff] %v13119_v45  ;;  %3867 = vmax.xlane.f32.xlu0 %v3866_v33  ;;  %v2591_v33 = vpop.f32.mrf.mxu3 }
 0x432   :  { %v13133_v45 = vpop.xlane.xlu1 %3735 }
 0x433   :  { %v13126_v54 = vpop.xlane.xlu0 %3741  ;;  %17421 = vst [vmem:[#allocation233_spill] sm:$0xff] %v13133_v45  ;;  %v3863_v45 = vsel %vm3604_vm10, %v13136_v6, -inf }
 0x434   :  { %17419 = vst [vmem:[#allocation231_spill] sm:$0xff] %v13126_v54  ;;  %3855 = vmax.xlane.f32.xlu2 %v3854_v53  ;;  %v13145_v53 = vadd.f32 %v13016_v52, %v2554_v30  ;;  %v2520_v7 = vpop.f32.mrf.mxu1  ;;  %v13152_v54 = vadd.f32 %v13016_v52, %v2517_v8 }
 0x436   :  { %17424 = vst [vmem:[#allocation236_spill] sm:$0xff] %v13145_v53  ;;  %v3878_v6 = vsel %vm3600_vm9, %v13152_v54, -inf }
 0x437   :  { %v13140_v26 = vpop.xlane.xlu2 %3729  ;;  %3870 = vmax.xlane.f32.xlu1 %v3869_v27  ;;  %17426 = vst [vmem:[#allocation238_spill] sm:$0xff] %v13152_v54  ;;  %v3884_v27 = vsel %vm3600_vm9, %v13145_v53, -inf  ;;  %v13178_v54 = vadd.f32 %v12990_v36, %v2520_v7 }
 0x438   :  { %17423 = vst [vmem:[#allocation235_spill] sm:$0xff] %v13140_v26  ;;  %3876 = vmax.xlane.f32.xlu0 %v3875_v40  ;;  %v2557_v40 = vpop.f32.mrf.mxu2  ;;  %v13157_v26 = vadd.f32 %v13016_v52, %v2480_v49  ;;  %v2594_v30 = vpop.f32.mrf.mxu3 }
 0x439   :  { %v13166_v8 = vadd.f32 %v12990_v36, %v2594_v30  ;;  %v13173_v53 = vadd.f32 %v12990_v36, %v2557_v40  ;;  %17434 = vst [vmem:[#allocation246_spill] sm:$0xff] %v13178_v54 }
 0x43a   :  { %v13154_v59 = vpop.xlane.xlu1 %3744  ;;  %17428 = vst [vmem:[#allocation240_spill] sm:$0xff] %v13157_v26  ;;  %v3872_v49 = vsel %vm3600_vm9, %v13157_v26, -inf }
 0x43b   :  { %v13147_v10 = vpop.xlane.xlu0 %3750  ;;  %17427 = vst [vmem:[#allocation239_spill] sm:$0xff] %v13154_v59  ;;  %v3887_v26 = vsel %vm3604_vm10, %v13173_v53, -inf }
 0x43c   :  { %17425 = vst [vmem:[#allocation237_spill] sm:$0xff] %v13147_v10  ;;  %3864 = vmax.xlane.f32.xlu2 %v3863_v45  ;;  %v2628_v45 = vpop.f32.mrf.mxu0  ;;  %v2665_v10 = vpop.f32.mrf.mxu1 }
 0x43d   :  { %17430 = vst [vmem:[#allocation242_spill] sm:$0xff] %v13166_v8 }
 0x43e   :  { %17432 = vst [vmem:[#allocation244_spill] sm:$0xff] %v13173_v53 }
 0x43f   :  { %v13161_v9 = vpop.xlane.xlu2 %3738  ;;  %3879 = vmax.xlane.f32.xlu1 %v3878_v6  ;;  %v3893_v6 = vsel %vm3604_vm10, %v13166_v8, -inf }
 0x440   :  { %17429 = vst [vmem:[#allocation241_spill] sm:$0xff] %v13161_v9  ;;  %3885 = vmax.xlane.f32.xlu0 %v3884_v27  ;;  %v2702_v27 = vpop.f32.mrf.mxu2 }
 0x442   :  { %v13175_v9 = vpop.xlane.xlu1 %3753 }
 0x443   :  { %v13168_v59 = vpop.xlane.xlu0 %3759  ;;  %17433 = vst [vmem:[#allocation245_spill] sm:$0xff] %v13175_v9  ;;  %v3881_v9 = vsel %vm3604_vm10, %v13178_v54, -inf }
 0x444   :  { %17431 = vst [vmem:[#allocation243_spill] sm:$0xff] %v13168_v59  ;;  %3873 = vmax.xlane.f32.xlu2 %v3872_v49  ;;  %v13187_v49 = vadd.f32 %v13016_v52, %v2665_v10  ;;  %v2631_v7 = vpop.f32.mrf.mxu0  ;;  %v13194_v59 = vadd.f32 %v13016_v52, %v2628_v45 }
 0x446   :  { %17436 = vst [vmem:[#allocation248_spill] sm:$0xff] %v13187_v49  ;;  %v3896_v54 = vsel %vm3600_vm9, %v13194_v59, -inf }
 0x447   :  { %v13182_v30 = vpop.xlane.xlu2 %3747  ;;  %3888 = vmax.xlane.f32.xlu1 %v3887_v26  ;;  %17438 = vst [vmem:[#allocation250_spill] sm:$0xff] %v13194_v59  ;;  %v3902_v26 = vsel %vm3600_vm9, %v13187_v49, -inf  ;;  %v13220_v59 = vadd.f32 %v12990_v36, %v2631_v7 }
 0x448   :  { %17435 = vst [vmem:[#allocation247_spill] sm:$0xff] %v13182_v30  ;;  %3894 = vmax.xlane.f32.xlu0 %v3893_v6  ;;  %v2668_v6 = vpop.f32.mrf.mxu1  ;;  %v13199_v30 = vadd.f32 %v13016_v52, %v2591_v33  ;;  %v2705_v10 = vpop.f32.mrf.mxu2 }
 0x449   :  { %v13208_v45 = vadd.f32 %v12990_v36, %v2705_v10  ;;  %v13215_v49 = vadd.f32 %v12990_v36, %v2668_v6  ;;  %17446 = vst [vmem:[#allocation258_spill] sm:$0xff] %v13220_v59 }
 0x44a   :  { %v13196_v8 = vpop.xlane.xlu1 %3762  ;;  %17440 = vst [vmem:[#allocation252_spill] sm:$0xff] %v13199_v30  ;;  %v3890_v33 = vsel %vm3600_vm9, %v13199_v30, -inf }
 0x44b   :  { %v13189_v40 = vpop.xlane.xlu0 %3768  ;;  %17439 = vst [vmem:[#allocation251_spill] sm:$0xff] %v13196_v8  ;;  %v3905_v30 = vsel %vm3604_vm10, %v13215_v49, -inf }
 0x44c   :  { %17437 = vst [vmem:[#allocation249_spill] sm:$0xff] %v13189_v40  ;;  %3882 = vmax.xlane.f32.xlu2 %v3881_v9  ;;  %v2739_v9 = vpop.f32.mrf.mxu3  ;;  %v2776_v40 = vpop.f32.mrf.mxu0 }
 0x44d   :  { %17442 = vst [vmem:[#allocation254_spill] sm:$0xff] %v13208_v45 }
 0x44e   :  { %17444 = vst [vmem:[#allocation256_spill] sm:$0xff] %v13215_v49  ;;  %v13248_v49 = vld [vmem:[%s16688_s5 + $0x38] sm:$0x1] }
 0x44f   :  { %v13203_v53 = vpop.xlane.xlu2 %3756  ;;  %3897 = vmax.xlane.f32.xlu1 %v3896_v54  ;;  %v3911_v54 = vsel %vm3604_vm10, %v13208_v45, -inf }
 0x450   :  { %17441 = vst [vmem:[#allocation253_spill] sm:$0xff] %v13203_v53  ;;  %3903 = vmax.xlane.f32.xlu0 %v3902_v26  ;;  %v2813_v26 = vpop.f32.mrf.mxu1 }
 0x452   :  { %v13217_v53 = vpop.xlane.xlu1 %3771 }
 0x453   :  { %v13210_v8 = vpop.xlane.xlu0 %3777  ;;  %17445 = vst [vmem:[#allocation257_spill] sm:$0xff] %v13217_v53  ;;  %v3899_v53 = vsel %vm3604_vm10, %v13220_v59, -inf }
 0x454   :  { %17443 = vst [vmem:[#allocation255_spill] sm:$0xff] %v13210_v8  ;;  %3891 = vmax.xlane.f32.xlu2 %v3890_v33  ;;  %v13229_v33 = vadd.f32 %v13016_v52, %v2776_v40  ;;  %v2742_v7 = vpop.f32.mrf.mxu3  ;;  %v13236_v8 = vadd.f32 %v13016_v52, %v2739_v9  ;;  %v2850_v9 = vpop.f32.mrf.mxu2 }
 0x456   :  { %17448 = vst [vmem:[#allocation260_spill] sm:$0xff] %v13229_v33 }
 0x457   :  { %v13224_v10 = vpop.xlane.xlu2 %3765  ;;  %3906 = vmax.xlane.f32.xlu1 %v3905_v30  ;;  %17450 = vst [vmem:[#allocation262_spill] sm:$0xff] %v13236_v8  ;;  %v3920_v30 = vsel %vm3600_vm9, %v13229_v33, -inf }
 0x458   :  { %17447 = vst [vmem:[#allocation259_spill] sm:$0xff] %v13224_v10  ;;  %3912 = vmax.xlane.f32.xlu0 %v3911_v54  ;;  %v2779_v54 = vpop.f32.mrf.mxu0  ;;  %v13241_v10 = vadd.f32 %v13016_v52, %v2702_v27  ;;  %v2816_v40 = vpop.f32.mrf.mxu1 }
 0x459   :  { %v13255_v52 = vadd.f32 %v13248_v49, %v2816_v40 }
 0x45a   :  { %v13238_v45 = vpop.xlane.xlu1 %3780  ;;  %17452 = vst [vmem:[#allocation264_spill] sm:$0xff] %v13241_v10  ;;  %v3908_v33 = vsel %vm3600_vm9, %v13241_v10, -inf }
 0x45b   :  { %v13231_v6 = vpop.xlane.xlu0 %3786  ;;  %17451 = vst [vmem:[#allocation263_spill] sm:$0xff] %v13238_v45  ;;  %v3929_v40 = vsel %vm3604_vm10, %v13255_v52, -inf }
 0x45c   :  { %17449 = vst [vmem:[#allocation261_spill] sm:$0xff] %v13231_v6  ;;  %3900 = vmax.xlane.f32.xlu2 %v3899_v53  ;;  %v3914_v53 = vsel %vm3600_vm9, %v13236_v8, -inf  ;;  %v2887_v45 = vpop.f32.mrf.mxu3  ;;  %v13262_v6 = vadd.f32 %v12990_v36, %v2779_v54  ;;  %v13267_v8 = vadd.f32 %v12990_v36, %v2742_v7 }
 0x45d   :  { %17454 = vst [vmem:[#allocation266_spill] sm:$0xff] %v13255_v52  ;;  %v2853_v52 = vpop.f32.mrf.mxu2 }
 0x45e   :  { %17456 = vst [vmem:[#allocation268_spill] sm:$0xff] %v13262_v6  ;;  %v3923_v10 = vsel %vm3604_vm10, %v13262_v6, -inf  ;;  %v3917_v7 = vsel %vm3604_vm10, %v13267_v8, -inf }
 0x45f   :  { %v13250_v59 = vpop.xlane.xlu2 %3774  ;;  %3915 = vmax.xlane.f32.xlu1 %v3914_v53  ;;  %17458 = vst [vmem:[#allocation270_spill] sm:$0xff] %v13267_v8 }
 0x460   :  { %17453 = vst [vmem:[#allocation265_spill] sm:$0xff] %v13250_v59  ;;  %3921 = vmax.xlane.f32.xlu0 %v3920_v30  ;;  %v2924_v30 = vpop.f32.mrf.mxu0 }
 0x462   :  { %v13264_v59 = vpop.xlane.xlu1 %3789 }
 0x463   :  { %v13257_v27 = vpop.xlane.xlu0 %3795  ;;  %17457 = vst [vmem:[#allocation269_spill] sm:$0xff] %v13264_v59 }
 0x464   :  { %17455 = vst [vmem:[#allocation267_spill] sm:$0xff] %v13257_v27  ;;  %3909 = vmax.xlane.f32.xlu2 %v3908_v33  ;;  %v13278_v33 = vld [vmem:[%s16688_s5 + $0x30] sm:$0xff]  ;;  %s10953_s5 = smov 96  }
 0x465   :  { %v13281_v54 = vadd.f32 %v13278_v33, %v2887_v45  ;;  %v13293_v59 = vadd.f32 %v13278_v33, %v2813_v26 }
 0x467   :  { %v13271_v53 = vpop.xlane.xlu2 %3783  ;;  %3924 = vmax.xlane.f32.xlu1 %v3923_v10  ;;  %17460 = vst [vmem:[#allocation272_spill] sm:$0xff] %v13281_v54  ;;  %v3938_v45 = vsel %vm3600_vm9, %v13281_v54, -inf  ;;  %v3926_v26 = vsel %vm3600_vm9, %v13293_v59, -inf }
 0x468   :  { %17459 = vst [vmem:[#allocation271_spill] sm:$0xff] %v13271_v53  ;;  %3930 = vmax.xlane.f32.xlu0 %v3929_v40  ;;  %v13288_v40 = vadd.f32 %v13278_v33, %v2850_v9  ;;  %v2890_v53 = vpop.f32.mrf.mxu3  ;;  %v2927_v10 = vpop.f32.mrf.mxu0 }
 0x469   :  { %17464 = vst [vmem:[#allocation276_spill] sm:$0xff] %v13293_v59  ;;  %v13302_v9 = vadd.f32 %v13248_v49, %v2927_v10  ;;  %v13309_v54 = vadd.f32 %v13248_v49, %v2890_v53 }
 0x46a   :  { %17462 = vst [vmem:[#allocation274_spill] sm:$0xff] %v13288_v40  ;;  %v13290_v6 = vpop.xlane.xlu1 %3798  ;;  %v3932_v8 = vsel %vm3600_vm9, %v13288_v40, -inf  ;;  %v13314_v40 = vadd.f32 %v13248_v49, %v2853_v52 }
 0x46b   :  { %v13283_v36 = vpop.xlane.xlu0 %3804  ;;  %17463 = vst [vmem:[#allocation275_spill] sm:$0xff] %v13290_v6  ;;  %v3941_v59 = vsel %vm3604_vm10, %v13309_v54, -inf }
 0x46c   :  { %17461 = vst [vmem:[#allocation273_spill] sm:$0xff] %v13283_v36  ;;  %3918 = vmax.xlane.f32.xlu2 %v3917_v7  ;;  %v2961_v7 = vpop.f32.mrf.mxu1  ;;  %v2998_v36 = vpop.f32.mrf.mxu2 }
 0x46d   :  { %17466 = vst [vmem:[#allocation278_spill] sm:$0xff] %v13302_v9 }
 0x46e   :  { %17468 = vst [vmem:[#allocation280_spill] sm:$0xff] %v13309_v54 }
 0x46f   :  { %v13297_v27 = vpop.xlane.xlu2 %3792  ;;  %3933 = vmax.xlane.f32.xlu1 %v3932_v8  ;;  %17470 = vst [vmem:[#allocation282_spill] sm:$0xff] %v13314_v40  ;;  %v3947_v8 = vsel %vm3604_vm10, %v13302_v9, -inf }
 0x470   :  { %17465 = vst [vmem:[#allocation277_spill] sm:$0xff] %v13297_v27  ;;  %3939 = vmax.xlane.f32.xlu0 %v3938_v45  ;;  %v3035_v45 = vpop.f32.mrf.mxu3 }
 0x472   :  { %v13311_v27 = vpop.xlane.xlu1 %3807 }
 0x473   :  { %v13304_v6 = vpop.xlane.xlu0 %3813  ;;  %17469 = vst [vmem:[#allocation281_spill] sm:$0xff] %v13311_v27  ;;  %v3935_v27 = vsel %vm3604_vm10, %v13314_v40, -inf }
 0x474   :  { %17467 = vst [vmem:[#allocation279_spill] sm:$0xff] %v13304_v6  ;;  %3927 = vmax.xlane.f32.xlu2 %v3926_v26  ;;  %v13323_v26 = vadd.f32 %v13278_v33, %v2998_v36  ;;  %v2964_v52 = vpop.f32.mrf.mxu1  ;;  %v13330_v6 = vadd.f32 %v13278_v33, %v2961_v7 }
 0x476   :  { %17472 = vst [vmem:[#allocation284_spill] sm:$0xff] %v13323_v26  ;;  %v3950_v40 = vsel %vm3600_vm9, %v13330_v6, -inf }
 0x477   :  { %v13318_v10 = vpop.xlane.xlu2 %3801  ;;  %3942 = vmax.xlane.f32.xlu1 %v3941_v59  ;;  %17474 = vst [vmem:[#allocation286_spill] sm:$0xff] %v13330_v6  ;;  %v3956_v59 = vsel %vm3600_vm9, %v13323_v26, -inf  ;;  %v13356_v6 = vadd.f32 %v13248_v49, %v2964_v52 }
 0x478   :  { %17471 = vst [vmem:[#allocation283_spill] sm:$0xff] %v13318_v10  ;;  %3948 = vmax.xlane.f32.xlu0 %v3947_v8  ;;  %v3001_v8 = vpop.f32.mrf.mxu2  ;;  %v13335_v10 = vadd.f32 %v13278_v33, %v2924_v30  ;;  %v3038_v36 = vpop.f32.mrf.mxu3 }
 0x479   :  { %v13344_v7 = vadd.f32 %v13248_v49, %v3038_v36  ;;  %v13351_v26 = vadd.f32 %v13248_v49, %v3001_v8  ;;  %17482 = vst [vmem:[#allocation294_spill] sm:$0xff] %v13356_v6 }
 0x47a   :  { %v13332_v9 = vpop.xlane.xlu1 %3816  ;;  %17476 = vst [vmem:[#allocation288_spill] sm:$0xff] %v13335_v10  ;;  %v3944_v30 = vsel %vm3600_vm9, %v13335_v10, -inf }
 0x47b   :  { %v13325_v53 = vpop.xlane.xlu0 %3822  ;;  %17475 = vst [vmem:[#allocation287_spill] sm:$0xff] %v13332_v9  ;;  %v3959_v10 = vsel %vm3604_vm10, %v13351_v26, -inf }
 0x47c   :  { %17473 = vst [vmem:[#allocation285_spill] sm:$0xff] %v13325_v53  ;;  %3936 = vmax.xlane.f32.xlu2 %v3935_v27  ;;  %v3072_v27 = vpop.f32.mrf.mxu0  ;;  %v3109_v53 = vpop.f32.mrf.mxu1 }
 0x47d   :  { %17478 = vst [vmem:[#allocation290_spill] sm:$0xff] %v13344_v7 }
 0x47e   :  { %17480 = vst [vmem:[#allocation292_spill] sm:$0xff] %v13351_v26 }
 0x47f   :  { %v13339_v54 = vpop.xlane.xlu2 %3810  ;;  %3951 = vmax.xlane.f32.xlu1 %v3950_v40  ;;  %v3965_v40 = vsel %vm3604_vm10, %v13344_v7, -inf }
 0x480   :  { %17477 = vst [vmem:[#allocation289_spill] sm:$0xff] %v13339_v54  ;;  %3957 = vmax.xlane.f32.xlu0 %v3956_v59  ;;  %v3146_v59 = vpop.f32.mrf.mxu2 }
 0x482   :  { %v13353_v54 = vpop.xlane.xlu1 %3825 }
 0x483   :  { %v13346_v9 = vpop.xlane.xlu0 %3831  ;;  %17481 = vst [vmem:[#allocation293_spill] sm:$0xff] %v13353_v54  ;;  %v13372_v54 = vadd.f32 %v13278_v33, %v3072_v27 }
 0x484   :  { %17479 = vst [vmem:[#allocation291_spill] sm:$0xff] %v13346_v9  ;;  %3945 = vmax.xlane.f32.xlu2 %v3944_v30  ;;  %v13365_v30 = vadd.f32 %v13278_v33, %v3109_v53  ;;  %v3953_v9 = vsel %vm3604_vm10, %v13356_v6, -inf  ;;  %v3075_v52 = vpop.f32.mrf.mxu0 }
 0x485   :  { %17486 = vst [vmem:[#allocation298_spill] sm:$0xff] %v13372_v54  ;;  %v3968_v6 = vsel %vm3600_vm9, %v13372_v54, -inf  ;;  %v13398_v54 = vadd.f32 %v13248_v49, %v3075_v52 }
 0x486   :  { %17484 = vst [vmem:[#allocation296_spill] sm:$0xff] %v13365_v30 }
 0x487   :  { %v13360_v36 = vpop.xlane.xlu2 %3819  ;;  %3960 = vmax.xlane.f32.xlu1 %v3959_v10  ;;  %v3974_v10 = vsel %vm3600_vm9, %v13365_v30, -inf  ;;  %17494 = vst [vmem:[#allocation306_spill] sm:$0xff] %v13398_v54 }
 0x488   :  { %17483 = vst [vmem:[#allocation295_spill] sm:$0xff] %v13360_v36  ;;  %3966 = vmax.xlane.f32.xlu0 %v3965_v40  ;;  %v3112_v40 = vpop.f32.mrf.mxu1  ;;  %v13377_v36 = vadd.f32 %v13278_v33, %v3035_v45  ;;  %v3149_v53 = vpop.f32.mrf.mxu2 }
 0x489   :  { %v13393_v30 = vadd.f32 %v13248_v49, %v3112_v40 }
 0x48a   :  { %v13374_v7 = vpop.xlane.xlu1 %3834  ;;  %17488 = vst [vmem:[#allocation300_spill] sm:$0xff] %v13377_v36  ;;  %v3962_v45 = vsel %vm3600_vm9, %v13377_v36, -inf }
 0x48b   :  { %v13367_v8 = vpop.xlane.xlu0 %3840  ;;  %17487 = vst [vmem:[#allocation299_spill] sm:$0xff] %v13374_v7  ;;  %v3977_v36 = vsel %vm3604_vm10, %v13393_v30, -inf }
 0x48c   :  { %17485 = vst [vmem:[#allocation297_spill] sm:$0xff] %v13367_v8  ;;  %3954 = vmax.xlane.f32.xlu2 %v3953_v9  ;;  %v13386_v9 = vadd.f32 %v13248_v49, %v3149_v53  ;;  %v3220_v7 = vpop.f32.mrf.mxu0  ;;  %v3183_v8 = vpop.f32.mrf.mxu3 }
 0x48d   :  { %17492 = vst [vmem:[#allocation304_spill] sm:$0xff] %v13393_v30  ;;  %v13407_v40 = vadd.f32 %v13278_v33, %v3220_v7  ;;  %v13414_v52 = vadd.f32 %v13278_v33, %v3183_v8 }
 0x48e   :  { %17490 = vst [vmem:[#allocation302_spill] sm:$0xff] %v13386_v9 }
 0x48f   :  { %v13381_v26 = vpop.xlane.xlu2 %3828  ;;  %3969 = vmax.xlane.f32.xlu1 %v3968_v6  ;;  %v3983_v6 = vsel %vm3604_vm10, %v13386_v9, -inf  ;;  %17496 = vst [vmem:[#allocation308_spill] sm:$0xff] %v13407_v40  ;;  %v3992_v7 = vsel %vm3600_vm9, %v13407_v40, -inf }
 0x490   :  { %17489 = vst [vmem:[#allocation301_spill] sm:$0xff] %v13381_v26  ;;  %3975 = vmax.xlane.f32.xlu0 %v3974_v10  ;;  %v3257_v10 = vpop.f32.mrf.mxu1  ;;  %v3294_v40 = vpop.f32.mrf.mxu2 }
 0x491   :  { %17498 = vst [vmem:[#allocation310_spill] sm:$0xff] %v13414_v52 }
 0x492   :  { %v13395_v26 = vpop.xlane.xlu1 %3843 }
 0x493   :  { %v13388_v27 = vpop.xlane.xlu0 %3849  ;;  %17493 = vst [vmem:[#allocation305_spill] sm:$0xff] %v13395_v26 }
 0x494   :  { %17491 = vst [vmem:[#allocation303_spill] sm:$0xff] %v13388_v27  ;;  %3963 = vmax.xlane.f32.xlu2 %v3962_v45  ;;  %v3971_v27 = vsel %vm3604_vm10, %v13398_v54, -inf  ;;  %v3223_v26 = vpop.f32.mrf.mxu0  ;;  %v3186_v30 = vpop.f32.mrf.mxu3 }
 0x497   :  { %v13402_v53 = vpop.xlane.xlu2 %3837  ;;  %3978 = vmax.xlane.f32.xlu1 %v3977_v36 }
 0x498   :  { %17495 = vst [vmem:[#allocation307_spill] sm:$0xff] %v13402_v53  ;;  %3984 = vmax.xlane.f32.xlu0 %v3983_v6  ;;  %v13419_v6 = vadd.f32 %v13278_v33, %v3146_v59  ;;  %v3260_v36 = vpop.f32.mrf.mxu1 }
 0x499   :  { %v13428_v8 = vadd.f32 %v13248_v49, %v3260_v36 }
 0x49a   :  { %v13416_v9 = vpop.xlane.xlu1 %3852  ;;  %17500 = vst [vmem:[#allocation312_spill] sm:$0xff] %v13419_v6  ;;  %v3980_v59 = vsel %vm3600_vm9, %v13419_v6, -inf }
 0x49b   :  { %v13409_v45 = vpop.xlane.xlu0 %3858  ;;  %17499 = vst [vmem:[#allocation311_spill] sm:$0xff] %v13416_v9  ;;  %v13435_v9 = vadd.f32 %v13248_v49, %v3223_v26  ;;  %v4001_v36 = vsel %vm3604_vm10, %v13428_v8, -inf }
 0x49c   :  { %17497 = vst [vmem:[#allocation309_spill] sm:$0xff] %v13409_v45  ;;  %3972 = vmax.xlane.f32.xlu2 %v3971_v27  ;;  %v3986_v27 = vsel %vm3600_vm9, %v13414_v52, -inf }
 0x49d   :  { %17502 = vst [vmem:[#allocation314_spill] sm:$0xff] %v13428_v8 }
 0x49e   :  { %17504 = vst [vmem:[#allocation316_spill] sm:$0xff] %v13435_v9 }
 0x49f   :  { %v13423_v53 = vpop.xlane.xlu2 %3846  ;;  %3987 = vmax.xlane.f32.xlu1 %v3986_v27  ;;  %v3331_v27 = vpop.f32.mrf.mxu3 }
 0x4a0   :  { %17501 = vst [vmem:[#allocation313_spill] sm:$0xff] %v13423_v53  ;;  %3993 = vmax.xlane.f32.xlu0 %v3992_v7  ;;  %v3368_v7 = vpop.f32.mrf.mxu0  ;;  %v13440_v53 = vadd.f32 %v13248_v49, %v3186_v30  ;;  %v13449_v26 = vadd.f32 %v13278_v33, %v3331_v27 }
 0x4a2   :  { %v13437_v45 = vpop.xlane.xlu1 %3861  ;;  %17506 = vst [vmem:[#allocation318_spill] sm:$0xff] %v13440_v53  ;;  %v3989_v30 = vsel %vm3604_vm10, %v13440_v53, -inf }
 0x4a3   :  { %v13430_v54 = vpop.xlane.xlu0 %3867  ;;  %17505 = vst [vmem:[#allocation317_spill] sm:$0xff] %v13437_v45  ;;  %v3297_v45 = vpop.f32.mrf.mxu2 }
 0x4a4   :  { %17503 = vst [vmem:[#allocation315_spill] sm:$0xff] %v13430_v54  ;;  %3981 = vmax.xlane.f32.xlu2 %v3980_v59  ;;  %v3995_v59 = vsel %vm3604_vm10, %v13435_v9, -inf  ;;  %v13456_v54 = vadd.f32 %v13278_v33, %v3294_v40 }
 0x4a5   :  { %17508 = vst [vmem:[#allocation320_spill] sm:$0xff] %v13449_v26 }
 0x4a6   :  { %17510 = vst [vmem:[#allocation322_spill] sm:$0xff] %v13456_v54  ;;  %v4004_v53 = vsel %vm3600_vm9, %v13456_v54, -inf  ;;  %v13484_v54 = vadd.f32 %v13248_v49, %v3297_v45 }
 0x4a7   :  { %v13444_v52 = vpop.xlane.xlu2 %3855  ;;  %3996 = vmax.xlane.f32.xlu1 %v3995_v59  ;;  %v4010_v59 = vsel %vm3600_vm9, %v13449_v26, -inf }
 0x4a8   :  { %17507 = vst [vmem:[#allocation319_spill] sm:$0xff] %v13444_v52  ;;  %4002 = vmax.xlane.f32.xlu0 %v4001_v36  ;;  %v13461_v36 = vadd.f32 %v13278_v33, %v3257_v10  ;;  %v3371_v27 = vpop.f32.mrf.mxu0  ;;  %v17660_v52 = vld [vmem:[#allocation176_spill] sm:$0xff] }
 0x4a9   :  { %v13470_v40 = vadd.f32 %v13248_v49, %v3371_v27  ;;  %17518 = vst [vmem:[#allocation330_spill] sm:$0xff] %v13484_v54 }
 0x4aa   :  { %v13458_v8 = vpop.xlane.xlu1 %3870  ;;  %17512 = vst [vmem:[#allocation324_spill] sm:$0xff] %v13461_v36  ;;  %v3998_v10 = vsel %vm3600_vm9, %v13461_v36, -inf  ;;  %v3405_v36 = vpop.f32.mrf.mxu1 }
 0x4ab   :  { %v13451_v6 = vpop.xlane.xlu0 %3876  ;;  %17511 = vst [vmem:[#allocation323_spill] sm:$0xff] %v13458_v8  ;;  %v3442_v27 = vpop.f32.mrf.mxu2  ;;  %v13500_v45 = vadd.f32 %v13278_v33, %v3405_v36 }
 0x4ac   :  { %17509 = vst [vmem:[#allocation321_spill] sm:$0xff] %v13451_v6  ;;  %3990 = vmax.xlane.f32.xlu2 %v3989_v30  ;;  %v3334_v30 = vpop.f32.mrf.mxu3 }
 0x4ad   :  { %17514 = vst [vmem:[#allocation326_spill] sm:$0xff] %v13470_v40  ;;  %v13477_v26 = vadd.f32 %v13248_v49, %v3334_v30  ;;  %v4022_v36 = vsel %vm3600_vm9, %v13500_v45, -inf }
 0x4ae   :  { %17522 = vst [vmem:[#allocation334_spill] sm:$0xff] %v13500_v45 }
 0x4af   :  { %v13465_v9 = vpop.xlane.xlu2 %3864  ;;  %4005 = vmax.xlane.f32.xlu1 %v4004_v53  ;;  %17516 = vst [vmem:[#allocation328_spill] sm:$0xff] %v13477_v26  ;;  %v4019_v53 = vsel %vm3604_vm10, %v13470_v40, -inf }
 0x4b0   :  { %17513 = vst [vmem:[#allocation325_spill] sm:$0xff] %v13465_v9  ;;  %4011 = vmax.xlane.f32.xlu0 %v4010_v59  ;;  %v4035_v59 = vsub.f32 %v12384_v22, %v12820_v25  ;;  %v4007_v25 = vsel %vm3604_vm10, %v13484_v54, -inf }
 0x4b2   :  { %v13479_v8 = vpop.xlane.xlu1 %3879  ;;  %v4180_v30 = vmul.f32 1.442695, %v4035_v59  ;;  %v13507_v59 = vadd.f32 %v13278_v33, %v3368_v7 }
 0x4b3   :  { %v13472_v6 = vpop.xlane.xlu0 %3885  ;;  %17517 = vst [vmem:[#allocation329_spill] sm:$0xff] %v13479_v8  ;;  %v13493_v8 = vadd.f32 %v13278_v33, %v3442_v27 }
 0x4b4   :  { %17515 = vst [vmem:[#allocation327_spill] sm:$0xff] %v13472_v6  ;;  %3999 = vmax.xlane.f32.xlu2 %v3998_v10  ;;  %v4013_v10 = vsel %vm3604_vm10, %v13477_v26, -inf  ;;  %10306 = vpow2.f32 %v4180_v30  ;;  %v4016_v7 = vsel %vm3600_vm9, %v13507_v59, -inf }
 0x4b5   :  { %17520 = vst [vmem:[#allocation332_spill] sm:$0xff] %v13493_v8  ;;  %v4028_v27 = vsel %vm3600_vm9, %v13493_v8, -inf }
 0x4b6   :  { %17524 = vst [vmem:[#allocation336_spill] sm:$0xff] %v13507_v59  ;;  %v17558_v59 = vld [vmem:[#allocation149_spill] sm:$0xff] }
 0x4b7   :  { %v13488_v6 = vpop.xlane.xlu2 %3873  ;;  %4014 = vmax.xlane.f32.xlu1 %v4013_v10  ;;  %v4036_v10 = vsub.f32 %v12393_v46, %v12830_v51  ;;  %v3408_v51 = vpop.f32.mrf.mxu1 }
 0x4b8   :  { %17519 = vst [vmem:[#allocation331_spill] sm:$0xff] %v13488_v6  ;;  %4020 = vmax.xlane.f32.xlu0 %v4019_v53  ;;  %v4038_v53 = vsub.f32 %v12378_v13, %v12816_v23  ;;  %v3445_v23 = vpop.f32.mrf.mxu2 }
 0x4b9   :  { %v4182_v46 = vmul.f32 1.442695, %v4036_v10  ;;  %v4039_v10 = vsub.f32 %v12414_v62, %v12843_v60 }
 0x4ba   :  { %v13502_v40 = vpop.xlane.xlu1 %3888  ;;  %v4186_v13 = vmul.f32 1.442695, %v4038_v53  ;;  %v13523_v30 = vpop.eup %10306 }
 0x4bb   :  { %v13495_v22 = vpop.xlane.xlu0 %3894  ;;  %17523 = vst [vmem:[#allocation335_spill] sm:$0xff] %v13502_v40  ;;  %v4469_v53 = vsel %vm3604_vm10, %v13523_v30, 0.0  ;;  %v4188_v62 = vmul.f32 1.442695, %v4039_v10 }
 0x4bc   :  { %17521 = vst [vmem:[#allocation333_spill] sm:$0xff] %v13495_v22  ;;  %4008 = vmax.xlane.f32.xlu2 %v4007_v25  ;;  %v4034_v25 = vsub.f32 %v12353_v37, %v12797_v32  ;;  %10308 = vpow2.f32 %v4186_v13  ;;  %v4041_v37 = vsub.f32 %v12408_v61, %v12839_v29  ;;  %v13533_v32 = vadd.f32 %v13248_v49, %v3408_v51 }
 0x4bd   :  { %10310 = vpow2.f32 %v4182_v46  ;;  %v4037_v61 = vsub.f32 %v12428_v16, %v12853_v31  ;;  %v4044_v46 = vsub.f32 %v12441_v63, %v12862_v19  ;;  %v4042_v51 = vsub.f32 %v12449_v3, %v12866_v44 }
 0x4be   :  { %v4178_v45 = vmul.f32 1.442695, %v4034_v25  ;;  %17529 = vst [vmem:[#allocation341_spill] sm:$0xff] %v13533_v32  ;;  %v4192_v13 = vmul.f32 1.442695, %v4041_v37  ;;  %v4040_v63 = vsub.f32 %v12458_v15, %v12875_v5 }
 0x4bf   :  { %v13513_v26 = vpop.xlane.xlu2 %3882  ;;  %4023 = vmax.xlane.f32.xlu1 %v4022_v36  ;;  %v4198_v10 = vmul.f32 1.442695, %v4044_v46  ;;  %v4194_v3 = vmul.f32 1.442695, %v4042_v51 }
 0x4c0   :  { %17525 = vst [vmem:[#allocation337_spill] sm:$0xff] %v13513_v26  ;;  %4029 = vmax.xlane.f32.xlu0 %v4028_v27  ;;  %v13526_v27 = vadd.f32 %v13248_v49, %v3445_v23  ;;  %10312 = vpow2.f32 %v4178_v45  ;;  %v4025_v49 = vsel %vm3604_vm10, %v13533_v32, -inf  ;;  %v4184_v45 = vmul.f32 1.442695, %v4037_v61 }
 0x4c1   :  { %10314 = vpow2.f32 %v4192_v13 }
 0x4c2   :  { %17527 = vst [vmem:[#allocation339_spill] sm:$0xff] %v13526_v27  ;;  %v13528_v8 = vpop.xlane.xlu1 %3897  ;;  %v4031_v25 = vsel %vm3604_vm10, %v13526_v27, -inf  ;;  %v13549_v23 = vpop.eup %10308  ;;  %10316 = vpow2.f32 %v4188_v62  ;;  %v4047_v62 = vsub.f32 %v12475_v1, %v12884_v58  ;;  %v4043_v1 = vsub.f32 %v12493_v17, %v12897_v48  ;;  %v17556_v27 = vld [vmem:[#allocation148_spill] sm:$0xff] }
 0x4c3   :  { %v13519_v33 = vpop.xlane.xlu0 %3903  ;;  %17528 = vst [vmem:[#allocation340_spill] sm:$0xff] %v13528_v8  ;;  %v4478_v16 = vsel %vm3600_vm9, %v13549_v23, 0.0  ;;  %10318 = vpow2.f32 %v4184_v45  ;;  %v4045_v45 = vsub.f32 %v12481_v56, %v12892_v34 }
 0x4c4   :  { %17526 = vst [vmem:[#allocation338_spill] sm:$0xff] %v13519_v33  ;;  %4017 = vmax.xlane.f32.xlu2 %v4016_v7  ;;  %v13553_v7 = vpop.eup %10310  ;;  %10320 = vpow2.f32 %v4198_v10  ;;  %v4204_v51 = vmul.f32 1.442695, %v4047_v62 }
 0x4c5   :  { %10322 = vpow2.f32 %v4194_v3  ;;  %v4200_v56 = vmul.f32 1.442695, %v4045_v45  ;;  %v4050_v3 = vsub.f32 %v12508_v12, %v12906_v28  ;;  %v4046_v12 = vsub.f32 %v12525_v0, %v12918_v4 }
 0x4c6   :  { %v13559_v31 = vpop.eup %10312 }
 0x4c7   :  { %v13539_v36 = vpop.xlane.xlu2 %3891  ;;  %4032 = vmax.xlane.f32.xlu1 %v4031_v25  ;;  %v4466_v25 = vsel %vm3600_vm9, %v13559_v31, 0.0  ;;  %v13573_v13 = vpop.eup %10314  ;;  %v4210_v45 = vmul.f32 1.442695, %v4050_v3 }
 0x4c8   :  { %17530 = vst [vmem:[#allocation342_spill] sm:$0xff] %v13539_v36  ;;  %4470 = vadd.xlane.f32.xlu0 %v4469_v53  ;;  %v4472_v53 = vsel %vm3600_vm9, %v13553_v7, 0.0  ;;  %v13577_v61 = vpop.eup %10316  ;;  %v4487_v15 = vsel %vm3604_vm10, %v13573_v13, 0.0  ;;  %v17650_v36 = vld [vmem:[#allocation173_spill] sm:$0xff] }
 0x4c9   :  { %v13583_v5 = vpop.eup %10318 }
 0x4ca   :  { %v13551_v60 = vpop.xlane.xlu1 %3906  ;;  %v13597_v10 = vpop.eup %10320 }
 0x4cb   :  { %v13545_v29 = vpop.xlane.xlu0 %3912  ;;  %17532 = vst [vmem:[#allocation344_spill] sm:$0xff] %v13551_v60  ;;  %v4496_v17 = vsel %vm3600_vm9, %v13597_v10, 0.0 }
 0x4cc   :  { %17531 = vst [vmem:[#allocation343_spill] sm:$0xff] %v13545_v29  ;;  %4026 = vmax.xlane.f32.xlu2 %v4025_v49  ;;  %v4190_v49 = vmul.f32 1.442695, %v4040_v63  ;;  %v13601_v63 = vpop.eup %10322 }
 0x4ce   :  { %10324 = vpow2.f32 %v4190_v49  ;;  %v4048_v49 = vsub.f32 %v12516_v35, %v12913_v24 }
 0x4cf   :  { %v13563_v37 = vpop.xlane.xlu2 %3900  ;;  %4473 = vadd.xlane.f32.xlu1 %v4472_v53  ;;  %v4475_v53 = vsel %vm3604_vm10, %v13583_v5, 0.0  ;;  %10326 = vpow2.f32 %v4204_v51 }
 0x4d0   :  { %17533 = vst [vmem:[#allocation345_spill] sm:$0xff] %v13563_v37  ;;  %4479 = vadd.xlane.f32.xlu0 %v4478_v16  ;;  %v4481_v16 = vsel %vm3604_vm10, %v13577_v61, 0.0  ;;  %10328 = vpow2.f32 %v4200_v56  ;;  %v4206_v35 = vmul.f32 1.442695, %v4048_v49  ;;  %v4053_v56 = vsub.f32 %v12539_v2, %v12927_v57 }
 0x4d1   :  { %v4049_v2 = vsub.f32 %v12557_v38, %v12939_v21 }
 0x4d2   :  { %v13575_v44 = vpop.xlane.xlu1 %3915  ;;  %v4216_v49 = vmul.f32 1.442695, %v4053_v56 }
 0x4d3   :  { %v13569_v19 = vpop.xlane.xlu0 %3921  ;;  %17535 = vst [vmem:[#allocation347_spill] sm:$0xff] %v13575_v44 }
 0x4d4   :  { %17534 = vst [vmem:[#allocation346_spill] sm:$0xff] %v13569_v19  ;;  %4467 = vadd.xlane.f32.xlu2 %v4466_v25  ;;  %v4196_v25 = vmul.f32 1.442695, %v4043_v1  ;;  %v13607_v48 = vpop.eup %10324 }
 0x4d5   :  { %v13621_v51 = vpop.eup %10326 }
 0x4d6   :  { %10330 = vpow2.f32 %v4196_v25  ;;  %v13625_v1 = vpop.eup %10328  ;;  %v4505_v0 = vsel %vm3604_vm10, %v13621_v51, 0.0  ;;  %v4051_v25 = vsub.f32 %v12548_v43, %v12934_v47 }
 0x4d7   :  { %v13587_v46 = vpop.xlane.xlu2 %3909  ;;  %4482 = vadd.xlane.f32.xlu1 %v4481_v16  ;;  %v4484_v16 = vsel %vm3600_vm9, %v13607_v48, 0.0  ;;  %10332 = vpow2.f32 %v4210_v45 }
 0x4d8   :  { %17536 = vst [vmem:[#allocation348_spill] sm:$0xff] %v13587_v46  ;;  %4488 = vadd.xlane.f32.xlu0 %v4487_v15  ;;  %v4490_v15 = vsel %vm3600_vm9, %v13601_v63, 0.0  ;;  %10334 = vpow2.f32 %v4206_v35  ;;  %v4212_v43 = vmul.f32 1.442695, %v4051_v25  ;;  %v4056_v35 = vsub.f32 %v12573_v11, %v12948_v18 }
 0x4d9   :  { %v4052_v11 = vsub.f32 %v12589_v39, %v12960_v50 }
 0x4da   :  { %v13599_v34 = vpop.xlane.xlu1 %3924  ;;  %v4222_v25 = vmul.f32 1.442695, %v4056_v35 }
 0x4db   :  { %v13593_v58 = vpop.xlane.xlu0 %3930  ;;  %17538 = vst [vmem:[#allocation350_spill] sm:$0xff] %v13599_v34 }
 0x4dc   :  { %17537 = vst [vmem:[#allocation349_spill] sm:$0xff] %v13593_v58  ;;  %4476 = vadd.xlane.f32.xlu2 %v4475_v53  ;;  %v4202_v53 = vmul.f32 1.442695, %v4046_v12  ;;  %v13631_v4 = vpop.eup %10330 }
 0x4dd   :  { %v13645_v45 = vpop.eup %10332 }
 0x4de   :  { %10336 = vpow2.f32 %v4202_v53  ;;  %v13649_v12 = vpop.eup %10334  ;;  %v4514_v38 = vsel %vm3600_vm9, %v13645_v45, 0.0  ;;  %v4054_v53 = vsub.f32 %v12582_v14, %v12955_v42 }
 0x4df   :  { %v13611_v62 = vpop.xlane.xlu2 %3918  ;;  %4491 = vadd.xlane.f32.xlu1 %v4490_v15  ;;  %v4493_v15 = vsel %vm3604_vm10, %v13631_v4, 0.0  ;;  %10338 = vpow2.f32 %v4216_v49 }
 0x4e0   :  { %17539 = vst [vmem:[#allocation351_spill] sm:$0xff] %v13611_v62  ;;  %4497 = vadd.xlane.f32.xlu0 %v4496_v17  ;;  %v4499_v17 = vsel %vm3604_vm10, %v13625_v1, 0.0  ;;  %10340 = vpow2.f32 %v4212_v43  ;;  %v4218_v14 = vmul.f32 1.442695, %v4054_v53  ;;  %v4059_v43 = vsub.f32 %v12604_v20, %v12969_v41 }
 0x4e2   :  { %v13623_v24 = vpop.xlane.xlu1 %3933 }
 0x4e3   :  { %v13617_v28 = vpop.xlane.xlu0 %3939  ;;  %17541 = vst [vmem:[#allocation353_spill] sm:$0xff] %v13623_v24 }
 0x4e4   :  { %17540 = vst [vmem:[#allocation352_spill] sm:$0xff] %v13617_v28  ;;  %4485 = vadd.xlane.f32.xlu2 %v4484_v16  ;;  %v4208_v16 = vmul.f32 1.442695, %v4049_v2  ;;  %v13655_v21 = vpop.eup %10336 }
 0x4e5   :  { %v13669_v49 = vpop.eup %10338 }
 0x4e6   :  { %10342 = vpow2.f32 %v4208_v16  ;;  %17547 = vst [vmem:[#allocation359_spill] sm:$0xff] %v13669_v49  ;;  %v13673_v2 = vpop.eup %10340  ;;  %v4523_v39 = vsel %vm3604_vm10, %v13669_v49, 0.0  ;;  %v17549_v16 = vld [vmem:[#allocation146_spill] sm:$0xff] }
 0x4e7   :  { %v13635_v3 = vpop.xlane.xlu2 %3927  ;;  %4500 = vadd.xlane.f32.xlu1 %v4499_v17  ;;  %v4502_v17 = vsel %vm3600_vm9, %v13655_v21, 0.0  ;;  %10344 = vpow2.f32 %v4222_v25  ;;  %v4057_v35 = vsub.f32 %v17549_v16, %v12976_v55  ;;  %v4517_v53 = vsel %vm3604_vm10, %v13673_v2, 0.0  ;;  %v17551_v25 = vld [vmem:[#allocation193_spill] sm:$0xff] }
 0x4e8   :  { %17542 = vst [vmem:[#allocation354_spill] sm:$0xff] %v13635_v3  ;;  %4506 = vadd.xlane.f32.xlu0 %v4505_v0  ;;  %v4508_v0 = vsel %vm3600_vm9, %v13649_v12, 0.0  ;;  %10346 = vpow2.f32 %v4218_v14 }
 0x4e9   :  { %v4224_v55 = vmul.f32 1.442695, %v4057_v35 }
 0x4ea   :  { %v13647_v47 = vpop.xlane.xlu1 %3942 }
 0x4eb   :  { %v13641_v57 = vpop.xlane.xlu0 %3948  ;;  %17544 = vst [vmem:[#allocation356_spill] sm:$0xff] %v13647_v47 }
 0x4ec   :  { %17543 = vst [vmem:[#allocation355_spill] sm:$0xff] %v13641_v57  ;;  %4494 = vadd.xlane.f32.xlu2 %v4493_v15  ;;  %v4214_v15 = vmul.f32 1.442695, %v4052_v11  ;;  %v13679_v50 = vpop.eup %10342  ;;  %v17552_v11 = vld [vmem:[#allocation147_spill] sm:$0xff] }
 0x4ed   :  { %v4055_v20 = vsub.f32 %v17552_v11, %v17551_v25  ;;  %v13693_v14 = vpop.eup %10344  ;;  %v17557_v11 = vld [vmem:[#allocation197_spill] sm:$0xff] }
 0x4ee   :  { %10348 = vpow2.f32 %v4214_v15  ;;  %v4060_v54 = vsub.f32 %v17558_v59, %v17557_v11 }
 0x4ef   :  { %v13659_v56 = vpop.xlane.xlu2 %3936  ;;  %4509 = vadd.xlane.f32.xlu1 %v4508_v0  ;;  %v4228_v0 = vmul.f32 1.442695, %v4059_v43  ;;  %v4220_v15 = vmul.f32 1.442695, %v4055_v20  ;;  %v17555_v43 = vld [vmem:[#allocation195_spill] sm:$0xff] }
 0x4f0   :  { %17545 = vst [vmem:[#allocation357_spill] sm:$0xff] %v13659_v56  ;;  %4515 = vadd.xlane.f32.xlu0 %v4514_v38  ;;  %v4062_v32 = vsub.f32 %v17556_v27, %v17555_v43  ;;  %v17560_v20 = vld [vmem:[#allocation199_spill] sm:$0xff]  ;;  %v4230_v59 = vmul.f32 1.442695, %v4060_v54 }
 0x4f1   :  { %10350 = vpow2.f32 %v4228_v0 }
 0x4f2   :  { %v13671_v42 = vpop.xlane.xlu1 %3951  ;;  %10352 = vpow2.f32 %v4224_v55  ;;  %v4234_v0 = vmul.f32 1.442695, %v4062_v32  ;;  %v17565_v32 = vld [vmem:[#allocation201_spill] sm:$0xff] }
 0x4f3   :  { %v13665_v18 = vpop.xlane.xlu0 %3957  ;;  %17548 = vst [vmem:[#allocation360_spill] sm:$0xff] %v13671_v42  ;;  %10354 = vpow2.f32 %v4220_v15 }
 0x4f4   :  { %17546 = vst [vmem:[#allocation358_spill] sm:$0xff] %v13665_v18  ;;  %4503 = vadd.xlane.f32.xlu2 %v4502_v17  ;;  %v4511_v17 = vsel %vm3604_vm10, %v13679_v50, 0.0  ;;  %10356 = vpow2.f32 %v4234_v0 }
 0x4f5   :  { %10358 = vpow2.f32 %v4230_v59 }
 0x4f7   :  { %v13683_v38 = vpop.xlane.xlu2 %3945  ;;  %4518 = vadd.xlane.f32.xlu1 %v4517_v53  ;;  %v4532_v53 = vsel %vm3600_vm9, %v13693_v14, 0.0 }
 0x4f8   :  { %17550 = vst [vmem:[#allocation146_spill] sm:$0xff] %v13683_v38  ;;  %4524 = vadd.xlane.f32.xlu0 %v4523_v39  ;;  %v13697_v39 = vpop.eup %10346 }
 0x4f9   :  { %v13703_v25 = vpop.eup %10348 }
 0x4fa   :  { %v13695_v16 = vpop.xlane.xlu1 %3960  ;;  %v4520_v55 = vsel %vm3600_vm9, %v13703_v25, 0.0 }
 0x4fb   :  { %v13689_v41 = vpop.xlane.xlu0 %3966  ;;  %17554 = vst [vmem:[#allocation147_spill] sm:$0xff] %v13695_v16  ;;  %v13717_v16 = vpop.eup %10350 }
 0x4fc   :  { %17553 = vst [vmem:[#allocation193_spill] sm:$0xff] %v13689_v41  ;;  %4512 = vadd.xlane.f32.xlu2 %v4511_v17  ;;  %v4526_v17 = vsel %vm3600_vm9, %v13697_v39, 0.0  ;;  %v17561_v41 = vld [vmem:[#allocation150_spill] sm:$0xff] }
 0x4fd   :  { %v4058_v27 = vsub.f32 %v17561_v41, %v17560_v20  ;;  %17563 = vst [vmem:[#allocation197_spill] sm:$0xff] %v13717_v16  ;;  %v4541_v41 = vsel %vm3604_vm10, %v13717_v16, 0.0  ;;  %v17567_v20 = vld [vmem:[#allocation203_spill] sm:$0xff] }
 0x4ff   :  { %v13707_v35 = vpop.xlane.xlu2 %3954  ;;  %4527 = vadd.xlane.f32.xlu1 %v4526_v17  ;;  %v4226_v15 = vmul.f32 1.442695, %v4058_v27  ;;  %v17570_v27 = vld [vmem:[#allocation205_spill] sm:$0xff] }
 0x500   :  { %17559 = vst [vmem:[#allocation195_spill] sm:$0xff] %v13707_v35  ;;  %4533 = vadd.xlane.f32.xlu0 %v4532_v53  ;;  %v13721_v53 = vpop.eup %10352  ;;  %v17566_v35 = vld [vmem:[#allocation151_spill] sm:$0xff] }
 0x501   :  { %v4065_v57 = vsub.f32 %v17566_v35, %v17565_v32  ;;  %v13727_v17 = vpop.eup %10354  ;;  %10360 = vpow2.f32 %v4226_v15 }
 0x502   :  { %v13719_v11 = vpop.xlane.xlu1 %3969  ;;  %v4529_v59 = vsel %vm3604_vm10, %v13727_v17, 0.0  ;;  %v13741_v42 = vpop.eup %10356 }
 0x503   :  { %v13713_v43 = vpop.xlane.xlu0 %3975  ;;  %17564 = vst [vmem:[#allocation149_spill] sm:$0xff] %v13719_v11  ;;  %v4240_v0 = vmul.f32 1.442695, %v4065_v57  ;;  %v17571_v11 = vld [vmem:[#allocation153_spill] sm:$0xff]  ;;  %v17576_v57 = vld [vmem:[#allocation207_spill] sm:$0xff] }
 0x504   :  { %17562 = vst [vmem:[#allocation148_spill] sm:$0xff] %v13713_v43  ;;  %4521 = vadd.xlane.f32.xlu2 %v4520_v55  ;;  %v17568_v43 = vld [vmem:[#allocation152_spill] sm:$0xff]  ;;  %v4535_v55 = vsel %vm3604_vm10, %v13721_v53, 0.0  ;;  %v4061_v35 = vsub.f32 %v17571_v11, %v17570_v27  ;;  %v4550_v11 = vsel %vm3600_vm9, %v13741_v42, 0.0  ;;  %v17578_v27 = vld [vmem:[#allocation209_spill] sm:$0xff] }
 0x505   :  { %v4063_v18 = vsub.f32 %v17568_v43, %v17567_v20  ;;  %17573 = vst [vmem:[#allocation201_spill] sm:$0xff] %v13741_v42  ;;  %10362 = vpow2.f32 %v4240_v0  ;;  %v17723_v42 = vld [vmem:[#allocation204_spill] sm:$0xff] }
 0x506   :  { %v4232_v15 = vmul.f32 1.442695, %v4061_v35  ;;  %v17581_v35 = vld [vmem:[#allocation211_spill] sm:$0xff] }
 0x507   :  { %v13731_v54 = vpop.xlane.xlu2 %3963  ;;  %4536 = vadd.xlane.f32.xlu1 %v4535_v55  ;;  %v4236_v43 = vmul.f32 1.442695, %v4063_v18 }
 0x508   :  { %17569 = vst [vmem:[#allocation199_spill] sm:$0xff] %v13731_v54  ;;  %4542 = vadd.xlane.f32.xlu0 %v4541_v41  ;;  %v13745_v41 = vpop.eup %10358  ;;  %v17577_v54 = vld [vmem:[#allocation154_spill] sm:$0xff] }
 0x509   :  { %17575 = vst [vmem:[#allocation203_spill] sm:$0xff] %v13745_v41  ;;  %v4068_v58 = vsub.f32 %v17577_v54, %v17576_v57  ;;  %v13751_v55 = vpop.eup %10360  ;;  %10364 = vpow2.f32 %v4236_v43 }
 0x50a   :  { %v13743_v20 = vpop.xlane.xlu1 %3978  ;;  %10366 = vpow2.f32 %v4232_v15  ;;  %v4538_v43 = vsel %vm3600_vm9, %v13751_v55, 0.0 }
 0x50b   :  { %v13737_v32 = vpop.xlane.xlu0 %3984  ;;  %17574 = vst [vmem:[#allocation151_spill] sm:$0xff] %v13743_v20  ;;  %v4246_v0 = vmul.f32 1.442695, %v4068_v58  ;;  %v17582_v20 = vld [vmem:[#allocation156_spill] sm:$0xff]  ;;  %v13765_v47 = vpop.eup %10362  ;;  %v17587_v58 = vld [vmem:[#allocation213_spill] sm:$0xff] }
 0x50c   :  { %17572 = vst [vmem:[#allocation150_spill] sm:$0xff] %v13737_v32  ;;  %4530 = vadd.xlane.f32.xlu2 %v4529_v59  ;;  %v17579_v32 = vld [vmem:[#allocation155_spill] sm:$0xff]  ;;  %v4544_v59 = vsel %vm3600_vm9, %v13745_v41, 0.0  ;;  %v4064_v54 = vsub.f32 %v17582_v20, %v17581_v35  ;;  %v4559_v20 = vsel %vm3604_vm10, %v13765_v47, 0.0 }
 0x50d   :  { %v4066_v38 = vsub.f32 %v17579_v32, %v17578_v27  ;;  %17584 = vst [vmem:[#allocation153_spill] sm:$0xff] %v13765_v47  ;;  %10368 = vpow2.f32 %v4246_v0  ;;  %v17590_v35 = vld [vmem:[#allocation215_spill] sm:$0xff] }
 0x50e   :  { %v4238_v15 = vmul.f32 1.442695, %v4064_v54  ;;  %v17593_v54 = vld [vmem:[#allocation217_spill] sm:$0xff] }
 0x50f   :  { %v13755_v18 = vpop.xlane.xlu2 %3972  ;;  %4545 = vadd.xlane.f32.xlu1 %v4544_v59  ;;  %v4242_v32 = vmul.f32 1.442695, %v4066_v38 }
 0x510   :  { %17580 = vst [vmem:[#allocation152_spill] sm:$0xff] %v13755_v18  ;;  %4551 = vadd.xlane.f32.xlu0 %v4550_v11  ;;  %v13769_v11 = vpop.eup %10364  ;;  %v17588_v18 = vld [vmem:[#allocation157_spill] sm:$0xff] }
 0x511   :  { %17586 = vst [vmem:[#allocation154_spill] sm:$0xff] %v13769_v11  ;;  %v4071_v34 = vsub.f32 %v17588_v18, %v17587_v58  ;;  %v13775_v59 = vpop.eup %10366  ;;  %10370 = vpow2.f32 %v4242_v32 }
 0x512   :  { %v13767_v27 = vpop.xlane.xlu1 %3987  ;;  %17589 = vst [vmem:[#allocation209_spill] sm:$0xff] %v13775_v59  ;;  %10372 = vpow2.f32 %v4238_v15  ;;  %v4547_v32 = vsel %vm3604_vm10, %v13775_v59, 0.0  ;;  %v17689_v59 = vld [vmem:[#allocation186_spill] sm:$0xff] }
 0x513   :  { %v13761_v57 = vpop.xlane.xlu0 %3993  ;;  %17585 = vst [vmem:[#allocation207_spill] sm:$0xff] %v13767_v27  ;;  %v4252_v0 = vmul.f32 1.442695, %v4071_v34  ;;  %v17594_v27 = vld [vmem:[#allocation159_spill] sm:$0xff]  ;;  %v13789_v28 = vpop.eup %10368 }
 0x514   :  { %17583 = vst [vmem:[#allocation205_spill] sm:$0xff] %v13761_v57  ;;  %4539 = vadd.xlane.f32.xlu2 %v4538_v43  ;;  %v17591_v57 = vld [vmem:[#allocation158_spill] sm:$0xff]  ;;  %v4553_v43 = vsel %vm3604_vm10, %v13769_v11, 0.0  ;;  %v4067_v18 = vsub.f32 %v17594_v27, %v17593_v54  ;;  %v17599_v34 = vld [vmem:[#allocation219_spill] sm:$0xff]  ;;  %v4568_v27 = vsel %vm3600_vm9, %v13789_v28, 0.0  ;;  %v17602_v54 = vld [vmem:[#allocation221_spill] sm:$0xff] }
 0x515   :  { %v4069_v56 = vsub.f32 %v17591_v57, %v17590_v35  ;;  %17596 = vst [vmem:[#allocation156_spill] sm:$0xff] %v13789_v28  ;;  %10374 = vpow2.f32 %v4252_v0  ;;  %v17680_v28 = vld [vmem:[#allocation183_spill] sm:$0xff]  ;;  %v17707_v11 = vld [vmem:[#allocation192_spill] sm:$0xff] }
 0x516   :  { %v4244_v15 = vmul.f32 1.442695, %v4067_v18  ;;  %v17605_v18 = vld [vmem:[#allocation223_spill] sm:$0xff] }
 0x517   :  { %v13779_v38 = vpop.xlane.xlu2 %3981  ;;  %4554 = vadd.xlane.f32.xlu1 %v4553_v43  ;;  %v4248_v57 = vmul.f32 1.442695, %v4069_v56 }
 0x518   :  { %17592 = vst [vmem:[#allocation155_spill] sm:$0xff] %v13779_v38  ;;  %4560 = vadd.xlane.f32.xlu0 %v4559_v20  ;;  %v13793_v20 = vpop.eup %10370  ;;  %v17600_v38 = vld [vmem:[#allocation160_spill] sm:$0xff] }
 0x519   :  { %17598 = vst [vmem:[#allocation157_spill] sm:$0xff] %v13793_v20  ;;  %v4074_v19 = vsub.f32 %v17600_v38, %v17599_v34  ;;  %v13799_v43 = vpop.eup %10372  ;;  %10376 = vpow2.f32 %v4248_v57 }
 0x51a   :  { %v13791_v35 = vpop.xlane.xlu1 %3996  ;;  %17601 = vst [vmem:[#allocation215_spill] sm:$0xff] %v13799_v43  ;;  %10378 = vpow2.f32 %v4244_v15  ;;  %v4556_v57 = vsel %vm3600_vm9, %v13799_v43, 0.0  ;;  %v17716_v43 = vld [vmem:[#allocation198_spill] sm:$0xff] }
 0x51b   :  { %v13785_v58 = vpop.xlane.xlu0 %4002  ;;  %17597 = vst [vmem:[#allocation213_spill] sm:$0xff] %v13791_v35  ;;  %v4258_v0 = vmul.f32 1.442695, %v4074_v19  ;;  %v17606_v35 = vld [vmem:[#allocation162_spill] sm:$0xff]  ;;  %v13813_v62 = vpop.eup %10374  ;;  %v17611_v19 = vld [vmem:[#allocation225_spill] sm:$0xff] }
 0x51c   :  { %17595 = vst [vmem:[#allocation211_spill] sm:$0xff] %v13785_v58  ;;  %4548 = vadd.xlane.f32.xlu2 %v4547_v32  ;;  %v17603_v58 = vld [vmem:[#allocation161_spill] sm:$0xff]  ;;  %v4562_v32 = vsel %vm3600_vm9, %v13793_v20, 0.0  ;;  %v4070_v38 = vsub.f32 %v17606_v35, %v17605_v18  ;;  %v4577_v35 = vsel %vm3604_vm10, %v13813_v62, 0.0  ;;  %v17614_v18 = vld [vmem:[#allocation227_spill] sm:$0xff] }
 0x51d   :  { %v4072_v24 = vsub.f32 %v17603_v58, %v17602_v54  ;;  %17608 = vst [vmem:[#allocation159_spill] sm:$0xff] %v13813_v62  ;;  %10380 = vpow2.f32 %v4258_v0 }
 0x51e   :  { %v4250_v15 = vmul.f32 1.442695, %v4070_v38  ;;  %v17617_v38 = vld [vmem:[#allocation229_spill] sm:$0xff] }
 0x51f   :  { %v13803_v56 = vpop.xlane.xlu2 %3990  ;;  %4563 = vadd.xlane.f32.xlu1 %v4562_v32  ;;  %v4254_v58 = vmul.f32 1.442695, %v4072_v24 }
 0x520   :  { %17604 = vst [vmem:[#allocation158_spill] sm:$0xff] %v13803_v56  ;;  %4569 = vadd.xlane.f32.xlu0 %v4568_v27  ;;  %v13817_v27 = vpop.eup %10376  ;;  %v17612_v56 = vld [vmem:[#allocation163_spill] sm:$0xff] }
 0x521   :  { %17610 = vst [vmem:[#allocation160_spill] sm:$0xff] %v13817_v27  ;;  %v4077_v3 = vsub.f32 %v17612_v56, %v17611_v19  ;;  %v13823_v32 = vpop.eup %10378  ;;  %10382 = vpow2.f32 %v4254_v58 }
 0x522   :  { %v13815_v54 = vpop.xlane.xlu1 %4005  ;;  %17613 = vst [vmem:[#allocation221_spill] sm:$0xff] %v13823_v32  ;;  %10384 = vpow2.f32 %v4250_v15  ;;  %v4565_v58 = vsel %vm3604_vm10, %v13823_v32, 0.0  ;;  %v17698_v32 = vld [vmem:[#allocation189_spill] sm:$0xff] }
 0x523   :  { %v13809_v34 = vpop.xlane.xlu0 %4011  ;;  %17609 = vst [vmem:[#allocation219_spill] sm:$0xff] %v13815_v54  ;;  %v4264_v0 = vmul.f32 1.442695, %v4077_v3  ;;  %v17618_v54 = vld [vmem:[#allocation165_spill] sm:$0xff]  ;;  %v13837_v60 = vpop.eup %10380  ;;  %v17623_v3 = vld [vmem:[#allocation231_spill] sm:$0xff] }
 0x524   :  { %17607 = vst [vmem:[#allocation217_spill] sm:$0xff] %v13809_v34  ;;  %4557 = vadd.xlane.f32.xlu2 %v4556_v57  ;;  %v17615_v34 = vld [vmem:[#allocation164_spill] sm:$0xff]  ;;  %v4571_v57 = vsel %vm3604_vm10, %v13817_v27, 0.0  ;;  %v4073_v56 = vsub.f32 %v17618_v54, %v17617_v38  ;;  %v4586_v54 = vsel %vm3600_vm9, %v13837_v60, 0.0  ;;  %v17626_v38 = vld [vmem:[#allocation233_spill] sm:$0xff] }
 0x525   :  { %v4075_v37 = vsub.f32 %v17615_v34, %v17614_v18  ;;  %17620 = vst [vmem:[#allocation162_spill] sm:$0xff] %v13837_v60  ;;  %10386 = vpow2.f32 %v4264_v0 }
 0x526   :  { %v4256_v15 = vmul.f32 1.442695, %v4073_v56  ;;  %v17629_v56 = vld [vmem:[#allocation235_spill] sm:$0xff] }
 0x527   :  { %v13827_v24 = vpop.xlane.xlu2 %3999  ;;  %4572 = vadd.xlane.f32.xlu1 %v4571_v57  ;;  %v4260_v34 = vmul.f32 1.442695, %v4075_v37 }
 0x528   :  { %17616 = vst [vmem:[#allocation161_spill] sm:$0xff] %v13827_v24  ;;  %4578 = vadd.xlane.f32.xlu0 %v4577_v35  ;;  %v13841_v35 = vpop.eup %10382  ;;  %v17624_v24 = vld [vmem:[#allocation166_spill] sm:$0xff] }
 0x529   :  { %17622 = vst [vmem:[#allocation163_spill] sm:$0xff] %v13841_v35  ;;  %v4080_v29 = vsub.f32 %v17624_v24, %v17623_v3  ;;  %v13847_v57 = vpop.eup %10384  ;;  %10388 = vpow2.f32 %v4260_v34 }
 0x52a   :  { %v13839_v18 = vpop.xlane.xlu1 %4014  ;;  %17625 = vst [vmem:[#allocation227_spill] sm:$0xff] %v13847_v57  ;;  %10390 = vpow2.f32 %v4256_v15  ;;  %v4574_v34 = vsel %vm3600_vm9, %v13847_v57, 0.0 }
 0x52b   :  { %v13833_v19 = vpop.xlane.xlu0 %4020  ;;  %17621 = vst [vmem:[#allocation225_spill] sm:$0xff] %v13839_v18  ;;  %v4270_v0 = vmul.f32 1.442695, %v4080_v29  ;;  %v17630_v18 = vld [vmem:[#allocation168_spill] sm:$0xff]  ;;  %v13861_v22 = vpop.eup %10386  ;;  %v17635_v29 = vld [vmem:[#allocation237_spill] sm:$0xff] }
 0x52c   :  { %17619 = vst [vmem:[#allocation223_spill] sm:$0xff] %v13833_v19  ;;  %4566 = vadd.xlane.f32.xlu2 %v4565_v58  ;;  %v17627_v19 = vld [vmem:[#allocation167_spill] sm:$0xff]  ;;  %v4580_v58 = vsel %vm3600_vm9, %v13841_v35, 0.0  ;;  %v4076_v24 = vsub.f32 %v17630_v18, %v17629_v56  ;;  %v4595_v18 = vsel %vm3604_vm10, %v13861_v22, 0.0 }
 0x52d   :  { %v4078_v44 = vsub.f32 %v17627_v19, %v17626_v38  ;;  %17632 = vst [vmem:[#allocation165_spill] sm:$0xff] %v13861_v22  ;;  %10392 = vpow2.f32 %v4270_v0  ;;  %v17638_v56 = vld [vmem:[#allocation239_spill] sm:$0xff] }
 0x52e   :  { %v4262_v15 = vmul.f32 1.442695, %v4076_v24  ;;  %v17641_v24 = vld [vmem:[#allocation241_spill] sm:$0xff] }
 0x52f   :  { %v13851_v37 = vpop.xlane.xlu2 %4008  ;;  %4581 = vadd.xlane.f32.xlu1 %v4580_v58  ;;  %v4266_v19 = vmul.f32 1.442695, %v4078_v44 }
 0x530   :  { %17628 = vst [vmem:[#allocation164_spill] sm:$0xff] %v13851_v37  ;;  %4587 = vadd.xlane.f32.xlu0 %v4586_v54  ;;  %v13865_v54 = vpop.eup %10388  ;;  %v17636_v37 = vld [vmem:[#allocation169_spill] sm:$0xff] }
 0x531   :  { %17634 = vst [vmem:[#allocation166_spill] sm:$0xff] %v13865_v54  ;;  %v4083_v8 = vsub.f32 %v17636_v37, %v17635_v29  ;;  %v13871_v58 = vpop.eup %10390  ;;  %10394 = vpow2.f32 %v4266_v19 }
 0x532   :  { %v13863_v38 = vpop.xlane.xlu1 %4023  ;;  %17637 = vst [vmem:[#allocation233_spill] sm:$0xff] %v13871_v58  ;;  %10396 = vpow2.f32 %v4262_v15  ;;  %v4583_v19 = vsel %vm3604_vm10, %v13871_v58, 0.0 }
 0x533   :  { %v13857_v3 = vpop.xlane.xlu0 %4029  ;;  %17633 = vst [vmem:[#allocation231_spill] sm:$0xff] %v13863_v38  ;;  %v4276_v0 = vmul.f32 1.442695, %v4083_v8  ;;  %v17642_v38 = vld [vmem:[#allocation171_spill] sm:$0xff]  ;;  %v13885_v46 = vpop.eup %10392 }
 0x534   :  { %17631 = vst [vmem:[#allocation229_spill] sm:$0xff] %v13857_v3  ;;  %4575 = vadd.xlane.f32.xlu2 %v4574_v34  ;;  %v17639_v3 = vld [vmem:[#allocation170_spill] sm:$0xff]  ;;  %v4589_v34 = vsel %vm3604_vm10, %v13865_v54, 0.0  ;;  %v4079_v37 = vsub.f32 %v17642_v38, %v17641_v24  ;;  %v17646_v8 = vld [vmem:[#allocation243_spill] sm:$0xff]  ;;  %v4604_v38 = vsel %vm3600_vm9, %v13885_v46, 0.0  ;;  %v17649_v24 = vld [vmem:[#allocation245_spill] sm:$0xff] }
 0x535   :  { %v4081_v33 = vsub.f32 %v17639_v3, %v17638_v56  ;;  %17643 = vst [vmem:[#allocation235_spill] sm:$0xff] %v13885_v46  ;;  %10398 = vpow2.f32 %v4276_v0  ;;  %v4084_v6 = vsub.f32 %v17650_v36, %v17649_v24 }
 0x536   :  { %v4268_v15 = vmul.f32 1.442695, %v4079_v37  ;;  %v17652_v37 = vld [vmem:[#allocation247_spill] sm:$0xff] }
 0x537   :  { %v13875_v44 = vpop.xlane.xlu2 %4017  ;;  %4590 = vadd.xlane.f32.xlu1 %v4589_v34  ;;  %v4272_v3 = vmul.f32 1.442695, %v4081_v33  ;;  %v4278_v36 = vmul.f32 1.442695, %v4084_v6 }
 0x538   :  { %17640 = vst [vmem:[#allocation167_spill] sm:$0xff] %v13875_v44  ;;  %4596 = vadd.xlane.f32.xlu0 %v4595_v18  ;;  %v13889_v18 = vpop.eup %10394  ;;  %v17647_v44 = vld [vmem:[#allocation172_spill] sm:$0xff] }
 0x539   :  { %17645 = vst [vmem:[#allocation237_spill] sm:$0xff] %v13889_v18  ;;  %v4086_v26 = vsub.f32 %v17647_v44, %v17646_v8  ;;  %v13895_v34 = vpop.eup %10396  ;;  %10400 = vpow2.f32 %v4272_v3 }
 0x53a   :  { %v13887_v56 = vpop.xlane.xlu1 %4032  ;;  %17648 = vst [vmem:[#allocation169_spill] sm:$0xff] %v13895_v34  ;;  %10402 = vpow2.f32 %v4268_v15  ;;  %v4592_v3 = vsel %vm3600_vm9, %v13895_v34, 0.0  ;;  %v17662_v34 = vld [vmem:[#allocation177_spill] sm:$0xff] }
 0x53b   :  { %v13881_v29 = vpop.xlane.xlu0 %4470  ;;  %17644 = vst [vmem:[#allocation168_spill] sm:$0xff] %v13887_v56  ;;  %v4282_v0 = vmul.f32 1.442695, %v4086_v26  ;;  %v17653_v56 = vld [vmem:[#allocation174_spill] sm:$0xff]  ;;  %v13909_v40 = vpop.eup %10398  ;;  %v17656_v26 = vld [vmem:[#allocation249_spill] sm:$0xff] }
 0x53c   :  { %4584 = vadd.xlane.f32.xlu2 %v4583_v19  ;;  %v4598_v19 = vsel %vm3600_vm9, %v13889_v18, 0.0  ;;  %v4082_v44 = vsub.f32 %v17653_v56, %v17652_v37  ;;  %17654 = vst [vmem:[#allocation170_spill] sm:$0xff] %v13909_v40  ;;  %v4613_v56 = vsel %vm3604_vm10, %v13909_v40, 0.0  ;;  %v17659_v37 = vld [vmem:[#allocation251_spill] sm:$0xff]  ;;  %v17671_v18 = vld [vmem:[#allocation180_spill] sm:$0xff] }
 0x53d   :  { %10404 = vpow2.f32 %v4282_v0  ;;  %v4087_v22 = vsub.f32 %v17660_v52, %v17659_v37 }
 0x53e   :  { %v4274_v15 = vmul.f32 1.442695, %v4082_v44  ;;  %10406 = vpow2.f32 %v4278_v36  ;;  %v17661_v44 = vld [vmem:[#allocation253_spill] sm:$0xff] }
 0x53f   :  { %v13899_v33 = vpop.xlane.xlu2 %4026  ;;  %4599 = vadd.xlane.f32.xlu1 %v4598_v19  ;;  %v13913_v24 = vpop.eup %10400  ;;  %v4284_v52 = vmul.f32 1.442695, %v4087_v22 }
 0x540   :  { %4605 = vadd.xlane.f32.xlu0 %v4604_v38  ;;  %17651 = vst [vmem:[#allocation239_spill] sm:$0xff] %v13899_v33  ;;  %v17657_v33 = vld [vmem:[#allocation175_spill] sm:$0xff]  ;;  %v13919_v19 = vpop.eup %10402  ;;  %10408 = vpow2.f32 %v4274_v15 }
 0x541   :  { %17655 = vst [vmem:[#allocation241_spill] sm:$0xff] %v13913_v24  ;;  %v4089_v9 = vsub.f32 %v17657_v33, %v17656_v26  ;;  %v4085_v33 = vsub.f32 %v17662_v34, %v17661_v44  ;;  %v4601_v36 = vsel %vm3604_vm10, %v13919_v19, 0.0  ;;  %v17668_v44 = vld [vmem:[#allocation257_spill] sm:$0xff] }
 0x542   :  { %v13911_v38 = vpop.xlane.xlu1 %4473  ;;  %17658 = vst [vmem:[#allocation171_spill] sm:$0xff] %v13919_v19  ;;  %v17669_v19 = vld [vmem:[#allocation179_spill] sm:$0xff] }
 0x543   :  { %v13905_v8 = vpop.xlane.xlu0 %4479  ;;  %v4288_v0 = vmul.f32 1.442695, %v4089_v9  ;;  %v13933_v40 = vpop.eup %10404  ;;  %v4280_v15 = vmul.f32 1.442695, %v4085_v33  ;;  %v17665_v9 = vld [vmem:[#allocation255_spill] sm:$0xff]  ;;  %v4090_v46 = vsub.f32 %v17669_v19, %v17668_v44 }
 0x544   :  { %4593 = vadd.xlane.f32.xlu2 %v4592_v3  ;;  %v4607_v3 = vsel %vm3604_vm10, %v13913_v24, 0.0  ;;  %17663 = vst [vmem:[#allocation243_spill] sm:$0xff] %v13933_v40  ;;  %v13937_v37 = vpop.eup %10406  ;;  %v17666_v24 = vld [vmem:[#allocation178_spill] sm:$0xff]  ;;  %v4622_v34 = vsel %vm3600_vm9, %v13933_v40, 0.0  ;;  %v17670_v33 = vld [vmem:[#allocation259_spill] sm:$0xff] }
 0x545   :  { %17664 = vst [vmem:[#allocation172_spill] sm:$0xff] %v13937_v37  ;;  %10410 = vpow2.f32 %v4288_v0  ;;  %v4092_v27 = vsub.f32 %v17666_v24, %v17665_v9  ;;  %v4088_v24 = vsub.f32 %v17671_v18, %v17670_v33  ;;  %v4290_v19 = vmul.f32 1.442695, %v4090_v46  ;;  %v17677_v33 = vld [vmem:[#allocation263_spill] sm:$0xff] }
 0x546   :  { %10412 = vpow2.f32 %v4284_v52 }
 0x547   :  { %v13923_v6 = vpop.xlane.xlu2 %4467  ;;  %4608 = vadd.xlane.f32.xlu1 %v4607_v3  ;;  %v13943_v3 = vpop.eup %10408  ;;  %10414 = vpow2.f32 %v4280_v15  ;;  %v4294_v0 = vmul.f32 1.442695, %v4092_v27  ;;  %v4286_v15 = vmul.f32 1.442695, %v4088_v24  ;;  %v17674_v27 = vld [vmem:[#allocation261_spill] sm:$0xff] }
 0x548   :  { %4614 = vadd.xlane.f32.xlu0 %v4613_v56  ;;  %17667 = vst [vmem:[#allocation245_spill] sm:$0xff] %v13943_v3  ;;  %v4610_v52 = vsel %vm3600_vm9, %v13943_v3, 0.0  ;;  %v17678_v3 = vld [vmem:[#allocation182_spill] sm:$0xff]  ;;  %v17679_v24 = vld [vmem:[#allocation265_spill] sm:$0xff] }
 0x549   :  { %10416 = vpow2.f32 %v4294_v0  ;;  %v4093_v58 = vsub.f32 %v17678_v3, %v17677_v33 }
 0x54a   :  { %v13935_v56 = vpop.xlane.xlu1 %4482  ;;  %10418 = vpow2.f32 %v4290_v19 }
 0x54b   :  { %v13929_v26 = vpop.xlane.xlu0 %4488  ;;  %v13957_v40 = vpop.eup %10410  ;;  %10420 = vpow2.f32 %v4286_v15  ;;  %v4296_v3 = vmul.f32 1.442695, %v4093_v58 }
 0x54c   :  { %4602 = vadd.xlane.f32.xlu2 %v4601_v36  ;;  %v4616_v36 = vsel %vm3600_vm9, %v13937_v37, 0.0  ;;  %17672 = vst [vmem:[#allocation173_spill] sm:$0xff] %v13957_v40  ;;  %v13961_v44 = vpop.eup %10412  ;;  %v17675_v37 = vld [vmem:[#allocation181_spill] sm:$0xff]  ;;  %v4631_v18 = vsel %vm3604_vm10, %v13957_v40, 0.0 }
 0x54d   :  { %17673 = vst [vmem:[#allocation247_spill] sm:$0xff] %v13961_v44  ;;  %v4095_v54 = vsub.f32 %v17675_v37, %v17674_v27  ;;  %v4091_v37 = vsub.f32 %v17680_v28, %v17679_v24  ;;  %v17686_v24 = vld [vmem:[#allocation269_spill] sm:$0xff] }
 0x54f   :  { %v13947_v22 = vpop.xlane.xlu2 %4476  ;;  %4617 = vadd.xlane.f32.xlu1 %v4616_v36  ;;  %v13967_v36 = vpop.eup %10414  ;;  %v4300_v0 = vmul.f32 1.442695, %v4095_v54  ;;  %v4292_v15 = vmul.f32 1.442695, %v4091_v37  ;;  %v17683_v54 = vld [vmem:[#allocation267_spill] sm:$0xff] }
 0x550   :  { %4623 = vadd.xlane.f32.xlu0 %v4622_v34  ;;  %17676 = vst [vmem:[#allocation174_spill] sm:$0xff] %v13967_v36  ;;  %v4619_v19 = vsel %vm3604_vm10, %v13967_v36, 0.0  ;;  %v13981_v40 = vpop.eup %10416  ;;  %v17687_v36 = vld [vmem:[#allocation185_spill] sm:$0xff]  ;;  %v17688_v37 = vld [vmem:[#allocation271_spill] sm:$0xff] }
 0x551   :  { %17681 = vst [vmem:[#allocation249_spill] sm:$0xff] %v13981_v40  ;;  %v13985_v33 = vpop.eup %10418  ;;  %10422 = vpow2.f32 %v4300_v0  ;;  %v4640_v28 = vsel %vm3600_vm9, %v13981_v40, 0.0  ;;  %v4096_v60 = vsub.f32 %v17687_v36, %v17686_v24 }
 0x552   :  { %v13959_v34 = vpop.xlane.xlu1 %4491  ;;  %17682 = vst [vmem:[#allocation175_spill] sm:$0xff] %v13985_v33  ;;  %10424 = vpow2.f32 %v4296_v3 }
 0x553   :  { %v13953_v9 = vpop.xlane.xlu0 %4497  ;;  %10426 = vpow2.f32 %v4292_v15  ;;  %v4302_v36 = vmul.f32 1.442695, %v4096_v60 }
 0x554   :  { %4611 = vadd.xlane.f32.xlu2 %v4610_v52  ;;  %v4625_v52 = vsel %vm3604_vm10, %v13961_v44, 0.0  ;;  %v17684_v44 = vld [vmem:[#allocation184_spill] sm:$0xff] }
 0x555   :  { %v4098_v62 = vsub.f32 %v17684_v44, %v17683_v54  ;;  %v4094_v44 = vsub.f32 %v17689_v59, %v17688_v37  ;;  %v17695_v37 = vld [vmem:[#allocation275_spill] sm:$0xff] }
 0x557   :  { %v13971_v46 = vpop.xlane.xlu2 %4485  ;;  %4626 = vadd.xlane.f32.xlu1 %v4625_v52  ;;  %v13991_v52 = vpop.eup %10420  ;;  %v4306_v0 = vmul.f32 1.442695, %v4098_v62  ;;  %v4298_v15 = vmul.f32 1.442695, %v4094_v44  ;;  %v17692_v62 = vld [vmem:[#allocation273_spill] sm:$0xff] }
 0x558   :  { %4632 = vadd.xlane.f32.xlu0 %v4631_v18  ;;  %17685 = vst [vmem:[#allocation251_spill] sm:$0xff] %v13991_v52  ;;  %v4628_v3 = vsel %vm3600_vm9, %v13991_v52, 0.0  ;;  %v14005_v40 = vpop.eup %10422  ;;  %v17696_v52 = vld [vmem:[#allocation188_spill] sm:$0xff]  ;;  %v17697_v44 = vld [vmem:[#allocation277_spill] sm:$0xff] }
 0x559   :  { %17690 = vst [vmem:[#allocation176_spill] sm:$0xff] %v14005_v40  ;;  %v14009_v24 = vpop.eup %10424  ;;  %10428 = vpow2.f32 %v4306_v0  ;;  %v4649_v59 = vsel %vm3604_vm10, %v14005_v40, 0.0  ;;  %v4099_v57 = vsub.f32 %v17696_v52, %v17695_v37 }
 0x55a   :  { %v13983_v18 = vpop.xlane.xlu1 %4500  ;;  %17691 = vst [vmem:[#allocation253_spill] sm:$0xff] %v14009_v24  ;;  %10430 = vpow2.f32 %v4302_v36 }
 0x55b   :  { %v13977_v27 = vpop.xlane.xlu0 %4506  ;;  %10432 = vpow2.f32 %v4298_v15  ;;  %v4308_v52 = vmul.f32 1.442695, %v4099_v57 }
 0x55c   :  { %4620 = vadd.xlane.f32.xlu2 %v4619_v19  ;;  %v4634_v19 = vsel %vm3600_vm9, %v13985_v33, 0.0  ;;  %v17693_v33 = vld [vmem:[#allocation187_spill] sm:$0xff] }
 0x55d   :  { %v4101_v35 = vsub.f32 %v17693_v33, %v17692_v62  ;;  %v4097_v33 = vsub.f32 %v17698_v32, %v17697_v44  ;;  %v17704_v44 = vld [vmem:[#allocation281_spill] sm:$0xff] }
 0x55f   :  { %v13995_v58 = vpop.xlane.xlu2 %4494  ;;  %4635 = vadd.xlane.f32.xlu1 %v4634_v19  ;;  %v14015_v19 = vpop.eup %10426  ;;  %v4312_v0 = vmul.f32 1.442695, %v4101_v35  ;;  %v4304_v15 = vmul.f32 1.442695, %v4097_v33  ;;  %v17701_v35 = vld [vmem:[#allocation279_spill] sm:$0xff] }
 0x560   :  { %4641 = vadd.xlane.f32.xlu0 %v4640_v28  ;;  %17694 = vst [vmem:[#allocation177_spill] sm:$0xff] %v14015_v19  ;;  %v4637_v36 = vsel %vm3604_vm10, %v14015_v19, 0.0  ;;  %v14029_v40 = vpop.eup %10428  ;;  %v17705_v19 = vld [vmem:[#allocation191_spill] sm:$0xff] }
 0x561   :  { %17699 = vst [vmem:[#allocation255_spill] sm:$0xff] %v14029_v40  ;;  %v14033_v37 = vpop.eup %10430  ;;  %10434 = vpow2.f32 %v4312_v0  ;;  %v4658_v32 = vsel %vm3600_vm9, %v14029_v40, 0.0  ;;  %v4102_v41 = vsub.f32 %v17705_v19, %v17704_v44  ;;  %v17706_v33 = vld [vmem:[#allocation283_spill] sm:$0xff] }
 0x562   :  { %v14007_v28 = vpop.xlane.xlu1 %4509  ;;  %17700 = vst [vmem:[#allocation178_spill] sm:$0xff] %v14033_v37  ;;  %10436 = vpow2.f32 %v4308_v52 }
 0x563   :  { %v14001_v54 = vpop.xlane.xlu0 %4515  ;;  %10438 = vpow2.f32 %v4304_v15  ;;  %v4314_v19 = vmul.f32 1.442695, %v4102_v41 }
 0x564   :  { %4629 = vadd.xlane.f32.xlu2 %v4628_v3  ;;  %v4643_v3 = vsel %vm3604_vm10, %v14009_v24, 0.0  ;;  %v17702_v24 = vld [vmem:[#allocation190_spill] sm:$0xff] }
 0x565   :  { %v4104_v47 = vsub.f32 %v17702_v24, %v17701_v35  ;;  %v4100_v24 = vsub.f32 %v17707_v11, %v17706_v33  ;;  %v17713_v33 = vld [vmem:[#allocation287_spill] sm:$0xff] }
 0x567   :  { %v14019_v60 = vpop.xlane.xlu2 %4503  ;;  %4644 = vadd.xlane.f32.xlu1 %v4643_v3  ;;  %v14039_v3 = vpop.eup %10432  ;;  %v4318_v0 = vmul.f32 1.442695, %v4104_v47  ;;  %v4310_v15 = vmul.f32 1.442695, %v4100_v24  ;;  %v17710_v47 = vld [vmem:[#allocation285_spill] sm:$0xff] }
 0x568   :  { %4650 = vadd.xlane.f32.xlu0 %v4649_v59  ;;  %17703 = vst [vmem:[#allocation257_spill] sm:$0xff] %v14039_v3  ;;  %v4646_v52 = vsel %vm3600_vm9, %v14039_v3, 0.0  ;;  %v14053_v40 = vpop.eup %10434  ;;  %v17714_v3 = vld [vmem:[#allocation196_spill] sm:$0xff]  ;;  %v17715_v24 = vld [vmem:[#allocation289_spill] sm:$0xff] }
 0x569   :  { %17708 = vst [vmem:[#allocation179_spill] sm:$0xff] %v14053_v40  ;;  %v14057_v44 = vpop.eup %10436  ;;  %10440 = vpow2.f32 %v4318_v0  ;;  %v4667_v11 = vsel %vm3604_vm10, %v14053_v40, 0.0  ;;  %v4105_v49 = vsub.f32 %v17714_v3, %v17713_v33 }
 0x56a   :  { %v14031_v59 = vpop.xlane.xlu1 %4518  ;;  %17709 = vst [vmem:[#allocation259_spill] sm:$0xff] %v14057_v44  ;;  %10442 = vpow2.f32 %v4314_v19 }
 0x56b   :  { %v14025_v62 = vpop.xlane.xlu0 %4524  ;;  %10444 = vpow2.f32 %v4310_v15  ;;  %v4320_v3 = vmul.f32 1.442695, %v4105_v49 }
 0x56c   :  { %4638 = vadd.xlane.f32.xlu2 %v4637_v36  ;;  %v4652_v36 = vsel %vm3600_vm9, %v14033_v37, 0.0  ;;  %v17711_v37 = vld [vmem:[#allocation194_spill] sm:$0xff] }
 0x56d   :  { %v4107_v20 = vsub.f32 %v17711_v37, %v17710_v47  ;;  %v4103_v37 = vsub.f32 %v17716_v43, %v17715_v24  ;;  %v17721_v24 = vld [vmem:[#allocation202_spill] sm:$0xff] }
 0x56f   :  { %v14043_v57 = vpop.xlane.xlu2 %4512  ;;  %4653 = vadd.xlane.f32.xlu1 %v4652_v36  ;;  %v14063_v36 = vpop.eup %10438  ;;  %v4324_v0 = vmul.f32 1.442695, %v4107_v20  ;;  %v4316_v15 = vmul.f32 1.442695, %v4103_v37 }
 0x570   :  { %4659 = vadd.xlane.f32.xlu0 %v4658_v32  ;;  %17712 = vst [vmem:[#allocation180_spill] sm:$0xff] %v14063_v36  ;;  %v4655_v19 = vsel %vm3604_vm10, %v14063_v36, 0.0  ;;  %v14077_v40 = vpop.eup %10440 }
 0x571   :  { %17717 = vst [vmem:[#allocation261_spill] sm:$0xff] %v14077_v40  ;;  %v14081_v33 = vpop.eup %10442  ;;  %10446 = vpow2.f32 %v4324_v0  ;;  %v4676_v20 = vsel %vm3600_vm9, %v14077_v40, 0.0 }
 0x572   :  { %v14055_v32 = vpop.xlane.xlu1 %4527  ;;  %17718 = vst [vmem:[#allocation181_spill] sm:$0xff] %v14081_v33  ;;  %v14085_v43 = vpop.eup %10444  ;;  %10448 = vpow2.f32 %v4320_v3  ;;  %v4670_v49 = vsel %vm3600_vm9, %v14081_v33, 0.0 }
 0x573   :  { %v14049_v35 = vpop.xlane.xlu0 %4533  ;;  %17719 = vst [vmem:[#allocation263_spill] sm:$0xff] %v14085_v43  ;;  %10450 = vpow2.f32 %v4316_v15  ;;  %v4664_v40 = vsel %vm3600_vm9, %v14085_v43, 0.0  ;;  %v17735_v43 = vld [vmem:[#allocation2_spill] sm:$0xff] }
 0x574   :  { %4647 = vadd.xlane.f32.xlu2 %v4646_v52  ;;  %v4661_v52 = vsel %vm3604_vm10, %v14057_v44, 0.0 }
 0x577   :  { %v14067_v41 = vpop.xlane.xlu2 %4521  ;;  %4662 = vadd.xlane.f32.xlu1 %v4661_v52  ;;  %v17720_v52 = vld [vmem:[#allocation293_spill] sm:$0xff]  ;;  %v14099_v3 = vpop.eup %10446 }
 0x578   :  { %4668 = vadd.xlane.f32.xlu0 %v4667_v11  ;;  %v4108_v44 = vsub.f32 %v17721_v24, %v17720_v52  ;;  %17724 = vst [vmem:[#allocation182_spill] sm:$0xff] %v14099_v3  ;;  %v14103_v52 = vpop.eup %10448  ;;  %v4685_v15 = vsel %vm3604_vm10, %v14099_v3, 0.0 }
 0x579   :  { %17726 = vst [vmem:[#allocation183_spill] sm:$0xff] %v14103_v52  ;;  %v14107_v33 = vpop.eup %10450 }
 0x57a   :  { %v14079_v11 = vpop.xlane.xlu1 %4536  ;;  %v4326_v16 = vmul.f32 1.442695, %v4108_v44  ;;  %17727 = vst [vmem:[#allocation267_spill] sm:$0xff] %v14107_v33  ;;  %v4673_v44 = vsel %vm3604_vm10, %v14107_v33, 0.0  ;;  %v17736_v33 = vld [vmem:[#allocation12_spill] sm:$0xff] }
 0x57b   :  { %v14073_v47 = vpop.xlane.xlu0 %4542 }
 0x57c   :  { %4656 = vadd.xlane.f32.xlu2 %v4655_v19  ;;  %v17722_v19 = vld [vmem:[#allocation295_spill] sm:$0xff]  ;;  %10452 = vpow2.f32 %v4326_v16 }
 0x57d   :  { %v4106_v0 = vsub.f32 %v17723_v42, %v17722_v19 }
 0x57f   :  { %v14089_v36 = vpop.xlane.xlu2 %4530  ;;  %4671 = vadd.xlane.f32.xlu1 %v4670_v49  ;;  %v4322_v24 = vmul.f32 1.442695, %v4106_v0  ;;  %v4679_v49 = vsel %vm3604_vm10, %v14103_v52, 0.0 }
 0x580   :  { %4677 = vadd.xlane.f32.xlu0 %v4676_v20 }
 0x581   :  { %10454 = vpow2.f32 %v4322_v24 }
 0x582   :  { %v14101_v20 = vpop.xlane.xlu1 %4545  ;;  %v14119_v0 = vpop.eup %10452  ;;  %10456 = vrcp.f32 %v13923_v6 }
 0x583   :  { %v14095_v37 = vpop.xlane.xlu0 %4551  ;;  %17725 = vst [vmem:[#allocation265_spill] sm:$0xff] %v14101_v20  ;;  %10458 = vrcp.f32 %v13881_v29 }
 0x584   :  { %4665 = vadd.xlane.f32.xlu2 %v4664_v40  ;;  %17730 = vst [vmem:[#allocation185_spill] sm:$0xff] %v14119_v0  ;;  %10460 = vrcp.f32 %v13905_v8 }
 0x585   :  { %10462 = vrcp.f32 %v13971_v46  ;;  %v17833_v46 = vld [vmem:[#allocation127_spill] sm:$0xff] }
 0x586   :  { %10464 = vrcp.f32 %v13959_v34 }
 0x587   :  { %v14109_v42 = vpop.xlane.xlu2 %4539  ;;  %4680 = vadd.xlane.f32.xlu1 %v4679_v49  ;;  %v14121_v3 = vpop.eup %10454  ;;  %10466 = vrcp.f32 %v13935_v56 }
 0x588   :  { %4686 = vadd.xlane.f32.xlu0 %v4685_v15  ;;  %17731 = vst [vmem:[#allocation271_spill] sm:$0xff] %v14121_v3  ;;  %v4688_v15 = vsel %vm3600_vm9, %v14119_v0, 0.0  ;;  %v4682_v49 = vsel %vm3600_vm9, %v14121_v3, 0.0  ;;  %10468 = vrcp.f32 %v13911_v38 }
 0x589   :  { %10470 = vrcp.f32 %v13929_v26 }
 0x58a   :  { %v14117_v19 = vpop.xlane.xlu1 %4554  ;;  %10472 = vrcp.f32 %v13995_v58  ;;  %v17838_v58 = vld [vmem:[#allocation47_spill] sm:$0xff] }
 0x58b   :  { %v14113_v40 = vpop.xlane.xlu0 %4560  ;;  %17729 = vst [vmem:[#allocation269_spill] sm:$0xff] %v14117_v19  ;;  %10474 = vrcp.f32 %v14019_v60 }
 0x58c   :  { %17728 = vst [vmem:[#allocation184_spill] sm:$0xff] %v14113_v40  ;;  %4674 = vadd.xlane.f32.xlu2 %v4673_v44  ;;  %v10120_v40 = vpack.i.bf16 %v17736_v33, %v17735_v43  ;;  %v17744_v33 = vld [vmem:[#allocation11_spill] sm:$0xff]  ;;  %10476 = vrcp.f32 %v13947_v22 }
 0x58d   :  { %10478 = vrcp.f32 %v14007_v28 }
 0x58e   :  { %10480 = vrcp.f32 %v14001_v54 }
 0x58f   :  { %v14123_v16 = vpop.xlane.xlu2 %4548  ;;  %4689 = vadd.xlane.f32.xlu1 %v4688_v15  ;;  %10482 = vrcp.f32 %v13977_v27 }
 0x590   :  { %17732 = vst [vmem:[#allocation186_spill] sm:$0xff] %v14123_v16  ;;  %10484 = vrcp.f32 %v13953_v9 }
 0x591   :  { %10486 = vrcp.f32 %v14043_v57 }
 0x592   :  { %v14131_v52 = vpop.xlane.xlu1 %4563 }
 0x593   :  { %v14127_v24 = vpop.xlane.xlu0 %4569  ;;  %17734 = vst [vmem:[#allocation187_spill] sm:$0xff] %v14131_v52  ;;  %v17759_v52 = vld [vmem:[#allocation30_spill] sm:$0xff] }
 0x594   :  { %17733 = vst [vmem:[#allocation273_spill] sm:$0xff] %v14127_v24  ;;  %4683 = vadd.xlane.f32.xlu2 %v4682_v49  ;;  %v17741_v49 = vld [vmem:[#allocation8_spill] sm:$0xff] }
 0x597   :  { %v14133_v44 = vpop.xlane.xlu2 %4557 }
 0x59a   :  { %v14140_v0 = vpop.xlane.xlu1 %4572 }
 0x59b   :  { %v14137_v20 = vpop.xlane.xlu0 %4578  ;;  %17738 = vst [vmem:[#allocation188_spill] sm:$0xff] %v14140_v0  ;;  %v17747_v0 = vld [vmem:[#allocation4_spill] sm:$0xff] }
 0x59c   :  { %17737 = vst [vmem:[#allocation275_spill] sm:$0xff] %v14137_v20  ;;  %10121 = vrot.lane.b32.xlu0 %v10120_v40, %s10953_s5  ;;  %v17746_v40 = vld [vmem:[#allocation15_spill] sm:$0xff] }
 0x59f   :  { %v14142_v15 = vpop.xlane.xlu2 %4566 }
 0x5a0   :  { %17739 = vst [vmem:[#allocation277_spill] sm:$0xff] %v14142_v15  ;;  %v17751_v15 = vld [vmem:[#allocation7_spill] sm:$0xff] }
 0x5a2   :  { %v14148_v3 = vpop.xlane.xlu1 %4581 }
 0x5a3   :  { %v14144_v24 = vpop.xlane.xlu0 %4587  ;;  %17742 = vst [vmem:[#allocation279_spill] sm:$0xff] %v14148_v3 }
 0x5a4   :  { %17740 = vst [vmem:[#allocation189_spill] sm:$0xff] %v14144_v24  ;;  %5260 = vrot.lane.b32.xlu0 %v17741_v49, %s10953_s5  ;;  %v17750_v49 = vld [vmem:[#allocation10_spill] sm:$0xff] }
 0x5a5   :  { %v10125_v3 = vpack.i.bf16 %v17751_v15, %v17750_v49 }
 0x5a7   :  { %v14150_v16 = vpop.xlane.xlu2 %4575 }
 0x5a8   :  { %17743 = vst [vmem:[#allocation190_spill] sm:$0xff] %v14150_v16  ;;  %5296 = vrot.lane.b32.xlu1 %v17744_v33, %s10953_s5  ;;  %v17752_v16 = vld [vmem:[#allocation6_spill] sm:$0xff]  ;;  %v17754_v33 = vld [vmem:[#allocation19_spill] sm:$0xff] }
 0x5aa   :  { %v14160_v20 = vpop.xlane.xlu1 %4590 }
 0x5ab   :  { %v14154_v43 = vpop.xlane.xlu0 %4596  ;;  %17748 = vst [vmem:[#allocation191_spill] sm:$0xff] %v14160_v20  ;;  %v17758_v20 = vld [vmem:[#allocation34_spill] sm:$0xff] }
 0x5ac   :  { %17745 = vst [vmem:[#allocation281_spill] sm:$0xff] %v14154_v43  ;;  %5332 = vrot.lane.b32.xlu0 %v17746_v40, %s10953_s5  ;;  %5188 = vrot.lane.b32.xlu2 %v17747_v0, %s10953_s5  ;;  %v17757_v43 = vld [vmem:[#allocation16_spill] sm:$0xff] }
 0x5af   :  { %v14162_v24 = vpop.xlane.xlu2 %4584 }
 0x5b0   :  { %17749 = vst [vmem:[#allocation283_spill] sm:$0xff] %v14162_v24  ;;  %5224 = vrot.lane.b32.xlu1 %v17752_v16, %s10953_s5  ;;  %v10130_v24 = vpack.i.bf16 %v17758_v20, %v17757_v43  ;;  %v17761_v16 = vld [vmem:[#allocation38_spill] sm:$0xff] }
 0x5b2   :  { %v14173_v40 = vpop.xlane.xlu1 %4599 }
 0x5b3   :  { %v14168_v19 = vpop.xlane.xlu0 %4605  ;;  %17755 = vst [vmem:[#allocation285_spill] sm:$0xff] %v14173_v40  ;;  %v17766_v40 = vld [vmem:[#allocation18_spill] sm:$0xff] }
 0x5b4   :  { %17753 = vst [vmem:[#allocation192_spill] sm:$0xff] %v14168_v19  ;;  %5404 = vrot.lane.b32.xlu0 %v17754_v33, %s10953_s5  ;;  %10126 = vrot.lane.b32.xlu2 %v10125_v3, %s10953_s5  ;;  %v17764_v33 = vld [vmem:[#allocation21_spill] sm:$0xff]  ;;  %v17765_v19 = vld [vmem:[#allocation20_spill] sm:$0xff] }
 0x5b7   :  { %v14175_v0 = vpop.xlane.xlu2 %4593 }
 0x5b8   :  { %17756 = vst [vmem:[#allocation194_spill] sm:$0xff] %v14175_v0  ;;  %5440 = vrot.lane.b32.xlu1 %v17759_v52, %s10953_s5  ;;  %v10135_v0 = vpack.i.bf16 %v17765_v19, %v17764_v33  ;;  %v17768_v52 = vld [vmem:[#allocation54_spill] sm:$0xff] }
 0x5ba   :  { %v14186_v49 = vpop.xlane.xlu1 %4608 }
 0x5bb   :  { %v14181_v15 = vpop.xlane.xlu0 %4614  ;;  %17762 = vst [vmem:[#allocation196_spill] sm:$0xff] %v14186_v49 }
 0x5bc   :  { %17760 = vst [vmem:[#allocation287_spill] sm:$0xff] %v14181_v15  ;;  %5476 = vrot.lane.b32.xlu0 %v17761_v16, %s10953_s5  ;;  %10131 = vrot.lane.b32.xlu2 %v10130_v24, %s10953_s5  ;;  %v17771_v16 = vld [vmem:[#allocation43_spill] sm:$0xff] }
 0x5bd   :  { %v17772_v15 = vld [vmem:[#allocation67_spill] sm:$0xff] }
 0x5be   :  { %v10140_v49 = vpack.i.bf16 %v17772_v15, %v17771_v16 }
 0x5bf   :  { %v14188_v3 = vpop.xlane.xlu2 %4602 }
 0x5c0   :  { %17763 = vst [vmem:[#allocation289_spill] sm:$0xff] %v14188_v3  ;;  %5368 = vrot.lane.b32.xlu1 %v17766_v40, %s10953_s5  ;;  %v17773_v3 = vld [vmem:[#allocation65_spill] sm:$0xff]  ;;  %v17775_v40 = vld [vmem:[#allocation66_spill] sm:$0xff] }
 0x5c2   :  { %v14199_v43 = vpop.xlane.xlu1 %4617 }
 0x5c3   :  { %v14194_v20 = vpop.xlane.xlu0 %4623  ;;  %17769 = vst [vmem:[#allocation293_spill] sm:$0xff] %v14199_v43  ;;  %v17779_v43 = vld [vmem:[#allocation44_spill] sm:$0xff] }
 0x5c4   :  { %17767 = vst [vmem:[#allocation198_spill] sm:$0xff] %v14194_v20  ;;  %5548 = vrot.lane.b32.xlu0 %v17768_v52, %s10953_s5  ;;  %10136 = vrot.lane.b32.xlu2 %v10135_v0, %s10953_s5  ;;  %v17778_v52 = vld [vmem:[#allocation58_spill] sm:$0xff] }
 0x5c5   :  { %v10145_v20 = vpack.i.bf16 %v17779_v43, %v17778_v52  ;;  %v17788_v43 = vld [vmem:[#allocation9_spill] sm:$0xff] }
 0x5c7   :  { %v14201_v24 = vpop.xlane.xlu2 %4611 }
 0x5c8   :  { %17770 = vst [vmem:[#allocation202_spill] sm:$0xff] %v14201_v24  ;;  %5584 = vrot.lane.b32.xlu1 %v17773_v3, %s10953_s5  ;;  %v17780_v24 = vld [vmem:[#allocation42_spill] sm:$0xff]  ;;  %v17782_v3 = vld [vmem:[#allocation89_spill] sm:$0xff] }
 0x5ca   :  { %v14212_v33 = vpop.xlane.xlu1 %4626 }
 0x5cb   :  { %v14207_v19 = vpop.xlane.xlu0 %4632  ;;  %17776 = vst [vmem:[#allocation204_spill] sm:$0xff] %v14212_v33  ;;  %v17787_v33 = vld [vmem:[#allocation3_spill] sm:$0xff] }
 0x5cc   :  { %17774 = vst [vmem:[#allocation295_spill] sm:$0xff] %v14207_v19  ;;  %5620 = vrot.lane.b32.xlu0 %v17775_v40, %s10953_s5  ;;  %10141 = vrot.lane.b32.xlu2 %v10140_v49, %s10953_s5  ;;  %v17785_v40 = vld [vmem:[#allocation68_spill] sm:$0xff]  ;;  %v17786_v19 = vld [vmem:[#allocation90_spill] sm:$0xff] }
 0x5cf   :  { %v14214_v0 = vpop.xlane.xlu2 %4620 }
 0x5d0   :  { %17777 = vst [vmem:[#allocation2_spill] sm:$0xff] %v14214_v0  ;;  %5512 = vrot.lane.b32.xlu1 %v17780_v24, %s10953_s5  ;;  %v10150_v0 = vpack.i.bf16 %v17786_v19, %v17785_v40  ;;  %v17795_v19 = vld [vmem:[#allocation33_spill] sm:$0xff] }
 0x5d1   :  { %v17798_v40 = vld [vmem:[#allocation5_spill] sm:$0xff] }
 0x5d2   :  { %v14227_v49 = vpop.xlane.xlu1 %4635 }
 0x5d3   :  { %v14220_v15 = vpop.xlane.xlu0 %4641  ;;  %17784 = vst [vmem:[#allocation11_spill] sm:$0xff] %v14227_v49  ;;  %v17794_v49 = vld [vmem:[#allocation78_spill] sm:$0xff] }
 0x5d4   :  { %17781 = vst [vmem:[#allocation12_spill] sm:$0xff] %v14220_v15  ;;  %5692 = vrot.lane.b32.xlu0 %v17782_v3, %s10953_s5  ;;  %10146 = vrot.lane.b32.xlu2 %v10145_v20, %s10953_s5  ;;  %v17791_v20 = vld [vmem:[#allocation91_spill] sm:$0xff]  ;;  %v17792_v3 = vld [vmem:[#allocation82_spill] sm:$0xff] }
 0x5d5   :  { %v10155_v15 = vpack.i.bf16 %v17792_v3, %v17791_v20  ;;  %v17801_v20 = vld [vmem:[#allocation31_spill] sm:$0xff] }
 0x5d7   :  { %v14225_v16 = vpop.xlane.xlu2 %4629 }
 0x5d8   :  { %17783 = vst [vmem:[#allocation8_spill] sm:$0xff] %v14225_v16  ;;  %5728 = vrot.lane.b32.xlu1 %v17787_v33, %s10953_s5 }
 0x5da   :  { %v14242_v16 = vpop.xlane.xlu1 %4644 }
 0x5db   :  { %v14236_v24 = vpop.xlane.xlu0 %4650  ;;  %17793 = vst [vmem:[#allocation10_spill] sm:$0xff] %v14242_v16 }
 0x5dc   :  { %5764 = vrot.lane.b32.xlu0 %v17788_v43, %s10953_s5  ;;  %10151 = vrot.lane.b32.xlu2 %v10150_v0, %s10953_s5  ;;  %17789 = vst [vmem:[#allocation15_spill] sm:$0xff] %v14236_v24  ;;  %v17799_v43 = vld [vmem:[#allocation46_spill] sm:$0xff] }
 0x5dd   :  { %v10160_v24 = vpack.i.bf16 %v17799_v43, %v17798_v40  ;;  %v17808_v40 = vld [vmem:[#allocation64_spill] sm:$0xff]  ;;  %v17811_v43 = vld [vmem:[#allocation45_spill] sm:$0xff] }
 0x5df   :  { %v14238_v52 = vpop.xlane.xlu2 %4638 }
 0x5e0   :  { %17790 = vst [vmem:[#allocation4_spill] sm:$0xff] %v14238_v52  ;;  %5656 = vrot.lane.b32.xlu1 %v17794_v49, %s10953_s5  ;;  %v17800_v52 = vld [vmem:[#allocation40_spill] sm:$0xff] }
 0x5e2   :  { %v14260_v49 = vpop.xlane.xlu1 %4653 }
 0x5e3   :  { %v14249_v33 = vpop.xlane.xlu0 %4659  ;;  %17802 = vst [vmem:[#allocation19_spill] sm:$0xff] %v14260_v49  ;;  %v17813_v49 = vld [vmem:[#allocation69_spill] sm:$0xff] }
 0x5e4   :  { %5836 = vrot.lane.b32.xlu0 %v17795_v19, %s10953_s5  ;;  %10156 = vrot.lane.b32.xlu2 %v10155_v15, %s10953_s5  ;;  %17796 = vst [vmem:[#allocation7_spill] sm:$0xff] %v14249_v33  ;;  %v17804_v15 = vld [vmem:[#allocation23_spill] sm:$0xff]  ;;  %v17805_v19 = vld [vmem:[#allocation14_spill] sm:$0xff] }
 0x5e5   :  { %v10165_v16 = vpack.i.bf16 %v17805_v19, %v17804_v15  ;;  %v17815_v19 = vld [vmem:[#allocation87_spill] sm:$0xff] }
 0x5e7   :  { %v14251_v0 = vpop.xlane.xlu2 %4647 }
 0x5e8   :  { %17797 = vst [vmem:[#allocation6_spill] sm:$0xff] %v14251_v0  ;;  %5872 = vrot.lane.b32.xlu1 %v17800_v52, %s10953_s5  ;;  %v17807_v0 = vld [vmem:[#allocation13_spill] sm:$0xff] }
 0x5ea   :  { %v14273_v52 = vpop.xlane.xlu1 %4662 }
 0x5eb   :  { %v14266_v33 = vpop.xlane.xlu0 %4668  ;;  %17809 = vst [vmem:[#allocation30_spill] sm:$0xff] %v14273_v52  ;;  %v17819_v52 = vld [vmem:[#allocation63_spill] sm:$0xff] }
 0x5ec   :  { %5908 = vrot.lane.b32.xlu0 %v17801_v20, %s10953_s5  ;;  %10161 = vrot.lane.b32.xlu2 %v10160_v24, %s10953_s5  ;;  %17806 = vst [vmem:[#allocation34_spill] sm:$0xff] %v14266_v33  ;;  %v17812_v20 = vld [vmem:[#allocation76_spill] sm:$0xff]  ;;  %v17818_v33 = vld [vmem:[#allocation53_spill] sm:$0xff] }
 0x5ef   :  { %v14262_v3 = vpop.xlane.xlu2 %4656 }
 0x5f0   :  { %17803 = vst [vmem:[#allocation16_spill] sm:$0xff] %v14262_v3  ;;  %5800 = vrot.lane.b32.xlu1 %v17807_v0, %s10953_s5  ;;  %v10170_v3 = vpack.i.bf16 %v17812_v20, %v17811_v43  ;;  %v17820_v43 = vld [vmem:[#allocation92_spill] sm:$0xff] }
 0x5f3   :  { %v14281_v15 = vpop.xlane.xlu0 %4677 }
 0x5f4   :  { %5980 = vrot.lane.b32.xlu0 %v17808_v40, %s10953_s5  ;;  %10166 = vrot.lane.b32.xlu2 %v10165_v16, %s10953_s5  ;;  %17814 = vst [vmem:[#allocation21_spill] sm:$0xff] %v14281_v15  ;;  %v14288_v16 = vpop.xlane.xlu1 %4671  ;;  %v17817_v40 = vld [vmem:[#allocation55_spill] sm:$0xff] }
 0x5f7   :  { %v14275_v24 = vpop.xlane.xlu2 %4665 }
 0x5f8   :  { %17810 = vst [vmem:[#allocation38_spill] sm:$0xff] %v14275_v24  ;;  %6016 = vrot.lane.b32.xlu1 %v17813_v49, %s10953_s5  ;;  %v10175_v24 = vpack.i.bf16 %v17818_v33, %v17817_v40  ;;  %v17825_v33 = vld [vmem:[#allocation108_spill] sm:$0xff]  ;;  %v10457_v40 = vpop.eup %10456  ;;  %10488 = vrcp.f32 %v14031_v59 }
 0x5f9   :  { %v5042_v6 = vmul.f32 %v10457_v40, %v13559_v31  ;;  %v10459_v31 = vpop.eup %10458  ;;  %10490 = vrcp.f32 %v14055_v32 }
 0x5fb   :  { %v14297_v49 = vpop.xlane.xlu0 %4686 }
 0x5fc   :  { %6052 = vrot.lane.b32.xlu0 %v17815_v19, %s10953_s5  ;;  %10171 = vrot.lane.b32.xlu2 %v10170_v3, %s10953_s5  ;;  %17821 = vst [vmem:[#allocation18_spill] sm:$0xff] %v14297_v49  ;;  %v17823_v3 = vld [vmem:[#allocation77_spill] sm:$0xff]  ;;  %v17824_v19 = vld [vmem:[#allocation100_spill] sm:$0xff]  ;;  %v14304_v15 = vpop.xlane.xlu1 %4680 }
 0x5ff   :  { %v14286_v0 = vpop.xlane.xlu2 %4674 }
 0x600   :  { %17816 = vst [vmem:[#allocation20_spill] sm:$0xff] %v14286_v0  ;;  %5944 = vrot.lane.b32.xlu1 %v17819_v52, %s10953_s5  ;;  %v10180_v0 = vpack.i.bf16 %v17824_v19, %v17823_v3  ;;  %v17826_v52 = vld [vmem:[#allocation109_spill] sm:$0xff]  ;;  %v17827_v3 = vld [vmem:[#allocation99_spill] sm:$0xff] }
 0x601   :  { %v17828_v19 = vld [vmem:[#allocation79_spill] sm:$0xff] }
 0x604   :  { %6124 = vrot.lane.b32.xlu0 %v17820_v43, %s10953_s5  ;;  %10176 = vrot.lane.b32.xlu2 %v10175_v24, %s10953_s5  ;;  %v14322_v29 = vpop.xlane.xlu1 %4689 }
 0x607   :  { %v14299_v20 = vpop.xlane.xlu2 %4683 }
 0x608   :  { %17822 = vst [vmem:[#allocation54_spill] sm:$0xff] %v14299_v20  ;;  %6160 = vrot.lane.b32.xlu1 %v17825_v33, %s10953_s5  ;;  %v10185_v33 = vpack.i.bf16 %v17828_v19, %v17827_v3  ;;  %v17829_v20 = vld [vmem:[#allocation88_spill] sm:$0xff] }
 0x60c   :  { %6196 = vrot.lane.b32.xlu0 %v17826_v52, %s10953_s5  ;;  %10181 = vrot.lane.b32.xlu2 %v10180_v0, %s10953_s5  ;;  %v17830_v0 = vld [vmem:[#allocation126_spill] sm:$0xff]  ;;  %v10461_v52 = vpop.eup %10460  ;;  %10492 = vrcp.f32 %v13983_v18 }
 0x60d   :  { %v5046_v19 = vmul.f32 %v10461_v52, %v13549_v23 }
 0x60e   :  { %v10122_v24 = vpop.permute.xlu0 %10121 }
 0x60f   :  { %v5189_v43 = vpop.permute.xlu2 %5188  ;;  %v10123_v49 = vunpack.i.l.bf16 %v10122_v24 }
 0x610   :  { %9822 = vmatpush.msk.msra.mxu3 %vm256_vm7, %v5189_v43  ;;  %6088 = vrot.lane.b32.xlu1 %v17829_v20, %s10953_s5  ;;  %v5043_v20 = vmul.f32 %v10459_v31, %v13523_v30  ;;  %v17831_v43 = vld [vmem:[#allocation101_spill] sm:$0xff]  ;;  %v10124_v30 = vunpack.i.h.bf16 %v10122_v24  ;;  %v17835_v24 = vld [vmem:[#allocation118_spill] sm:$0xff] }
 0x612   :  { %5214 = vmatpush.msra.mxu3 %v10123_v49 }
 0x613   :  { %9823 = vmatmul.msk.f32.vlgmr.msra.gmra.mxu3 %vm3600_vm9, %v5042_v6  ;;  %v17832_v6 = vld [vmem:[#allocation119_spill] sm:$0xff] }
 0x614   :  { %6268 = vrot.lane.b32.xlu0 %v17830_v0, %s10953_s5  ;;  %10186 = vrot.lane.b32.xlu2 %v10185_v33, %s10953_s5  ;;  %v10190_v3 = vpack.i.bf16 %v17832_v6, %v17831_v43  ;;  %v10463_v33 = vpop.eup %10462  ;;  %v17834_v0 = vld [vmem:[#allocation128_spill] sm:$0xff]  ;;  %10494 = vrcp.f32 %v14049_v35 }
 0x615   :  { %v10465_v34 = vpop.eup %10464  ;;  %10496 = vrcp.f32 %v14109_v42 }
 0x616   :  { %v5261_v8 = vpop.permute.xlu0 %5260  ;;  %v10467_v31 = vpop.eup %10466  ;;  %10498 = vrcp.f32 %v14089_v36 }
 0x617   :  { %9828 = vmatpush.msk.msrb.mxu1 %vm256_vm7, %v5261_v8  ;;  %v10127_v40 = vpop.permute.xlu2 %10126  ;;  %v5048_v8 = vmul.f32 %v10463_v33, %v13607_v48  ;;  %v10469_v26 = vpop.eup %10468  ;;  %v17837_v48 = vld [vmem:[#allocation110_spill] sm:$0xff]  ;;  %v5047_v6 = vmul.f32 %v10467_v31, %v13577_v61  ;;  %10500 = vrcp.f32 %v14067_v41 }
 0x618   :  { %v10128_v49 = vunpack.i.l.bf16 %v10127_v40  ;;  %6304 = vrot.lane.b32.xlu1 %v17833_v46, %s10953_s5  ;;  %v10129_v60 = vunpack.i.h.bf16 %v10127_v40  ;;  %v5044_v46 = vmul.f32 %v10469_v26, %v13553_v7  ;;  %v17839_v7 = vld [vmem:[#allocation135_spill] sm:$0xff] }
 0x61a   :  { %5286 = vmatpush.msrb.mxu1 %v10128_v49  ;;  %v5297_v56 = vpop.permute.xlu1 %5296  ;;  %v5050_v49 = vmul.f32 %v10465_v34, %v13601_v63  ;;  %v17841_v34 = vld [vmem:[#allocation48_spill] sm:$0xff] }
 0x61b   :  { %9824 = vmatmul.msk.f32.gmra.mxu3 %vm3600_vm9, %v5043_v20  ;;  %9829 = vmatmul.msk.f32.vlgmr.msrb.gmra.mxu1 %vm3600_vm9, %v5046_v19  ;;  %v17836_v20 = vld [vmem:[#allocation117_spill] sm:$0xff] }
 0x61c   :  { %6340 = vrot.lane.b32.xlu0 %v17834_v0, %s10953_s5  ;;  %10191 = vrot.lane.b32.xlu2 %v10190_v3, %s10953_s5  ;;  %v10195_v43 = vpack.i.bf16 %v17836_v20, %v17835_v24  ;;  %v10471_v3 = vpop.eup %10470  ;;  %v17844_v24 = vld [vmem:[#allocation57_spill] sm:$0xff]  ;;  %10502 = vrcp.f32 %v14079_v11 }
 0x61d   :  { %9831 = vmatpush.msk.msrb.mxu2 %vm256_vm7, %v5297_v56  ;;  %v10473_v61 = vpop.eup %10472  ;;  %v5049_v33 = vmul.f32 %v10471_v3, %v13573_v13  ;;  %v17847_v3 = vld [vmem:[#allocation25_spill] sm:$0xff]  ;;  %10504 = vrcp.f32 %v14073_v47 }
 0x61e   :  { %v5333_v23 = vpop.permute.xlu0 %5332  ;;  %v10475_v0 = vpop.eup %10474  ;;  %v5051_v40 = vmul.f32 %v10473_v61, %v13631_v4  ;;  %10506 = vrcp.f32 %v14095_v37 }
 0x61f   :  { %9834 = vmatpush.msk.msrb.mxu3 %vm256_vm7, %v5333_v23  ;;  %5322 = vmatpush.msrb.mxu2 %v10124_v30  ;;  %v10132_v52 = vpop.permute.xlu2 %10131  ;;  %v10477_v56 = vpop.eup %10476  ;;  %v17840_v30 = vld [vmem:[#allocation56_spill] sm:$0xff]  ;;  %v5054_v23 = vmul.f32 %v10475_v0, %v13655_v21  ;;  %v17848_v0 = vld [vmem:[#allocation70_spill] sm:$0xff]  ;;  %10508 = vrcp.f32 %v14025_v62  ;;  %v17849_v62 = vld [vmem:[#allocation187_spill] sm:$0xff] }
 0x620   :  { %9832 = vmatmul.msk.f32.vlgmr.msrb.gmra.mxu2 %vm3600_vm9, %v5048_v8  ;;  %v10133_v38 = vunpack.i.l.bf16 %v10132_v52  ;;  %6232 = vrot.lane.b32.xlu1 %v17837_v48, %s10953_s5  ;;  %v10200_v13 = vpack.i.bf16 %v17840_v30, %v17839_v7  ;;  %v10479_v54 = vpop.eup %10478  ;;  %v17842_v8 = vld [vmem:[#allocation28_spill] sm:$0xff]  ;;  %v10134_v4 = vunpack.i.h.bf16 %v10132_v52  ;;  %v17843_v52 = vld [vmem:[#allocation26_spill] sm:$0xff]  ;;  %10510 = vrcp.f32 %v14133_v44 }
 0x621   :  { %v10481_v31 = vpop.eup %10480  ;;  %v10210_v20 = vpack.i.bf16 %v17844_v24, %v17843_v52  ;;  %v17846_v48 = vld [vmem:[#allocation136_spill] sm:$0xff]  ;;  %10512 = vrcp.f32 %v17849_v62  ;;  %v17857_v52 = vld [vmem:[#allocation265_spill] sm:$0xff] }
 0x622   :  { %5358 = vmatpush.msrb.mxu3 %v10133_v38  ;;  %v5225_v63 = vpop.permute.xlu1 %5224  ;;  %v5056_v38 = vmul.f32 %v10479_v54, %v13649_v12  ;;  %v10483_v26 = vpop.eup %10482  ;;  %v17845_v12 = vld [vmem:[#allocation17_spill] sm:$0xff] }
 0x623   :  { %9835 = vmatmul.msk.f32.vlgmr.msrb.gmra.mxu3 %vm3600_vm9, %v5050_v49  ;;  %9830 = vmatmul.msk.f32.gmra.mxu1 %vm3600_vm9, %v5047_v6  ;;  %v5045_v49 = vmul.f32 %v10477_v56, %v13583_v5  ;;  %v10485_v5 = vpop.eup %10484  ;;  %v10205_v6 = vpack.i.bf16 %v17846_v48, %v17845_v12  ;;  %v5055_v59 = vmul.f32 %v10483_v26, %v13621_v51  ;;  %v17850_v54 = vld [vmem:[#allocation269_spill] sm:$0xff]  ;;  %v17855_v26 = vld [vmem:[#allocation307_spill] sm:$0xff] }
 0x624   :  { %6412 = vrot.lane.b32.xlu0 %v17838_v58, %s10953_s5  ;;  %10196 = vrot.lane.b32.xlu2 %v10195_v43, %s10953_s5  ;;  %v5058_v43 = vmul.f32 %v10481_v31, %v13645_v45  ;;  %v10487_v58 = vpop.eup %10486  ;;  %v5052_v51 = vmul.f32 %v10485_v5, %v13597_v10  ;;  %10514 = vrcp.f32 %v17850_v54  ;;  %v17854_v31 = vld [vmem:[#allocation201_spill] sm:$0xff] }
 0x625   :  { %9825 = vmatpush.msk.msrb.mxu0 %vm256_vm7, %v5225_v63  ;;  %10516 = vrcp.f32 %v17857_v52  ;;  %v17875_v54 = vld [vmem:[#allocation221_spill] sm:$0xff]  ;;  %v17880_v52 = vld [vmem:[#allocation283_spill] sm:$0xff] }
 0x626   :  { %v5405_v19 = vpop.permute.xlu0 %5404 }
 0x627   :  { %9840 = vmatpush.msk.msra.mxu1 %vm256_vm7, %v5405_v19  ;;  %5250 = vmatpush.msrb.mxu0 %v10129_v60  ;;  %v10137_v22 = vpop.permute.xlu2 %10136  ;;  %v10489_v60 = vpop.eup %10488  ;;  %v5057_v19 = vmul.f32 %v10487_v58, %v13679_v50 }
 0x628   :  { %9826 = vmatmul.msk.f32.vlgmr.msrb.gmra.mxu0 %vm3600_vm9, %v5044_v46  ;;  %9833 = vmatmul.msk.f32.gmra.mxu2 %vm3600_vm9, %v5049_v33  ;;  %v10138_v28 = vunpack.i.l.bf16 %v10137_v22  ;;  %v10139_v32 = vunpack.i.h.bf16 %v10137_v22  ;;  %v10491_v61 = vpop.eup %10490  ;;  %v5059_v46 = vmul.f32 %v10489_v60, %v13673_v2  ;;  %v17861_v60 = vld [vmem:[#allocation277_spill] sm:$0xff] }
 0x629   :  { %6448 = vrot.lane.b32.xlu1 %v17841_v34, %s10953_s5  ;;  %v10493_v33 = vpop.eup %10492  ;;  %v5062_v10 = vmul.f32 %v10491_v61, %v13697_v39 }
 0x62a   :  { %5430 = vmatpush.msra.mxu1 %v10138_v28  ;;  %v5441_v27 = vpop.permute.xlu1 %5440  ;;  %v10495_v50 = vpop.eup %10494  ;;  %v5053_v28 = vmul.f32 %v10493_v33, %v13625_v1  ;;  %v17865_v33 = vld [vmem:[#allocation206_spill] sm:$0xff] }
 0x62b   :  { %9836 = vmatmul.msk.f32.gmra.mxu3 %vm3600_vm9, %v5051_v40  ;;  %9841 = vmatmul.msk.f32.vlgmr.msra.gmra.mxu1 %vm3600_vm9, %v5054_v23  ;;  %v10497_v22 = vpop.eup %10496  ;;  %v5064_v39 = vmul.f32 %v10495_v50, %v13693_v14  ;;  %v17866_v50 = vld [vmem:[#allocation154_spill] sm:$0xff] }
 0x62c   :  { %6484 = vrot.lane.b32.xlu0 %v17842_v8, %s10953_s5  ;;  %10201 = vrot.lane.b32.xlu2 %v10200_v13, %s10953_s5  ;;  %v10499_v40 = vpop.eup %10498  ;;  %v5066_v11 = vmul.f32 %v10497_v22, %v13751_v55  ;;  %v17851_v8 = vld [vmem:[#allocation197_spill] sm:$0xff] }
 0x62d   :  { %9843 = vmatpush.msk.msra.mxu2 %vm256_vm7, %v5441_v27  ;;  %v10501_v7 = vpop.eup %10500  ;;  %v5063_v1 = vmul.f32 %v10499_v40, %v13727_v17  ;;  %v17870_v40 = vld [vmem:[#allocation279_spill] sm:$0xff] }
 0x62e   :  { %v5477_v21 = vpop.permute.xlu0 %5476  ;;  %v10503_v14 = vpop.eup %10502  ;;  %v5060_v55 = vmul.f32 %v10501_v7, %v13703_v25  ;;  %v17852_v25 = vld [vmem:[#allocation291_spill] sm:$0xff] }
 0x62f   :  { %9846 = vmatpush.msk.msra.mxu3 %vm256_vm7, %v5477_v21  ;;  %5466 = vmatpush.msra.mxu2 %v10134_v4  ;;  %v10142_v9 = vpop.permute.xlu2 %10141  ;;  %v10505_v13 = vpop.eup %10504  ;;  %v5065_v23 = vmul.f32 %v10503_v14, %v13721_v53  ;;  %v17853_v21 = vld [vmem:[#allocation200_spill] sm:$0xff] }
 0x630   :  { %9827 = vmatmul.msk.f32.gmra.mxu0 %vm3600_vm9, %v5045_v49  ;;  %9844 = vmatmul.msk.f32.vlgmr.msra.gmra.mxu2 %vm3600_vm9, %v5056_v38  ;;  %v10143_v57 = vunpack.i.l.bf16 %v10142_v9  ;;  %v10144_v36 = vunpack.i.h.bf16 %v10142_v9  ;;  %v10507_v17 = vpop.eup %10506  ;;  %v5067_v27 = vmul.f32 %v10505_v13, %v17851_v8  ;;  %v4110_v53 = vsub.f32 %v17853_v21, %v17852_v25  ;;  %v17856_v9 = vld [vmem:[#allocation216_spill] sm:$0xff] }
 0x631   :  { %6376 = vrot.lane.b32.xlu1 %v17847_v3, %s10953_s5  ;;  %v10509_v4 = vpop.eup %10508  ;;  %v5070_v38 = vmul.f32 %v10507_v17, %v17854_v31  ;;  %v17873_v17 = vld [vmem:[#allocation189_spill] sm:$0xff]  ;;  %v17878_v31 = vld [vmem:[#allocation208_spill] sm:$0xff] }
 0x632   :  { %5502 = vmatpush.msra.mxu3 %v10143_v57  ;;  %v5369_v45 = vpop.permute.xlu1 %5368  ;;  %v10511_v49 = vpop.eup %10510  ;;  %v4112_v57 = vsub.f32 %v17856_v9, %v17855_v26  ;;  %v4330_v48 = vmul.f32 1.442695, %v4110_v53  ;;  %v17877_v53 = vld [vmem:[#allocation299_spill] sm:$0xff]  ;;  %v17879_v26 = vld [vmem:[#allocation273_spill] sm:$0xff] }
 0x633   :  { %9847 = vmatmul.msk.f32.vlgmr.msra.gmra.mxu3 %vm3600_vm9, %v5058_v43  ;;  %9842 = vmatmul.msk.f32.gmra.mxu1 %vm3600_vm9, %v5055_v59  ;;  %v10513_v12 = vpop.eup %10512  ;;  %v17860_v59 = vld [vmem:[#allocation359_spill] sm:$0xff] }
 0x634   :  { %10211 = vrot.lane.b32.xlu0 %v10210_v20, %s10953_s5  ;;  %10206 = vrot.lane.b32.xlu2 %v10205_v6, %s10953_s5  ;;  %v17858_v20 = vld [vmem:[#allocation184_spill] sm:$0xff]  ;;  %v17859_v6 = vld [vmem:[#allocation215_spill] sm:$0xff]  ;;  %v5061_v58 = vmul.f32 %v10509_v4, %v17860_v59 }
 0x635   :  { %9837 = vmatpush.msk.msra.mxu0 %vm256_vm7, %v5369_v45  ;;  %10518 = vrcp.f32 %v17858_v20  ;;  %v5072_v3 = vmul.f32 %v10511_v49, %v17859_v6  ;;  %v10515_v45 = vpop.eup %10514  ;;  %v17876_v4 = vld [vmem:[#allocation227_spill] sm:$0xff] }
 0x636   :  { %v5549_v63 = vpop.permute.xlu0 %5548  ;;  %10520 = vrcp.f32 %v17861_v60 }
 0x637   :  { %9852 = vmatpush.msk.msrb.mxu1 %vm256_vm7, %v5549_v63  ;;  %5394 = vmatpush.msra.mxu0 %v10139_v32  ;;  %v10147_v18 = vpop.permute.xlu2 %10146  ;;  %v4334_v32 = vmul.f32 1.442695, %v4112_v57 }
 0x638   :  { %9838 = vmatmul.msk.f32.vlgmr.msra.gmra.mxu0 %vm3600_vm9, %v5052_v51  ;;  %9845 = vmatmul.msk.f32.gmra.mxu2 %vm3600_vm9, %v5057_v19  ;;  %v10148_v35 = vunpack.i.l.bf16 %v10147_v18  ;;  %v10149_v47 = vunpack.i.h.bf16 %v10147_v18  ;;  %v17862_v19 = vld [vmem:[#allocation157_spill] sm:$0xff]  ;;  %v17863_v18 = vld [vmem:[#allocation190_spill] sm:$0xff] }
 0x639   :  { %v5074_v61 = vmul.f32 %v10513_v12, %v17862_v19  ;;  %10522 = vrcp.f32 %v17863_v18 }
 0x63a   :  { %5574 = vmatpush.msrb.mxu1 %v10148_v35  ;;  %v5585_v42 = vpop.permute.xlu1 %5584  ;;  %v10517_v35 = vpop.eup %10516  ;;  %10524 = vpow2.f32 %v4330_v48  ;;  %v17882_v48 = vld [vmem:[#allocation209_spill] sm:$0xff] }
 0x63b   :  { %9848 = vmatmul.msk.f32.gmra.mxu3 %vm3600_vm9, %v5059_v46  ;;  %9853 = vmatmul.msk.f32.vlgmr.msrb.gmra.mxu1 %vm3600_vm9, %v5062_v10  ;;  %v17864_v46 = vld [vmem:[#allocation297_spill] sm:$0xff]  ;;  %10526 = vpow2.f32 %v4334_v32  ;;  %v17883_v32 = vld [vmem:[#allocation191_spill] sm:$0xff] }
 0x63c   :  { %6592 = vrot.lane.b32.xlu0 %v17848_v0, %s10953_s5  ;;  %9855 = vmatpush.msk.msrb.mxu2 %vm256_vm7, %v5585_v42  ;;  %v4113_v10 = vsub.f32 %v17865_v33, %v17864_v46  ;;  %v5071_v0 = vmul.f32 %v10515_v45, %v17866_v50  ;;  %v10519_v42 = vpop.eup %10518 }
 0x63e   :  { %v5621_v2 = vpop.permute.xlu0 %5620  ;;  %5610 = vmatpush.msrb.mxu2 %v10144_v36  ;;  %v17867_v36 = vld [vmem:[#allocation305_spill] sm:$0xff]  ;;  %v4336_v7 = vmul.f32 1.442695, %v4113_v10  ;;  %v17887_v10 = vld [vmem:[#allocation188_spill] sm:$0xff] }
 0x63f   :  { %9858 = vmatpush.msk.msrb.mxu3 %vm256_vm7, %v5621_v2  ;;  %v10152_v56 = vpop.permute.xlu2 %10151  ;;  %v17868_v2 = vld [vmem:[#allocation214_spill] sm:$0xff] }
 0x640   :  { %9839 = vmatmul.msk.f32.gmra.mxu0 %vm3600_vm9, %v5053_v28  ;;  %9856 = vmatmul.msk.f32.vlgmr.msrb.gmra.mxu2 %vm3600_vm9, %v5064_v39  ;;  %v10153_v41 = vunpack.i.l.bf16 %v10152_v56  ;;  %v10154_v43 = vunpack.i.h.bf16 %v10152_v56  ;;  %v4114_v22 = vsub.f32 %v17868_v2, %v17867_v36  ;;  %v17869_v39 = vld [vmem:[#allocation186_spill] sm:$0xff] }
 0x641   :  { %10528 = vrcp.f32 %v17869_v39 }
 0x642   :  { %5646 = vmatpush.msrb.mxu3 %v10153_v41  ;;  %v5513_v30 = vpop.permute.xlu1 %5512  ;;  %10530 = vrcp.f32 %v17870_v40  ;;  %v4338_v13 = vmul.f32 1.442695, %v4114_v22 }
 0x643   :  { %9859 = vmatmul.msk.f32.vlgmr.msrb.gmra.mxu3 %vm3600_vm9, %v5066_v11  ;;  %9854 = vmatmul.msk.f32.gmra.mxu1 %vm3600_vm9, %v5063_v1  ;;  %v10521_v11 = vpop.eup %10520  ;;  %v17871_v1 = vld [vmem:[#allocation203_spill] sm:$0xff]  ;;  %10532 = vrcp.f32 %v17873_v17  ;;  %v17894_v17 = vld [vmem:[#allocation237_spill] sm:$0xff] }
 0x644   :  { %9849 = vmatpush.msk.msrb.mxu0 %vm256_vm7, %v5513_v30  ;;  %v5068_v14 = vmul.f32 %v10517_v35, %v17871_v1  ;;  %v17872_v30 = vld [vmem:[#allocation153_spill] sm:$0xff]  ;;  %v5075_v8 = vmul.f32 %v10521_v11, %v17875_v54  ;;  %v17886_v35 = vld [vmem:[#allocation159_spill] sm:$0xff]  ;;  %v17891_v1 = vld [vmem:[#allocation202_spill] sm:$0xff] }
 0x645   :  { %v17895_v54 = vld [vmem:[#allocation194_spill] sm:$0xff] }
 0x646   :  { %v5693_v37 = vpop.permute.xlu0 %5692  ;;  %5538 = vmatpush.msrb.mxu0 %v10149_v47  ;;  %v5073_v47 = vmul.f32 %v10519_v42, %v17872_v30  ;;  %v17888_v42 = vld [vmem:[#allocation192_spill] sm:$0xff] }
 0x647   :  { %9864 = vmatpush.msk.msra.mxu1 %vm256_vm7, %v5693_v37  ;;  %v10157_v34 = vpop.permute.xlu2 %10156  ;;  %v10523_v37 = vpop.eup %10522 }
 0x648   :  { %9850 = vmatmul.msk.f32.vlgmr.msrb.gmra.mxu0 %vm3600_vm9, %v5060_v55  ;;  %9857 = vmatmul.msk.f32.gmra.mxu2 %vm3600_vm9, %v5065_v23  ;;  %v10158_v44 = vunpack.i.l.bf16 %v10157_v34  ;;  %v10159_v56 = vunpack.i.h.bf16 %v10157_v34  ;;  %v14479_v23 = vpop.eup %10524  ;;  %v5078_v25 = vmul.f32 %v10523_v37, %v17876_v4  ;;  %v17893_v37 = vld [vmem:[#allocation166_spill] sm:$0xff] }
 0x649   :  { %v14485_v62 = vpop.eup %10526  ;;  %v4694_v49 = vsel %vm3600_vm9, %v14479_v23, 0.0 }
 0x64a   :  { %5718 = vmatpush.msra.mxu1 %v10158_v44  ;;  %v5729_v24 = vpop.permute.xlu1 %5728  ;;  %v17874_v44 = vld [vmem:[#allocation275_spill] sm:$0xff]  ;;  %v4700_v57 = vsel %vm3600_vm9, %v14485_v62, 0.0 }
 0x64b   :  { %9860 = vmatmul.msk.f32.gmra.mxu3 %vm3600_vm9, %v5067_v27  ;;  %9865 = vmatmul.msk.f32.vlgmr.msra.gmra.mxu1 %vm3600_vm9, %v5070_v38  ;;  %10534 = vrcp.f32 %v17874_v44  ;;  %v10529_v27 = vpop.eup %10528  ;;  %v4111_v38 = vsub.f32 %v17878_v31, %v17877_v53  ;;  %v17897_v31 = vld [vmem:[#allocation235_spill] sm:$0xff] }
 0x64c   :  { %9867 = vmatpush.msk.msra.mxu2 %vm256_vm7, %v5729_v24  ;;  %10536 = vpow2.f32 %v4336_v7  ;;  %v10531_v21 = vpop.eup %10530  ;;  %v5069_v6 = vmul.f32 %v10529_v27, %v17882_v48  ;;  %v17896_v27 = vld [vmem:[#allocation196_spill] sm:$0xff]  ;;  %v17902_v48 = vld [vmem:[#allocation171_spill] sm:$0xff] }
 0x64d   :  { %10538 = vpow2.f32 %v4338_v13  ;;  %v4332_v59 = vmul.f32 1.442695, %v4111_v38 }
 0x64e   :  { %v5765_v5 = vpop.permute.xlu0 %5764  ;;  %5754 = vmatpush.msra.mxu2 %v10154_v43  ;;  %10540 = vrcp.f32 %v17879_v26  ;;  %v10533_v43 = vpop.eup %10532 }
 0x64f   :  { %9870 = vmatpush.msk.msra.mxu3 %vm256_vm7, %v5765_v5  ;;  %v14456_v63 = vpop.permute.xlu2 %10161  ;;  %10542 = vrcp.f32 %v17880_v52  ;;  %v17881_v5 = vld [vmem:[#allocation163_spill] sm:$0xff] }
 0x650   :  { %9851 = vmatmul.msk.f32.gmra.mxu0 %vm3600_vm9, %v5061_v58  ;;  %9868 = vmatmul.msk.f32.vlgmr.msra.gmra.mxu2 %vm3600_vm9, %v5072_v3  ;;  %v10163_v51 = vunpack.i.l.bf16 %v14456_v63  ;;  %v10164_v24 = vunpack.i.h.bf16 %v14456_v63  ;;  %v5080_v12 = vmul.f32 %v10531_v21, %v17881_v5  ;;  %10544 = vrcp.f32 %v17883_v32  ;;  %v17899_v52 = vld [vmem:[#allocation287_spill] sm:$0xff]  ;;  %v17904_v32 = vld [vmem:[#allocation8_spill] sm:$0xff] }
 0x651   :  { %v10535_v3 = vpop.eup %10534 }
 0x652   :  { %5790 = vmatpush.msra.mxu3 %v10163_v51  ;;  %v5657_v28 = vpop.permute.xlu1 %5656  ;;  %v14505_v45 = vpop.eup %10536  ;;  %v17884_v51 = vld [vmem:[#allocation162_spill] sm:$0xff]  ;;  %v5079_v46 = vmul.f32 %v10535_v3, %v17886_v35 }
 0x653   :  { %9871 = vmatmul.msk.f32.vlgmr.msra.gmra.mxu3 %vm3600_vm9, %v5074_v61  ;;  %9866 = vmatmul.msk.f32.gmra.mxu1 %vm3600_vm9, %v5071_v0  ;;  %v14510_v60 = vpop.eup %10538  ;;  %v5082_v19 = vmul.f32 %v10533_v43, %v17884_v51  ;;  %v17885_v61 = vld [vmem:[#allocation285_spill] sm:$0xff]  ;;  %v4703_v0 = vsel %vm3604_vm10, %v14505_v45, 0.0  ;;  %v17905_v51 = vld [vmem:[#allocation35_spill] sm:$0xff] }
 0x654   :  { %9861 = vmatpush.msk.msra.mxu0 %vm256_vm7, %v5657_v28  ;;  %10546 = vrcp.f32 %v17885_v61  ;;  %v10541_v18 = vpop.eup %10540  ;;  %v4706_v22 = vsel %vm3600_vm9, %v14510_v60, 0.0  ;;  %v17889_v28 = vld [vmem:[#allocation156_spill] sm:$0xff]  ;;  %v17901_v43 = vld [vmem:[#allocation245_spill] sm:$0xff] }
 0x655   :  { %v10543_v33 = vpop.eup %10542  ;;  %10548 = vpow2.f32 %v4332_v59  ;;  %v5076_v40 = vmul.f32 %v10541_v18, %v17889_v28  ;;  %v17903_v59 = vld [vmem:[#allocation281_spill] sm:$0xff] }
 0x656   :  { %v5837_v41 = vpop.permute.xlu0 %5836  ;;  %5682 = vmatpush.msra.mxu0 %v10159_v56  ;;  %10550 = vrcp.f32 %v17887_v10  ;;  %v10545_v39 = vpop.eup %10544  ;;  %v17890_v56 = vld [vmem:[#allocation233_spill] sm:$0xff] }
 0x657   :  { %9876 = vmatpush.msk.msrb.mxu1 %vm256_vm7, %v5837_v41  ;;  %v14477_v55 = vpop.permute.xlu2 %10166  ;;  %10552 = vrcp.f32 %v17888_v42  ;;  %v5081_v41 = vmul.f32 %v10543_v33, %v17890_v56  ;;  %v5083_v13 = vmul.f32 %v10545_v39, %v17893_v37  ;;  %v17906_v18 = vld [vmem:[#allocation169_spill] sm:$0xff] }
 0x658   :  { %9862 = vmatmul.msk.f32.vlgmr.msra.gmra.mxu0 %vm3600_vm9, %v5068_v14  ;;  %9869 = vmatmul.msk.f32.gmra.mxu2 %vm3600_vm9, %v5073_v47  ;;  %v10168_v34 = vunpack.i.l.bf16 %v14477_v55  ;;  %v10169_v36 = vunpack.i.h.bf16 %v14477_v55  ;;  %10554 = vrcp.f32 %v17891_v1  ;;  %v17892_v47 = vld [vmem:[#allocation289_spill] sm:$0xff]  ;;  %v17914_v1 = vld [vmem:[#allocation295_spill] sm:$0xff] }
 0x659   :  { %10556 = vrcp.f32 %v17892_v47 }
 0x65a   :  { %5862 = vmatpush.msrb.mxu1 %v10168_v34  ;;  %v5873_v9 = vpop.permute.xlu1 %5872  ;;  %v10547_v11 = vpop.eup %10546  ;;  %10558 = vrcp.f32 %v17895_v54 }
 0x65b   :  { %9872 = vmatmul.msk.f32.gmra.mxu3 %vm3600_vm9, %v5075_v8  ;;  %4695 = vadd.xlane.f32.xlu1 %v4694_v49  ;;  %v14531_v30 = vpop.eup %10548  ;;  %v5086_v34 = vmul.f32 %v10547_v11, %v17894_v17  ;;  %10560 = vrcp.f32 %v17896_v27  ;;  %v17898_v49 = vld [vmem:[#allocation160_spill] sm:$0xff]  ;;  %v17913_v11 = vld [vmem:[#allocation293_spill] sm:$0xff] }
 0x65c   :  { %9877 = vmatmul.msk.f32.vlgmr.msrb.gmra.mxu1 %vm3600_vm9, %v5078_v25  ;;  %9879 = vmatpush.msk.msrb.mxu2 %vm256_vm7, %v5873_v9  ;;  %v10551_v55 = vpop.eup %10550  ;;  %v4697_v21 = vsel %vm3604_vm10, %v14531_v30, 0.0  ;;  %10562 = vrcp.f32 %v17899_v52  ;;  %v17916_v17 = vld [vmem:[#allocation165_spill] sm:$0xff]  ;;  %v17923_v52 = vld [vmem:[#allocation2_spill] sm:$0xff] }
 0x65d   :  { %4701 = vadd.xlane.f32.xlu2 %v4700_v57  ;;  %v10553_v44 = vpop.eup %10552  ;;  %v5077_v26 = vmul.f32 %v10551_v55, %v17898_v49 }
 0x65e   :  { %v5909_v20 = vpop.permute.xlu0 %5908  ;;  %5898 = vmatpush.msrb.mxu2 %v10164_v24  ;;  %v10555_v53 = vpop.eup %10554  ;;  %v5088_v38 = vmul.f32 %v10553_v44, %v17897_v31  ;;  %v17920_v31 = vld [vmem:[#allocation247_spill] sm:$0xff] }
 0x65f   :  { %9882 = vmatpush.msk.msrb.mxu3 %vm256_vm7, %v5909_v20  ;;  %v10172_v58 = vpop.permute.xlu2 %10171  ;;  %v10557_v9 = vpop.eup %10556  ;;  %v17900_v20 = vld [vmem:[#allocation198_spill] sm:$0xff]  ;;  %v5090_v5 = vmul.f32 %v10555_v53, %v17901_v43 }
 0x660   :  { %9863 = vmatmul.msk.f32.gmra.mxu0 %vm3600_vm9, %v5069_v6  ;;  %9880 = vmatmul.msk.f32.vlgmr.msrb.gmra.mxu2 %vm3600_vm9, %v5080_v12  ;;  %v10173_v63 = vunpack.i.l.bf16 %v10172_v58  ;;  %v10174_v4 = vunpack.i.h.bf16 %v10172_v58  ;;  %10564 = vrcp.f32 %v17900_v20  ;;  %v10559_v12 = vpop.eup %10558  ;;  %v5087_v6 = vmul.f32 %v10557_v9, %v17902_v48  ;;  %v17922_v9 = vld [vmem:[#allocation24_spill] sm:$0xff]  ;;  %v17924_v20 = vld [vmem:[#allocation19_spill] sm:$0xff] }
 0x661   :  { %v10561_v3 = vpop.eup %10560  ;;  %10566 = vrcp.f32 %v17903_v59  ;;  %v5084_v35 = vmul.f32 %v10559_v12, %v17906_v18  ;;  %v17925_v48 = vld [vmem:[#allocation172_spill] sm:$0xff] }
 0x662   :  { %5934 = vmatpush.msrb.mxu3 %v10173_v63  ;;  %v5801_v50 = vpop.permute.xlu1 %5800  ;;  %10568 = vrcp.f32 %v17904_v32  ;;  %v10563_v61 = vpop.eup %10562 }
 0x663   :  { %9883 = vmatmul.msk.f32.vlgmr.msrb.gmra.mxu3 %vm3600_vm9, %v5082_v19  ;;  %9873 = vmatpush.msk.msrb.mxu0 %vm256_vm7, %v5801_v50 }
 0x664   :  { %9878 = vmatmul.msk.f32.gmra.mxu1 %vm3600_vm9, %v5079_v46  ;;  %v17907_v46 = vld [vmem:[#allocation241_spill] sm:$0xff] }
 0x665   :  { %4707 = vadd.xlane.f32.xlu2 %v4706_v22  ;;  %5826 = vmatpush.msrb.mxu0 %v10169_v36  ;;  %v5089_v33 = vmul.f32 %v10561_v3, %v17907_v46  ;;  %v17909_v36 = vld [vmem:[#allocation204_spill] sm:$0xff]  ;;  %v17911_v22 = vld [vmem:[#allocation170_spill] sm:$0xff]  ;;  %v17926_v3 = vld [vmem:[#allocation173_spill] sm:$0xff] }
 0x666   :  { %4704 = vadd.xlane.f32.xlu0 %v4703_v0  ;;  %v5981_v2 = vpop.permute.xlu0 %5980  ;;  %v10565_v10 = vpop.eup %10564  ;;  %v17908_v0 = vld [vmem:[#allocation11_spill] sm:$0xff]  ;;  %v5091_v39 = vmul.f32 %v10563_v61, %v17911_v22  ;;  %v17929_v61 = vld [vmem:[#allocation177_spill] sm:$0xff]  ;;  %v17934_v22 = vld [vmem:[#allocation16_spill] sm:$0xff] }
 0x667   :  { %9888 = vmatpush.msk.msra.mxu1 %vm256_vm7, %v5981_v2  ;;  %v10177_v7 = vpop.permute.xlu2 %10176  ;;  %10570 = vrcp.f32 %v17908_v0  ;;  %v17910_v2 = vld [vmem:[#allocation37_spill] sm:$0xff]  ;;  %v10567_v28 = vpop.eup %10566  ;;  %v17932_v0 = vld [vmem:[#allocation210_spill] sm:$0xff] }
 0x668   :  { %9874 = vmatmul.msk.f32.vlgmr.msrb.gmra.mxu0 %vm3600_vm9, %v5076_v40  ;;  %9881 = vmatmul.msk.f32.gmra.mxu2 %vm3600_vm9, %v5081_v41  ;;  %v10178_v14 = vunpack.i.l.bf16 %v10177_v7  ;;  %v10179_v63 = vunpack.i.h.bf16 %v10177_v7  ;;  %10572 = vrcp.f32 %v17909_v36  ;;  %v17912_v40 = vld [vmem:[#allocation243_spill] sm:$0xff]  ;;  %v10569_v41 = vpop.eup %10568  ;;  %v17930_v46 = vld [vmem:[#allocation257_spill] sm:$0xff]  ;;  %v17933_v36 = vld [vmem:[#allocation12_spill] sm:$0xff] }
 0x669   :  { %v5094_v56 = vmul.f32 %v10565_v10, %v17912_v40  ;;  %10574 = vrcp.f32 %v17913_v11  ;;  %v17936_v11 = vld [vmem:[#allocation71_spill] sm:$0xff] }
 0x66a   :  { %6006 = vmatpush.msra.mxu1 %v10178_v14  ;;  %v6017_v8 = vpop.permute.xlu1 %6016  ;;  %10576 = vrcp.f32 %v17914_v1 }
 0x66b   :  { %9884 = vmatmul.msk.f32.gmra.mxu3 %vm3600_vm9, %v5083_v13  ;;  %9891 = vmatpush.msk.msra.mxu2 %vm256_vm7, %v6017_v8  ;;  %v17915_v13 = vld [vmem:[#allocation251_spill] sm:$0xff]  ;;  %v17917_v8 = vld [vmem:[#allocation4_spill] sm:$0xff] }
 0x66c   :  { %9889 = vmatmul.msk.f32.vlgmr.msra.gmra.mxu1 %vm3600_vm9, %v5086_v34  ;;  %v5096_v55 = vmul.f32 %v10569_v41, %v17915_v13  ;;  %v5085_v34 = vmul.f32 %v10567_v28, %v17916_v17  ;;  %10578 = vrcp.f32 %v17917_v8  ;;  %v17938_v13 = vld [vmem:[#allocation313_spill] sm:$0xff] }
 0x66d   :  { %4698 = vadd.xlane.f32.xlu2 %v4697_v21  ;;  %6042 = vmatpush.msra.mxu2 %v10174_v4  ;;  %v10571_v37 = vpop.eup %10570  ;;  %v17918_v4 = vld [vmem:[#allocation175_spill] sm:$0xff]  ;;  %v17919_v21 = vld [vmem:[#allocation6_spill] sm:$0xff] }
 0x66e   :  { %v6053_v25 = vpop.permute.xlu0 %6052  ;;  %v10573_v44 = vpop.eup %10572  ;;  %10580 = vrcp.f32 %v17919_v21 }
 0x66f   :  { %9894 = vmatpush.msk.msra.mxu3 %vm256_vm7, %v6053_v25  ;;  %v10182_v57 = vpop.permute.xlu2 %10181  ;;  %v5098_v25 = vmul.f32 %v10571_v37, %v17918_v4  ;;  %v10575_v53 = vpop.eup %10574  ;;  %10582 = vrcp.f32 %v17923_v52  ;;  %v17942_v4 = vld [vmem:[#allocation176_spill] sm:$0xff] }
 0x670   :  { %9875 = vmatmul.msk.f32.gmra.mxu0 %vm3600_vm9, %v5077_v26  ;;  %9892 = vmatmul.msk.f32.vlgmr.msra.gmra.mxu2 %vm3600_vm9, %v5088_v38  ;;  %v10183_v24 = vunpack.i.l.bf16 %v10182_v57  ;;  %v10184_v14 = vunpack.i.h.bf16 %v10182_v57  ;;  %v5095_v38 = vmul.f32 %v10573_v44, %v17920_v31  ;;  %v10577_v49 = vpop.eup %10576  ;;  %v17921_v26 = vld [vmem:[#allocation49_spill] sm:$0xff]  ;;  %10584 = vrcp.f32 %v17924_v20  ;;  %v17944_v31 = vld [vmem:[#allocation228_spill] sm:$0xff] }
 0x671   :  { %v10215_v57 = vpack.i.bf16 %v17922_v9, %v17921_v26  ;;  %v5097_v59 = vmul.f32 %v10577_v49, %v17926_v3  ;;  %v17945_v26 = vld [vmem:[#allocation10_spill] sm:$0xff]  ;;  %v17947_v20 = vld [vmem:[#allocation249_spill] sm:$0xff] }
 0x672   :  { %6078 = vmatpush.msra.mxu3 %v10183_v24  ;;  %v5945_v58 = vpop.permute.xlu1 %5944  ;;  %v10579_v12 = vpop.eup %10578 }
 0x673   :  { %9895 = vmatmul.msk.f32.vlgmr.msra.gmra.mxu3 %vm3600_vm9, %v5090_v5  ;;  %9885 = vmatpush.msk.msra.mxu0 %vm256_vm7, %v5945_v58  ;;  %v5099_v18 = vmul.f32 %v10579_v12, %v17929_v61  ;;  %v17952_v61 = vld [vmem:[#allocation259_spill] sm:$0xff] }
 0x674   :  { %9890 = vmatmul.msk.f32.gmra.mxu1 %vm3600_vm9, %v5087_v6  ;;  %6556 = vrot.lane.b32.xlu1 %v17905_v51, %s10953_s5  ;;  %v5092_v6 = vmul.f32 %v10575_v53, %v17925_v48  ;;  %v10581_v58 = vpop.eup %10580  ;;  %v17943_v53 = vld [vmem:[#allocation319_spill] sm:$0xff] }
 0x675   :  { %5970 = vmatpush.msra.mxu0 %v10179_v63  ;;  %v17927_v63 = vld [vmem:[#allocation7_spill] sm:$0xff] }
 0x676   :  { %v6125_v19 = vpop.permute.xlu0 %6124  ;;  %10586 = vrcp.f32 %v17927_v63  ;;  %v17950_v63 = vld [vmem:[#allocation212_spill] sm:$0xff] }
 0x677   :  { %9900 = vmatpush.msk.msrb.mxu1 %vm256_vm7, %v6125_v19  ;;  %v10187_v50 = vpop.permute.xlu2 %10186  ;;  %v17928_v19 = vld [vmem:[#allocation15_spill] sm:$0xff] }
 0x678   :  { %9886 = vmatmul.msk.f32.vlgmr.msra.gmra.mxu0 %vm3600_vm9, %v5084_v35  ;;  %9893 = vmatmul.msk.f32.gmra.mxu2 %vm3600_vm9, %v5089_v33  ;;  %v10188_v42 = vunpack.i.l.bf16 %v10187_v50  ;;  %v10189_v43 = vunpack.i.h.bf16 %v10187_v50  ;;  %10588 = vrcp.f32 %v17928_v19  ;;  %v10583_v35 = vpop.eup %10582  ;;  %v5102_v33 = vmul.f32 %v10581_v58, %v17930_v46  ;;  %v17931_v50 = vld [vmem:[#allocation301_spill] sm:$0xff]  ;;  %v17951_v19 = vld [vmem:[#allocation20_spill] sm:$0xff] }
 0x679   :  { %v10585_v10 = vpop.eup %10584  ;;  %10590 = vrcp.f32 %v17933_v36  ;;  %v17953_v46 = vld [vmem:[#allocation181_spill] sm:$0xff] }
 0x67a   :  { %6520 = vrot.lane.b32.xlu0 %v17910_v2, %s10953_s5  ;;  %6150 = vmatpush.msrb.mxu1 %v10188_v42  ;;  %v6161_v7 = vpop.permute.xlu1 %6160  ;;  %v4109_v42 = vsub.f32 %v17932_v0, %v17931_v50  ;;  %10592 = vrcp.f32 %v17934_v22  ;;  %v17954_v50 = vld [vmem:[#allocation38_spill] sm:$0xff] }
 0x67b   :  { %9896 = vmatmul.msk.f32.gmra.mxu3 %vm3600_vm9, %v5091_v39  ;;  %9903 = vmatpush.msk.msrb.mxu2 %vm256_vm7, %v6161_v7  ;;  %v17937_v7 = vld [vmem:[#allocation174_spill] sm:$0xff] }
 0x67c   :  { %9901 = vmatmul.msk.f32.vlgmr.msrb.gmra.mxu1 %vm3600_vm9, %v5094_v56  ;;  %v10587_v40 = vpop.eup %10586  ;;  %v17935_v56 = vld [vmem:[#allocation178_spill] sm:$0xff]  ;;  %v5093_v1 = vmul.f32 %v10583_v35, %v17937_v7 }
 0x67d   :  { %6186 = vmatpush.msrb.mxu2 %v10184_v14  ;;  %v5104_v41 = vmul.f32 %v10585_v10, %v17935_v56  ;;  %v17956_v56 = vld [vmem:[#allocation253_spill] sm:$0xff]  ;;  %v17957_v7 = vld [vmem:[#allocation54_spill] sm:$0xff] }
 0x67e   :  { %v6197_v47 = vpop.permute.xlu0 %6196  ;;  %v10589_v14 = vpop.eup %10588 }
 0x67f   :  { %9906 = vmatpush.msk.msrb.mxu3 %vm256_vm7, %v6197_v47  ;;  %v10192_v54 = vpop.permute.xlu2 %10191  ;;  %v4328_v47 = vmul.f32 1.442695, %v4109_v42 }
 0x680   :  { %9887 = vmatmul.msk.f32.gmra.mxu0 %vm3600_vm9, %v5085_v34  ;;  %9904 = vmatmul.msk.f32.vlgmr.msrb.gmra.mxu2 %vm3600_vm9, %v5096_v55  ;;  %v10193_v27 = vunpack.i.l.bf16 %v10192_v54  ;;  %v10194_v39 = vunpack.i.h.bf16 %v10192_v54  ;;  %v17939_v55 = vld [vmem:[#allocation222_spill] sm:$0xff]  ;;  %v17941_v54 = vld [vmem:[#allocation255_spill] sm:$0xff] }
 0x681   :  { %v4115_v17 = vsub.f32 %v17939_v55, %v17938_v13  ;;  %v17940_v34 = vld [vmem:[#allocation30_spill] sm:$0xff]  ;;  %v5106_v8 = vmul.f32 %v10587_v40, %v17941_v54  ;;  %v17960_v55 = vld [vmem:[#allocation267_spill] sm:$0xff] }
 0x682   :  { %6222 = vmatpush.msrb.mxu3 %v10193_v27  ;;  %v6089_v24 = vpop.permute.xlu1 %6088  ;;  %10594 = vrcp.f32 %v17940_v34  ;;  %v10591_v27 = vpop.eup %10590 }
 0x683   :  { %9907 = vmatmul.msk.f32.vlgmr.msrb.gmra.mxu3 %vm3600_vm9, %v5098_v25  ;;  %9897 = vmatpush.msk.msrb.mxu0 %vm256_vm7, %v6089_v24  ;;  %10596 = vrcp.f32 %v14288_v16  ;;  %v5103_v25 = vmul.f32 %v10589_v14, %v17942_v4  ;;  %v10593_v21 = vpop.eup %10592  ;;  %v4340_v49 = vmul.f32 1.442695, %v4115_v17  ;;  %v17959_v14 = vld [vmem:[#allocation234_spill] sm:$0xff] }
 0x684   :  { %9902 = vmatmul.msk.f32.gmra.mxu1 %vm3600_vm9, %v5095_v38  ;;  %10598 = vpow2.f32 %v4328_v47  ;;  %v4118_v38 = vsub.f32 %v17944_v31, %v17943_v53 }
 0x685   :  { %10216 = vrot.lane.b32.xlu2 %v10215_v57, %s10953_s5  ;;  %6114 = vmatpush.msrb.mxu0 %v10189_v43  ;;  %10600 = vrcp.f32 %v17945_v26  ;;  %v17946_v57 = vld [vmem:[#allocation21_spill] sm:$0xff]  ;;  %v5100_v43 = vmul.f32 %v10591_v27, %v17947_v20  ;;  %v17962_v27 = vld [vmem:[#allocation226_spill] sm:$0xff]  ;;  %v17967_v20 = vld [vmem:[#allocation271_spill] sm:$0xff] }
 0x686   :  { %v6269_v5 = vpop.permute.xlu0 %6268  ;;  %10602 = vrcp.f32 %v17946_v57  ;;  %v17965_v57 = vld [vmem:[#allocation183_spill] sm:$0xff] }
 0x687   :  { %9912 = vmatpush.msk.msra.mxu1 %vm256_vm7, %v6269_v5  ;;  %v10197_v32 = vpop.permute.xlu2 %10196  ;;  %v17948_v5 = vld [vmem:[#allocation180_spill] sm:$0xff]  ;;  %10604 = vpow2.f32 %v4340_v49 }
 0x688   :  { %9898 = vmatmul.msk.f32.vlgmr.msrb.gmra.mxu0 %vm3600_vm9, %v5092_v6  ;;  %9905 = vmatmul.msk.f32.gmra.mxu2 %vm3600_vm9, %v5097_v59  ;;  %v10198_v51 = vunpack.i.l.bf16 %v10197_v32  ;;  %v10199_v16 = vunpack.i.h.bf16 %v10197_v32  ;;  %v10595_v24 = vpop.eup %10594  ;;  %v5105_v12 = vmul.f32 %v10593_v21, %v17948_v5  ;;  %v4346_v6 = vmul.f32 1.442695, %v4118_v38  ;;  %v17949_v32 = vld [vmem:[#allocation303_spill] sm:$0xff]  ;;  %v17963_v21 = vld [vmem:[#allocation34_spill] sm:$0xff] }
 0x689   :  { %v10597_v48 = vpop.eup %10596  ;;  %10606 = vrcp.f32 %v17951_v19  ;;  %v17964_v38 = vld [vmem:[#allocation263_spill] sm:$0xff] }
 0x68a   :  { %6294 = vmatpush.msra.mxu1 %v10198_v51  ;;  %v6305_v2 = vpop.permute.xlu1 %6304  ;;  %v14633_v58 = vpop.eup %10598  ;;  %v4116_v51 = vsub.f32 %v17950_v63, %v17949_v32  ;;  %10608 = vpow2.f32 %v4346_v6 }
 0x68b   :  { %9908 = vmatmul.msk.f32.gmra.mxu3 %vm3600_vm9, %v5099_v18  ;;  %9915 = vmatpush.msk.msra.mxu2 %vm256_vm7, %v6305_v2  ;;  %v5107_v18 = vmul.f32 %v10595_v24, %v17952_v61  ;;  %v10601_v35 = vpop.eup %10600  ;;  %10610 = vrcp.f32 %v17954_v50  ;;  %v4691_v40 = vsel %vm3604_vm10, %v14633_v58, 0.0  ;;  %v17966_v24 = vld [vmem:[#allocation18_spill] sm:$0xff]  ;;  %v17970_v61 = vld [vmem:[#allocation179_spill] sm:$0xff] }
 0x68c   :  { %9913 = vmatmul.msk.f32.vlgmr.msra.gmra.mxu1 %vm3600_vm9, %v5102_v33  ;;  %v5110_v33 = vmul.f32 %v10597_v48, %v17953_v46  ;;  %v10603_v10 = vpop.eup %10602  ;;  %v4342_v42 = vmul.f32 1.442695, %v4116_v51  ;;  %10612 = vrcp.f32 %v14304_v15  ;;  %v17969_v48 = vld [vmem:[#allocation224_spill] sm:$0xff]  ;;  %v17971_v46 = vld [vmem:[#allocation182_spill] sm:$0xff] }
 0x68d   :  { %6628 = vrot.lane.b32.xlu2 %v17936_v11, %s10953_s5  ;;  %6330 = vmatpush.msra.mxu2 %v10194_v39  ;;  %v14645_v22 = vpop.eup %10604  ;;  %v17955_v39 = vld [vmem:[#allocation261_spill] sm:$0xff]  ;;  %10614 = vrcp.f32 %v17957_v7  ;;  %v17973_v50 = vld [vmem:[#allocation218_spill] sm:$0xff] }
 0x68e   :  { %v6341_v28 = vpop.permute.xlu0 %6340  ;;  %10616 = vpow2.f32 %v4342_v42  ;;  %v4709_v13 = vsel %vm3604_vm10, %v14645_v22, 0.0 }
 0x68f   :  { %9918 = vmatpush.msk.msra.mxu3 %vm256_vm7, %v6341_v28  ;;  %v10202_v37 = vpop.permute.xlu2 %10201  ;;  %v5112_v28 = vmul.f32 %v10603_v10, %v17955_v39  ;;  %v10607_v11 = vpop.eup %10606  ;;  %10618 = vrcp.f32 %v17963_v21  ;;  %v17972_v10 = vld [vmem:[#allocation309_spill] sm:$0xff] }
 0x690   :  { %9899 = vmatmul.msk.f32.gmra.mxu0 %vm3600_vm9, %v5093_v1  ;;  %9916 = vmatmul.msk.f32.vlgmr.msra.gmra.mxu2 %vm3600_vm9, %v5104_v41  ;;  %v10203_v44 = vunpack.i.l.bf16 %v10202_v37  ;;  %v10204_v36 = vunpack.i.h.bf16 %v10202_v37  ;;  %v5101_v41 = vmul.f32 %v10601_v35, %v17956_v56  ;;  %v14655_v15 = vpop.eup %10608  ;;  %v17958_v1 = vld [vmem:[#allocation325_spill] sm:$0xff]  ;;  %v5111_v17 = vmul.f32 %v10607_v11, %v17960_v55  ;;  %v17975_v56 = vld [vmem:[#allocation220_spill] sm:$0xff] }
 0x691   :  { %v4121_v47 = vsub.f32 %v17959_v14, %v17958_v1  ;;  %v10611_v37 = vpop.eup %10610  ;;  %10620 = vrcp.f32 %v17966_v24  ;;  %v17976_v1 = vld [vmem:[#allocation59_spill] sm:$0xff]  ;;  %v17979_v55 = vld [vmem:[#allocation236_spill] sm:$0xff] }
 0x692   :  { %6366 = vmatpush.msra.mxu3 %v10203_v44  ;;  %v6233_v9 = vpop.permute.xlu1 %6232  ;;  %v10613_v34 = vpop.eup %10612  ;;  %v5108_v49 = vmul.f32 %v10611_v37, %v17964_v38  ;;  %v17977_v14 = vld [vmem:[#allocation83_spill] sm:$0xff] }
 0x693   :  { %9919 = vmatmul.msk.f32.vlgmr.msra.gmra.mxu3 %vm3600_vm9, %v5106_v8  ;;  %9909 = vmatpush.msk.msra.mxu0 %vm256_vm7, %v6233_v9  ;;  %v10615_v54 = vpop.eup %10614  ;;  %v17961_v8 = vld [vmem:[#allocation317_spill] sm:$0xff]  ;;  %v4718_v9 = vsel %vm3600_vm9, %v14655_v15, 0.0 }
 0x694   :  { %9914 = vmatmul.msk.f32.gmra.mxu1 %vm3600_vm9, %v5103_v25  ;;  %v4120_v4 = vsub.f32 %v17962_v27, %v17961_v8  ;;  %v4352_v25 = vmul.f32 1.442695, %v4121_v47  ;;  %v10220_v47 = vpack.i.bf16 %v17977_v14, %v17976_v1  ;;  %v17980_v8 = vld [vmem:[#allocation93_spill] sm:$0xff] }
 0x695   :  { %6258 = vmatpush.msra.mxu0 %v10199_v16  ;;  %v5113_v16 = vmul.f32 %v10613_v34, %v17965_v57 }
 0x696   :  { %v6413_v52 = vpop.permute.xlu0 %6412  ;;  %v4350_v5 = vmul.f32 1.442695, %v4120_v4  ;;  %10622 = vpow2.f32 %v4352_v25  ;;  %v17981_v4 = vld [vmem:[#allocation81_spill] sm:$0xff]  ;;  %v17982_v25 = vld [vmem:[#allocation80_spill] sm:$0xff] }
 0x697   :  { %9924 = vmatpush.msk.msrb.mxu1 %vm256_vm7, %v6413_v52  ;;  %v10207_v3 = vpop.permute.xlu2 %10206  ;;  %v14671_v52 = vpop.eup %10616  ;;  %v10225_v21 = vpack.i.bf16 %v17982_v25, %v17981_v4 }
 0x698   :  { %9910 = vmatmul.msk.f32.vlgmr.msra.gmra.mxu0 %vm3600_vm9, %v5100_v43  ;;  %9917 = vmatmul.msk.f32.gmra.mxu2 %vm3600_vm9, %v5105_v12  ;;  %v10208_v59 = vunpack.i.l.bf16 %v10207_v3  ;;  %v10209_v53 = vunpack.i.h.bf16 %v10207_v3  ;;  %v5114_v43 = vmul.f32 %v10615_v54, %v17967_v20  ;;  %v17968_v12 = vld [vmem:[#allocation315_spill] sm:$0xff]  ;;  %v4712_v3 = vsel %vm3600_vm9, %v14671_v52, 0.0 }
 0x699   :  { %v4122_v6 = vsub.f32 %v17969_v48, %v17968_v12  ;;  %10624 = vpow2.f32 %v4350_v5 }
 0x69a   :  { %6438 = vmatpush.msrb.mxu1 %v10208_v59  ;;  %v10619_v59 = vpop.eup %10618 }
 0x69b   :  { %9920 = vmatmul.msk.f32.gmra.mxu3 %vm3600_vm9, %v5107_v18  ;;  %v6449_v0 = vpop.permute.xlu1 %6448  ;;  %v10621_v32 = vpop.eup %10620  ;;  %v4354_v63 = vmul.f32 1.442695, %v4122_v6  ;;  %v5109_v18 = vmul.f32 %v10619_v59, %v17970_v61  ;;  %v17987_v6 = vld [vmem:[#allocation120_spill] sm:$0xff] }
 0x69c   :  { %9925 = vmatmul.msk.f32.vlgmr.msrb.gmra.mxu1 %vm3600_vm9, %v5110_v33  ;;  %9927 = vmatpush.msk.msrb.mxu2 %vm256_vm7, %v6449_v0  ;;  %v14684_v35 = vpop.eup %10622  ;;  %v5115_v33 = vmul.f32 %v10621_v32, %v17971_v46  ;;  %v4119_v0 = vsub.f32 %v17973_v50, %v17972_v10  ;;  %v17990_v10 = vld [vmem:[#allocation232_spill] sm:$0xff] }
 0x69d   :  { %10626 = vpow2.f32 %v4354_v63  ;;  %v4727_v42 = vsel %vm3604_vm10, %v14684_v35, 0.0 }
 0x69e   :  { %v6485_v2 = vpop.permute.xlu0 %6484  ;;  %4692 = vadd.xlane.f32.xlu1 %v4691_v40  ;;  %6474 = vmatpush.msrb.mxu2 %v10204_v36  ;;  %v17974_v40 = vld [vmem:[#allocation311_spill] sm:$0xff] }
 0x69f   :  { %9930 = vmatpush.msk.msrb.mxu3 %vm256_vm7, %v6485_v2  ;;  %v14693_v36 = vpop.eup %10624  ;;  %v4348_v2 = vmul.f32 1.442695, %v4119_v0 }
 0x6a0   :  { %9911 = vmatmul.msk.f32.gmra.mxu0 %vm3600_vm9, %v5101_v41  ;;  %9928 = vmatmul.msk.f32.vlgmr.msrb.gmra.mxu2 %vm3600_vm9, %v5112_v28  ;;  %v4724_v39 = vsel %vm3600_vm9, %v14693_v36, 0.0  ;;  %v4117_v41 = vsub.f32 %v17975_v56, %v17974_v40 }
 0x6a1   :  { %10628 = vpow2.f32 %v4348_v2  ;;  %v17992_v2 = vld [vmem:[#allocation238_spill] sm:$0xff] }
 0x6a2   :  { %v4344_v7 = vmul.f32 1.442695, %v4117_v41 }
 0x6a3   :  { %v6377_v44 = vpop.permute.xlu1 %6376  ;;  %v14697_v28 = vpop.eup %10626 }
 0x6a4   :  { %4710 = vadd.xlane.f32.xlu0 %v4709_v13  ;;  %9926 = vmatmul.msk.f32.gmra.mxu1 %vm3600_vm9, %v5111_v17  ;;  %v4730_v11 = vsel %vm3600_vm9, %v14697_v28, 0.0  ;;  %10630 = vpow2.f32 %v4344_v7  ;;  %v17978_v13 = vld [vmem:[#allocation327_spill] sm:$0xff]  ;;  %v17994_v7 = vld [vmem:[#allocation244_spill] sm:$0xff] }
 0x6a5   :  { %9921 = vmatpush.msk.msrb.mxu0 %vm256_vm7, %v6377_v44  ;;  %v4128_v17 = vsub.f32 %v17979_v55, %v17978_v13  ;;  %v17995_v55 = vld [vmem:[#allocation331_spill] sm:$0xff] }
 0x6a6   :  { %v10212_v31 = vpop.permute.xlu0 %10211  ;;  %4719 = vadd.xlane.f32.xlu1 %v4718_v9  ;;  %v17984_v9 = vld [vmem:[#allocation72_spill] sm:$0xff] }
 0x6a7   :  { %v10213_v26 = vunpack.i.l.bf16 %v10212_v31  ;;  %6402 = vmatpush.msrb.mxu0 %v10209_v53  ;;  %v10214_v19 = vunpack.i.h.bf16 %v10212_v31  ;;  %v14705_v37 = vpop.eup %10628  ;;  %v4366_v44 = vmul.f32 1.442695, %v4128_v17  ;;  %v17983_v31 = vld [vmem:[#allocation94_spill] sm:$0xff]  ;;  %v17996_v17 = vld [vmem:[#allocation240_spill] sm:$0xff] }
 0x6a8   :  { %9922 = vmatmul.msk.f32.vlgmr.msrb.gmra.mxu0 %vm3600_vm9, %v5108_v49  ;;  %9929 = vmatmul.msk.f32.gmra.mxu2 %vm3600_vm9, %v5113_v16  ;;  %v4721_v34 = vsel %vm3604_vm10, %v14705_v37, 0.0  ;;  %v17985_v16 = vld [vmem:[#allocation95_spill] sm:$0xff] }
 0x6a9   :  { %6510 = vmatpush.msrb.mxu3 %v10213_v26  ;;  %10632 = vpow2.f32 %v4366_v44 }
 0x6aa   :  { %9931 = vmatmul.msk.f32.vlgmr.msrb.gmra.mxu3 %vm3600_vm9, %v5114_v43  ;;  %v14712_v54 = vpop.eup %10630 }
 0x6ab   :  { %v4715_v27 = vsel %vm3604_vm10, %v14712_v54, 0.0 }
 0x6ac   :  { %4713 = vadd.xlane.f32.xlu0 %v4712_v3 }
 0x6ae   :  { %v6593_v51 = vpop.permute.xlu0 %6592 }
 0x6af   :  { %9939 = vmatpush.msk.msra.mxu2 %vm256_vm7, %v6593_v51  ;;  %v14720_v53 = vpop.eup %10632 }
 0x6b0   :  { %9923 = vmatmul.msk.f32.gmra.mxu0 %vm3600_vm9, %v5109_v18  ;;  %v4748_v49 = vsel %vm3600_vm9, %v14720_v53, 0.0 }
 0x6b1   :  { %6618 = vmatpush.msra.mxu2 %v10214_v19 }
 0x6b2   :  { %9932 = vmatmul.msk.f32.gmra.mxu3 %vm3600_vm9, %v5115_v33  ;;  %v17989_v33 = vld [vmem:[#allocation323_spill] sm:$0xff] }
 0x6b3   :  { %v4123_v50 = vsub.f32 %v17990_v10, %v17989_v33 }
 0x6b4   :  { %4728 = vadd.xlane.f32.xlu0 %v4727_v42  ;;  %v17991_v42 = vld [vmem:[#allocation329_spill] sm:$0xff] }
 0x6b5   :  { %v4356_v40 = vmul.f32 1.442695, %v4123_v50 }
 0x6b6   :  { %4725 = vadd.xlane.f32.xlu2 %v4724_v39  ;;  %v4126_v39 = vsub.f32 %v17992_v2, %v17991_v42 }
 0x6b8   :  { %v4362_v41 = vmul.f32 1.442695, %v4126_v39 }
 0x6bc   :  { %4731 = vadd.xlane.f32.xlu0 %v4730_v11  ;;  %v17993_v11 = vld [vmem:[#allocation335_spill] sm:$0xff] }
 0x6bd   :  { %v4129_v1 = vsub.f32 %v17994_v7, %v17993_v11 }
 0x6bf   :  { %10221 = vrot.lane.b32.xlu1 %v10220_v47, %s10953_s5  ;;  %v4368_v47 = vmul.f32 1.442695, %v4129_v1 }
 0x6c4   :  { %4722 = vadd.xlane.f32.xlu0 %v4721_v34  ;;  %v4124_v34 = vsub.f32 %v17996_v17, %v17995_v55 }
 0x6c6   :  { %v4358_v25 = vmul.f32 1.442695, %v4124_v34  ;;  %v18009_v34 = vld [vmem:[#allocation321_spill] sm:$0xff] }
 0x6c7   :  { %6700 = vrot.lane.b32.xlu1 %v17980_v8, %s10953_s5  ;;  %v17998_v8 = vld [vmem:[#allocation252_spill] sm:$0xff] }
 0x6cc   :  { %4716 = vadd.xlane.f32.xlu0 %v4715_v27 }
 0x6ce   :  { %6736 = vrot.lane.b32.xlu2 %v17983_v31, %s10953_s5  ;;  %v4696_v5 = vpop.xlane.xlu1 %4695 }
 0x6cf   :  { %10226 = vrot.lane.b32.xlu1 %v10225_v21, %s10953_s5 }
 0x6d0   :  { %v4702_v38 = vpop.xlane.xlu2 %4701 }
 0x6d1   :  { %10634 = vrcp.f32 %v4702_v38 }
 0x6d4   :  { %4749 = vadd.xlane.f32.xlu0 %v4748_v49 }
 0x6d6   :  { %6664 = vrot.lane.b32.xlu2 %v17984_v9, %s10953_s5 }
 0x6d7   :  { %v10635_v26 = vpop.eup %10634  ;;  %6772 = vrot.lane.b32.xlu1 %v17985_v16, %s10953_s5 }
 0x6d8   :  { %v5120_v57 = vmul.f32 %v10635_v26, %v14485_v62  ;;  %v14732_v20 = vpop.xlane.xlu2 %4707  ;;  %v17986_v62 = vld [vmem:[#allocation102_spill] sm:$0xff] }
 0x6d9   :  { %v4705_v24 = vpop.xlane.xlu0 %4704  ;;  %v10230_v3 = vpack.i.bf16 %v17987_v6, %v17986_v62  ;;  %v18000_v62 = vld [vmem:[#allocation104_spill] sm:$0xff]  ;;  %v18001_v6 = vld [vmem:[#allocation103_spill] sm:$0xff] }
 0x6da   :  { %10636 = vrcp.f32 %v4705_v24  ;;  %9940 = vmatmul.msk.f32.vlgmr.msra.gmra.mxu2 %vm3600_vm9, %v5120_v57 }
 0x6db   :  { %10638 = vrcp.f32 %v4696_v5 }
 0x6dc   :  { %10640 = vrcp.f32 %v14322_v29  ;;  %v17988_v29 = vld [vmem:[#allocation185_spill] sm:$0xff] }
 0x6e0   :  { %v10637_v43 = vpop.eup %10636  ;;  %v4699_v48 = vpop.xlane.xlu2 %4698 }
 0x6e1   :  { %v5121_v12 = vmul.f32 %v10637_v43, %v14505_v45  ;;  %v10639_v32 = vpop.eup %10638  ;;  %10642 = vrcp.f32 %v4699_v48  ;;  %v17999_v43 = vld [vmem:[#allocation113_spill] sm:$0xff] }
 0x6e2   :  { %v10641_v51 = vpop.eup %10640  ;;  %v5118_v45 = vmul.f32 %v10639_v32, %v14479_v23  ;;  %10644 = vpow2.f32 %v4356_v40  ;;  %v18007_v40 = vld [vmem:[#allocation264_spill] sm:$0xff] }
 0x6e3   :  { %9941 = vmatmul.msk.f32.gmra.mxu2 %vm3600_vm9, %v5121_v12  ;;  %v5116_v46 = vmul.f32 %v10641_v51, %v17988_v29  ;;  %10646 = vpow2.f32 %v4362_v41  ;;  %v18002_v51 = vld [vmem:[#allocation112_spill] sm:$0xff] }
 0x6e4   :  { %10648 = vpow2.f32 %v4368_v47 }
 0x6e5   :  { %10650 = vpow2.f32 %v4358_v25 }
 0x6e6   :  { %v6557_v59 = vpop.permute.xlu1 %6556 }
 0x6e7   :  { %9936 = vmatpush.msk.msra.mxu1 %vm256_vm7, %v6557_v59  ;;  %v10643_v0 = vpop.eup %10642 }
 0x6e8   :  { %10231 = vrot.lane.b32.xlu0 %v10230_v3, %s10953_s5  ;;  %v10217_v63 = vpop.permute.xlu2 %10216  ;;  %v5119_v56 = vmul.f32 %v10643_v0, %v14531_v30  ;;  %v14756_v14 = vpop.eup %10644  ;;  %v17997_v30 = vld [vmem:[#allocation342_spill] sm:$0xff]  ;;  %v10235_v3 = vpack.i.bf16 %v18001_v6, %v18000_v62  ;;  %v18005_v0 = vld [vmem:[#allocation111_spill] sm:$0xff] }
 0x6e9   :  { %v10218_v19 = vunpack.i.l.bf16 %v10217_v63  ;;  %v10219_v18 = vunpack.i.h.bf16 %v10217_v63  ;;  %v14758_v13 = vpop.eup %10646  ;;  %v4733_v44 = vsel %vm3604_vm10, %v14756_v14, 0.0  ;;  %v4130_v27 = vsub.f32 %v17998_v8, %v17997_v30  ;;  %v18011_v8 = vld [vmem:[#allocation338_spill] sm:$0xff] }
 0x6ea   :  { %v4742_v4 = vsel %vm3600_vm9, %v14758_v13, 0.0  ;;  %v14768_v31 = vpop.eup %10648  ;;  %v18014_v62 = vld [vmem:[#allocation250_spill] sm:$0xff] }
 0x6eb   :  { %6582 = vmatpush.msra.mxu1 %v10218_v19  ;;  %v4370_v21 = vmul.f32 1.442695, %v4130_v27  ;;  %v4751_v38 = vsel %vm3604_vm10, %v14768_v31, 0.0  ;;  %v14772_v49 = vpop.eup %10650  ;;  %v18012_v27 = vld [vmem:[#allocation248_spill] sm:$0xff] }
 0x6ec   :  { %v6521_v61 = vpop.permute.xlu0 %6520  ;;  %9937 = vmatmul.msk.f32.vlgmr.msra.gmra.mxu1 %vm3600_vm9, %v5118_v45  ;;  %v4736_v9 = vsel %vm3600_vm9, %v14772_v49, 0.0  ;;  %v18004_v45 = vld [vmem:[#allocation246_spill] sm:$0xff] }
 0x6ed   :  { %9933 = vmatpush.msk.msra.mxu0 %vm256_vm7, %v6521_v61  ;;  %10652 = vpow2.f32 %v4370_v21 }
 0x6ef   :  { %6546 = vmatpush.msra.mxu0 %v10219_v18 }
 0x6f0   :  { %9934 = vmatmul.msk.f32.vlgmr.msra.gmra.mxu0 %vm3600_vm9, %v5116_v46  ;;  %v6629_v23 = vpop.permute.xlu2 %6628 }
 0x6f1   :  { %9942 = vmatpush.msk.msra.mxu3 %vm256_vm7, %v6629_v23  ;;  %v18006_v23 = vld [vmem:[#allocation348_spill] sm:$0xff] }
 0x6f3   :  { %v14774_v26 = vpop.eup %10652 }
 0x6f4   :  { %9938 = vmatmul.msk.f32.gmra.mxu1 %vm3600_vm9, %v5119_v56  ;;  %v4754_v57 = vsel %vm3600_vm9, %v14774_v26, 0.0  ;;  %v4136_v56 = vsub.f32 %v18007_v40, %v18006_v23 }
 0x6f6   :  { %v4382_v47 = vmul.f32 1.442695, %v4136_v56 }
 0x6ff   :  { %4734 = vadd.xlane.f32.xlu2 %v4733_v44  ;;  %v18010_v44 = vld [vmem:[#allocation230_spill] sm:$0xff] }
 0x700   :  { %v4125_v30 = vsub.f32 %v18010_v44, %v18009_v34 }
 0x701   :  { %4743 = vadd.xlane.f32.xlu1 %v4742_v4  ;;  %v4134_v4 = vsub.f32 %v18012_v27, %v18011_v8 }
 0x709   :  { %4752 = vadd.xlane.f32.xlu1 %v4751_v38 }
 0x711   :  { %4755 = vadd.xlane.f32.xlu1 %v4754_v57  ;;  %v4693_v16 = vpop.xlane.xlu1 %4692  ;;  %v4378_v57 = vmul.f32 1.442695, %v4134_v4 }
 0x712   :  { %4737 = vadd.xlane.f32.xlu0 %v4736_v9  ;;  %10654 = vrcp.f32 %v4693_v16 }
 0x713   :  { %10656 = vrcp.f32 %v14732_v20 }
 0x717   :  { %v4711_v24 = vpop.xlane.xlu0 %4710  ;;  %6880 = vrot.lane.b32.xlu2 %v17999_v43, %s10953_s5 }
 0x718   :  { %v10655_v5 = vpop.eup %10654 }
 0x719   :  { %v5117_v12 = vmul.f32 %v10655_v5, %v14633_v58  ;;  %v4720_v32 = vpop.xlane.xlu1 %4719  ;;  %v18003_v58 = vld [vmem:[#allocation337_spill] sm:$0xff]  ;;  %v10657_v18 = vpop.eup %10656 }
 0x71a   :  { %v4127_v61 = vsub.f32 %v18004_v45, %v18003_v58  ;;  %v5122_v42 = vmul.f32 %v10657_v18, %v14510_v60  ;;  %v18008_v60 = vld [vmem:[#allocation129_spill] sm:$0xff] }
 0x71b   :  { %9935 = vmatmul.msk.f32.gmra.mxu0 %vm3600_vm9, %v5117_v12 }
 0x71c   :  { %v4364_v10 = vmul.f32 1.442695, %v4127_v61 }
 0x71f   :  { %v4714_v48 = vpop.xlane.xlu0 %4713 }
 0x726   :  { %10236 = vrot.lane.b32.xlu0 %v10235_v3, %s10953_s5 }
 0x727   :  { %v4729_v59 = vpop.xlane.xlu0 %4728 }
 0x729   :  { %v4726_v63 = vpop.xlane.xlu2 %4725 }
 0x72a   :  { %6844 = vrot.lane.b32.xlu1 %v18002_v51, %s10953_s5  ;;  %10658 = vrcp.f32 %v4726_v63 }
 0x72b   :  { %10660 = vrcp.f32 %v4711_v24 }
 0x72c   :  { %10662 = vrcp.f32 %v4729_v59 }
 0x72d   :  { %10664 = vpow2.f32 %v4364_v10 }
 0x72e   :  { %10666 = vrcp.f32 %v4720_v32 }
 0x72f   :  { %v14790_v19 = vpop.xlane.xlu0 %4731  ;;  %10668 = vrcp.f32 %v4714_v48  ;;  %v18013_v48 = vld [vmem:[#allocation340_spill] sm:$0xff] }
 0x730   :  { %v10659_v29 = vpop.eup %10658  ;;  %10670 = vpow2.f32 %v4382_v47  ;;  %v4132_v6 = vsub.f32 %v18014_v62, %v18013_v48  ;;  %v18028_v48 = vld [vmem:[#allocation122_spill] sm:$0xff] }
 0x731   :  { %v10222_v46 = vpop.permute.xlu1 %10221  ;;  %v6737_v33 = vpop.permute.xlu2 %6736  ;;  %v5128_v2 = vmul.f32 %v10659_v29, %v14693_v36 }
 0x732   :  { %v10224_v50 = vunpack.i.h.bf16 %v10222_v46  ;;  %v10223_v20 = vunpack.i.l.bf16 %v10222_v46  ;;  %6808 = vrot.lane.b32.xlu1 %v18005_v0, %s10953_s5  ;;  %9951 = vmatpush.msk.msrb.mxu2 %vm256_vm7, %v6737_v33  ;;  %v10661_v41 = vpop.eup %10660  ;;  %v4374_v32 = vmul.f32 1.442695, %v4132_v6  ;;  %v18016_v46 = vld [vmem:[#allocation242_spill] sm:$0xff] }
 0x733   :  { %v10663_v11 = vpop.eup %10662  ;;  %v5123_v36 = vmul.f32 %v10661_v41, %v14645_v22 }
 0x734   :  { %6654 = vmatpush.msra.mxu3 %v10223_v20  ;;  %6762 = vmatpush.msrb.mxu2 %v10224_v50  ;;  %v5129_v55 = vmul.f32 %v10663_v11, %v14684_v35  ;;  %v14809_v17 = vpop.eup %10664  ;;  %v4360_v35 = vmul.f32 1.442695, %v4125_v30  ;;  %v18019_v11 = vld [vmem:[#allocation121_spill] sm:$0xff] }
 0x735   :  { %9943 = vmatmul.msk.f32.vlgmr.msra.gmra.mxu3 %vm3600_vm9, %v5122_v42  ;;  %9952 = vmatmul.msk.f32.vlgmr.msrb.gmra.mxu2 %vm3600_vm9, %v5128_v2  ;;  %v10667_v25 = vpop.eup %10666  ;;  %v4745_v22 = vsel %vm3604_vm10, %v14809_v17, 0.0  ;;  %v18017_v2 = vld [vmem:[#allocation347_spill] sm:$0xff] }
 0x736   :  { %v10669_v38 = vpop.eup %10668  ;;  %v5126_v43 = vmul.f32 %v10667_v25, %v14655_v15 }
 0x737   :  { %v4723_v39 = vpop.xlane.xlu0 %4722  ;;  %v5124_v5 = vmul.f32 %v10669_v38, %v14671_v52  ;;  %v14821_v12 = vpop.eup %10670 }
 0x738   :  { %10672 = vrcp.f32 %v4723_v39  ;;  %v4772_v59 = vsel %vm3600_vm9, %v14821_v12, 0.0  ;;  %v18018_v39 = vld [vmem:[#allocation262_spill] sm:$0xff] }
 0x739   :  { %v6701_v7 = vpop.permute.xlu1 %6700  ;;  %v6665_v1 = vpop.permute.xlu2 %6664  ;;  %v4138_v23 = vsub.f32 %v18018_v39, %v18017_v2  ;;  %v18033_v39 = vld [vmem:[#allocation354_spill] sm:$0xff] }
 0x73a   :  { %6916 = vrot.lane.b32.xlu1 %v18008_v60, %s10953_s5  ;;  %9948 = vmatpush.msk.msrb.mxu1 %vm256_vm7, %v6701_v7  ;;  %v18020_v7 = vld [vmem:[#allocation139_spill] sm:$0xff] }
 0x73b   :  { %9945 = vmatpush.msk.msrb.mxu0 %vm256_vm7, %v6665_v1  ;;  %v10240_v1 = vpack.i.bf16 %v18020_v7, %v18019_v11 }
 0x73d   :  { %9944 = vmatmul.msk.f32.gmra.mxu3 %vm3600_vm9, %v5123_v36  ;;  %9953 = vmatmul.msk.f32.gmra.mxu2 %vm3600_vm9, %v5129_v55 }
 0x73e   :  { %v10673_v3 = vpop.eup %10672 }
 0x73f   :  { %v4717_v21 = vpop.xlane.xlu0 %4716  ;;  %v5127_v58 = vmul.f32 %v10673_v3, %v14705_v37  ;;  %v18015_v37 = vld [vmem:[#allocation333_spill] sm:$0xff] }
 0x740   :  { %4746 = vadd.xlane.f32.xlu2 %v4745_v22  ;;  %10674 = vrcp.f32 %v4717_v21  ;;  %v4131_v33 = vsub.f32 %v18016_v46, %v18015_v37  ;;  %v18022_v21 = vld [vmem:[#allocation343_spill] sm:$0xff]  ;;  %v18023_v22 = vld [vmem:[#allocation254_spill] sm:$0xff]  ;;  %v18029_v46 = vld [vmem:[#allocation345_spill] sm:$0xff] }
 0x741   :  { %v10227_v9 = vpop.permute.xlu1 %10226  ;;  %10676 = vpow2.f32 %v4360_v35  ;;  %v4137_v38 = vsub.f32 %v18023_v22, %v18022_v21  ;;  %v18024_v35 = vld [vmem:[#allocation344_spill] sm:$0xff] }
 0x742   :  { %v10229_v16 = vunpack.i.h.bf16 %v10227_v9  ;;  %v10228_v24 = vunpack.i.l.bf16 %v10227_v9  ;;  %10678 = vpow2.f32 %v4378_v57  ;;  %v4372_v50 = vmul.f32 1.442695, %v4131_v33  ;;  %v18025_v9 = vld [vmem:[#allocation256_spill] sm:$0xff]  ;;  %v18030_v33 = vld [vmem:[#allocation258_spill] sm:$0xff] }
 0x743   :  { %10680 = vpow2.f32 %v4374_v32  ;;  %v4135_v57 = vsub.f32 %v18025_v9, %v18024_v35 }
 0x744   :  { %6690 = vmatpush.msrb.mxu0 %v10229_v16  ;;  %6726 = vmatpush.msrb.mxu1 %v10228_v24  ;;  %10682 = vrcp.f32 %v14790_v19  ;;  %v4386_v19 = vmul.f32 1.442695, %v4138_v23  ;;  %v18034_v23 = vld [vmem:[#allocation276_spill] sm:$0xff] }
 0x745   :  { %9946 = vmatmul.msk.f32.vlgmr.msrb.gmra.mxu0 %vm3600_vm9, %v5124_v5  ;;  %9949 = vmatmul.msk.f32.vlgmr.msrb.gmra.mxu1 %vm3600_vm9, %v5126_v43  ;;  %10684 = vpow2.f32 %v4372_v50  ;;  %v18026_v43 = vld [vmem:[#allocation131_spill] sm:$0xff]  ;;  %v18027_v5 = vld [vmem:[#allocation138_spill] sm:$0xff] }
 0x746   :  { %v10675_v15 = vpop.eup %10674  ;;  %10686 = vpow2.f32 %v4386_v19  ;;  %v10245_v62 = vpack.i.bf16 %v18028_v48, %v18027_v5 }
 0x747   :  { %v14829_v63 = vpop.eup %10676  ;;  %v5125_v51 = vmul.f32 %v10675_v15, %v14712_v54  ;;  %v4750_v29 = vpop.xlane.xlu0 %4749 }
 0x748   :  { %4773 = vadd.xlane.f32.xlu2 %v4772_v59  ;;  %v14834_v45 = vpop.eup %10678  ;;  %v4739_v61 = vsel %vm3604_vm10, %v14829_v63, 0.0  ;;  %10688 = vrcp.f32 %v4750_v29 }
 0x749   :  { %v6773_v52 = vpop.permute.xlu1 %6772  ;;  %v4766_v18 = vsel %vm3600_vm9, %v14834_v45, 0.0  ;;  %v14843_v54 = vpop.eup %10680 }
 0x74a   :  { %9954 = vmatpush.msk.msrb.mxu3 %vm256_vm7, %v6773_v52  ;;  %v4760_v10 = vsel %vm3600_vm9, %v14843_v54, 0.0  ;;  %v10683_v20 = vpop.eup %10682 }
 0x74b   :  { %v5130_v40 = vmul.f32 %v10683_v20, %v14697_v28  ;;  %v14853_v56 = vpop.eup %10684  ;;  %v18021_v28 = vld [vmem:[#allocation32_spill] sm:$0xff] }
 0x74c   :  { %v4757_v41 = vsel %vm3604_vm10, %v14853_v56, 0.0  ;;  %v14859_v47 = vpop.eup %10686 }
 0x74d   :  { %9947 = vmatmul.msk.f32.gmra.mxu0 %vm3600_vm9, %v5125_v51  ;;  %9950 = vmatmul.msk.f32.gmra.mxu1 %vm3600_vm9, %v5127_v58  ;;  %v4778_v60 = vsel %vm3600_vm9, %v14859_v47, 0.0 }
 0x74e   :  { %v10689_v34 = vpop.eup %10688 }
 0x74f   :  { %v5136_v4 = vmul.f32 %v10689_v34, %v14720_v53  ;;  %v4380_v53 = vmul.f32 1.442695, %v4135_v57  ;;  %v18036_v34 = vld [vmem:[#allocation270_spill] sm:$0xff]  ;;  %v18041_v57 = vld [vmem:[#allocation352_spill] sm:$0xff] }
 0x750   :  { %4740 = vadd.xlane.f32.xlu0 %v4739_v61  ;;  %4767 = vadd.xlane.f32.xlu2 %v4766_v18 }
 0x758   :  { %4761 = vadd.xlane.f32.xlu0 %v4760_v10  ;;  %v4133_v10 = vsub.f32 %v18030_v33, %v18029_v46 }
 0x75a   :  { %v10232_v0 = vpop.permute.xlu0 %10231 }
 0x75b   :  { %v10233_v42 = vunpack.i.l.bf16 %v10232_v0  ;;  %v10234_v27 = vunpack.i.h.bf16 %v10232_v0  ;;  %v18031_v0 = vld [vmem:[#allocation50_spill] sm:$0xff] }
 0x75d   :  { %6798 = vmatpush.msrb.mxu3 %v10233_v42  ;;  %v18032_v42 = vld [vmem:[#allocation130_spill] sm:$0xff] }
 0x75e   :  { %9955 = vmatmul.msk.f32.vlgmr.msrb.gmra.mxu3 %vm3600_vm9, %v5130_v40  ;;  %v4142_v40 = vsub.f32 %v18034_v23, %v18033_v39  ;;  %v18046_v23 = vld [vmem:[#allocation36_spill] sm:$0xff] }
 0x760   :  { %v4394_v19 = vmul.f32 1.442695, %v4142_v40  ;;  %v18047_v40 = vld [vmem:[#allocation357_spill] sm:$0xff] }
 0x764   :  { %4758 = vadd.xlane.f32.xlu1 %v4757_v41 }
 0x768   :  { %10241 = vrot.lane.b32.xlu2 %v10240_v1, %s10953_s5 }
 0x76c   :  { %7024 = vrot.lane.b32.xlu0 %v18021_v28, %s10953_s5  ;;  %4779 = vadd.xlane.f32.xlu1 %v4778_v60 }
 0x772   :  { %v4735_v36 = vpop.xlane.xlu2 %4734 }
 0x773   :  { %10690 = vrcp.f32 %v4735_v36 }
 0x774   :  { %v4744_v55 = vpop.xlane.xlu1 %4743 }
 0x779   :  { %v10691_v44 = vpop.eup %10690 }
 0x77a   :  { %v6881_v30 = vpop.permute.xlu2 %6880  ;;  %v5131_v8 = vmul.f32 %v10691_v44, %v14756_v14  ;;  %v4384_v14 = vmul.f32 1.442695, %v4137_v38  ;;  %v18039_v38 = vld [vmem:[#allocation346_spill] sm:$0xff] }
 0x77b   :  { %9963 = vmatpush.msk.msra.mxu2 %vm256_vm7, %v6881_v30  ;;  %v18037_v30 = vld [vmem:[#allocation353_spill] sm:$0xff] }
 0x77c   :  { %v4753_v25 = vpop.xlane.xlu1 %4752  ;;  %9956 = vmatmul.msk.f32.gmra.mxu3 %vm3600_vm9, %v5131_v8  ;;  %v18038_v8 = vld [vmem:[#allocation274_spill] sm:$0xff] }
 0x77d   :  { %10692 = vrcp.f32 %v4753_v25  ;;  %6906 = vmatpush.msra.mxu2 %v10234_v27  ;;  %v4144_v27 = vsub.f32 %v18038_v8, %v18037_v30 }
 0x77e   :  { %9964 = vmatmul.msk.f32.vlgmr.msra.gmra.mxu2 %vm3600_vm9, %v5136_v4  ;;  %10694 = vpow2.f32 %v4384_v14 }
 0x77f   :  { %10696 = vpow2.f32 %v4380_v53  ;;  %v4398_v22 = vmul.f32 1.442695, %v4144_v27 }
 0x780   :  { %10698 = vrcp.f32 %v4744_v55  ;;  %v18035_v55 = vld [vmem:[#allocation351_spill] sm:$0xff] }
 0x781   :  { %v4139_v44 = vsub.f32 %v18036_v34, %v18035_v55  ;;  %v18052_v55 = vld [vmem:[#allocation350_spill] sm:$0xff]  ;;  %v18053_v34 = vld [vmem:[#allocation268_spill] sm:$0xff] }
 0x783   :  { %v10693_v16 = vpop.eup %10692  ;;  %v4388_v25 = vmul.f32 1.442695, %v4139_v44  ;;  %v4141_v44 = vsub.f32 %v18053_v34, %v18052_v55 }
 0x784   :  { %v5137_v24 = vmul.f32 %v10693_v16, %v14768_v31  ;;  %v14881_v6 = vpop.eup %10694  ;;  %v4756_v32 = vpop.xlane.xlu1 %4755  ;;  %v18042_v16 = vld [vmem:[#allocation272_spill] sm:$0xff] }
 0x785   :  { %6988 = vrot.lane.b32.xlu1 %v18026_v43, %s10953_s5  ;;  %v14884_v3 = vpop.eup %10696  ;;  %v4775_v31 = vsel %vm3604_vm10, %v14881_v6, 0.0  ;;  %v4738_v59 = vpop.xlane.xlu0 %4737  ;;  %v4146_v14 = vsub.f32 %v18042_v16, %v18041_v57  ;;  %v4392_v30 = vmul.f32 1.442695, %v4141_v44 }
 0x786   :  { %9965 = vmatmul.msk.f32.gmra.mxu2 %vm3600_vm9, %v5137_v24  ;;  %v4769_v15 = vsel %vm3604_vm10, %v14884_v3, 0.0  ;;  %v10699_v51 = vpop.eup %10698  ;;  %10700 = vrcp.f32 %v4738_v59  ;;  %v14980_v16 = vpop.f32.mrf.mxu1 }
 0x787   :  { %v5134_v18 = vmul.f32 %v10699_v51, %v14758_v13  ;;  %v4376_v13 = vmul.f32 1.442695, %v4133_v10  ;;  %v4402_v48 = vmul.f32 1.442695, %v4146_v14 }
 0x789   :  { %10702 = vpow2.f32 %v4376_v13 }
 0x78c   :  { %v10701_v29 = vpop.eup %10700 }
 0x78d   :  { %10246 = vrot.lane.b32.xlu1 %v10245_v62, %s10953_s5  ;;  %v5132_v20 = vmul.f32 %v10701_v29, %v14772_v49 }
 0x78f   :  { %v14905_v41 = vpop.eup %10702 }
 0x790   :  { %v4763_v11 = vsel %vm3604_vm10, %v14905_v41, 0.0 }
 0x791   :  { %4776 = vadd.xlane.f32.xlu2 %v4775_v31 }
 0x796   :  { %4770 = vadd.xlane.f32.xlu0 %v4769_v15 }
 0x798   :  { %v10237_v52 = vpop.permute.xlu0 %10236 }
 0x799   :  { %v10238_v61 = vunpack.i.l.bf16 %v10237_v52  ;;  %v10239_v50 = vunpack.i.h.bf16 %v10237_v52 }
 0x79c   :  { %v6845_v58 = vpop.permute.xlu1 %6844 }
 0x79d   :  { %9960 = vmatpush.msk.msra.mxu1 %vm256_vm7, %v6845_v58 }
 0x79f   :  { %6870 = vmatpush.msra.mxu1 %v10238_v61  ;;  %v18043_v61 = vld [vmem:[#allocation22_spill] sm:$0xff] }
 0x7a0   :  { %9961 = vmatmul.msk.f32.vlgmr.msra.gmra.mxu1 %vm3600_vm9, %v5134_v18  ;;  %v18044_v18 = vld [vmem:[#allocation27_spill] sm:$0xff] }
 0x7a1   :  { %v10250_v29 = vpack.i.bf16 %v18044_v18, %v18043_v61  ;;  %v18062_v18 = vld [vmem:[#allocation52_spill] sm:$0xff] }
 0x7a4   :  { %v6809_v37 = vpop.permute.xlu1 %6808 }
 0x7a5   :  { %9957 = vmatpush.msk.msra.mxu0 %vm256_vm7, %v6809_v37 }
 0x7a7   :  { %6834 = vmatpush.msra.mxu0 %v10239_v50 }
 0x7a8   :  { %9958 = vmatmul.msk.f32.vlgmr.msra.gmra.mxu0 %vm3600_vm9, %v5132_v20 }
 0x7a9   :  { %6952 = vrot.lane.b32.xlu2 %v18032_v42, %s10953_s5 }
 0x7aa   :  { %7060 = vrot.lane.b32.xlu0 %v18031_v0, %s10953_s5 }
 0x7ac   :  { %v6917_v2 = vpop.permute.xlu1 %6916 }
 0x7ad   :  { %9966 = vmatpush.msk.msra.mxu3 %vm256_vm7, %v6917_v2  ;;  %v14951_v2 = vpop.f32.mrf.mxu2 }
 0x7ae   :  { %18045 = vst [vmem:[#allocation43_spill] sm:$0xff] %v14951_v2 }
 0x7b3   :  { %v4747_v49 = vpop.xlane.xlu2 %4746 }
 0x7b4   :  { %10704 = vrcp.f32 %v4747_v49 }
 0x7b5   :  { %10706 = vpow2.f32 %v4394_v19  ;;  %v18048_v19 = vld [vmem:[#allocation282_spill] sm:$0xff] }
 0x7b6   :  { %v4145_v49 = vsub.f32 %v18048_v19, %v18047_v40  ;;  %v18065_v19 = vld [vmem:[#allocation360_spill] sm:$0xff] }
 0x7b7   :  { %4764 = vadd.xlane.f32.xlu1 %v4763_v11 }
 0x7ba   :  { %v10705_v7 = vpop.eup %10704 }
 0x7bb   :  { %v14909_v1 = vpop.eup %10706  ;;  %v4774_v28 = vpop.xlane.xlu2 %4773  ;;  %v5135_v60 = vmul.f32 %v10705_v7, %v14809_v17  ;;  %v18040_v17 = vld [vmem:[#allocation260_spill] sm:$0xff]  ;;  %v18050_v7 = vld [vmem:[#allocation29_spill] sm:$0xff] }
 0x7bc   :  { %v4790_v36 = vsel %vm3600_vm9, %v14909_v1, 0.0  ;;  %v4140_v35 = vsub.f32 %v18040_v17, %v18039_v38 }
 0x7bd   :  { %9962 = vmatmul.msk.f32.gmra.mxu1 %vm3600_vm9, %v5135_v60 }
 0x7be   :  { %v4390_v53 = vmul.f32 1.442695, %v4140_v35 }
 0x7bf   :  { %4791 = vadd.xlane.f32.xlu1 %v4790_v36 }
 0x7c3   :  { %v4741_v4 = vpop.xlane.xlu0 %4740  ;;  %v4768_v21 = vpop.xlane.xlu2 %4767 }
 0x7c4   :  { %10708 = vrcp.f32 %v4741_v4  ;;  %v18054_v4 = vld [vmem:[#allocation51_spill] sm:$0xff] }
 0x7c5   :  { %10710 = vrcp.f32 %v4756_v32  ;;  %v14930_v32 = vpop.f32.mrf.mxu3 }
 0x7c6   :  { %10712 = vpow2.f32 %v4388_v25  ;;  %v18055_v25 = vld [vmem:[#allocation356_spill] sm:$0xff] }
 0x7c7   :  { %10714 = vpow2.f32 %v4398_v22  ;;  %v18056_v22 = vld [vmem:[#allocation280_spill] sm:$0xff] }
 0x7c8   :  { %10716 = vpow2.f32 %v4390_v53  ;;  %v4147_v38 = vsub.f32 %v18056_v22, %v18055_v25  ;;  %v18058_v53 = vld [vmem:[#allocation146_spill] sm:$0xff] }
 0x7c9   :  { %10718 = vpow2.f32 %v4402_v48 }
 0x7ca   :  { %v10709_v9 = vpop.eup %10708  ;;  %10720 = vrcp.f32 %v4774_v28  ;;  %v18051_v28 = vld [vmem:[#allocation60_spill] sm:$0xff]  ;;  %v4404_v57 = vmul.f32 1.442695, %v4147_v38  ;;  %v18069_v38 = vld [vmem:[#allocation355_spill] sm:$0xff] }
 0x7cb   :  { %v5133_v24 = vmul.f32 %v10709_v9, %v14829_v63  ;;  %v10711_v43 = vpop.eup %10710  ;;  %v10242_v5 = vpop.permute.xlu2 %10241  ;;  %v10255_v60 = vpack.i.bf16 %v18051_v28, %v18050_v7 }
 0x7cc   :  { %v10243_v62 = vunpack.i.l.bf16 %v10242_v5  ;;  %v14925_v31 = vpop.eup %10712  ;;  %v5138_v59 = vmul.f32 %v10711_v43, %v14774_v26  ;;  %v4762_v51 = vpop.xlane.xlu0 %4761  ;;  %v10244_v20 = vunpack.i.h.bf16 %v10242_v5  ;;  %v18057_v43 = vld [vmem:[#allocation39_spill] sm:$0xff]  ;;  %v18059_v5 = vld [vmem:[#allocation288_spill] sm:$0xff] }
 0x7cd   :  { %9959 = vmatmul.msk.f32.gmra.mxu0 %vm3600_vm9, %v5133_v24  ;;  %v14928_v15 = vpop.eup %10714  ;;  %v4781_v63 = vsel %vm3604_vm10, %v14925_v31, 0.0  ;;  %v14954_v39 = vpop.f32.mrf.mxu3  ;;  %v4148_v48 = vsub.f32 %v18059_v5, %v18058_v53 }
 0x7ce   :  { %6942 = vmatpush.msra.mxu3 %v10243_v62  ;;  %v4796_v52 = vsel %vm3600_vm9, %v14928_v15, 0.0  ;;  %v14937_v58 = vpop.eup %10716  ;;  %v18060_v62 = vld [vmem:[#allocation349_spill] sm:$0xff] }
 0x7cf   :  { %9967 = vmatmul.msk.f32.vlgmr.msra.gmra.mxu3 %vm3600_vm9, %v5138_v59  ;;  %v14939_v26 = vpop.eup %10718  ;;  %v4784_v46 = vsel %vm3600_vm9, %v14937_v58, 0.0  ;;  %v18061_v59 = vld [vmem:[#allocation266_spill] sm:$0xff] }
 0x7d0   :  { %v4802_v33 = vsel %vm3600_vm9, %v14939_v26, 0.0  ;;  %v10721_v10 = vpop.eup %10720 }
 0x7d1   :  { %v5144_v13 = vmul.f32 %v10721_v10, %v14821_v12  ;;  %v18049_v12 = vld [vmem:[#allocation41_spill] sm:$0xff] }
 0x7d2   :  { %4782 = vadd.xlane.f32.xlu2 %v4781_v63  ;;  %v4143_v63 = vsub.f32 %v18061_v59, %v18060_v62  ;;  %v18072_v59 = vld [vmem:[#allocation74_spill] sm:$0xff] }
 0x7d4   :  { %4797 = vadd.xlane.f32.xlu0 %v4796_v52 }
 0x7d7   :  { %v4759_v37 = vpop.xlane.xlu1 %4758 }
 0x7d8   :  { %10722 = vrcp.f32 %v4759_v37  ;;  %10251 = vrot.lane.b32.xlu1 %v10250_v29, %s10953_s5  ;;  %v18063_v29 = vld [vmem:[#allocation61_spill] sm:$0xff] }
 0x7d9   :  { %v10260_v37 = vpack.i.bf16 %v18063_v29, %v18062_v18  ;;  %v18075_v18 = vld [vmem:[#allocation195_spill] sm:$0xff]  ;;  %v18076_v29 = vld [vmem:[#allocation294_spill] sm:$0xff] }
 0x7da   :  { %4785 = vadd.xlane.f32.xlu2 %v4784_v46  ;;  %v4406_v46 = vmul.f32 1.442695, %v4148_v48 }
 0x7dc   :  { %4803 = vadd.xlane.f32.xlu0 %v4802_v33 }
 0x7de   :  { %v7025_v50 = vpop.permute.xlu0 %7024  ;;  %v10723_v0 = vpop.eup %10722 }
 0x7df   :  { %9975 = vmatpush.msk.msrb.mxu2 %vm256_vm7, %v7025_v50  ;;  %v5139_v42 = vmul.f32 %v10723_v0, %v14853_v56  ;;  %v14961_v11 = vpop.xlane.xlu1 %4779  ;;  %v4400_v56 = vmul.f32 1.442695, %v4145_v49 }
 0x7e1   :  { %7050 = vmatpush.msrb.mxu2 %v10244_v20  ;;  %9968 = vmatmul.msk.f32.gmra.mxu3 %vm3600_vm9, %v5139_v42  ;;  %10724 = vpow2.f32 %v4400_v56  ;;  %v4396_v20 = vmul.f32 1.442695, %v4143_v63  ;;  %v14999_v42 = vpop.f32.mrf.mxu2  ;;  %v15010_v56 = vpop.f32.mrf.mxu1 }
 0x7e2   :  { %9976 = vmatmul.msk.f32.vlgmr.msrb.gmra.mxu2 %vm3600_vm9, %v5144_v13  ;;  %10726 = vrcp.f32 %v4768_v21  ;;  %18064 = vst [vmem:[#allocation67_spill] sm:$0xff] %v14999_v42  ;;  %v18191_v42 = vld [vmem:[#allocation145_spill] sm:$0xff] }
 0x7e3   :  { %10728 = vpow2.f32 %v4392_v30 }
 0x7e4   :  { %10730 = vrcp.f32 %v4762_v51 }
 0x7e7   :  { %v14971_v8 = vpop.eup %10724 }
 0x7e8   :  { %v10727_v27 = vpop.eup %10726  ;;  %v4799_v21 = vsel %vm3604_vm10, %v14971_v8, 0.0 }
 0x7e9   :  { %v5142_v9 = vmul.f32 %v10727_v27, %v14834_v45  ;;  %v14983_v24 = vpop.eup %10728 }
 0x7ea   :  { %v4787_v52 = vsel %vm3604_vm10, %v14983_v24, 0.0  ;;  %v10731_v51 = vpop.eup %10730 }
 0x7f0   :  { %7132 = vrot.lane.b32.xlu0 %v18046_v23, %s10953_s5  ;;  %v5140_v23 = vmul.f32 %v10731_v51, %v14843_v54  ;;  %v18074_v51 = vld [vmem:[#allocation84_spill] sm:$0xff] }
 0x7f2   :  { %7168 = vrot.lane.b32.xlu2 %v18049_v12, %s10953_s5  ;;  %v15007_v12 = vpop.f32.mrf.mxu0 }
 0x7f7   :  { %v6989_v36 = vpop.permute.xlu1 %6988 }
 0x7f8   :  { %10256 = vrot.lane.b32.xlu0 %v10255_v60, %s10953_s5  ;;  %9972 = vmatpush.msk.msrb.mxu1 %vm256_vm7, %v6989_v36  ;;  %v18067_v60 = vld [vmem:[#allocation358_spill] sm:$0xff]  ;;  %v18068_v36 = vld [vmem:[#allocation284_spill] sm:$0xff] }
 0x7f9   :  { %v4152_v55 = vsub.f32 %v18068_v36, %v18067_v60 }
 0x7fa   :  { %v15041_v5 = vpop.f32.mrf.mxu0 }
 0x7fb   :  { %v4414_v27 = vmul.f32 1.442695, %v4152_v55  ;;  %v15068_v55 = vpop.f32.mrf.mxu2 }
 0x7fc   :  { %18080 = vst [vmem:[#allocation58_spill] sm:$0xff] %v15068_v55 }
 0x7ff   :  { %v10247_v17 = vpop.permute.xlu1 %10246 }
 0x800   :  { %7096 = vrot.lane.b32.xlu0 %v18054_v4, %s10953_s5  ;;  %v10248_v35 = vunpack.i.l.bf16 %v10247_v17  ;;  %v10249_v0 = vunpack.i.h.bf16 %v10247_v17  ;;  %v18070_v17 = vld [vmem:[#allocation278_spill] sm:$0xff] }
 0x802   :  { %4800 = vadd.xlane.f32.xlu1 %v4799_v21  ;;  %7014 = vmatpush.msrb.mxu1 %v10248_v35  ;;  %v4149_v35 = vsub.f32 %v18070_v17, %v18069_v38 }
 0x803   :  { %9973 = vmatmul.msk.f32.vlgmr.msrb.gmra.mxu1 %vm3600_vm9, %v5142_v9 }
 0x804   :  { %v4777_v14 = vpop.xlane.xlu2 %4776  ;;  %v4408_v21 = vmul.f32 1.442695, %v4149_v35 }
 0x805   :  { %10732 = vrcp.f32 %v4777_v14 }
 0x806   :  { %10734 = vpow2.f32 %v4404_v57 }
 0x808   :  { %7204 = vrot.lane.b32.xlu0 %v18057_v43, %s10953_s5 }
 0x809   :  { %v4771_v45 = vpop.xlane.xlu0 %4770 }
 0x80a   :  { %10736 = vrcp.f32 %v4771_v45  ;;  %4788 = vadd.xlane.f32.xlu1 %v4787_v52  ;;  %v18071_v45 = vld [vmem:[#allocation73_spill] sm:$0xff]  ;;  %v18073_v52 = vld [vmem:[#allocation62_spill] sm:$0xff] }
 0x80b   :  { %v10733_v61 = vpop.eup %10732  ;;  %10738 = vpow2.f32 %v4406_v46 }
 0x80c   :  { %v6953_v33 = vpop.permute.xlu2 %6952  ;;  %v5145_v10 = vmul.f32 %v10733_v61, %v14881_v6  ;;  %v14996_v50 = vpop.eup %10734  ;;  %v18066_v6 = vld [vmem:[#allocation286_spill] sm:$0xff]  ;;  %10740 = vpow2.f32 %v4396_v20  ;;  %v10265_v61 = vpack.i.bf16 %v18074_v51, %v18073_v52  ;;  %v18077_v20 = vld [vmem:[#allocation75_spill] sm:$0xff] }
 0x80d   :  { %9969 = vmatpush.msk.msrb.mxu0 %vm256_vm7, %v6953_v33  ;;  %v4150_v49 = vsub.f32 %v18066_v6, %v18065_v19  ;;  %v4805_v54 = vsel %vm3604_vm10, %v14996_v50, 0.0 }
 0x80e   :  { %9977 = vmatmul.msk.f32.gmra.mxu2 %vm3600_vm9, %v5145_v10 }
 0x80f   :  { %6978 = vmatpush.msrb.mxu0 %v10249_v0  ;;  %v4410_v7 = vmul.f32 1.442695, %v4150_v49  ;;  %v15055_v0 = vpop.f32.mrf.mxu3 }
 0x810   :  { %v10737_v13 = vpop.eup %10736  ;;  %10261 = vrot.lane.b32.xlu0 %v10260_v37, %s10953_s5  ;;  %9970 = vmatmul.msk.f32.vlgmr.msrb.gmra.mxu0 %vm3600_vm9, %v5140_v23  ;;  %v4151_v37 = vsub.f32 %v18076_v29, %v18075_v18  ;;  %18078 = vst [vmem:[#allocation65_spill] sm:$0xff] %v15055_v0  ;;  %v15090_v18 = vpop.f32.mrf.mxu0  ;;  %v18190_v0 = vld [vmem:[#allocation137_spill] sm:$0xff] }
 0x811   :  { %v5143_v40 = vmul.f32 %v10737_v13, %v14884_v3  ;;  %v15015_v28 = vpop.eup %10738  ;;  %10742 = vpow2.f32 %v4410_v7  ;;  %18088 = vst [vmem:[#allocation42_spill] sm:$0xff] %v15090_v18 }
 0x812   :  { %4806 = vadd.xlane.f32.xlu1 %v4805_v54  ;;  %v15017_v3 = vpop.eup %10740  ;;  %v4808_v34 = vsel %vm3600_vm9, %v15015_v28, 0.0  ;;  %10744 = vpow2.f32 %v4414_v27  ;;  %v4412_v23 = vmul.f32 1.442695, %v4151_v37  ;;  %v18089_v37 = vld [vmem:[#allocation96_spill] sm:$0xff] }
 0x813   :  { %9974 = vmatmul.msk.f32.gmra.mxu1 %vm3600_vm9, %v5143_v40  ;;  %v4793_v30 = vsel %vm3604_vm10, %v15017_v3, 0.0 }
 0x817   :  { %v15026_v4 = vpop.eup %10742  ;;  %v15061_v54 = vpop.f32.mrf.mxu3 }
 0x818   :  { %v4814_v25 = vsel %vm3600_vm9, %v15026_v4, 0.0  ;;  %v15030_v22 = vpop.eup %10744  ;;  %18079 = vst [vmem:[#allocation66_spill] sm:$0xff] %v15061_v54  ;;  %v18189_v54 = vld [vmem:[#allocation140_spill] sm:$0xff] }
 0x819   :  { %v4820_v9 = vsel %vm3600_vm9, %v15030_v22, 0.0 }
 0x81a   :  { %4809 = vadd.xlane.f32.xlu1 %v4808_v34 }
 0x81b   :  { %4794 = vadd.xlane.f32.xlu2 %v4793_v30  ;;  %v18082_v30 = vld [vmem:[#allocation292_spill] sm:$0xff] }
 0x81c   :  { %v7061_v44 = vpop.permute.xlu0 %7060 }
 0x81d   :  { %9978 = vmatpush.msk.msrb.mxu3 %vm256_vm7, %v7061_v44  ;;  %v18081_v44 = vld [vmem:[#allocation147_spill] sm:$0xff] }
 0x81e   :  { %v4153_v27 = vsub.f32 %v18082_v30, %v18081_v44  ;;  %v18093_v44 = vld [vmem:[#allocation193_spill] sm:$0xff]  ;;  %v18094_v30 = vld [vmem:[#allocation290_spill] sm:$0xff] }
 0x820   :  { %v4416_v35 = vmul.f32 1.442695, %v4153_v27  ;;  %v4155_v27 = vsub.f32 %v18094_v30, %v18093_v44 }
 0x822   :  { %4815 = vadd.xlane.f32.xlu1 %v4814_v25  ;;  %v18084_v25 = vld [vmem:[#allocation300_spill] sm:$0xff] }
 0x82a   :  { %4821 = vadd.xlane.f32.xlu1 %v4820_v9  ;;  %v4765_v57 = vpop.xlane.xlu1 %4764 }
 0x82b   :  { %10746 = vrcp.f32 %v4765_v57 }
 0x82c   :  { %10748 = vpow2.f32 %v4408_v21 }
 0x82d   :  { %10750 = vrcp.f32 %v14961_v11 }
 0x831   :  { %v10747_v14 = vpop.eup %10746 }
 0x832   :  { %v5141_v43 = vmul.f32 %v10747_v14, %v14905_v41  ;;  %v15039_v53 = vpop.eup %10748  ;;  %v4792_v62 = vpop.xlane.xlu1 %4791 }
 0x833   :  { %7240 = vrot.lane.b32.xlu2 %v18071_v45, %s10953_s5  ;;  %v4811_v48 = vsel %vm3604_vm10, %v15039_v53, 0.0  ;;  %v10751_v63 = vpop.eup %10750  ;;  %v18086_v45 = vld [vmem:[#allocation298_spill] sm:$0xff] }
 0x834   :  { %9971 = vmatmul.msk.f32.gmra.mxu0 %vm3600_vm9, %v5141_v43  ;;  %v5146_v11 = vmul.f32 %v10751_v63, %v14859_v47  ;;  %v18085_v43 = vld [vmem:[#allocation149_spill] sm:$0xff] }
 0x83a   :  { %4812 = vadd.xlane.f32.xlu0 %v4811_v48  ;;  %v4156_v48 = vsub.f32 %v18086_v45, %v18085_v43  ;;  %v18100_v43 = vld [vmem:[#allocation312_spill] sm:$0xff] }
 0x843   :  { %7276 = vrot.lane.b32.xlu1 %v18072_v59, %s10953_s5 }
 0x845   :  { %v4783_v41 = vpop.xlane.xlu2 %4782 }
 0x846   :  { %10752 = vrcp.f32 %v4783_v41  ;;  %v4422_v41 = vmul.f32 1.442695, %v4156_v48 }
 0x847   :  { %v4798_v33 = vpop.xlane.xlu0 %4797 }
 0x848   :  { %10754 = vrcp.f32 %v4798_v33 }
 0x849   :  { %10756 = vpow2.f32 %v4412_v23 }
 0x84a   :  { %v10252_v46 = vpop.permute.xlu1 %10251  ;;  %10758 = vrcp.f32 %v4792_v62  ;;  %v15081_v62 = vpop.f32.mrf.mxu1 }
 0x84b   :  { %v10253_v10 = vunpack.i.l.bf16 %v10252_v46  ;;  %7312 = vrot.lane.b32.xlu1 %v18077_v20, %s10953_s5  ;;  %v10254_v7 = vunpack.i.h.bf16 %v10252_v46  ;;  %18087 = vst [vmem:[#allocation44_spill] sm:$0xff] %v15081_v62 }
 0x84c   :  { %v10753_v40 = vpop.eup %10752 }
 0x84d   :  { %7086 = vmatpush.msrb.mxu3 %v10253_v10  ;;  %v4786_v13 = vpop.xlane.xlu2 %4785  ;;  %v5147_v6 = vmul.f32 %v10753_v40, %v14925_v31 }
 0x84e   :  { %10266 = vrot.lane.b32.xlu0 %v10265_v61, %s10953_s5  ;;  %9979 = vmatmul.msk.f32.vlgmr.msrb.gmra.mxu3 %vm3600_vm9, %v5146_v11  ;;  %v10755_v19 = vpop.eup %10754  ;;  %10760 = vrcp.f32 %v4786_v13 }
 0x84f   :  { %v5152_v47 = vmul.f32 %v10755_v19, %v14928_v15  ;;  %v15066_v60 = vpop.eup %10756  ;;  %v4804_v36 = vpop.xlane.xlu0 %4803  ;;  %v18083_v15 = vld [vmem:[#allocation199_spill] sm:$0xff]  ;;  %10762 = vpow2.f32 %v4416_v35 }
 0x850   :  { %v4817_v31 = vsel %vm3604_vm10, %v15066_v60, 0.0  ;;  %v4154_v38 = vsub.f32 %v18084_v25, %v18083_v15  ;;  %v10759_v17 = vpop.eup %10758  ;;  %v15105_v19 = vpop.f32.mrf.mxu2  ;;  %v18095_v25 = vld [vmem:[#allocation85_spill] sm:$0xff] }
 0x851   :  { %v5150_v14 = vmul.f32 %v10759_v17, %v14909_v1  ;;  %18090 = vst [vmem:[#allocation89_spill] sm:$0xff] %v15105_v19  ;;  %v18179_v19 = vld [vmem:[#allocation326_spill] sm:$0xff] }
 0x852   :  { %v4418_v9 = vmul.f32 1.442695, %v4154_v38 }
 0x854   :  { %10764 = vpow2.f32 %v4418_v9  ;;  %v10761_v59 = vpop.eup %10760 }
 0x855   :  { %v7169_v49 = vpop.permute.xlu2 %7168  ;;  %v15084_v52 = vpop.eup %10762  ;;  %v5148_v1 = vmul.f32 %v10761_v59, %v14937_v58  ;;  %10766 = vpow2.f32 %v4422_v41 }
 0x856   :  { %9980 = vmatmul.msk.f32.gmra.mxu3 %vm3600_vm9, %v5147_v6  ;;  %9987 = vmatpush.msk.msra.mxu2 %vm256_vm7, %v7169_v49  ;;  %v4823_v29 = vsel %vm3604_vm10, %v15084_v52, 0.0 }
 0x858   :  { %7194 = vmatpush.msra.mxu2 %v10254_v7 }
 0x859   :  { %9988 = vmatmul.msk.f32.vlgmr.msra.gmra.mxu2 %vm3600_vm9, %v5152_v47 }
 0x85a   :  { %v15087_v61 = vpop.eup %10764 }
 0x85b   :  { %v4826_v33 = vsel %vm3600_vm9, %v15087_v61, 0.0  ;;  %v15100_v10 = vpop.eup %10766 }
 0x85c   :  { %4818 = vadd.xlane.f32.xlu2 %v4817_v31  ;;  %v4832_v23 = vsel %vm3600_vm9, %v15100_v10, 0.0 }
 0x862   :  { %v7133_v34 = vpop.permute.xlu0 %7132 }
 0x863   :  { %9984 = vmatpush.msk.msra.mxu1 %vm256_vm7, %v7133_v34  ;;  %v15113_v34 = vpop.f32.mrf.mxu0 }
 0x864   :  { %18092 = vst [vmem:[#allocation90_spill] sm:$0xff] %v15113_v34 }
 0x86a   :  { %v10257_v21 = vpop.permute.xlu0 %10256 }
 0x86b   :  { %v10258_v57 = vunpack.i.l.bf16 %v10257_v21  ;;  %v10259_v51 = vunpack.i.h.bf16 %v10257_v21 }
 0x86d   :  { %7158 = vmatpush.msra.mxu1 %v10258_v57  ;;  %v18098_v57 = vld [vmem:[#allocation97_spill] sm:$0xff] }
 0x86e   :  { %9985 = vmatmul.msk.f32.vlgmr.msra.gmra.mxu1 %vm3600_vm9, %v5150_v14  ;;  %v18099_v14 = vld [vmem:[#allocation155_spill] sm:$0xff] }
 0x86f   :  { %v4160_v45 = vsub.f32 %v18100_v43, %v18099_v14 }
 0x872   :  { %v7097_v63 = vpop.permute.xlu0 %7096 }
 0x873   :  { %9981 = vmatpush.msk.msra.mxu0 %vm256_vm7, %v7097_v63  ;;  %v4430_v63 = vmul.f32 1.442695, %v4160_v45 }
 0x874   :  { %7348 = vrot.lane.b32.xlu2 %v18089_v37, %s10953_s5 }
 0x875   :  { %7122 = vmatpush.msra.mxu0 %v10259_v51  ;;  %4824 = vadd.xlane.f32.xlu1 %v4823_v29  ;;  %v4801_v46 = vpop.xlane.xlu1 %4800 }
 0x876   :  { %9982 = vmatmul.msk.f32.vlgmr.msra.gmra.mxu0 %vm3600_vm9, %v5148_v1  ;;  %10768 = vrcp.f32 %v4801_v46  ;;  %v15131_v1 = vpop.f32.mrf.mxu1  ;;  %v15137_v46 = vpop.f32.mrf.mxu0 }
 0x877   :  { %10770 = vrcp.f32 %v4804_v36  ;;  %v15109_v36 = vpop.f32.mrf.mxu3  ;;  %18101 = vst [vmem:[#allocation9_spill] sm:$0xff] %v15131_v1 }
 0x878   :  { %4827 = vadd.xlane.f32.xlu0 %v4826_v33  ;;  %18091 = vst [vmem:[#allocation68_spill] sm:$0xff] %v15109_v36 }
 0x879   :  { %18102 = vst [vmem:[#allocation91_spill] sm:$0xff] %v15137_v46  ;;  %v18177_v46 = vld [vmem:[#allocation332_spill] sm:$0xff] }
 0x87a   :  { %v7205_v58 = vpop.permute.xlu0 %7204 }
 0x87b   :  { %9990 = vmatpush.msk.msra.mxu3 %vm256_vm7, %v7205_v58 }
 0x87c   :  { %v10769_v20 = vpop.eup %10768 }
 0x87d   :  { %v4789_v11 = vpop.xlane.xlu1 %4788  ;;  %v5153_v13 = vmul.f32 %v10769_v20, %v14971_v8  ;;  %v10771_v40 = vpop.eup %10770  ;;  %v18103_v20 = vld [vmem:[#allocation152_spill] sm:$0xff] }
 0x87e   :  { %10772 = vrcp.f32 %v4789_v11  ;;  %v5154_v7 = vmul.f32 %v10771_v40, %v14939_v26  ;;  %v18096_v26 = vld [vmem:[#allocation86_spill] sm:$0xff]  ;;  %v18106_v40 = vld [vmem:[#allocation296_spill] sm:$0xff] }
 0x87f   :  { %9989 = vmatmul.msk.f32.gmra.mxu2 %vm3600_vm9, %v5153_v13  ;;  %v10270_v38 = vpack.i.bf16 %v18096_v26, %v18095_v25  ;;  %v15122_v21 = vpop.f32.mrf.mxu3  ;;  %v18104_v11 = vld [vmem:[#allocation306_spill] sm:$0xff]  ;;  %v18109_v25 = vld [vmem:[#allocation151_spill] sm:$0xff]  ;;  %v18110_v26 = vld [vmem:[#allocation304_spill] sm:$0xff] }
 0x880   :  { %4833 = vadd.xlane.f32.xlu0 %v4832_v23  ;;  %18097 = vst [vmem:[#allocation3_spill] sm:$0xff] %v15122_v21  ;;  %v4157_v13 = vsub.f32 %v18104_v11, %v18103_v20  ;;  %v18105_v23 = vld [vmem:[#allocation148_spill] sm:$0xff]  ;;  %v15178_v11 = vpop.f32.mrf.mxu1 }
 0x881   :  { %18113 = vst [vmem:[#allocation78_spill] sm:$0xff] %v15178_v11 }
 0x882   :  { %v10262_v6 = vpop.permute.xlu0 %10261 }
 0x883   :  { %v10263_v49 = vunpack.i.l.bf16 %v10262_v6  ;;  %v10264_v51 = vunpack.i.h.bf16 %v10262_v6  ;;  %v4158_v6 = vsub.f32 %v18106_v40, %v18105_v23 }
 0x884   :  { %v10773_v47 = vpop.eup %10772 }
 0x885   :  { %7230 = vmatpush.msra.mxu3 %v10263_v49  ;;  %v4807_v8 = vpop.xlane.xlu1 %4806  ;;  %v5149_v31 = vmul.f32 %v10773_v47, %v14983_v24  ;;  %v4420_v24 = vmul.f32 1.442695, %v4155_v27  ;;  %v4424_v49 = vmul.f32 1.442695, %v4157_v13  ;;  %v18107_v47 = vld [vmem:[#allocation150_spill] sm:$0xff]  ;;  %v15180_v13 = vpop.f32.mrf.mxu2 }
 0x886   :  { %9991 = vmatmul.msk.f32.vlgmr.msra.gmra.mxu3 %vm3600_vm9, %v5154_v7  ;;  %10774 = vrcp.f32 %v4807_v8  ;;  %v18108_v8 = vld [vmem:[#allocation302_spill] sm:$0xff]  ;;  %v4426_v30 = vmul.f32 1.442695, %v4158_v6  ;;  %18114 = vst [vmem:[#allocation33_spill] sm:$0xff] %v15180_v13 }
 0x887   :  { %9983 = vmatmul.msk.f32.gmra.mxu0 %vm3600_vm9, %v5149_v31  ;;  %v4161_v31 = vsub.f32 %v18108_v8, %v18107_v47  ;;  %v18116_v6 = vld [vmem:[#allocation310_spill] sm:$0xff]  ;;  %v18118_v47 = vld [vmem:[#allocation105_spill] sm:$0xff] }
 0x889   :  { %v4432_v27 = vmul.f32 1.442695, %v4161_v31 }
 0x88c   :  { %v10775_v15 = vpop.eup %10774 }
 0x88d   :  { %v4810_v17 = vpop.xlane.xlu1 %4809  ;;  %v5155_v35 = vmul.f32 %v10775_v15, %v14996_v50 }
 0x88e   :  { %10776 = vrcp.f32 %v4810_v17  ;;  %10271 = vrot.lane.b32.xlu1 %v10270_v38, %s10953_s5  ;;  %v4795_v9 = vpop.xlane.xlu2 %4794  ;;  %v4159_v38 = vsub.f32 %v18110_v26, %v18109_v25  ;;  %v18121_v25 = vld [vmem:[#allocation115_spill] sm:$0xff] }
 0x88f   :  { %10778 = vrcp.f32 %v4795_v9  ;;  %9992 = vmatmul.msk.f32.gmra.mxu3 %vm3600_vm9, %v5155_v35  ;;  %v15157_v9 = vpop.f32.mrf.mxu0 }
 0x890   :  { %10780 = vpow2.f32 %v4420_v24  ;;  %18111 = vst [vmem:[#allocation82_spill] sm:$0xff] %v15157_v9 }
 0x891   :  { %10782 = vpow2.f32 %v4430_v63 }
 0x894   :  { %7384 = vrot.lane.b32.xlu0 %v18098_v57, %s10953_s5  ;;  %v10777_v48 = vpop.eup %10776  ;;  %v4428_v57 = vmul.f32 1.442695, %v4159_v38 }
 0x895   :  { %v10779_v59 = vpop.eup %10778  ;;  %v5156_v29 = vmul.f32 %v10777_v48, %v15015_v28  ;;  %v4816_v58 = vpop.xlane.xlu1 %4815 }
 0x896   :  { %v7241_v50 = vpop.permute.xlu2 %7240  ;;  %v5151_v41 = vmul.f32 %v10779_v59, %v15017_v3  ;;  %v15135_v37 = vpop.eup %10780 }
 0x897   :  { %9993 = vmatpush.msk.msrb.mxu0 %vm256_vm7, %v7241_v50  ;;  %v4829_v3 = vsel %vm3604_vm10, %v15135_v37, 0.0  ;;  %v15142_v33 = vpop.eup %10782 }
 0x898   :  { %9986 = vmatmul.msk.f32.gmra.mxu1 %vm3600_vm9, %v5151_v41  ;;  %v4844_v28 = vsel %vm3600_vm9, %v15142_v33, 0.0  ;;  %v18112_v41 = vld [vmem:[#allocation114_spill] sm:$0xff] }
 0x899   :  { %7266 = vmatpush.msrb.mxu0 %v10264_v51 }
 0x89a   :  { %9994 = vmatmul.msk.f32.vlgmr.msrb.gmra.mxu0 %vm3600_vm9, %v5156_v29 }
 0x89d   :  { %4830 = vadd.xlane.f32.xlu2 %v4829_v3  ;;  %v4822_v44 = vpop.xlane.xlu1 %4821 }
 0x8a5   :  { %4845 = vadd.xlane.f32.xlu2 %v4844_v28 }
 0x8ad   :  { %v4813_v7 = vpop.xlane.xlu0 %4812 }
 0x8ae   :  { %10784 = vrcp.f32 %v4813_v7  ;;  %v18117_v7 = vld [vmem:[#allocation106_spill] sm:$0xff] }
 0x8af   :  { %10786 = vpow2.f32 %v4424_v49  ;;  %v10275_v8 = vpack.i.bf16 %v18118_v47, %v18117_v7  ;;  %v18131_v7 = vld [vmem:[#allocation211_spill] sm:$0xff]  ;;  %v18132_v47 = vld [vmem:[#allocation314_spill] sm:$0xff] }
 0x8b0   :  { %10788 = vpow2.f32 %v4426_v30 }
 0x8b1   :  { %10790 = vpow2.f32 %v4432_v27  ;;  %v15193_v27 = vpop.f32.mrf.mxu1 }
 0x8b2   :  { %10792 = vrcp.f32 %v4816_v58  ;;  %18119 = vst [vmem:[#allocation5_spill] sm:$0xff] %v15193_v27  ;;  %v18169_v27 = vld [vmem:[#allocation231_spill] sm:$0xff] }
 0x8b3   :  { %10794 = vrcp.f32 %v4822_v44 }
 0x8b4   :  { %v10785_v15 = vpop.eup %10784  ;;  %10796 = vpow2.f32 %v4428_v57  ;;  %v18123_v57 = vld [vmem:[#allocation308_spill] sm:$0xff] }
 0x8b5   :  { %v5157_v17 = vmul.f32 %v10785_v15, %v15039_v53  ;;  %v15155_v35 = vpop.eup %10786  ;;  %v7277_v24 = vpop.permute.xlu1 %7276  ;;  %v18120_v15 = vld [vmem:[#allocation98_spill] sm:$0xff] }
 0x8b6   :  { %9996 = vmatpush.msk.msrb.mxu1 %vm256_vm7, %v7277_v24  ;;  %v4835_v14 = vsel %vm3604_vm10, %v15155_v35, 0.0  ;;  %v15163_v43 = vpop.eup %10788  ;;  %v18122_v24 = vld [vmem:[#allocation205_spill] sm:$0xff] }
 0x8b7   :  { %9995 = vmatmul.msk.f32.gmra.mxu0 %vm3600_vm9, %v5157_v17  ;;  %v15165_v53 = vpop.eup %10790  ;;  %v4838_v45 = vsel %vm3600_vm9, %v15163_v43, 0.0 }
 0x8b8   :  { %4836 = vadd.xlane.f32.xlu1 %v4835_v14  ;;  %v10793_v48 = vpop.eup %10792  ;;  %v4847_v3 = vsel %vm3604_vm10, %v15165_v53, 0.0  ;;  %v4164_v14 = vsub.f32 %v18123_v57, %v18122_v24  ;;  %v15226_v57 = vpop.f32.mrf.mxu3 }
 0x8b9   :  { %v10795_v59 = vpop.eup %10794  ;;  %v5158_v28 = vmul.f32 %v10793_v48, %v15026_v4  ;;  %v18115_v4 = vld [vmem:[#allocation207_spill] sm:$0xff]  ;;  %18135 = vst [vmem:[#allocation40_spill] sm:$0xff] %v15226_v57 }
 0x8ba   :  { %v15174_v58 = vpop.eup %10796  ;;  %v5160_v20 = vmul.f32 %v10795_v59, %v15030_v22  ;;  %v4162_v22 = vsub.f32 %v18116_v6, %v18115_v4  ;;  %v15207_v59 = vpop.f32.mrf.mxu2 }
 0x8bb   :  { %v4841_v23 = vsel %vm3604_vm10, %v15174_v58, 0.0  ;;  %18124 = vst [vmem:[#allocation46_spill] sm:$0xff] %v15207_v59 }
 0x8bc   :  { %v4434_v30 = vmul.f32 1.442695, %v4162_v22 }
 0x8bd   :  { %v7313_v50 = vpop.permute.xlu1 %7312  ;;  %7456 = vrot.lane.b32.xlu2 %v18112_v41, %s10953_s5  ;;  %v18125_v41 = vld [vmem:[#allocation219_spill] sm:$0xff] }
 0x8be   :  { %4839 = vadd.xlane.f32.xlu0 %v4838_v45  ;;  %9999 = vmatpush.msk.msrb.mxu2 %vm256_vm7, %v7313_v50  ;;  %v4438_v50 = vmul.f32 1.442695, %v4164_v14 }
 0x8c0   :  { %v10267_v63 = vpop.permute.xlu0 %10266  ;;  %4848 = vadd.xlane.f32.xlu1 %v4847_v3  ;;  %v18128_v3 = vld [vmem:[#allocation318_spill] sm:$0xff] }
 0x8c1   :  { %v10269_v51 = vunpack.i.h.bf16 %v10267_v63  ;;  %v10268_v29 = vunpack.i.l.bf16 %v10267_v63  ;;  %v18126_v63 = vld [vmem:[#allocation322_spill] sm:$0xff] }
 0x8c3   :  { %7302 = vmatpush.msrb.mxu1 %v10268_v29  ;;  %7338 = vmatpush.msrb.mxu2 %v10269_v51  ;;  %v4168_v51 = vsub.f32 %v18126_v63, %v18125_v41  ;;  %v18127_v29 = vld [vmem:[#allocation158_spill] sm:$0xff]  ;;  %v18136_v63 = vld [vmem:[#allocation116_spill] sm:$0xff] }
 0x8c4   :  { %9997 = vmatmul.msk.f32.vlgmr.msrb.gmra.mxu1 %vm3600_vm9, %v5158_v28  ;;  %10000 = vmatmul.msk.f32.vlgmr.msrb.gmra.mxu2 %vm3600_vm9, %v5160_v20  ;;  %v4163_v28 = vsub.f32 %v18128_v3, %v18127_v29  ;;  %v15239_v29 = vpop.f32.mrf.mxu0 }
 0x8c5   :  { %v4446_v6 = vmul.f32 1.442695, %v4168_v51  ;;  %v15237_v51 = vpop.f32.mrf.mxu1  ;;  %18138 = vst [vmem:[#allocation23_spill] sm:$0xff] %v15239_v29 }
 0x8c6   :  { %4842 = vadd.xlane.f32.xlu0 %v4841_v23  ;;  %v18129_v23 = vld [vmem:[#allocation107_spill] sm:$0xff]  ;;  %v4436_v22 = vmul.f32 1.442695, %v4163_v28  ;;  %18137 = vst [vmem:[#allocation31_spill] sm:$0xff] %v15237_v51 }
 0x8cf   :  { %v4819_v40 = vpop.xlane.xlu2 %4818 }
 0x8d0   :  { %10798 = vrcp.f32 %v4819_v40  ;;  %v18130_v40 = vld [vmem:[#allocation123_spill] sm:$0xff] }
 0x8d1   :  { %10800 = vpow2.f32 %v4434_v30  ;;  %v10280_v4 = vpack.i.bf16 %v18130_v40, %v18129_v23  ;;  %v18134_v30 = vld [vmem:[#allocation324_spill] sm:$0xff]  ;;  %v15250_v40 = vpop.f32.mrf.mxu1 }
 0x8d2   :  { %18139 = vst [vmem:[#allocation14_spill] sm:$0xff] %v15250_v40 }
 0x8d6   :  { %v10799_v49 = vpop.eup %10798 }
 0x8d7   :  { %v7349_v31 = vpop.permute.xlu2 %7348  ;;  %v5159_v44 = vmul.f32 %v10799_v49, %v15066_v60  ;;  %v15200_v26 = vpop.eup %10800 }
 0x8d8   :  { %10002 = vmatpush.msk.msrb.mxu3 %vm256_vm7, %v7349_v31  ;;  %v4850_v60 = vsel %vm3600_vm9, %v15200_v26, 0.0 }
 0x8d9   :  { %7420 = vrot.lane.b32.xlu1 %v18120_v15, %s10953_s5  ;;  %9998 = vmatmul.msk.f32.gmra.mxu1 %vm3600_vm9, %v5159_v44  ;;  %v18133_v44 = vld [vmem:[#allocation161_spill] sm:$0xff] }
 0x8da   :  { %10276 = vrot.lane.b32.xlu0 %v10275_v8, %s10953_s5  ;;  %v4167_v8 = vsub.f32 %v18132_v47, %v18131_v7  ;;  %v4166_v15 = vsub.f32 %v18134_v30, %v18133_v44  ;;  %v15257_v47 = vpop.f32.mrf.mxu3  ;;  %v18142_v44 = vld [vmem:[#allocation316_spill] sm:$0xff] }
 0x8db   :  { %18140 = vst [vmem:[#allocation13_spill] sm:$0xff] %v15257_v47 }
 0x8dc   :  { %v4444_v24 = vmul.f32 1.442695, %v4167_v8  ;;  %v15260_v8 = vpop.f32.mrf.mxu1 }
 0x8e1   :  { %7492 = vrot.lane.b32.xlu1 %v18121_v25, %s10953_s5 }
 0x8e6   :  { %4851 = vadd.xlane.f32.xlu2 %v4850_v60 }
 0x8e8   :  { %v4825_v38 = vpop.xlane.xlu1 %4824 }
 0x8e9   :  { %10802 = vrcp.f32 %v4825_v38 }
 0x8ea   :  { %10804 = vpow2.f32 %v4438_v50 }
 0x8eb   :  { %v4828_v45 = vpop.xlane.xlu0 %4827 }
 0x8ec   :  { %10806 = vrcp.f32 %v4828_v45  ;;  %v4442_v45 = vmul.f32 1.442695, %v4166_v15 }
 0x8ef   :  { %v10803_v17 = vpop.eup %10802 }
 0x8f0   :  { %v5161_v48 = vmul.f32 %v10803_v17, %v15084_v52  ;;  %v15216_v52 = vpop.eup %10804 }
 0x8f1   :  { %v4856_v60 = vsel %vm3600_vm9, %v15216_v52, 0.0 }
 0x8f2   :  { %10001 = vmatmul.msk.f32.gmra.mxu2 %vm3600_vm9, %v5161_v48  ;;  %v10807_v49 = vpop.eup %10806 }
 0x8f3   :  { %v4834_v20 = vpop.xlane.xlu0 %4833  ;;  %v5162_v38 = vmul.f32 %v10807_v49, %v15087_v61 }
 0x8f4   :  { %10808 = vrcp.f32 %v4834_v20 }
 0x8f5   :  { %10810 = vpow2.f32 %v4446_v6 }
 0x8f6   :  { %10812 = vpow2.f32 %v4436_v22 }
 0x8f7   :  { %10814 = vpow2.f32 %v4444_v24  ;;  %v15267_v24 = vpop.f32.mrf.mxu2 }
 0x8f8   :  { %10816 = vpow2.f32 %v4442_v45  ;;  %18145 = vst [vmem:[#allocation64_spill] sm:$0xff] %v15267_v24 }
 0x8fa   :  { %v10809_v17 = vpop.eup %10808 }
 0x8fb   :  { %v15230_v50 = vpop.eup %10810  ;;  %v5164_v41 = vmul.f32 %v10809_v17, %v15100_v10 }
 0x8fc   :  { %v15235_v61 = vpop.eup %10812  ;;  %v4868_v3 = vsel %vm3600_vm9, %v15230_v50, 0.0 }
 0x8fd   :  { %v4853_v10 = vsel %vm3604_vm10, %v15235_v61, 0.0  ;;  %v15246_v28 = vpop.eup %10814 }
 0x8fe   :  { %10281 = vrot.lane.b32.xlu2 %v10280_v4, %s10953_s5  ;;  %v15248_v20 = vpop.eup %10816  ;;  %v4865_v4 = vsel %vm3604_vm10, %v15246_v28, 0.0 }
 0x8ff   :  { %v4862_v6 = vsel %vm3600_vm9, %v15248_v20, 0.0 }
 0x900   :  { %v10272_v31 = vpop.permute.xlu1 %10271 }
 0x901   :  { %v10273_v25 = vunpack.i.l.bf16 %v10272_v31  ;;  %v10274_v48 = vunpack.i.h.bf16 %v10272_v31  ;;  %v18141_v31 = vld [vmem:[#allocation213_spill] sm:$0xff] }
 0x902   :  { %v4165_v30 = vsub.f32 %v18142_v44, %v18141_v31 }
 0x903   :  { %7374 = vmatpush.msrb.mxu3 %v10273_v25 }
 0x904   :  { %4857 = vadd.xlane.f32.xlu0 %v4856_v60  ;;  %10003 = vmatmul.msk.f32.vlgmr.msrb.gmra.mxu3 %vm3600_vm9, %v5162_v38  ;;  %v4440_v25 = vmul.f32 1.442695, %v4165_v30  ;;  %v18143_v60 = vld [vmem:[#allocation124_spill] sm:$0xff]  ;;  %v18144_v38 = vld [vmem:[#allocation125_spill] sm:$0xff] }
 0x905   :  { %v10285_v17 = vpack.i.bf16 %v18144_v38, %v18143_v60  ;;  %v18151_v30 = vld [vmem:[#allocation217_spill] sm:$0xff] }
 0x906   :  { %v7385_v14 = vpop.permute.xlu0 %7384  ;;  %7528 = vrot.lane.b32.xlu2 %v18136_v63, %s10953_s5 }
 0x907   :  { %10005 = vmatpush.msk.msra.mxu0 %vm256_vm7, %v7385_v14 }
 0x909   :  { %7410 = vmatpush.msra.mxu0 %v10274_v48  ;;  %v18146_v48 = vld [vmem:[#allocation132_spill] sm:$0xff] }
 0x90a   :  { %10006 = vmatmul.msk.f32.vlgmr.msra.gmra.mxu0 %vm3600_vm9, %v5164_v41  ;;  %v15276_v41 = vpop.f32.mrf.mxu2 }
 0x90b   :  { %4854 = vadd.xlane.f32.xlu1 %v4853_v10  ;;  %18147 = vst [vmem:[#allocation45_spill] sm:$0xff] %v15276_v41  ;;  %v15282_v10 = vpop.f32.mrf.mxu3  ;;  %v18156_v41 = vld [vmem:[#allocation167_spill] sm:$0xff] }
 0x90c   :  { %4869 = vadd.xlane.f32.xlu0 %v4868_v3  ;;  %18148 = vst [vmem:[#allocation76_spill] sm:$0xff] %v15282_v10 }
 0x910   :  { %v4831_v23 = vpop.xlane.xlu2 %4830 }
 0x911   :  { %10818 = vrcp.f32 %v4831_v23 }
 0x912   :  { %10820 = vpow2.f32 %v4440_v25 }
 0x913   :  { %4863 = vadd.xlane.f32.xlu1 %v4862_v6  ;;  %v15285_v6 = vpop.f32.mrf.mxu0  ;;  %v15292_v44 = vpop.f32.mrf.mxu3 }
 0x914   :  { %4866 = vadd.xlane.f32.xlu0 %v4865_v4  ;;  %18149 = vst [vmem:[#allocation69_spill] sm:$0xff] %v15285_v6 }
 0x915   :  { %18150 = vst [vmem:[#allocation87_spill] sm:$0xff] %v15292_v44 }
 0x917   :  { %v10819_v22 = vpop.eup %10818 }
 0x918   :  { %v4846_v49 = vpop.xlane.xlu2 %4845  ;;  %v5163_v7 = vmul.f32 %v10819_v22, %v15135_v37  ;;  %v15269_v37 = vpop.f32.mrf.mxu1 }
 0x919   :  { %v15272_v14 = vpop.eup %10820  ;;  %v15288_v22 = vpop.f32.mrf.mxu2 }
 0x91a   :  { %10004 = vmatmul.msk.f32.gmra.mxu3 %vm3600_vm9, %v5163_v7  ;;  %v4859_v63 = vsel %vm3604_vm10, %v15272_v14, 0.0 }
 0x91b   :  { %v15296_v60 = vpop.f32.mrf.mxu0  ;;  %v15304_v10 = vpop.f32.mrf.mxu3 }
 0x91c   :  { %18153 = vst [vmem:[#allocation55_spill] sm:$0xff] %v15296_v60 }
 0x920   :  { %v7457_v15 = vpop.permute.xlu2 %7456  ;;  %v15280_v3 = vpop.f32.mrf.mxu1 }
 0x921   :  { %10011 = vmatpush.msk.msra.mxu2 %vm256_vm7, %v7457_v15  ;;  %v18152_v15 = vld [vmem:[#allocation320_spill] sm:$0xff] }
 0x922   :  { %v4170_v25 = vsub.f32 %v18152_v15, %v18151_v30  ;;  %v18157_v30 = vld [vmem:[#allocation336_spill] sm:$0xff] }
 0x923   :  { %v4172_v15 = vsub.f32 %v18157_v30, %v18156_v41  ;;  %v15312_v6 = vpop.f32.mrf.mxu0 }
 0x924   :  { %v4450_v38 = vmul.f32 1.442695, %v4170_v25  ;;  %v18158_v25 = vld [vmem:[#allocation133_spill] sm:$0xff]  ;;  %18159 = vst [vmem:[#allocation53_spill] sm:$0xff] %v15312_v6 }
 0x928   :  { %10286 = vrot.lane.b32.xlu0 %v10285_v17, %s10953_s5  ;;  %v15290_v31 = vpop.f32.mrf.mxu1  ;;  %v18154_v17 = vld [vmem:[#allocation164_spill] sm:$0xff] }
 0x92b   :  { %v4837_v45 = vpop.xlane.xlu1 %4836 }
 0x92c   :  { %10822 = vrcp.f32 %v4837_v45  ;;  %7564 = vrot.lane.b32.xlu1 %v18146_v48, %s10953_s5  ;;  %v18155_v45 = vld [vmem:[#allocation330_spill] sm:$0xff]  ;;  %v15300_v48 = vpop.f32.mrf.mxu2 }
 0x92d   :  { %10824 = vrcp.f32 %v4846_v49 }
 0x92f   :  { %4860 = vadd.xlane.f32.xlu2 %v4859_v63 }
 0x931   :  { %v4840_v7 = vpop.xlane.xlu0 %4839 }
 0x932   :  { %v10823_v23 = vpop.eup %10822  ;;  %10826 = vrcp.f32 %v4840_v7 }
 0x933   :  { %v5165_v4 = vmul.f32 %v10823_v23, %v15155_v35  ;;  %v4169_v35 = vsub.f32 %v18155_v45, %v18154_v17  ;;  %v15302_v23 = vpop.f32.mrf.mxu1  ;;  %10828 = vpow2.f32 %v4450_v38  ;;  %v10825_v60 = vpop.eup %10824  ;;  %v4454_v45 = vmul.f32 1.442695, %v4172_v15 }
 0x934   :  { %v15314_v38 = vpop.f32.mrf.mxu2  ;;  %v5168_v41 = vmul.f32 %v10825_v60, %v15142_v33 }
 0x935   :  { %10007 = vmatmul.msk.f32.gmra.mxu0 %vm3600_vm9, %v5165_v4  ;;  %v4849_v4 = vpop.xlane.xlu1 %4848  ;;  %v4448_v44 = vmul.f32 1.442695, %v4169_v35 }
 0x937   :  { %10830 = vpow2.f32 %v4448_v44 }
 0x938   :  { %v10827_v17 = vpop.eup %10826  ;;  %10832 = vrcp.f32 %v4849_v4  ;;  %v18160_v4 = vld [vmem:[#allocation134_spill] sm:$0xff] }
 0x939   :  { %v4843_v63 = vpop.xlane.xlu0 %4842  ;;  %v15310_v7 = vpop.eup %10828  ;;  %v5166_v44 = vmul.f32 %v10827_v17, %v15163_v43 }
 0x93a   :  { %10834 = vrcp.f32 %v4843_v63  ;;  %v4874_v33 = vsel %vm3600_vm9, %v15310_v7, 0.0  ;;  %v15338_v17 = vpop.f32.mrf.mxu0 }
 0x93b   :  { %v15318_v35 = vpop.f32.mrf.mxu1  ;;  %10836 = vpow2.f32 %v4454_v45 }
 0x93c   :  { %v15340_v45 = vpop.f32.mrf.mxu2 }
 0x947   :  { %7600 = vrot.lane.b32.xlu2 %v18158_v25, %s10953_s5 }
 0x94b   :  { %v7421_v40 = vpop.permute.xlu1 %7420 }
 0x94c   :  { %v10277_v24 = vpop.permute.xlu0 %10276  ;;  %10008 = vmatpush.msk.msra.mxu1 %vm256_vm7, %v7421_v40  ;;  %v15329_v40 = vpop.eup %10830 }
 0x94d   :  { %v10279_v49 = vunpack.i.h.bf16 %v10277_v24  ;;  %v10278_v51 = vunpack.i.l.bf16 %v10277_v24  ;;  %v15322_v24 = vpop.f32.mrf.mxu3  ;;  %v10833_v60 = vpop.eup %10832  ;;  %v4871_v15 = vsel %vm3604_vm10, %v15329_v40, 0.0 }
 0x94e   :  { %v10835_v43 = vpop.eup %10834  ;;  %v5169_v30 = vmul.f32 %v10833_v60, %v15165_v53 }
 0x94f   :  { %7482 = vmatpush.msra.mxu2 %v10278_v51  ;;  %7446 = vmatpush.msra.mxu1 %v10279_v49  ;;  %v15331_v63 = vpop.eup %10836  ;;  %v5167_v25 = vmul.f32 %v10835_v43, %v15174_v58  ;;  %v15343_v49 = vpop.f32.mrf.mxu1 }
 0x950   :  { %10012 = vmatmul.msk.f32.vlgmr.msra.gmra.mxu2 %vm3600_vm9, %v5168_v41  ;;  %7636 = vrot.lane.b32.xlu2 %v18160_v4, %s10953_s5  ;;  %18161 = vst [vmem:[#allocation63_spill] sm:$0xff] %v15343_v49  ;;  %v4880_v41 = vsel %vm3600_vm9, %v15331_v63, 0.0  ;;  %v15350_v4 = vpop.f32.mrf.mxu0 }
 0x951   :  { %10009 = vmatmul.msk.f32.vlgmr.msra.gmra.mxu1 %vm3600_vm9, %v5166_v44 }
 0x952   :  { %4875 = vadd.xlane.f32.xlu0 %v4874_v33  ;;  %v15352_v33 = vpop.f32.mrf.mxu2 }
 0x953   :  { %v7493_v51 = vpop.permute.xlu1 %7492 }
 0x954   :  { %10014 = vmatpush.msk.msra.mxu3 %vm256_vm7, %v7493_v51 }
 0x955   :  { %v15348_v53 = vpop.f32.mrf.mxu3 }
 0x956   :  { %4872 = vadd.xlane.f32.xlu1 %v4871_v15 }
 0x957   :  { %v15354_v60 = vpop.f32.mrf.mxu1 }
 0x958   :  { %10013 = vmatmul.msk.f32.gmra.mxu2 %vm3600_vm9, %v5169_v30  ;;  %18162 = vst [vmem:[#allocation92_spill] sm:$0xff] %v15354_v60  ;;  %v15362_v47 = vpop.f32.mrf.mxu0 }
 0x959   :  { %10010 = vmatmul.msk.f32.gmra.mxu1 %vm3600_vm9, %v5167_v25  ;;  %v4852_v44 = vpop.xlane.xlu2 %4851  ;;  %v18163_v25 = vld [vmem:[#allocation225_spill] sm:$0xff] }
 0x95a   :  { %4881 = vadd.xlane.f32.xlu0 %v4880_v41  ;;  %10838 = vrcp.f32 %v4852_v44  ;;  %v18164_v41 = vld [vmem:[#allocation328_spill] sm:$0xff]  ;;  %v15364_v57 = vpop.f32.mrf.mxu2 }
 0x95b   :  { %v4171_v6 = vsub.f32 %v18164_v41, %v18163_v25  ;;  %v18170_v25 = vld [vmem:[#allocation334_spill] sm:$0xff] }
 0x95c   :  { %v4174_v41 = vsub.f32 %v18170_v25, %v18169_v27 }
 0x95d   :  { %v15356_v30 = vpop.f32.mrf.mxu3  ;;  %v4452_v29 = vmul.f32 1.442695, %v4171_v6 }
 0x95f   :  { %v15367_v13 = vpop.f32.mrf.mxu1  ;;  %10840 = vpow2.f32 %v4452_v29 }
 0x960   :  { %v10839_v58 = vpop.eup %10838  ;;  %18165 = vst [vmem:[#allocation77_spill] sm:$0xff] %v15367_v13 }
 0x961   :  { %v10282_v43 = vpop.permute.xlu2 %10281  ;;  %v5170_v15 = vmul.f32 %v10839_v58, %v15200_v26  ;;  %v18166_v26 = vld [vmem:[#allocation143_spill] sm:$0xff]  ;;  %v18167_v58 = vld [vmem:[#allocation141_spill] sm:$0xff] }
 0x962   :  { %v10283_v51 = vunpack.i.l.bf16 %v10282_v43  ;;  %v10284_v59 = vunpack.i.h.bf16 %v10282_v43  ;;  %v4458_v43 = vmul.f32 1.442695, %v4174_v41 }
 0x964   :  { %7518 = vmatpush.msra.mxu3 %v10283_v51  ;;  %v18168_v51 = vld [vmem:[#allocation142_spill] sm:$0xff]  ;;  %10842 = vpow2.f32 %v4458_v43 }
 0x965   :  { %10015 = vmatmul.msk.f32.vlgmr.msra.gmra.mxu3 %vm3600_vm9, %v5170_v15  ;;  %v10290_v15 = vpack.i.bf16 %v18168_v51, %v18167_v58  ;;  %v15375_v6 = vpop.f32.mrf.mxu3  ;;  %v15378_v11 = vpop.eup %10840 }
 0x966   :  { %v4877_v27 = vsel %vm3604_vm10, %v15378_v11, 0.0 }
 0x969   :  { %v7529_v44 = vpop.permute.xlu2 %7528 }
 0x96a   :  { %10017 = vmatpush.msk.msrb.mxu0 %vm256_vm7, %v7529_v44  ;;  %v15380_v44 = vpop.f32.mrf.mxu0  ;;  %v15390_v29 = vpop.eup %10842 }
 0x96c   :  { %7554 = vmatpush.msrb.mxu0 %v10284_v59  ;;  %v15382_v59 = vpop.f32.mrf.mxu2 }
 0x96d   :  { %18171 = vst [vmem:[#allocation100_spill] sm:$0xff] %v15382_v59  ;;  %v15386_v58 = vpop.f32.mrf.mxu3 }
 0x96e   :  { %7672 = vrot.lane.b32.xlu0 %v18166_v26, %s10953_s5  ;;  %v15384_v26 = vpop.f32.mrf.mxu1 }
 0x96f   :  { %10291 = vrot.lane.b32.xlu1 %v10290_v15, %s10953_s5  ;;  %18172 = vst [vmem:[#allocation108_spill] sm:$0xff] %v15384_v26  ;;  %v18176_v26 = vld [vmem:[#allocation229_spill] sm:$0xff] }
 0x970   :  { %v4176_v36 = vsub.f32 %v18177_v46, %v18176_v26  ;;  %v18183_v46 = vld [vmem:[#allocation239_spill] sm:$0xff]  ;;  %v18184_v26 = vld [vmem:[#allocation341_spill] sm:$0xff] }
 0x972   :  { %v15397_v21 = vpop.f32.mrf.mxu0 }
 0x973   :  { %18174 = vst [vmem:[#allocation99_spill] sm:$0xff] %v15397_v21 }
 0x974   :  { %v15395_v41 = vpop.f32.mrf.mxu2 }
 0x975   :  { %18173 = vst [vmem:[#allocation109_spill] sm:$0xff] %v15395_v41 }
 0x976   :  { %v15392_v15 = vpop.f32.mrf.mxu1 }
 0x977   :  { %v4858_v9 = vpop.xlane.xlu0 %4857 }
 0x978   :  { %10844 = vrcp.f32 %v4858_v9  ;;  %v4886_v9 = vsel %vm3600_vm9, %v15390_v29, 0.0 }
 0x979   :  { %4878 = vadd.xlane.f32.xlu2 %v4877_v27  ;;  %v15402_v27 = vpop.f32.mrf.mxu3 }
 0x97a   :  { %18175 = vst [vmem:[#allocation79_spill] sm:$0xff] %v15402_v27 }
 0x97c   :  { %v15411_v62 = vpop.f32.mrf.mxu2 }
 0x97d   :  { %18180 = vst [vmem:[#allocation88_spill] sm:$0xff] %v15411_v62 }
 0x97e   :  { %v10845_v51 = vpop.eup %10844  ;;  %v4855_v43 = vpop.xlane.xlu1 %4854 }
 0x97f   :  { %v5172_v25 = vmul.f32 %v10845_v51, %v15216_v52  ;;  %10846 = vrcp.f32 %v4855_v43  ;;  %v18178_v51 = vld [vmem:[#allocation223_spill] sm:$0xff]  ;;  %v15409_v1 = vpop.f32.mrf.mxu1  ;;  %v4462_v43 = vmul.f32 1.442695, %v4176_v36 }
 0x980   :  { %v4173_v55 = vsub.f32 %v18179_v19, %v18178_v51 }
 0x981   :  { %10018 = vmatmul.msk.f32.vlgmr.msrb.gmra.mxu0 %vm3600_vm9, %v5172_v25  ;;  %4887 = vadd.xlane.f32.xlu2 %v4886_v9  ;;  %v15414_v25 = vpop.f32.mrf.mxu0  ;;  %v4870_v9 = vpop.xlane.xlu0 %4869  ;;  %10848 = vpow2.f32 %v4462_v43 }
 0x982   :  { %18181 = vst [vmem:[#allocation126_spill] sm:$0xff] %v15414_v25  ;;  %v4456_v27 = vmul.f32 1.442695, %v4173_v55  ;;  %v15416_v34 = vpop.f32.mrf.mxu3  ;;  %v10295_v25 = vpack.i.bf16 %v18191_v42, %v18190_v0 }
 0x983   :  { %18182 = vst [vmem:[#allocation101_spill] sm:$0xff] %v15416_v34 }
 0x984   :  { %10850 = vpow2.f32 %v4456_v27  ;;  %v15424_v51 = vpop.f32.mrf.mxu2 }
 0x985   :  { %v10847_v13 = vpop.eup %10846  ;;  %18185 = vst [vmem:[#allocation119_spill] sm:$0xff] %v15424_v51 }
 0x986   :  { %v5171_v52 = vmul.f32 %v10847_v13, %v15235_v61  ;;  %v4175_v13 = vsub.f32 %v18184_v26, %v18183_v46  ;;  %v4864_v41 = vpop.xlane.xlu1 %4863  ;;  %v18187_v46 = vld [vmem:[#allocation144_spill] sm:$0xff] }
 0x987   :  { %v15420_v61 = vpop.f32.mrf.mxu1  ;;  %v15422_v19 = vpop.eup %10848 }
 0x988   :  { %10016 = vmatmul.msk.f32.gmra.mxu3 %vm3600_vm9, %v5171_v52  ;;  %v4460_v36 = vmul.f32 1.442695, %v4175_v13  ;;  %v4892_v43 = vsel %vm3600_vm9, %v15422_v19, 0.0 }
 0x989   :  { %v15426_v62 = vpop.f32.mrf.mxu0  ;;  %v4867_v59 = vpop.xlane.xlu0 %4866 }
 0x98a   :  { %18186 = vst [vmem:[#allocation127_spill] sm:$0xff] %v15426_v62  ;;  %v6512_v52 = vpop.f32.mrf.mxu3  ;;  %v15428_v55 = vpop.eup %10850  ;;  %10852 = vpow2.f32 %v4460_v36 }
 0x98b   :  { %10854 = vrcp.f32 %v4864_v41  ;;  %v4883_v27 = vsel %vm3604_vm10, %v15428_v55, 0.0 }
 0x98c   :  { %v15438_v13 = vpop.f32.mrf.mxu2  ;;  %10856 = vrcp.f32 %v4867_v59 }
 0x98d   :  { %10858 = vrcp.f32 %v4870_v9 }
 0x98f   :  { %v15436_v26 = vpop.f32.mrf.mxu1 }
 0x990   :  { %v15440_v51 = vpop.eup %10852 }
 0x991   :  { %v10855_v34 = vpop.eup %10854  ;;  %v15444_v36 = vpop.f32.mrf.mxu0 }
 0x992   :  { %v15442_v18 = vpop.f32.mrf.mxu3  ;;  %18188 = vst [vmem:[#allocation128_spill] sm:$0xff] %v15444_v36 }
 0x994   :  { %v15455_v59 = vpop.f32.mrf.mxu2 }
 0x997   :  { %v15452_v60 = vpop.f32.mrf.mxu1 }
 0x998   :  { %4893 = vadd.xlane.f32.xlu0 %v4892_v43 }
 0x999   :  { %7708 = vrot.lane.b32.xlu2 %v18187_v46, %s10953_s5  ;;  %4884 = vadd.xlane.f32.xlu1 %v4883_v27  ;;  %v5174_v46 = vmul.f32 %v10855_v34, %v15248_v20  ;;  %v4889_v27 = vsel %vm3604_vm10, %v15440_v51, 0.0  ;;  %v6548_v34 = vpop.f32.mrf.mxu0 }
 0x99a   :  { %v10287_v62 = vpop.permute.xlu0 %10286  ;;  %v15457_v49 = vpop.f32.mrf.mxu3 }
 0x99b   :  { %v10288_v43 = vunpack.i.l.bf16 %v10287_v62 }
 0x99e   :  { %v7565_v41 = vpop.permute.xlu1 %7564 }
 0x99f   :  { %10020 = vmatpush.msk.msrb.mxu1 %vm256_vm7, %v7565_v41  ;;  %v10857_v41 = vpop.eup %10856 }
 0x9a0   :  { %v10859_v20 = vpop.eup %10858 }
 0x9a1   :  { %7744 = vrot.lane.b32.xlu2 %v18189_v54, %s10953_s5  ;;  %4890 = vadd.xlane.f32.xlu1 %v4889_v27  ;;  %v5175_v54 = vmul.f32 %v10857_v41, %v15246_v28  ;;  %v15462_v27 = vpop.f32.mrf.mxu1  ;;  %v5176_v2 = vmul.f32 %v10859_v20, %v15230_v50  ;;  %v15472_v42 = vpop.f32.mrf.mxu0  ;;  %v18193_v50 = vld [vmem:[#allocation168_spill] sm:$0xff] }
 0x9a2   :  { %7590 = vmatpush.msrb.mxu1 %v10288_v43  ;;  %v4861_v36 = vpop.xlane.xlu2 %4860  ;;  %v10289_v43 = vunpack.i.h.bf16 %v10287_v62  ;;  %v15475_v0 = vpop.f32.mrf.mxu3 }
 0x9a3   :  { %10021 = vmatmul.msk.f32.vlgmr.msrb.gmra.mxu1 %vm3600_vm9, %v5174_v46  ;;  %10860 = vrcp.f32 %v4861_v36  ;;  %v15468_v46 = vpop.f32.mrf.mxu2 }
 0x9a9   :  { %v10861_v21 = vpop.eup %10860  ;;  %v15477_v28 = vpop.f32.mrf.mxu1 }
 0x9aa   :  { %v7601_v9 = vpop.permute.xlu2 %7600  ;;  %v5173_v36 = vmul.f32 %v10861_v21, %v15272_v14  ;;  %18192 = vst [vmem:[#allocation118_spill] sm:$0xff] %v15477_v28  ;;  %v15483_v21 = vpop.f32.mrf.mxu0  ;;  %v18194_v14 = vld [vmem:[#allocation339_spill] sm:$0xff] }
 0x9ab   :  { %10022 = vmatmul.msk.f32.gmra.mxu1 %vm3600_vm9, %v5175_v54  ;;  %10023 = vmatpush.msk.msrb.mxu2 %vm256_vm7, %v7601_v9  ;;  %v15481_v62 = vpop.f32.mrf.mxu2  ;;  %v4177_v41 = vsub.f32 %v18194_v14, %v18193_v50  ;;  %v15487_v20 = vpop.f32.mrf.mxu3 }
 0x9ac   :  { %10296 = vrot.lane.b32.xlu0 %v10295_v25, %s10953_s5  ;;  %10019 = vmatmul.msk.f32.gmra.mxu0 %vm3600_vm9, %v5173_v36 }
 0x9ad   :  { %7626 = vmatpush.msrb.mxu2 %v10289_v43 }
 0x9ae   :  { %10024 = vmatmul.msk.f32.vlgmr.msrb.gmra.mxu2 %vm3600_vm9, %v5176_v2 }
 0x9b1   :  { %v15489_v2 = vpop.f32.mrf.mxu1 }
 0x9b2   :  { %v7637_v25 = vpop.permute.xlu2 %7636  ;;  %18195 = vst [vmem:[#allocation117_spill] sm:$0xff] %v15489_v2  ;;  %v15499_v36 = vpop.f32.mrf.mxu0 }
 0x9b3   :  { %10026 = vmatpush.msk.msrb.mxu3 %vm256_vm7, %v7637_v25  ;;  %v15495_v54 = vpop.f32.mrf.mxu2  ;;  %v15497_v9 = vpop.f32.mrf.mxu3 }
 0x9b4   :  { %7958 = vrot.lane.b32.xlu0 %v6512_v52, %s10954_s1  ;;  %v4464_v52 = vmul.f32 1.442695, %v4177_v41 }
 0x9b6   :  { %10862 = vpow2.f32 %v4464_v52 }
 0x9b9   :  { %v7160_v43 = vpop.f32.mrf.mxu1 }
 0x9ba   :  { %7814 = vrot.lane.b32.xlu1 %v15260_v8, %s10955_s2  ;;  %v15510_v50 = vpop.f32.mrf.mxu0 }
 0x9bb   :  { %v15506_v8 = vpop.f32.mrf.mxu3 }
 0x9bc   :  { %7818 = vrot.lane.b32.xlu0 %v15288_v22, %s10955_s2  ;;  %v15504_v25 = vpop.eup %10862  ;;  %18196 = vst [vmem:[#allocation110_spill] sm:$0xff] %v15506_v8  ;;  %v15508_v22 = vpop.f32.mrf.mxu2 }
 0x9bd   :  { %18197 = vst [vmem:[#allocation47_spill] sm:$0xff] %v15508_v22  ;;  %v4895_v14 = vsel %vm3604_vm10, %v15504_v25, 0.0 }
 0x9c1   :  { %v7163_v41 = vpop.f32.mrf.mxu1 }
 0x9c2   :  { %8102 = vrot.lane.b32.xlu1 %v7160_v43, %s10956_s13  ;;  %v15518_v28 = vpop.f32.mrf.mxu0 }
 0x9c3   :  { %v15516_v43 = vpop.f32.mrf.mxu3 }
 0x9c4   :  { %7816 = vrot.lane.b32.xlu0 %v15269_v37, %s10955_s2  ;;  %v15520_v22 = vpop.f32.mrf.mxu2 }
 0x9c5   :  { %v4876_v37 = vpop.xlane.xlu0 %4875  ;;  %18198 = vst [vmem:[#allocation135_spill] sm:$0xff] %v15520_v22 }
 0x9c9   :  { %v4873_v52 = vpop.xlane.xlu1 %4872 }
 0x9ca   :  { %4896 = vadd.xlane.f32.xlu2 %v4895_v14  ;;  %10864 = vrcp.f32 %v4873_v52  ;;  %7962 = vrot.lane.b32.xlu1 %v6548_v34, %s10954_s1 }
 0x9cb   :  { %v15528_v14 = vpop.f32.mrf.mxu3  ;;  %10866 = vrcp.f32 %v4876_v37 }
 0x9cc   :  { %8104 = vrot.lane.b32.xlu0 %v7163_v41, %s10956_s13  ;;  %18199 = vst [vmem:[#allocation56_spill] sm:$0xff] %v15528_v14  ;;  %v15530_v41 = vpop.f32.mrf.mxu0  ;;  %v15532_v52 = vpop.f32.mrf.mxu2 }
 0x9cd   :  { %v4882_v34 = vpop.xlane.xlu0 %4881 }
 0x9ce   :  { %10868 = vrcp.f32 %v4882_v34 }
 0x9d0   :  { %v10865_v2 = vpop.eup %10864 }
 0x9d1   :  { %v5177_v8 = vmul.f32 %v10865_v2, %v15329_v40  ;;  %v10867_v40 = vpop.eup %10866 }
 0x9d2   :  { %7960 = vrot.lane.b32.xlu1 %v15442_v18, %s10954_s1 }
 0x9d3   :  { %10025 = vmatmul.msk.f32.gmra.mxu2 %vm3600_vm9, %v5177_v8  ;;  %v15541_v14 = vpop.f32.mrf.mxu3 }
 0x9d4   :  { %7822 = vrot.lane.b32.xlu0 %v15304_v10, %s10955_s2  ;;  %v10869_v10 = vpop.eup %10868  ;;  %v15539_v2 = vpop.f32.mrf.mxu0 }
 0x9d5   :  { %v7196_v8 = vpop.f32.mrf.mxu2 }
 0x9da   :  { %7820 = vrot.lane.b32.xlu1 %v15300_v48, %s10955_s2  ;;  %v5178_v48 = vmul.f32 %v10867_v40, %v15310_v7 }
 0x9dc   :  { %7966 = vrot.lane.b32.xlu0 %v15392_v15, %s10954_s1  ;;  %v5180_v15 = vmul.f32 %v10869_v10, %v15331_v63 }
 0x9e0   :  { %v7673_v18 = vpop.permute.xlu0 %7672 }
 0x9e1   :  { %10029 = vmatpush.msk.msra.mxu0 %vm256_vm7, %v7673_v18  ;;  %v10292_v22 = vpop.permute.xlu1 %10291  ;;  %v7199_v18 = vpop.f32.mrf.mxu2 }
 0x9e2   :  { %8106 = vrot.lane.b32.xlu2 %v7196_v8, %s10956_s13  ;;  %v10294_v37 = vunpack.i.h.bf16 %v10292_v22  ;;  %v10293_v34 = vunpack.i.l.bf16 %v10292_v22  ;;  %7964 = vrot.lane.b32.xlu1 %v15472_v42, %s10954_s1  ;;  %v15552_v8 = vpop.f32.mrf.mxu0  ;;  %v7232_v22 = vpop.f32.mrf.mxu3 }
 0x9e4   :  { %7824 = vrot.lane.b32.xlu0 %v15322_v24, %s10955_s2  ;;  %7662 = vmatpush.msrb.mxu3 %v10293_v34 }
 0x9e5   :  { %7698 = vmatpush.msra.mxu0 %v10294_v37  ;;  %10027 = vmatmul.msk.f32.vlgmr.msrb.gmra.mxu3 %vm3600_vm9, %v5178_v48 }
 0x9e6   :  { %10030 = vmatmul.msk.f32.vlgmr.msra.gmra.mxu0 %vm3600_vm9, %v5180_v15 }
 0x9e9   :  { %v7340_v37 = vpop.f32.mrf.mxu2 }
 0x9ea   :  { %8108 = vrot.lane.b32.xlu2 %v7199_v18, %s10956_s13  ;;  %8110 = vrot.lane.b32.xlu1 %v7232_v22, %s10956_s13  ;;  %v15558_v24 = vpop.f32.mrf.mxu0 }
 0x9ec   :  { %7970 = vrot.lane.b32.xlu0 %v15438_v13, %s10954_s1  ;;  %v4879_v7 = vpop.xlane.xlu2 %4878  ;;  %v7235_v13 = vpop.f32.mrf.mxu3 }
 0x9ed   :  { %10870 = vrcp.f32 %v4879_v7 }
 0x9f2   :  { %7826 = vrot.lane.b32.xlu2 %v15338_v17, %s10955_s2  ;;  %7968 = vrot.lane.b32.xlu1 %v15409_v1, %s10954_s1  ;;  %v7268_v10 = vpop.f32.mrf.mxu0 }
 0x9f3   :  { %v10871_v63 = vpop.eup %10870 }
 0x9f4   :  { %7828 = vrot.lane.b32.xlu0 %v15350_v4, %s10955_s2  ;;  %v4888_v42 = vpop.xlane.xlu2 %4887  ;;  %v5179_v40 = vmul.f32 %v10871_v63, %v15378_v11  ;;  %v7304_v4 = vpop.f32.mrf.mxu1 }
 0x9f5   :  { %v7376_v7 = vpop.f32.mrf.mxu3 }
 0x9f6   :  { %10028 = vmatmul.msk.f32.gmra.mxu3 %vm3600_vm9, %v5179_v40 }
 0x9fa   :  { %8112 = vrot.lane.b32.xlu2 %v7235_v13, %s10956_s13  ;;  %8114 = vrot.lane.b32.xlu1 %v7268_v10, %s10956_s13  ;;  %v7271_v11 = vpop.f32.mrf.mxu0 }
 0x9fc   :  { %7974 = vrot.lane.b32.xlu0 %v15457_v49, %s10954_s1  ;;  %v7709_v17 = vpop.permute.xlu2 %7708 }
 0x9fd   :  { %10032 = vmatpush.msk.msra.mxu1 %vm256_vm7, %v7709_v17 }
 0xa02   :  { %7830 = vrot.lane.b32.xlu2 %v15280_v3, %s10955_s2  ;;  %7972 = vrot.lane.b32.xlu1 %v15455_v59, %s10954_s1  ;;  %v7412_v40 = vpop.f32.mrf.mxu0 }
 0xa04   :  { %7832 = vrot.lane.b32.xlu0 %v15290_v31, %s10955_s2  ;;  %v7745_v1 = vpop.permute.xlu2 %7744 }
 0xa05   :  { %10035 = vmatpush.msk.msra.mxu2 %vm256_vm7, %v7745_v1 }
 0xa0a   :  { %8116 = vrot.lane.b32.xlu2 %v7271_v11, %s10956_s13  ;;  %8118 = vrot.lane.b32.xlu1 %v7304_v4, %s10956_s13  ;;  %v7415_v17 = vpop.f32.mrf.mxu0 }
 0xa0b   :  { %v4894_v3 = vpop.xlane.xlu0 %4893 }
 0xa0c   :  { %7978 = vrot.lane.b32.xlu0 %v15483_v21, %s10954_s1  ;;  %v4885_v49 = vpop.xlane.xlu1 %4884  ;;  %v7307_v21 = vpop.f32.mrf.mxu1 }
 0xa0d   :  { %10872 = vrcp.f32 %v4885_v49 }
 0xa0e   :  { %10874 = vrcp.f32 %v4888_v42  ;;  %v7379_v42 = vpop.f32.mrf.mxu3 }
 0xa0f   :  { %10876 = vrcp.f32 %v4894_v3 }
 0xa12   :  { %7834 = vrot.lane.b32.xlu2 %v15314_v38, %s10955_s2  ;;  %7976 = vrot.lane.b32.xlu1 %v15475_v0, %s10954_s1 }
 0xa13   :  { %v10873_v31 = vpop.eup %10872 }
 0xa14   :  { %7836 = vrot.lane.b32.xlu0 %v15340_v45, %s10955_s2  ;;  %v5181_v59 = vmul.f32 %v10873_v31, %v15428_v55  ;;  %v10875_v34 = vpop.eup %10874  ;;  %v4891_v38 = vpop.xlane.xlu1 %4890 }
 0xa15   :  { %v10877_v0 = vpop.eup %10876  ;;  %10878 = vrcp.f32 %v4891_v38  ;;  %v5182_v55 = vmul.f32 %v10875_v34, %v15390_v29 }
 0xa16   :  { %10031 = vmatmul.msk.f32.gmra.mxu0 %vm3600_vm9, %v5181_v59  ;;  %v5184_v18 = vmul.f32 %v10877_v0, %v15422_v19  ;;  %v7343_v19 = vpop.f32.mrf.mxu2 }
 0xa1a   :  { %8120 = vrot.lane.b32.xlu2 %v7307_v21, %s10956_s13  ;;  %8122 = vrot.lane.b32.xlu1 %v7340_v37, %s10956_s13 }
 0xa1c   :  { %7982 = vrot.lane.b32.xlu0 %v15420_v61, %s10954_s1  ;;  %v10879_v61 = vpop.eup %10878 }
 0xa1d   :  { %v5183_v29 = vmul.f32 %v10879_v61, %v15440_v51  ;;  %v8437_v51 = vld [vmem:[%s16689_s3] sm:$0xff] }
 0xa1e   :  { %v10297_v45 = vpop.permute.xlu0 %10296  ;;  %v7484_v49 = vpop.f32.mrf.mxu2 }
 0xa1f   :  { %v10299_v48 = vunpack.i.h.bf16 %v10297_v45  ;;  %v10298_v15 = vunpack.i.l.bf16 %v10297_v45 }
 0xa21   :  { %7734 = vmatpush.msra.mxu1 %v10298_v15  ;;  %7770 = vmatpush.msra.mxu2 %v10299_v48 }
 0xa22   :  { %10033 = vmatmul.msk.f32.vlgmr.msra.gmra.mxu1 %vm3600_vm9, %v5182_v55  ;;  %10036 = vmatmul.msk.f32.vlgmr.msra.gmra.mxu2 %vm3600_vm9, %v5184_v18 }
 0xa23   :  { %7838 = vrot.lane.b32.xlu2 %v15348_v53, %s10955_s2  ;;  %7980 = vrot.lane.b32.xlu1 %v15499_v36, %s10954_s1  ;;  %v8438_v53 = vld [vmem:[%s16689_s3 + $0x8] sm:$0xff] }
 0xa24   :  { %7840 = vrot.lane.b32.xlu0 %v15356_v30, %s10955_s2  ;;  %8517 = vmatpush.msrb.mxu2 %v8438_v53 }
 0xa25   :  { %10105 = vmatpush.msra.mxu3 %v8438_v53 }
 0xa26   :  { %v7959_v22 = vpop.permute.xlu0 %7958  ;;  %8518 = vmatpush.msrb.mxu2 %v8437_v51 }
 0xa27   :  { %10106 = vmatpush.msra.mxu3 %v8437_v51 }
 0xa2a   :  { %10034 = vmatmul.msk.f32.gmra.mxu1 %vm3600_vm9, %v5183_v29 }
 0xa2b   :  { %8124 = vrot.lane.b32.xlu2 %v7343_v19, %s10956_s13  ;;  %8126 = vrot.lane.b32.xlu1 %v7376_v7, %s10956_s13 }
 0xa2c   :  { %7986 = vrot.lane.b32.xlu0 %v15468_v46, %s10954_s1  ;;  %v7815_v30 = vpop.permute.xlu1 %7814 }
 0xa2d   :  { %v8210_v3 = vsel %vm787_vm8, %v14930_v32, %v7815_v30 }
 0xa2e   :  { %v7819_v36 = vpop.permute.xlu0 %7818 }
 0xa33   :  { %7842 = vrot.lane.b32.xlu2 %v15362_v47, %s10955_s2  ;;  %7984 = vrot.lane.b32.xlu1 %v15436_v26, %s10954_s1 }
 0xa34   :  { %7844 = vrot.lane.b32.xlu0 %v15380_v44, %s10955_s2  ;;  %v8103_v46 = vpop.permute.xlu1 %8102 }
 0xa36   :  { %v7817_v63 = vpop.permute.xlu0 %7816 }
 0xa3b   :  { %8128 = vrot.lane.b32.xlu2 %v7379_v42, %s10956_s13  ;;  %8130 = vrot.lane.b32.xlu1 %v7412_v40, %s10956_s13  ;;  %v7520_v42 = vpop.f32.mrf.mxu3 }
 0xa3c   :  { %7846 = vrot.lane.b32.xlu0 %v15302_v23, %s10955_s2  ;;  %v7963_v13 = vpop.permute.xlu1 %7962  ;;  %v7448_v23 = vpop.f32.mrf.mxu1 }
 0xa3d   :  { %v4897_v10 = vpop.xlane.xlu2 %4896 }
 0xa3e   :  { %10880 = vrcp.f32 %v4897_v10  ;;  %v8105_v47 = vpop.permute.xlu0 %8104 }
 0xa43   :  { %7988 = vrot.lane.b32.xlu2 %v15481_v62, %s10954_s1  ;;  %8132 = vrot.lane.b32.xlu1 %v7415_v17, %s10956_s13  ;;  %v8247_v62 = vsel %vm8246_vm11, %v8210_v3, %v7959_v22 }
 0xa44   :  { %7850 = vrot.lane.b32.xlu0 %v15352_v33, %s10955_s2  ;;  %v10881_v44 = vpop.eup %10880  ;;  %v7961_v26 = vpop.permute.xlu1 %7960  ;;  %v8212_v33 = vsel %vm787_vm8, %v15007_v12, %v7819_v36  ;;  %v8284_v59 = vsel %vm8283_vm12, %v8247_v62, %v8103_v46 }
 0xa45   :  { %v8107_v1 = vpop.permute.xlu2 %8106  ;;  %v5185_v11 = vmul.f32 %v10881_v44, %v15504_v25  ;;  %v8249_v32 = vsel %vm8246_vm11, %v8212_v33, %v7963_v13  ;;  %v7487_v46 = vpop.f32.mrf.mxu2 }
 0xa46   :  { %v7823_v4 = vpop.permute.xlu0 %7822  ;;  %v8286_v37 = vsel %vm8283_vm12, %v8249_v32, %v8107_v1  ;;  %v18202_v1 = vld [vmem:[#allocation126_spill] sm:$0xff]  ;;  %v7523_v62 = vpop.f32.mrf.mxu3 }
 0xa47   :  { %10037 = vmatmul.msk.f32.gmra.mxu2 %vm3600_vm9, %v5185_v11  ;;  %v8322_v38 = vrot.slane %v8286_v37, 7  ;;  %v18203_v11 = vld [vmem:[#allocation67_spill] sm:$0xff] }
 0xa4b   :  { %7990 = vrot.lane.b32.xlu2 %v15487_v20, %s10954_s1  ;;  %8134 = vrot.lane.b32.xlu1 %v7448_v23, %s10956_s13  ;;  %v8211_v20 = vsel %vm787_vm8, %v14954_v39, %v7817_v63 }
 0xa4c   :  { %8138 = vrot.lane.b32.xlu0 %v7484_v49, %s10956_s13  ;;  %v7821_v25 = vpop.permute.xlu1 %7820  ;;  %v8248_v34 = vsel %vm8246_vm11, %v8211_v20, %v7961_v26 }
 0xa4d   :  { %v8109_v31 = vpop.permute.xlu2 %8108  ;;  %v8285_v12 = vsel %vm8283_vm12, %v8248_v34, %v8105_v47  ;;  %v8213_v0 = vsel %vm787_vm8, %v15041_v5, %v7821_v25  ;;  %v8214_v5 = vsel %vm787_vm8, %v14980_v16, %v7823_v4 }
 0xa4e   :  { %v7967_v21 = vpop.permute.xlu0 %7966  ;;  %v8416_v55 = vsel %vm256_vm7, %v8285_v12, %v8322_v38 }
 0xa4f   :  { %10038 = vmatmul.msk.f32.vlgmr.msrb.gmra.mxu2 %vm68_vm0, %v8284_v59  ;;  %v8251_v18 = vsel %vm8246_vm11, %v8214_v5, %v7967_v21  ;;  %v18205_v59 = vld [vmem:[#allocation65_spill] sm:$0xff] }
 0xa53   :  { %7994 = vrot.lane.b32.xlu2 %v15510_v50, %s10954_s1  ;;  %7848 = vrot.lane.b32.xlu1 %v15318_v35, %s10955_s2  ;;  %v7451_v35 = vpop.f32.mrf.mxu1 }
 0xa54   :  { %7852 = vrot.lane.b32.xlu0 %v15364_v57, %s10955_s2  ;;  %v7965_v45 = vpop.permute.xlu1 %7964 }
 0xa55   :  { %v7827_v48 = vpop.permute.xlu2 %7826  ;;  %v8250_v39 = vsel %vm8246_vm11, %v8213_v0, %v7965_v45 }
 0xa56   :  { %v7825_v15 = vpop.permute.xlu0 %7824  ;;  %v8287_v50 = vsel %vm8283_vm12, %v8250_v39, %v8109_v31  ;;  %v7556_v31 = vpop.f32.mrf.mxu0  ;;  %v18206_v39 = vld [vmem:[#allocation63_spill] sm:$0xff] }
 0xa57   :  { %10039 = vmatmul.msk.f32.gmra.mxu2 %vm68_vm0, %v8416_v55  ;;  %v8323_v57 = vrot.slane %v8287_v50, 7  ;;  %v8215_v16 = vsel %vm787_vm8, %v15010_v56, %v7825_v15  ;;  %v18207_v15 = vld [vmem:[#allocation47_spill] sm:$0xff]  ;;  %v18208_v55 = vld [vmem:[#allocation92_spill] sm:$0xff]  ;;  %v18209_v50 = vld [vmem:[#allocation66_spill] sm:$0xff] }
 0xa59   :  { %v8324_v53 = vsel %vm256_vm7, %v8322_v38, %v8323_v57 }
 0xa5b   :  { %7992 = vrot.lane.b32.xlu2 %v15497_v9, %s10954_s1  ;;  %8136 = vrot.lane.b32.xlu1 %v7451_v35, %s10956_s13 }
 0xa5c   :  { %7998 = vrot.lane.b32.xlu0 %v15452_v60, %s10954_s1  ;;  %v8111_v61 = vpop.permute.xlu1 %8110 }
 0xa5d   :  { %v8113_v22 = vpop.permute.xlu2 %8112  ;;  %v8288_v29 = vsel %vm8283_vm12, %v8251_v18, %v8111_v61 }
 0xa5e   :  { %v7971_v19 = vpop.permute.xlu0 %7970  ;;  %v8329_v7 = vrot.slane %v8288_v29, 6 }
 0xa60   :  { %v8417_v9 = vsel %vm249_vm6, %v8324_v53, %v8329_v7 }
 0xa61   :  { %10040 = vmatmul.msk.f32.gmra.mxu2 %vm68_vm0, %v8417_v9 }
 0xa63   :  { %7854 = vrot.lane.b32.xlu2 %v15375_v6, %s10955_s2  ;;  %7996 = vrot.lane.b32.xlu1 %v15518_v28, %s10954_s1  ;;  %v18200_v6 = vld [vmem:[#allocation43_spill] sm:$0xff] }
 0xa64   :  { %7856 = vrot.lane.b32.xlu0 %v15386_v58, %s10955_s2  ;;  %v7969_v60 = vpop.permute.xlu1 %7968  ;;  %v8216_v58 = vsel %vm787_vm8, %v18200_v6, %v7827_v48  ;;  %v18212_v6 = vld [vmem:[#allocation109_spill] sm:$0xff] }
 0xa65   :  { %v7831_v30 = vpop.permute.xlu2 %7830  ;;  %v8252_v36 = vsel %vm8246_vm11, %v8215_v16, %v7969_v60  ;;  %v8253_v28 = vsel %vm8246_vm11, %v8216_v58, %v7971_v19  ;;  %v7592_v19 = vpop.f32.mrf.mxu1  ;;  %v18213_v58 = vld [vmem:[#allocation90_spill] sm:$0xff] }
 0xa66   :  { %v7829_v51 = vpop.permute.xlu0 %7828  ;;  %v8289_v63 = vsel %vm8283_vm12, %v8252_v36, %v8113_v22  ;;  %v8218_v32 = vsel %vm787_vm8, %v18205_v59, %v7831_v30  ;;  %v7559_v22 = vpop.f32.mrf.mxu0  ;;  %v18218_v59 = vld [vmem:[#allocation9_spill] sm:$0xff] }
 0xa67   :  { %v8330_v56 = vrot.slane %v8289_v63, 6  ;;  %v8217_v4 = vsel %vm787_vm8, %v18203_v11, %v7829_v51 }
 0xa69   :  { %v8331_v44 = vsel %vm249_vm6, %v8329_v7, %v8330_v56  ;;  %v18210_v7 = vld [vmem:[#allocation42_spill] sm:$0xff] }
 0xa6b   :  { %8140 = vrot.lane.b32.xlu2 %v7487_v46, %s10956_s13  ;;  %8142 = vrot.lane.b32.xlu1 %v7520_v42, %s10956_s13 }
 0xa6c   :  { %8002 = vrot.lane.b32.xlu0 %v15495_v54, %s10954_s1  ;;  %v8115_v40 = vpop.permute.xlu1 %8114  ;;  %v18201_v54 = vld [vmem:[#allocation99_spill] sm:$0xff] }
 0xa6d   :  { %v8117_v13 = vpop.permute.xlu2 %8116  ;;  %v8290_v10 = vsel %vm8283_vm12, %v8253_v28, %v8115_v40 }
 0xa6e   :  { %v7975_v47 = vpop.permute.xlu0 %7974  ;;  %v8336_v17 = vrot.slane %v8290_v10, 5 }
 0xa6f   :  { %v8255_v37 = vsel %vm8246_vm11, %v8218_v32, %v7975_v47  ;;  %v7595_v47 = vpop.f32.mrf.mxu1 }
 0xa70   :  { %v8418_v26 = vsel %vm242_vm5, %v8331_v44, %v8336_v17  ;;  %v7628_v44 = vpop.f32.mrf.mxu2 }
 0xa71   :  { %10041 = vmatmul.msk.f32.gmra.mxu2 %vm68_vm0, %v8418_v26  ;;  %v18215_v26 = vld [vmem:[#allocation44_spill] sm:$0xff] }
 0xa73   :  { %7858 = vrot.lane.b32.xlu2 %v18201_v54, %s10955_s2  ;;  %8000 = vrot.lane.b32.xlu1 %v15462_v27, %s10954_s1  ;;  %v18204_v27 = vld [vmem:[#allocation110_spill] sm:$0xff] }
 0xa74   :  { %7860 = vrot.lane.b32.xlu0 %v18202_v1, %s10955_s2  ;;  %v7973_v23 = vpop.permute.xlu1 %7972 }
 0xa75   :  { %v7835_v49 = vpop.permute.xlu2 %7834  ;;  %v8254_v3 = vsel %vm8246_vm11, %v8217_v4, %v7973_v23 }
 0xa76   :  { %v7833_v33 = vpop.permute.xlu0 %7832  ;;  %v8291_v25 = vsel %vm8283_vm12, %v8254_v3, %v8117_v13  ;;  %v8220_v53 = vsel %vm787_vm8, %v18210_v7, %v7835_v49  ;;  %v18223_v7 = vld [vmem:[#allocation117_spill] sm:$0xff] }
 0xa77   :  { %v8337_v21 = vrot.slane %v8291_v25, 5  ;;  %v8219_v35 = vsel %vm787_vm8, %v18209_v50, %v7833_v33 }
 0xa79   :  { %v8338_v45 = vsel %vm242_vm5, %v8336_v17, %v8337_v21 }
 0xa7b   :  { %8144 = vrot.lane.b32.xlu2 %v7523_v62, %s10956_s13  ;;  %8146 = vrot.lane.b32.xlu1 %v7556_v31, %s10956_s13  ;;  %v18216_v31 = vld [vmem:[#allocation79_spill] sm:$0xff] }
 0xa7c   :  { %8006 = vrot.lane.b32.xlu0 %v18204_v27, %s10954_s1  ;;  %v8119_v20 = vpop.permute.xlu1 %8118  ;;  %v18217_v27 = vld [vmem:[#allocation101_spill] sm:$0xff] }
 0xa7d   :  { %v8121_v34 = vpop.permute.xlu2 %8120  ;;  %v8292_v38 = vsel %vm8283_vm12, %v8255_v37, %v8119_v20 }
 0xa7e   :  { %v7979_v12 = vpop.permute.xlu0 %7978  ;;  %v8343_v0 = vrot.slane %v8292_v38, 4  ;;  %v7631_v38 = vpop.f32.mrf.mxu2 }
 0xa7f   :  { %v8257_v16 = vsel %vm8246_vm11, %v8220_v53, %v7979_v12  ;;  %v18224_v53 = vld [vmem:[#allocation128_spill] sm:$0xff] }
 0xa80   :  { %v8419_v48 = vsel %vm235_vm4, %v8338_v45, %v8343_v0  ;;  %v18220_v45 = vld [vmem:[#allocation58_spill] sm:$0xff] }
 0xa81   :  { %10042 = vmatmul.msk.f32.vlgmr.msra.gmra.mxu3 %vm68_vm0, %v8419_v48 }
 0xa83   :  { %7862 = vrot.lane.b32.xlu2 %v18206_v39, %s10955_s2  ;;  %8004 = vrot.lane.b32.xlu1 %v18207_v15, %s10954_s1 }
 0xa84   :  { %7864 = vrot.lane.b32.xlu0 %v18208_v55, %s10955_s2  ;;  %v7977_v5 = vpop.permute.xlu1 %7976 }
 0xa85   :  { %v7839_v57 = vpop.permute.xlu2 %7838  ;;  %v8256_v18 = vsel %vm8246_vm11, %v8219_v35, %v7977_v5 }
 0xa86   :  { %v7837_v61 = vpop.permute.xlu0 %7836  ;;  %v8293_v29 = vsel %vm8283_vm12, %v8256_v18, %v8121_v34  ;;  %v8222_v54 = vsel %vm787_vm8, %v18215_v26, %v7839_v57  ;;  %v18228_v26 = vld [vmem:[#allocation91_spill] sm:$0xff] }
 0xa87   :  { %v8344_v9 = vrot.slane %v8293_v29, 4  ;;  %v8221_v56 = vsel %vm787_vm8, %v18213_v58, %v7837_v61 }
 0xa89   :  { %v8345_v63 = vsel %vm235_vm4, %v8343_v0, %v8344_v9  ;;  %v7664_v0 = vpop.f32.mrf.mxu3 }
 0xa8b   :  { %8148 = vrot.lane.b32.xlu2 %v7559_v22, %s10956_s13  ;;  %8150 = vrot.lane.b32.xlu1 %v7592_v19, %s10956_s13  ;;  %v18221_v22 = vld [vmem:[#allocation89_spill] sm:$0xff]  ;;  %v18222_v19 = vld [vmem:[#allocation127_spill] sm:$0xff] }
 0xa8c   :  { %8010 = vrot.lane.b32.xlu0 %v15530_v41, %s10954_s1  ;;  %v8123_v60 = vpop.permute.xlu1 %8122  ;;  %v18211_v41 = vld [vmem:[#allocation100_spill] sm:$0xff] }
 0xa8d   :  { %v8125_v30 = vpop.permute.xlu2 %8124  ;;  %v8294_v36 = vsel %vm8283_vm12, %v8257_v16, %v8123_v60 }
 0xa8e   :  { %v7983_v51 = vpop.permute.xlu0 %7982  ;;  %v8350_v46 = vrot.slane %v8294_v36, 3 }
 0xa8f   :  { %v8259_v11 = vsel %vm8246_vm11, %v8222_v54, %v7983_v51 }
 0xa90   :  { %v8420_v42 = vsel %vm228_vm3, %v8345_v63, %v8350_v46 }
 0xa91   :  { %10043 = vmatmul.msk.f32.gmra.mxu3 %vm68_vm0, %v8420_v42  ;;  %v7700_v42 = vpop.f32.mrf.mxu0 }
 0xa93   :  { %7866 = vrot.lane.b32.xlu2 %v18211_v41, %s10955_s2  ;;  %8008 = vrot.lane.b32.xlu1 %v15516_v43, %s10954_s1  ;;  %v18214_v43 = vld [vmem:[#allocation118_spill] sm:$0xff]  ;;  %v18225_v41 = vld [vmem:[#allocation77_spill] sm:$0xff] }
 0xa94   :  { %7868 = vrot.lane.b32.xlu0 %v18212_v6, %s10955_s2  ;;  %v18226_v6 = vld [vmem:[#allocation68_spill] sm:$0xff] }
 0xa95   :  { %v7981_v28 = vpop.permute.xlu1 %7980  ;;  %v7843_v40 = vpop.permute.xlu2 %7842 }
 0xa96   :  { %v8258_v13 = vsel %vm8246_vm11, %v8221_v56, %v7981_v28  ;;  %v7841_v10 = vpop.permute.xlu0 %7840  ;;  %v8224_v48 = vsel %vm787_vm8, %v18220_v45, %v7843_v40 }
 0xa97   :  { %v8295_v17 = vsel %vm8283_vm12, %v8258_v13, %v8125_v30  ;;  %v8223_v32 = vsel %vm787_vm8, %v18218_v59, %v7841_v10 }
 0xa98   :  { %v8351_v1 = vrot.slane %v8295_v17, 3  ;;  %v18227_v17 = vld [vmem:[#allocation88_spill] sm:$0xff] }
 0xa9a   :  { %v8352_v62 = vsel %vm228_vm3, %v8350_v46, %v8351_v1  ;;  %v7667_v46 = vpop.f32.mrf.mxu3 }
 0xa9b   :  { %8152 = vrot.lane.b32.xlu2 %v7595_v47, %s10956_s13  ;;  %8154 = vrot.lane.b32.xlu1 %v7628_v44, %s10956_s13  ;;  %v7703_v47 = vpop.f32.mrf.mxu0 }
 0xa9c   :  { %8014 = vrot.lane.b32.xlu0 %v18214_v43, %s10954_s1 }
 0xa9d   :  { %v8127_v4 = vpop.permute.xlu1 %8126  ;;  %v8129_v23 = vpop.permute.xlu2 %8128 }
 0xa9e   :  { %v8296_v49 = vsel %vm8283_vm12, %v8259_v11, %v8127_v4  ;;  %v7987_v3 = vpop.permute.xlu0 %7986 }
 0xa9f   :  { %v8357_v33 = vrot.slane %v8296_v49, 2  ;;  %v8261_v15 = vsel %vm8246_vm11, %v8224_v48, %v7987_v3  ;;  %v7736_v4 = vpop.f32.mrf.mxu1  ;;  %v18229_v3 = vld [vmem:[#allocation3_spill] sm:$0xff] }
 0xaa1   :  { %v8421_v25 = vsel %vm221_vm2, %v8352_v62, %v8357_v33 }
 0xaa2   :  { %10044 = vmatmul.msk.f32.gmra.mxu3 %vm68_vm0, %v8421_v25 }
 0xaa3   :  { %7870 = vrot.lane.b32.xlu2 %v18216_v31, %s10955_s2  ;;  %8012 = vrot.lane.b32.xlu1 %v15539_v2, %s10954_s1  ;;  %v18219_v2 = vld [vmem:[#allocation135_spill] sm:$0xff] }
 0xaa4   :  { %7872 = vrot.lane.b32.xlu0 %v18217_v27, %s10955_s2 }
 0xaa5   :  { %v7985_v21 = vpop.permute.xlu1 %7984  ;;  %v7989_v37 = vpop.permute.xlu2 %7988 }
 0xaa6   :  { %v8260_v20 = vsel %vm8246_vm11, %v8223_v32, %v7985_v21  ;;  %v7845_v34 = vpop.permute.xlu0 %7844 }
 0xaa7   :  { %v8297_v12 = vsel %vm8283_vm12, %v8260_v20, %v8129_v23  ;;  %v8225_v29 = vsel %vm787_vm8, %v18221_v22, %v7845_v34  ;;  %v7772_v23 = vpop.f32.mrf.mxu2  ;;  %v18232_v20 = vld [vmem:[#allocation119_spill] sm:$0xff]  ;;  %v18233_v34 = vld [vmem:[#allocation82_spill] sm:$0xff] }
 0xaa8   :  { %v8358_v39 = vrot.slane %v8297_v12, 2  ;;  %v8262_v16 = vsel %vm8246_vm11, %v8225_v29, %v7989_v37  ;;  %v18231_v37 = vld [vmem:[#allocation108_spill] sm:$0xff] }
 0xaaa   :  { %v8359_v18 = vsel %vm221_vm2, %v8357_v33, %v8358_v39  ;;  %v18230_v33 = vld [vmem:[#allocation56_spill] sm:$0xff]  ;;  %v7739_v39 = vpop.f32.mrf.mxu1 }
 0xaab   :  { %8156 = vrot.lane.b32.xlu2 %v7631_v38, %s10956_s13  ;;  %8158 = vrot.lane.b32.xlu1 %v7664_v0, %s10956_s13 }
 0xaac   :  { %8018 = vrot.lane.b32.xlu0 %v18219_v2, %s10954_s1 }
 0xaad   :  { %v8131_v55 = vpop.permute.xlu1 %8130  ;;  %v7991_v50 = vpop.permute.xlu2 %7990 }
 0xaae   :  { %v8298_v35 = vsel %vm8283_vm12, %v8261_v15, %v8131_v55  ;;  %v7847_v5 = vpop.permute.xlu0 %7846 }
 0xaaf   :  { %v8364_v57 = vrot.slane %v8298_v35, 1  ;;  %v8226_v58 = vsel %vm787_vm8, %v18226_v6, %v7847_v5 }
 0xab0   :  { %v8263_v13 = vsel %vm8246_vm11, %v8226_v58, %v7991_v50 }
 0xab1   :  { %v8422_v61 = vsel %vm214_vm1, %v8359_v18, %v8364_v57 }
 0xab2   :  { %10045 = vmatmul.msk.f32.gmra.mxu3 %vm68_vm0, %v8422_v61 }
 0xab3   :  { %7874 = vrot.lane.b32.xlu2 %v18222_v19, %s10955_s2  ;;  %8016 = vrot.lane.b32.xlu1 %v18223_v7, %s10954_s1 }
 0xab4   :  { %7876 = vrot.lane.b32.xlu0 %v18224_v53, %s10955_s2 }
 0xab5   :  { %v8133_v9 = vpop.permute.xlu1 %8132  ;;  %v7995_v60 = vpop.permute.xlu2 %7994 }
 0xab6   :  { %v8299_v30 = vsel %vm8283_vm12, %v8262_v16, %v8133_v9  ;;  %v7851_v36 = vpop.permute.xlu0 %7850 }
 0xab7   :  { %v8365_v51 = vrot.slane %v8299_v30, 1  ;;  %v8228_v54 = vsel %vm787_vm8, %v18228_v26, %v7851_v36  ;;  %v18236_v36 = vld [vmem:[#allocation33_spill] sm:$0xff] }
 0xab8   :  { %v8265_v11 = vsel %vm8246_vm11, %v8228_v54, %v7995_v60 }
 0xab9   :  { %v8366_v63 = vsel %vm214_vm1, %v8364_v57, %v8365_v51 }
 0xaba   :  { %10046 = vmatmul.msk.f32.gmra.mxu3 %vm68_vm0, %v8366_v63 }
 0xabb   :  { %8160 = vrot.lane.b32.xlu2 %v7667_v46, %s10956_s13  ;;  %8162 = vrot.lane.b32.xlu1 %v7700_v42, %s10956_s13 }
 0xabc   :  { %7878 = vrot.lane.b32.xlu0 %v18225_v41, %s10955_s2 }
 0xabd   :  { %v8135_v56 = vpop.permute.xlu1 %8134  ;;  %v7993_v28 = vpop.permute.xlu2 %7992 }
 0xabe   :  { %v8139_v40 = vpop.permute.xlu0 %8138  ;;  %v8300_v10 = vsel %vm8283_vm12, %v8263_v13, %v8135_v56 }
 0xabf   :  { %v8302_v49 = vsel %vm8283_vm12, %v8265_v11, %v8139_v40  ;;  %v10926_v11 = vld [vmem:[%s16686_s0] sm:$0xff] }
 0xac0   :  { %v8370_v62 = vrot.slane %v8302_v49, 7  ;;  %v18238_v49 = vld [vmem:[#allocation40_spill] sm:$0xff] }
 0xac2   :  { %10047 = vmatmul.msk.f32.gmra.mxu3 %vm68_vm0, %v8300_v10 }
 0xac3   :  { %8020 = vrot.lane.b32.xlu2 %v15532_v52, %s10954_s1  ;;  %8164 = vrot.lane.b32.xlu1 %v7703_v47, %s10956_s13  ;;  %v18237_v47 = vld [vmem:[#allocation46_spill] sm:$0xff] }
 0xac4   :  { %7882 = vrot.lane.b32.xlu0 %v18227_v17, %s10955_s2 }
 0xac5   :  { %v7849_v44 = vpop.permute.xlu1 %7848  ;;  %v7855_v43 = vpop.permute.xlu2 %7854 }
 0xac6   :  { %v7853_v1 = vpop.permute.xlu0 %7852  ;;  %v8227_v52 = vsel %vm787_vm8, %v18229_v3, %v7849_v44 }
 0xac7   :  { %v8264_v25 = vsel %vm8246_vm11, %v8227_v52, %v7993_v28  ;;  %v8229_v38 = vsel %vm787_vm8, %v18233_v34, %v7853_v1  ;;  %v15855_v28 = vld [vmem:[%s16690_s4] ss:$0 sm:$0xff] }
 0xaca   :  { %v7775_v19 = vpop.f32.mrf.mxu2 }
 0xacb   :  { %8022 = vrot.lane.b32.xlu2 %v18230_v33, %s10954_s1  ;;  %8166 = vrot.lane.b32.xlu1 %v7736_v4, %s10956_s13 }
 0xacc   :  { %8170 = vrot.lane.b32.xlu0 %v7772_v23, %s10956_s13 }
 0xacd   :  { %v8137_v31 = vpop.permute.xlu1 %8136  ;;  %v8141_v27 = vpop.permute.xlu2 %8140 }
 0xace   :  { %v8301_v59 = vsel %vm8283_vm12, %v8264_v25, %v8137_v31  ;;  %v7999_v32 = vpop.permute.xlu0 %7998 }
 0xacf   :  { %v8423_v21 = vsel %vm256_vm7, %v8301_v59, %v8370_v62 }
 0xad0   :  { %10048 = vmatmul.msk.f32.gmra.mxu3 %vm68_vm0, %v8423_v21 }
 0xad2   :  { %v8520_v63 = vpop.f32.mrf.mxu2 }
 0xad3   :  { %8026 = vrot.lane.b32.xlu2 %v15552_v8, %s10954_s1  ;;  %7880 = vrot.lane.b32.xlu1 %v18231_v37, %s10955_s2  ;;  %v18234_v8 = vld [vmem:[#allocation78_spill] sm:$0xff]  ;;  %v8521_v10 = vadd.f32 %v15855_v28, %v8520_v63 }
 0xad4   :  { %7884 = vrot.lane.b32.xlu0 %v18232_v20, %s10955_s2  ;;  %v8230_v15 = vsel %vm787_vm8, %v18234_v8, %v7855_v43 }
 0xad5   :  { %v7997_v12 = vpop.permute.xlu1 %7996  ;;  %v7859_v0 = vpop.permute.xlu2 %7858  ;;  %v8267_v50 = vsel %vm8246_vm11, %v8230_v15, %v7999_v32  ;;  %v15867_v4 = vadd.f32 %v10926_v11, %v8521_v10 }
 0xad6   :  { %v8266_v2 = vsel %vm8246_vm11, %v8229_v38, %v7997_v12  ;;  %v7857_v45 = vpop.permute.xlu0 %7856  ;;  %v8232_v51 = vsel %vm787_vm8, %v18236_v36, %v7859_v0  ;;  %v18239_v12 = vld [vmem:[#allocation13_spill] sm:$0xff] }
 0xad7   :  { %v8303_v48 = vsel %vm8283_vm12, %v8266_v2, %v8141_v27  ;;  %v8604_v33 = vsel %vm68_vm0, %v15867_v4, 0.0  ;;  %v10930_v36 = vld [vmem:[%s16686_s0 + $0x18] sm:$0xff] }
 0xad8   :  { %v8371_v55 = vrot.slane %v8303_v48, 7  ;;  %v10927_v48 = vld [vmem:[%s16686_s0 + $0x8] sm:$0xff] }
 0xada   :  { %v8372_v22 = vsel %vm256_vm7, %v8370_v62, %v8371_v55  ;;  %v8523_v1 = vpop.f32.mrf.mxu2 }
 0xadb   :  { %8024 = vrot.lane.b32.xlu2 %v15541_v14, %s10954_s1  ;;  %8168 = vrot.lane.b32.xlu1 %v7739_v39, %s10956_s13  ;;  %v18235_v14 = vld [vmem:[#allocation5_spill] sm:$0xff]  ;;  %v8524_v34 = vadd.f32 %v15855_v28, %v8523_v1 }
 0xadc   :  { %v8231_v7 = vsel %vm787_vm8, %v18235_v14, %v7857_v45 }
 0xadd   :  { %v8143_v35 = vpop.permute.xlu1 %8142  ;;  %v8145_v5 = vpop.permute.xlu2 %8144  ;;  %v15886_v39 = vadd.f32 %v10927_v48, %v8524_v34 }
 0xade   :  { %v8304_v57 = vsel %vm8283_vm12, %v8267_v50, %v8143_v35  ;;  %v8003_v18 = vpop.permute.xlu0 %8002 }
 0xadf   :  { %v8377_v61 = vrot.slane %v8304_v57, 6  ;;  %v8269_v42 = vsel %vm8246_vm11, %v8232_v51, %v8003_v18  ;;  %v10929_v18 = vld [vmem:[%s16686_s0 + $0x20] sm:$0xff]  ;;  %v8607_v14 = vsel %vm68_vm0, %v15886_v39, 0.0 }
 0xae1   :  { %v8424_v29 = vsel %vm249_vm6, %v8372_v22, %v8377_v61 }
 0xae2   :  { %10049 = vmatmul.msk.f32.gmra.mxu3 %vm68_vm0, %v8424_v29 }
 0xae3   :  { %8028 = vrot.lane.b32.xlu2 %v15558_v24, %s10954_s1  ;;  %8172 = vrot.lane.b32.xlu1 %v7775_v19, %s10956_s13 }
 0xae4   :  { %v8526_v32 = vpop.f32.mrf.mxu2 }
 0xae5   :  { %v8001_v53 = vpop.permute.xlu1 %8000  ;;  %v7863_v16 = vpop.permute.xlu2 %7862  ;;  %v8527_v38 = vadd.f32 %v15855_v28, %v8526_v32 }
 0xae6   :  { %v8268_v9 = vsel %vm8246_vm11, %v8231_v7, %v8001_v53  ;;  %v7861_v60 = vpop.permute.xlu0 %7860  ;;  %v8234_v3 = vsel %vm787_vm8, %v18238_v49, %v7863_v16  ;;  %v18240_v7 = vld [vmem:[#allocation23_spill] sm:$0xff] }
 0xae7   :  { %v8305_v30 = vsel %vm8283_vm12, %v8268_v9, %v8145_v5  ;;  %v8233_v17 = vsel %vm787_vm8, %v18237_v47, %v7861_v60  ;;  %v10928_v5 = vld [vmem:[%s16686_s0 + $0x10] sm:$0xff] }
 0xae8   :  { %v8378_v46 = vrot.slane %v8305_v30, 6  ;;  %v15893_v57 = vadd.f32 %v10928_v5, %v8527_v38 }
 0xaea   :  { %v8379_v40 = vsel %vm249_vm6, %v8377_v61, %v8378_v46  ;;  %v8610_v16 = vsel %vm68_vm0, %v15893_v57, 0.0 }
 0xaed   :  { %v8147_v24 = vpop.permute.xlu1 %8146  ;;  %v8149_v6 = vpop.permute.xlu2 %8148 }
 0xaee   :  { %v8306_v41 = vsel %vm8283_vm12, %v8269_v42, %v8147_v24  ;;  %v8007_v58 = vpop.permute.xlu0 %8006 }
 0xaef   :  { %v8384_v56 = vrot.slane %v8306_v41, 5  ;;  %v8271_v62 = vsel %vm8246_vm11, %v8234_v3, %v8007_v58 }
 0xaf1   :  { %v8425_v13 = vsel %vm242_vm5, %v8379_v40, %v8384_v56 }
 0xaf2   :  { %10050 = vmatmul.msk.f32.gmra.mxu3 %vm68_vm0, %v8425_v13 }
 0xaf4   :  { %v8529_v35 = vpop.f32.mrf.mxu2 }
 0xaf5   :  { %v8005_v44 = vpop.permute.xlu1 %8004  ;;  %v7867_v26 = vpop.permute.xlu2 %7866  ;;  %v8530_v29 = vadd.f32 %v15855_v28, %v8529_v35 }
 0xaf6   :  { %v8270_v43 = vsel %vm8246_vm11, %v8233_v17, %v8005_v44  ;;  %v7865_v54 = vpop.permute.xlu0 %7864  ;;  %v8236_v53 = vsel %vm787_vm8, %v18240_v7, %v7867_v26 }
 0xaf7   :  { %v8307_v23 = vsel %vm8283_vm12, %v8270_v43, %v8149_v6  ;;  %v8235_v0 = vsel %vm787_vm8, %v18239_v12, %v7865_v54  ;;  %v15914_v51 = vadd.f32 %v10930_v36, %v8530_v29  ;;  %v10931_v43 = vld [vmem:[%s16686_s0 + $0x28] sm:$0xff] }
 0xaf8   :  { %v8385_v52 = vrot.slane %v8307_v23, 5  ;;  %v18242_v23 = vld [vmem:[#allocation31_spill] sm:$0xff] }
 0xaf9   :  { %v8613_v58 = vsel %vm68_vm0, %v15914_v51, 0.0 }
 0xafa   :  { %v8386_v37 = vsel %vm242_vm5, %v8384_v56, %v8385_v52  ;;  %v18241_v56 = vld [vmem:[#allocation69_spill] sm:$0xff] }
 0xafd   :  { %v8151_v25 = vpop.permute.xlu1 %8150  ;;  %v8153_v27 = vpop.permute.xlu2 %8152 }
 0xafe   :  { %8605 = vadd.xlane.f32.xlu0 %v8604_v33  ;;  %v8308_v31 = vsel %vm8283_vm12, %v8271_v62, %v8151_v25  ;;  %v8011_v59 = vpop.permute.xlu0 %8010 }
 0xaff   :  { %v8391_v21 = vrot.slane %v8308_v31, 4  ;;  %v8273_v60 = vsel %vm8246_vm11, %v8236_v53, %v8011_v59  ;;  %v18245_v53 = vld [vmem:[#allocation45_spill] sm:$0xff] }
 0xb01   :  { %v8426_v20 = vsel %vm235_vm4, %v8386_v37, %v8391_v21 }
 0xb02   :  { %10051 = vmatmul.msk.f32.gmra.mxu3 %vm68_vm0, %v8426_v20 }
 0xb04   :  { %v8532_v2 = vpop.f32.mrf.mxu3 }
 0xb05   :  { %v8009_v45 = vpop.permute.xlu1 %8008  ;;  %v8533_v8 = vadd.f32 %v15855_v28, %v8532_v2  ;;  %v7871_v55 = vpop.permute.xlu2 %7870  ;;  %v10932_v2 = vld [vmem:[%s16686_s0 + $0x30] sm:$0xff] }
 0xb06   :  { %v8272_v15 = vsel %vm8246_vm11, %v8235_v0, %v8009_v45  ;;  %v7869_v50 = vpop.permute.xlu0 %7868  ;;  %v8238_v49 = vsel %vm787_vm8, %v18242_v23, %v7871_v55 }
 0xb07   :  { %v15898_v61 = vadd.f32 %v10929_v18, %v8533_v8  ;;  %v8309_v22 = vsel %vm8283_vm12, %v8272_v15, %v8153_v27  ;;  %v8237_v40 = vsel %vm787_vm8, %v18241_v56, %v7869_v50  ;;  %v18244_v15 = vld [vmem:[#allocation64_spill] sm:$0xff] }
 0xb08   :  { %v8392_v9 = vrot.slane %v8309_v22, 4 }
 0xb09   :  { %v8616_v19 = vsel %vm68_vm0, %v15898_v61, 0.0 }
 0xb0a   :  { %8617 = vadd.xlane.f32.xlu0 %v8616_v19  ;;  %v8393_v41 = vsel %vm235_vm4, %v8391_v21, %v8392_v9  ;;  %v18243_v21 = vld [vmem:[#allocation14_spill] sm:$0xff] }
 0xb0c   :  { %8608 = vadd.xlane.f32.xlu2 %v8607_v14 }
 0xb0d   :  { %v8155_v30 = vpop.permute.xlu1 %8154  ;;  %8611 = vadd.xlane.f32.xlu1 %v8610_v16  ;;  %v8157_v63 = vpop.permute.xlu2 %8156 }
 0xb0e   :  { %v8310_v46 = vsel %vm8283_vm12, %v8273_v60, %v8155_v30  ;;  %v8015_v42 = vpop.permute.xlu0 %8014 }
 0xb0f   :  { %v8398_v24 = vrot.slane %v8310_v46, 3  ;;  %v8275_v52 = vsel %vm8246_vm11, %v8238_v49, %v8015_v42 }
 0xb11   :  { %v8427_v6 = vsel %vm228_vm3, %v8393_v41, %v8398_v24 }
 0xb12   :  { %10052 = vmatmul.msk.f32.gmra.mxu3 %vm68_vm0, %v8427_v6 }
 0xb14   :  { %8614 = vadd.xlane.f32.xlu2 %v8613_v58  ;;  %v8535_v13 = vpop.f32.mrf.mxu3 }
 0xb15   :  { %v8013_v10 = vpop.permute.xlu1 %8012  ;;  %v8536_v47 = vadd.f32 %v15855_v28, %v8535_v13  ;;  %v7875_v54 = vpop.permute.xlu2 %7874 }
 0xb16   :  { %v8274_v17 = vsel %vm8246_vm11, %v8237_v40, %v8013_v10  ;;  %v7873_v44 = vpop.permute.xlu0 %7872  ;;  %v8240_v55 = vsel %vm787_vm8, %v18244_v15, %v7875_v54 }
 0xb17   :  { %v15929_v26 = vadd.f32 %v10931_v43, %v8536_v47  ;;  %v8311_v1 = vsel %vm8283_vm12, %v8274_v17, %v8157_v63  ;;  %v8239_v37 = vsel %vm787_vm8, %v18243_v21, %v7873_v44  ;;  %v18247_v47 = vld [vmem:[#allocation55_spill] sm:$0xff]  ;;  %v10957_v21 = vmov 16.0  }
 0xb18   :  { %v8399_v3 = vrot.slane %v8311_v1, 3  ;;  %v18248_v1 = vld [vmem:[#allocation87_spill] sm:$0xff]  ;;  %10882 = vrcp.f32 %v10957_v21 }
 0xb19   :  { %v8619_v11 = vsel %vm68_vm0, %v15929_v26, 0.0 }
 0xb1a   :  { %8620 = vadd.xlane.f32.xlu1 %v8619_v11  ;;  %v8400_v27 = vsel %vm228_vm3, %v8398_v24, %v8399_v3  ;;  %v18246_v24 = vld [vmem:[#allocation76_spill] sm:$0xff] }
 0xb1d   :  { %v8159_v33 = vpop.permute.xlu1 %8158  ;;  %v8161_v32 = vpop.permute.xlu2 %8160 }
 0xb1e   :  { %v8312_v62 = vsel %vm8283_vm12, %v8275_v52, %v8159_v33  ;;  %v8019_v25 = vpop.permute.xlu0 %8018 }
 0xb1f   :  { %v8405_v31 = vrot.slane %v8312_v62, 2  ;;  %v8277_v5 = vsel %vm8246_vm11, %v8240_v55, %v8019_v25  ;;  %v18249_v25 = vld [vmem:[#allocation53_spill] sm:$0xff] }
 0xb21   :  { %v8428_v59 = vsel %vm221_vm2, %v8400_v27, %v8405_v31 }
 0xb22   :  { %10053 = vmatmul.msk.f32.gmra.mxu3 %vm68_vm0, %v8428_v59 }
 0xb25   :  { %v8538_v20 = vpop.f32.mrf.mxu3  ;;  %v8017_v34 = vpop.permute.xlu1 %8016 }
 0xb26   :  { %v8539_v38 = vadd.f32 %v15855_v28, %v8538_v20  ;;  %v8276_v12 = vsel %vm8246_vm11, %v8239_v37, %v8017_v34  ;;  %v7877_v0 = vpop.permute.xlu0 %7876  ;;  %v8021_v35 = vpop.permute.xlu2 %8020 }
 0xb27   :  { %v8313_v48 = vsel %vm8283_vm12, %v8276_v12, %v8161_v32  ;;  %v8241_v9 = vsel %vm787_vm8, %v18245_v53, %v7877_v0 }
 0xb28   :  { %v15948_v45 = vadd.f32 %v10932_v2, %v8539_v38  ;;  %v8406_v50 = vrot.slane %v8313_v48, 2  ;;  %v8278_v60 = vsel %vm8246_vm11, %v8241_v9, %v8021_v35  ;;  %v10883_v38 = vpop.eup %10882 }
 0xb29   :  { %v8669_v12 = vmul.f32 16.0, %v10883_v38  ;;  %vm8673_vm13 = vweird.f32 %v10883_v38 }
 0xb2a   :  { %v8622_v8 = vsel %vm68_vm0, %v15948_v45, 0.0  ;;  %v8407_v19 = vsel %vm221_vm2, %v8405_v31, %v8406_v50 }
 0xb2b   :  { %8623 = vadd.xlane.f32.xlu0 %v8622_v8  ;;  %v8670_v0 = vsub.f32 1.0, %v8669_v12 }
 0xb2d   :  { %v8163_v18 = vpop.permute.xlu1 %8162  ;;  %v8671_v2 = vmul.f32 %v10883_v38, %v8670_v0 }
 0xb2e   :  { %v8314_v22 = vsel %vm8283_vm12, %v8277_v5, %v8163_v18  ;;  %v7879_v14 = vpop.permute.xlu0 %7878  ;;  %v8023_v30 = vpop.permute.xlu2 %8022 }
 0xb2f   :  { %v8412_v29 = vrot.slane %v8314_v22, 1  ;;  %v8242_v41 = vsel %vm787_vm8, %v18246_v24, %v7879_v14  ;;  %v8672_v8 = vadd.f32 %v10883_v38, %v8671_v2 }
 0xb30   :  { %v8279_v56 = vsel %vm8246_vm11, %v8242_v41, %v8023_v30 }
 0xb31   :  { %v8429_v7 = vsel %vm214_vm1, %v8407_v19, %v8412_v29  ;;  %v15987_v15 = vsel %vm8673_vm13, %v10883_v38, %v8672_v8  ;;  %v10933_v19 = vld [vmem:[%s16686_s0 + $0x38] sm:$0xff] }
 0xb32   :  { %10054 = vmatmul.msk.f32.gmra.mxu3 %vm68_vm0, %v8429_v7 }
 0xb35   :  { %v8165_v16 = vpop.permute.xlu1 %8164  ;;  %v8541_v48 = vpop.f32.mrf.mxu3 }
 0xb36   :  { %v8315_v36 = vsel %vm8283_vm12, %v8278_v60, %v8165_v16  ;;  %v7883_v42 = vpop.permute.xlu0 %7882  ;;  %v8027_v58 = vpop.permute.xlu2 %8026  ;;  %v8542_v22 = vadd.f32 %v15855_v28, %v8541_v48  ;;  %v10937_v48 = vld [vmem:[%s16686_s0 + $0x58] sm:$0xff] }
 0xb37   :  { %v8413_v46 = vrot.slane %v8315_v36, 1  ;;  %v8244_v17 = vsel %vm787_vm8, %v18247_v47, %v7883_v42  ;;  %v10934_v47 = vld [vmem:[%s16686_s0 + $0x40] sm:$0xff] }
 0xb38   :  { %v8281_v44 = vsel %vm8246_vm11, %v8244_v17, %v8027_v58  ;;  %v16000_v14 = vadd.f32 %v10933_v19, %v8542_v22 }
 0xb39   :  { %v8414_v63 = vsel %vm214_vm1, %v8412_v29, %v8413_v46 }
 0xb3a   :  { %10055 = vmatmul.msk.f32.gmra.mxu3 %vm68_vm0, %v8414_v63  ;;  %v8625_v16 = vsel %vm68_vm0, %v16000_v14, 0.0 }
 0xb3d   :  { %v8167_v6 = vpop.permute.xlu1 %8166  ;;  %v8544_v35 = vpop.f32.mrf.mxu3 }
 0xb3e   :  { %v8316_v40 = vsel %vm8283_vm12, %v8279_v56, %v8167_v6  ;;  %v8171_v13 = vpop.permute.xlu0 %8170  ;;  %v8025_v43 = vpop.permute.xlu2 %8024  ;;  %v8545_v24 = vadd.f32 %v15855_v28, %v8544_v35 }
 0xb3f   :  { %v8318_v54 = vsel %vm8283_vm12, %v8281_v44, %v8171_v13 }
 0xb40   :  { %v8432_v23 = vrot.slane %v8318_v54, 7  ;;  %v16024_v17 = vadd.f32 %v10934_v47, %v8545_v24  ;;  %v10935_v54 = vld [vmem:[%s16686_s0 + $0x48] sm:$0xff]  ;;  %v9124_v24 = vld [vmem:[%s16693_s8] sm:$0xff] }
 0xb42   :  { %10056 = vmatmul.msk.f32.gmra.mxu3 %vm68_vm0, %v8316_v40 }
 0xb45   :  { %v7881_v10 = vpop.permute.xlu1 %7880  ;;  %v8547_v7 = vpop.f32.mrf.mxu3 }
 0xb46   :  { %v8243_v11 = vsel %vm787_vm8, %v18248_v1, %v7881_v10  ;;  %v7885_v33 = vpop.permute.xlu0 %7884  ;;  %v8029_v27 = vpop.permute.xlu2 %8028  ;;  %v8548_v40 = vadd.f32 %v15855_v28, %v8547_v7 }
 0xb47   :  { %v8280_v49 = vsel %vm8246_vm11, %v8243_v11, %v8025_v43  ;;  %v8245_v31 = vsel %vm787_vm8, %v18249_v25, %v7885_v33  ;;  %v8628_v33 = vsel %vm68_vm0, %v16024_v17, 0.0 }
 0xb48   :  { %v8282_v59 = vsel %vm8246_vm11, %v8245_v31, %v8029_v27  ;;  %v16033_v1 = vadd.f32 %v10935_v54, %v8548_v40  ;;  %v10936_v27 = vld [vmem:[%s16686_s0 + $0x50] sm:$0xff] }
 0xb4a   :  { %v8631_v31 = vsel %vm68_vm0, %v16033_v1, 0.0 }
 0xb4d   :  { %v8169_v3 = vpop.permute.xlu1 %8168 }
 0xb4e   :  { %v8317_v52 = vsel %vm8283_vm12, %v8280_v49, %v8169_v3 }
 0xb4f   :  { %v8436_v62 = vsel %vm256_vm7, %v8317_v52, %v8432_v23 }
 0xb50   :  { %10057 = vmatmul.msk.f32.gmra.mxu3 %vm68_vm0, %v8436_v62 }
 0xb53   :  { %v8550_v42 = vpop.f32.mrf.mxu3 }
 0xb54   :  { %v8551_v49 = vadd.f32 %v15855_v28, %v8550_v42  ;;  %v9125_v42 = vld [vmem:[%s16693_s8 + $0x8] sm:$0xff] }
 0xb55   :  { %v8173_v32 = vpop.permute.xlu1 %8172  ;;  %9207 = vmatpush.msrb.mxu0 %v9125_v42 }
 0xb56   :  { %v8319_v37 = vsel %vm8283_vm12, %v8282_v59, %v8173_v32  ;;  %v16050_v59 = vadd.f32 %v10936_v27, %v8551_v49 }
 0xb57   :  { %v8433_v20 = vrot.slane %v8319_v37, 7  ;;  %9208 = vmatpush.msrb.mxu0 %v9124_v24 }
 0xb58   :  { %v8634_v38 = vsel %vm68_vm0, %v16050_v59, 0.0 }
 0xb59   :  { %v8434_v34 = vsel %vm256_vm7, %v8432_v23, %v8433_v20 }
 0xb5a   :  { %10058 = vmatmul.msk.f32.gmra.mxu3 %vm68_vm0, %v8434_v34 }
 0xb65   :  { %v8553_v23 = vpop.f32.mrf.mxu3 }
 0xb66   :  { %v8554_v34 = vadd.f32 %v15855_v28, %v8553_v23 }
 0xb68   :  { %v16068_v8 = vadd.f32 %v10937_v48, %v8554_v34  ;;  %v10940_v34 = vld [vmem:[%s16686_s0 + $0x70] sm:$0xff] }
 0xb6a   :  { %v8637_v35 = vsel %vm68_vm0, %v16068_v8, 0.0 }
 0xb71   :  { %v8606_v55 = vpop.xlane.xlu0 %8605 }
 0xb72   :  { %v8675_v50 = vmul.f32 %v15987_v15, %v8606_v55  ;;  %v10938_v55 = vld [vmem:[%s16686_s0 + $0x60] sm:$0xff] }
 0xb74   :  { %v15991_v5 = vsub.f32 %v15867_v4, %v8675_v50 }
 0xb75   :  { %v8556_v20 = vpop.f32.mrf.mxu3 }
 0xb76   :  { %v8717_v18 = vmul.f32 %v15991_v5, %v15991_v5  ;;  %v8557_v0 = vadd.f32 %v15855_v28, %v8556_v20 }
 0xb78   :  { %v8738_v29 = vsel %vm68_vm0, %v8717_v18, 0.0  ;;  %v16073_v50 = vadd.f32 %v10938_v55, %v8557_v0 }
 0xb79   :  { %8739 = vadd.xlane.f32.xlu2 %v8738_v29 }
 0xb7a   :  { %v8640_v29 = vsel %vm68_vm0, %v16073_v50, 0.0 }
 0xb7d   :  { %v8618_v58 = vpop.xlane.xlu0 %8617 }
 0xb7e   :  { %v8679_v44 = vmul.f32 %v15987_v15, %v8618_v58 }
 0xb7f   :  { %v8609_v53 = vpop.xlane.xlu2 %8608 }
 0xb80   :  { %v8676_v9 = vmul.f32 %v15987_v15, %v8609_v53  ;;  %v8612_v60 = vpop.xlane.xlu1 %8611  ;;  %v16039_v3 = vsub.f32 %v15898_v61, %v8679_v44 }
 0xb81   :  { %8626 = vadd.xlane.f32.xlu2 %v8625_v16  ;;  %v8677_v36 = vmul.f32 %v15987_v15, %v8612_v60  ;;  %v10939_v60 = vld [vmem:[%s16686_s0 + $0x68] sm:$0xff] }
 0xb82   :  { %v16006_v30 = vsub.f32 %v15886_v39, %v8676_v9  ;;  %v8721_v21 = vmul.f32 %v16039_v3, %v16039_v3 }
 0xb83   :  { %v16010_v46 = vsub.f32 %v15893_v57, %v8677_v36 }
 0xb84   :  { %v8718_v63 = vmul.f32 %v16006_v30, %v16006_v30  ;;  %v8750_v12 = vsel %vm68_vm0, %v8721_v21, 0.0 }
 0xb85   :  { %v8719_v6 = vmul.f32 %v16010_v46, %v16010_v46  ;;  %v8559_v7 = vpop.f32.mrf.mxu3 }
 0xb86   :  { %v8741_v41 = vsel %vm68_vm0, %v8718_v63, 0.0  ;;  %v8560_v9 = vadd.f32 %v15855_v28, %v8559_v7 }
 0xb87   :  { %v8615_v56 = vpop.xlane.xlu2 %8614  ;;  %8742 = vadd.xlane.f32.xlu1 %v8741_v41  ;;  %v8744_v10 = vsel %vm68_vm0, %v8719_v6, 0.0 }
 0xb88   :  { %v8678_v13 = vmul.f32 %v15987_v15, %v8615_v56  ;;  %8745 = vadd.xlane.f32.xlu0 %v8744_v10  ;;  %v16090_v36 = vadd.f32 %v10939_v60, %v8560_v9 }
 0xb8a   :  { %v16028_v43 = vsub.f32 %v15914_v51, %v8678_v13  ;;  %v8643_v63 = vsel %vm68_vm0, %v16090_v36, 0.0 }
 0xb8c   :  { %v8720_v11 = vmul.f32 %v16028_v43, %v16028_v43 }
 0xb8d   :  { %v8621_v62 = vpop.xlane.xlu1 %8620 }
 0xb8e   :  { %v8747_v52 = vsel %vm68_vm0, %v8720_v11, 0.0  ;;  %v8680_v25 = vmul.f32 %v15987_v15, %v8621_v62 }
 0xb8f   :  { %8748 = vadd.xlane.f32.xlu2 %v8747_v52  ;;  %8629 = vadd.xlane.f32.xlu1 %v8628_v33 }
 0xb90   :  { %8632 = vadd.xlane.f32.xlu0 %v8631_v31  ;;  %v16053_v32 = vsub.f32 %v15929_v26, %v8680_v25 }
 0xb92   :  { %v8722_v37 = vmul.f32 %v16053_v32, %v16053_v32 }
 0xb94   :  { %v8753_v2 = vsel %vm68_vm0, %v8722_v37, 0.0 }
 0xb95   :  { %v8562_v41 = vpop.f32.mrf.mxu3 }
 0xb96   :  { %v8563_v52 = vadd.f32 %v15855_v28, %v8562_v41 }
 0xb97   :  { %8635 = vadd.xlane.f32.xlu2 %v8634_v38  ;;  %8751 = vadd.xlane.f32.xlu1 %v8750_v12 }
 0xb98   :  { %8754 = vadd.xlane.f32.xlu0 %v8753_v2  ;;  %v16116_v38 = vadd.f32 %v10940_v34, %v8563_v52  ;;  %v16124_v2 = vld [vmem:[%s16691_s6] ss:$0 sm:$0xff] }
 0xb99   :  { %v10942_v34 = vld [vmem:[%s16686_s0 + $0x80] sm:$0xff] }
 0xb9e   :  { %v8624_v18 = vpop.xlane.xlu0 %8623 }
 0xb9f   :  { %8638 = vadd.xlane.f32.xlu1 %v8637_v35  ;;  %v8681_v22 = vmul.f32 %v15987_v15, %v8624_v18  ;;  %v16130_v18 = vld [vmem:[%s16692_s7] ss:$0 sm:$0xff] }
 0xba0   :  { %8641 = vadd.xlane.f32.xlu0 %v8640_v29 }
 0xba1   :  { %v16081_v19 = vsub.f32 %v15948_v45, %v8681_v22 }
 0xba3   :  { %v8723_v53 = vmul.f32 %v16081_v19, %v16081_v19 }
 0xba5   :  { %v8756_v16 = vsel %vm68_vm0, %v8723_v53, 0.0  ;;  %v8565_v40 = vpop.f32.mrf.mxu3  ;;  %v8646_v53 = vsel %vm68_vm0, %v16116_v38, 0.0 }
 0xba6   :  { %8757 = vadd.xlane.f32.xlu2 %v8756_v16 }
 0xbae   :  { %8644 = vadd.xlane.f32.xlu2 %v8643_v63 }
 0xbb5   :  { %v8568_v25 = vpop.f32.mrf.mxu3 }
 0xbec   :  { %v8740_v6 = vpop.xlane.xlu2 %8739 }
 0xbed   :  { %v8801_v58 = vmul.f32 %v8740_v6, %v15987_v15 }
 0xbef   :  { %v8822_v56 = vadd.f32 1e-05, %v8801_v58  ;;  %v8566_v58 = vadd.f32 %v15855_v28, %v8565_v40 }
 0xbf1   :  { %10884 = vrsqrt.f32 %v8822_v56  ;;  %vm8849_vm15 = vweird.f32 %v8822_v56 }
 0xbf4   :  { %v8627_v13 = vpop.xlane.xlu2 %8626 }
 0xbf5   :  { %v8682_v10 = vmul.f32 %v15987_v15, %v8627_v13 }
 0xbf7   :  { %v10885_v47 = vpop.eup %10884  ;;  %v16103_v44 = vsub.f32 %v16000_v14, %v8682_v10  ;;  %v8569_v10 = vadd.f32 %v15855_v28, %v8568_v25  ;;  %v10941_v25 = vld [vmem:[%s16686_s0 + $0x78] sm:$0xff] }
 0xbf8   :  { %v8844_v54 = vmul.f32 %v10885_v47, %v8822_v56  ;;  %vm8850_vm14 = vweird.f32 %v10885_v47 }
 0xbf9   :  { %v8724_v11 = vmul.f32 %v16103_v44, %v16103_v44  ;;  %vm8851_vm1 = vmor %vm8849_vm15, %vm8850_vm14 }
 0xbfa   :  { %v8845_v23 = vmul.f32 %v10885_v47, %v8844_v54  ;;  %v8743_v49 = vpop.xlane.xlu1 %8742 }
 0xbfb   :  { %v8802_v33 = vmul.f32 %v8743_v49, %v15987_v15  ;;  %v8759_v62 = vsel %vm68_vm0, %v8724_v11, 0.0  ;;  %v8746_v27 = vpop.xlane.xlu0 %8745 }
 0xbfc   :  { %v8846_v31 = vmul.f32 0.5, %v8845_v23  ;;  %8760 = vadd.xlane.f32.xlu1 %v8759_v62  ;;  %v8803_v37 = vmul.f32 %v8746_v27, %v15987_v15 }
 0xbfd   :  { %v16110_v21 = vadd.f32 1e-05, %v8802_v33 }
 0xbfe   :  { %v8847_v20 = vsub.f32 1.5, %v8846_v31  ;;  %v16119_v12 = vadd.f32 1e-05, %v8803_v37  ;;  %v16166_v31 = vadd.f32 %v10941_v25, %v8566_v58 }
 0xbff   :  { %10886 = vrsqrt.f32 %v16110_v21  ;;  %vm8859_vm3 = vweird.f32 %v16110_v21 }
 0xc00   :  { %v8848_v0 = vmul.f32 %v10885_v47, %v8847_v20  ;;  %10888 = vrsqrt.f32 %v16119_v12  ;;  %vm8869_vm6 = vweird.f32 %v16119_v12 }
 0xc02   :  { %v8852_v48 = vsel %vm8851_vm1, %v10885_v47, %v8848_v0  ;;  %v8749_v55 = vpop.xlane.xlu2 %8748  ;;  %v8630_v35 = vpop.xlane.xlu1 %8629  ;;  %v16174_v0 = vadd.f32 %v10942_v34, %v8569_v10 }
 0xc03   :  { %v9053_v22 = vmul.f32 %v8852_v48, %v15991_v5  ;;  %v8804_v29 = vmul.f32 %v8749_v55, %v15987_v15  ;;  %v8683_v7 = vmul.f32 %v15987_v15, %v8630_v35  ;;  %v8633_v9 = vpop.xlane.xlu0 %8632  ;;  %v8571_v5 = vpop.f32.mrf.mxu3 }
 0xc04   :  { %8647 = vadd.xlane.f32.xlu1 %v8646_v53  ;;  %v8684_v24 = vmul.f32 %v15987_v15, %v8633_v9 }
 0xc05   :  { %v10887_v16 = vpop.eup %10886  ;;  %v9078_v60 = vmul.f32 %v16124_v2, %v9053_v22  ;;  %v16138_v63 = vadd.f32 1e-05, %v8804_v29  ;;  %v16141_v42 = vsub.f32 %v16024_v17, %v8683_v7 }
 0xc06   :  { %v8854_v41 = vmul.f32 %v10887_v16, %v16110_v21  ;;  %v16145_v6 = vpop.eup %10888  ;;  %v16151_v13 = vsub.f32 %v16033_v1, %v8684_v24  ;;  %vm8860_vm2 = vweird.f32 %v10887_v16 }
 0xc07   :  { %v9103_v56 = vadd.f32 %v16130_v18, %v9078_v60  ;;  %10890 = vrsqrt.f32 %v16138_v63  ;;  %v8864_v54 = vmul.f32 %v16145_v6, %v16119_v12  ;;  %v8725_v11 = vmul.f32 %v16141_v42, %v16141_v42  ;;  %vm8861_vm5 = vmor %vm8859_vm3, %vm8860_vm2 }
 0xc08   :  { %v8855_v47 = vmul.f32 %v10887_v16, %v8854_v41  ;;  %v8726_v40 = vmul.f32 %v16151_v13, %v16151_v13  ;;  %vm8870_vm4 = vweird.f32 %v16145_v6  ;;  %v8572_v41 = vadd.f32 %v15855_v28, %v8571_v5 }
 0xc09   :  { %10059 = vmatmul.msk.f32.vlgmr.msrb.gmra.mxu0 %vm68_vm0, %v9103_v56  ;;  %v8865_v49 = vmul.f32 %v16145_v6, %v8864_v54  ;;  %v8762_v33 = vsel %vm68_vm0, %v8725_v11, 0.0  ;;  %vm16198_vm7 = vmor %vm8869_vm6, %vm8870_vm4  ;;  %v8649_v12 = vsel %vm68_vm0, %v16166_v31, 0.0  ;;  %vm8879_vm9 = vweird.f32 %v16138_v63 }
 0xc0a   :  { %v8856_v23 = vmul.f32 0.5, %v8855_v47  ;;  %v8636_v52 = vpop.xlane.xlu2 %8635  ;;  %v8752_v62 = vpop.xlane.xlu1 %8751  ;;  %8763 = vadd.xlane.f32.xlu0 %v8762_v33  ;;  %v8765_v20 = vsel %vm68_vm0, %v8726_v40, 0.0  ;;  %vm8664_vm3 = vcmask 123904  }
 0xc0b   :  { %v8685_v27 = vmul.f32 %v15987_v15, %v8636_v52  ;;  %v8805_v37 = vmul.f32 %v8752_v62, %v15987_v15  ;;  %v8866_v55 = vmul.f32 0.5, %v8865_v49  ;;  %8766 = vadd.xlane.f32.xlu2 %v8765_v20  ;;  %v8755_v35 = vpop.xlane.xlu0 %8754  ;;  %v8574_v56 = vpop.f32.mrf.mxu3  ;;  %v8652_v52 = vsel %vm68_vm0, %v16174_v0, 0.0  ;;  %v10943_v62 = vld [vmem:[%s16686_s0 + $0x88] sm:$0xff] }
 0xc0c   :  { %v8857_v48 = vsub.f32 1.5, %v8856_v23  ;;  %v8806_v53 = vmul.f32 %v8755_v35, %v15987_v15  ;;  %v16216_v25 = vadd.f32 %v10943_v62, %v8572_v41 }
 0xc0d   :  { %v16176_v22 = vpop.eup %10890  ;;  %v16180_v29 = vsub.f32 %v16050_v59, %v8685_v27  ;;  %v16182_v7 = vadd.f32 1e-05, %v8805_v37  ;;  %v8867_v60 = vsub.f32 1.5, %v8866_v55 }
 0xc0e   :  { %v8858_v9 = vmul.f32 %v10887_v16, %v8857_v48  ;;  %v8874_v24 = vmul.f32 %v16176_v22, %v16138_v63  ;;  %v16190_v21 = vadd.f32 1e-05, %v8806_v53  ;;  %vm8880_vm8 = vweird.f32 %v16176_v22 }
 0xc0f   :  { %10892 = vrsqrt.f32 %v16182_v7  ;;  %v8727_v58 = vmul.f32 %v16180_v29, %v16180_v29  ;;  %v8868_v47 = vmul.f32 %v16145_v6, %v8867_v60  ;;  %vm16238_vm10 = vmor %vm8879_vm9, %vm8880_vm8  ;;  %v8575_v63 = vadd.f32 %v15855_v28, %v8574_v56 }
 0xc10   :  { %v8862_v10 = vsel %vm8861_vm5, %v10887_v16, %v8858_v9  ;;  %v8875_v54 = vmul.f32 %v16176_v22, %v8874_v24  ;;  %10894 = vrsqrt.f32 %v16190_v21  ;;  %vm8889_vm12 = vweird.f32 %v16182_v7 }
 0xc11   :  { %v9054_v11 = vmul.f32 %v8862_v10, %v16006_v30  ;;  %v8768_v40 = vsel %vm68_vm0, %v8727_v58, 0.0  ;;  %v8872_v16 = vsel %vm16198_vm7, %v16145_v6, %v8868_v47  ;;  %v8655_v47 = vsel %vm68_vm0, %v16216_v25, 0.0 }
 0xc12   :  { %v8876_v23 = vmul.f32 0.5, %v8875_v54  ;;  %8769 = vadd.xlane.f32.xlu1 %v8768_v40  ;;  %v8639_v49 = vpop.xlane.xlu1 %8638  ;;  %8650 = vadd.xlane.f32.xlu0 %v8649_v12  ;;  %v9055_v20 = vmul.f32 %v8872_v16, %v16010_v46  ;;  %vm8899_vm15 = vweird.f32 %v16190_v21  ;;  %vm9298_vm9 = vcmask 261120  }
 0xc13   :  { %v8686_v30 = vmul.f32 %v15987_v15, %v8639_v49  ;;  %v9079_v33 = vmul.f32 %v16124_v2, %v9054_v11  ;;  %8653 = vadd.xlane.f32.xlu2 %v8652_v52  ;;  %v8642_v27 = vpop.xlane.xlu0 %8641  ;;  %v8577_v24 = vpop.f32.mrf.mxu3 }
 0xc14   :  { %v8877_v6 = vsub.f32 1.5, %v8876_v23  ;;  %v8687_v48 = vmul.f32 %v15987_v15, %v8642_v27  ;;  %v9080_v5 = vmul.f32 %v16124_v2, %v9055_v20  ;;  %v8578_v49 = vadd.f32 %v15855_v28, %v8577_v24 }
 0xc15   :  { %v10893_v37 = vpop.eup %10892  ;;  %v16220_v34 = vsub.f32 %v16068_v8, %v8686_v30  ;;  %v9104_v55 = vadd.f32 %v16130_v18, %v9079_v33 }
 0xc16   :  { %v8878_v35 = vmul.f32 %v16176_v22, %v8877_v6  ;;  %v8884_v53 = vmul.f32 %v10893_v37, %v16182_v7  ;;  %v16227_v9 = vpop.eup %10894  ;;  %v16230_v60 = vsub.f32 %v16073_v50, %v8687_v48  ;;  %v9105_v6 = vadd.f32 %v16130_v18, %v9080_v5 }
 0xc17   :  { %10060 = vmatmul.msk.f32.gmra.mxu0 %vm68_vm0, %v9104_v55  ;;  %v8728_v46 = vmul.f32 %v16220_v34, %v16220_v34  ;;  %v8894_v58 = vmul.f32 %v16227_v9, %v16190_v21  ;;  %vm8890_vm11 = vweird.f32 %v10893_v37  ;;  %v10945_v55 = vld [vmem:[%s16686_s0 + $0x98] sm:$0xff]  ;;  %vm8900_vm14 = vweird.f32 %v16227_v9 }
 0xc18   :  { %v8885_v41 = vmul.f32 %v10893_v37, %v8884_v53  ;;  %v8729_v11 = vmul.f32 %v16230_v60, %v16230_v60  ;;  %v8882_v40 = vsel %vm16238_vm10, %v16176_v22, %v8878_v35  ;;  %v10944_v22 = vld [vmem:[%s16686_s0 + $0x90] sm:$0xff]  ;;  %v16266_v35 = vadd.f32 %v10945_v55, %v8578_v49  ;;  %vm8891_vm13 = vmor %vm8889_vm12, %vm8890_vm11 }
 0xc19   :  { %v8771_v54 = vsel %vm68_vm0, %v8728_v46, 0.0  ;;  %v8895_v23 = vmul.f32 %v16227_v9, %v8894_v58  ;;  %v8758_v12 = vpop.xlane.xlu2 %8757  ;;  %v9056_v56 = vmul.f32 %v8882_v40, %v16028_v43  ;;  %v16261_v27 = vadd.f32 %v10944_v22, %v8575_v63  ;;  %vm8901_vm1 = vmor %vm8899_vm15, %vm8900_vm14 }
 0xc1a   :  { %v8886_v16 = vmul.f32 0.5, %v8885_v41  ;;  %8656 = vadd.xlane.f32.xlu1 %v8655_v47  ;;  %v8807_v30 = vmul.f32 %v8758_v12, %v15987_v15  ;;  %8772 = vadd.xlane.f32.xlu0 %v8771_v54  ;;  %v8774_v52 = vsel %vm68_vm0, %v8729_v11, 0.0  ;;  %v8661_v10 = vsel %vm68_vm0, %v16266_v35, 0.0 }
 0xc1b   :  { %8775 = vadd.xlane.f32.xlu2 %v8774_v52  ;;  %v8896_v48 = vmul.f32 0.5, %v8895_v23  ;;  %v9081_v43 = vmul.f32 %v16124_v2, %v9056_v56  ;;  %v8658_v41 = vsel %vm68_vm0, %v16261_v27, 0.0  ;;  %v8580_v11 = vpop.f32.mrf.mxu3 }
 0xc1c   :  { %v8887_v33 = vsub.f32 1.5, %v8886_v16  ;;  %v8828_v62 = vadd.f32 1e-05, %v8807_v30 }
 0xc1d   :  { %v8897_v46 = vsub.f32 1.5, %v8896_v48 }
 0xc1e   :  { %v8888_v20 = vmul.f32 %v10893_v37, %v8887_v33  ;;  %10896 = vrsqrt.f32 %v8828_v62  ;;  %v10946_v33 = vld [vmem:[%s16686_s0 + $0xa0] sm:$0x3]  ;;  %vm8909_vm4 = vweird.f32 %v8828_v62 }
 0xc1f   :  { %10061 = vmatmul.msk.f32.gmra.mxu0 %vm68_vm0, %v9105_v6  ;;  %v8898_v5 = vmul.f32 %v16227_v9, %v8897_v46  ;;  %v9294_v46 = vld [vmem:[%s16695_s10] sm:$0xff] }
 0xc20   :  { %v8892_v53 = vsel %vm8891_vm13, %v10893_v37, %v8888_v20  ;;  %v9106_v37 = vadd.f32 %v16130_v18, %v9081_v43 }
 0xc21   :  { %v8645_v24 = vpop.xlane.xlu2 %8644  ;;  %v9057_v54 = vmul.f32 %v8892_v53, %v16039_v3  ;;  %v8581_v3 = vadd.f32 %v15855_v28, %v8580_v11  ;;  %v8902_v49 = vsel %vm8901_vm1, %v16227_v9, %v8898_v5  ;;  %v9295_v53 = vld [vmem:[%s16695_s10 + $0x8] sm:$0xff] }
 0xc22   :  { %v8688_v58 = vmul.f32 %v15987_v15, %v8645_v24  ;;  %8659 = vadd.xlane.f32.xlu0 %v8658_v41  ;;  %v9058_v21 = vmul.f32 %v8902_v49, %v16053_v32 }
 0xc23   :  { %8662 = vadd.xlane.f32.xlu2 %v8661_v10  ;;  %v9082_v12 = vmul.f32 %v16124_v2, %v9057_v54  ;;  %v16294_v56 = vadd.f32 %v10946_v33, %v8581_v3 }
 0xc24   :  { %v10897_v47 = vpop.eup %10896  ;;  %v16278_v7 = vsub.f32 %v16090_v36, %v8688_v58  ;;  %v9083_v22 = vmul.f32 %v16124_v2, %v9058_v21 }
 0xc25   :  { %v8904_v63 = vmul.f32 %v10897_v47, %v8828_v62  ;;  %v9107_v28 = vadd.f32 %v16130_v18, %v9082_v12  ;;  %vm8910_vm2 = vweird.f32 %v10897_v47  ;;  %v8665_v9 = vsel %vm8664_vm3, %v16294_v56, 0.0  ;;  %v9297_v62 = vld [vmem:[%s16695_s10 + $0x18] sm:$0xff] }
 0xc26   :  { %v8730_v40 = vmul.f32 %v16278_v7, %v16278_v7  ;;  %vm8911_vm5 = vmor %vm8909_vm4, %vm8910_vm2  ;;  %v9108_v32 = vadd.f32 %v16130_v18, %v9083_v22  ;;  %9374 = vmatpush.msrb.mxu1 %v9297_v62  ;;  %10107 = vmatpush.msra.mxu2 %v9297_v62 }
 0xc27   :  { %10062 = vmatmul.msk.f32.gmra.mxu0 %vm68_vm0, %v9106_v37  ;;  %v8905_v16 = vmul.f32 %v10897_v47, %v8904_v63 }
 0xc28   :  { %v8777_v23 = vsel %vm68_vm0, %v8730_v40, 0.0 }
 0xc29   :  { %v8906_v30 = vmul.f32 0.5, %v8905_v16  ;;  %8778 = vadd.xlane.f32.xlu1 %v8777_v23 }
 0xc2b   :  { %v8907_v52 = vsub.f32 1.5, %v8906_v30 }
 0xc2d   :  { %v8908_v6 = vmul.f32 %v10897_v47, %v8907_v52 }
 0xc2f   :  { %10063 = vmatmul.msk.f32.gmra.mxu0 %vm68_vm0, %v9107_v28  ;;  %v8912_v20 = vsel %vm8911_vm5, %v10897_v47, %v8908_v6  ;;  %v16335_v28 = vld [vmem:[%s16694_s9] ss:$0 sm:$0xff] }
 0xc30   :  { %v9059_v48 = vmul.f32 %v8912_v20, %v16081_v19  ;;  %v9296_v19 = vld [vmem:[%s16695_s10 + $0x10] sm:$0xff] }
 0xc31   :  { %8666 = vadd.xlane.f32.xlu1 %v8665_v9  ;;  %9375 = vmatpush.msrb.mxu1 %v9296_v19 }
 0xc32   :  { %v9084_v55 = vmul.f32 %v16124_v2, %v9059_v48  ;;  %10108 = vmatpush.msra.mxu2 %v9296_v19 }
 0xc33   :  { %9376 = vmatpush.msrb.mxu1 %v9295_v53 }
 0xc34   :  { %v9109_v43 = vadd.f32 %v16130_v18, %v9084_v55  ;;  %10109 = vmatpush.msra.mxu2 %v9295_v53 }
 0xc35   :  { %9377 = vmatpush.msrb.mxu1 %v9294_v46 }
 0xc36   :  { %10110 = vmatpush.msra.mxu2 %v9294_v46 }
 0xc37   :  { %10064 = vmatmul.msk.f32.gmra.mxu0 %vm68_vm0, %v9108_v32 }
 0xc3f   :  { %10065 = vmatmul.msk.f32.gmra.mxu0 %vm68_vm0, %v9109_v43 }
 0xc6f   :  { %v8761_v24 = vpop.xlane.xlu1 %8760 }
 0xc70   :  { %v8808_v41 = vmul.f32 %v8761_v24, %v15987_v15 }
 0xc72   :  { %v8829_v58 = vadd.f32 1e-05, %v8808_v41 }
 0xc74   :  { %10898 = vrsqrt.f32 %v8829_v58  ;;  %vm8919_vm7 = vweird.f32 %v8829_v58 }
 0xc77   :  { %v8648_v10 = vpop.xlane.xlu1 %8647 }
 0xc78   :  { %v8689_v47 = vmul.f32 %v15987_v15, %v8648_v10 }
 0xc7a   :  { %v10899_v54 = vpop.eup %10898  ;;  %v16323_v37 = vsub.f32 %v16116_v38, %v8689_v47 }
 0xc7b   :  { %v8914_v11 = vmul.f32 %v10899_v54, %v8829_v58  ;;  %vm8920_vm6 = vweird.f32 %v10899_v54 }
 0xc7c   :  { %v8731_v5 = vmul.f32 %v16323_v37, %v16323_v37  ;;  %vm8921_vm8 = vmor %vm8919_vm7, %vm8920_vm6 }
 0xc7d   :  { %v8915_v63 = vmul.f32 %v10899_v54, %v8914_v11  ;;  %v8764_v40 = vpop.xlane.xlu0 %8763 }
 0xc7e   :  { %v8780_v16 = vsel %vm68_vm0, %v8731_v5, 0.0  ;;  %v8809_v23 = vmul.f32 %v8764_v40, %v15987_v15  ;;  %v8767_v12 = vpop.xlane.xlu2 %8766 }
 0xc7f   :  { %v8916_v3 = vmul.f32 0.5, %v8915_v63  ;;  %8781 = vadd.xlane.f32.xlu0 %v8780_v16  ;;  %v8810_v49 = vmul.f32 %v8767_v12, %v15987_v15 }
 0xc80   :  { %v8830_v52 = vadd.f32 1e-05, %v8809_v23 }
 0xc81   :  { %v8917_v30 = vsub.f32 1.5, %v8916_v3  ;;  %v16330_v33 = vadd.f32 1e-05, %v8810_v49 }
 0xc82   :  { %10900 = vrsqrt.f32 %v8830_v52  ;;  %vm8929_vm11 = vweird.f32 %v8830_v52 }
 0xc83   :  { %v8918_v21 = vmul.f32 %v10899_v54, %v8917_v30  ;;  %10902 = vrsqrt.f32 %v16330_v33  ;;  %vm8939_vm14 = vweird.f32 %v16330_v33 }
 0xc85   :  { %v8922_v6 = vsel %vm8921_vm8, %v10899_v54, %v8918_v21  ;;  %v8770_v9 = vpop.xlane.xlu1 %8769  ;;  %v8651_v20 = vpop.xlane.xlu0 %8650 }
 0xc86   :  { %v9060_v22 = vmul.f32 %v8922_v6, %v16103_v44  ;;  %v8811_v48 = vmul.f32 %v8770_v9, %v15987_v15  ;;  %v9210_v32 = vpop.f32.mrf.mxu0  ;;  %v8690_v55 = vmul.f32 %v15987_v15, %v8651_v20  ;;  %v8654_v43 = vpop.xlane.xlu2 %8653 }
 0xc87   :  { %v9211_v62 = vadd.f32 %v16335_v28, %v9210_v32  ;;  %v8691_v53 = vmul.f32 %v15987_v15, %v8654_v43 }
 0xc88   :  { %v16342_v19 = vadd.f32 1e-05, %v8811_v48  ;;  %v9085_v46 = vmul.f32 %v16124_v2, %v9060_v22  ;;  %v10901_v24 = vpop.eup %10900  ;;  %v16347_v41 = vsub.f32 %v16166_v31, %v8690_v55 }
 0xc89   :  { %v9273_v44 = vmax.f32 %v9211_v62, 0.0  ;;  %v10903_v58 = vpop.eup %10902  ;;  %v8924_v10 = vmul.f32 %v10901_v24, %v8830_v52  ;;  %v16352_v54 = vsub.f32 %v16174_v0, %v8691_v53  ;;  %vm8930_vm10 = vweird.f32 %v10901_v24 }
 0xc8a   :  { %10904 = vrsqrt.f32 %v16342_v19  ;;  %v8934_v47 = vmul.f32 %v10903_v58, %v16330_v33  ;;  %v8732_v11 = vmul.f32 %v16347_v41, %v16347_v41  ;;  %v9110_v63 = vadd.f32 %v16130_v18, %v9085_v46  ;;  %vm8931_vm13 = vmor %vm8929_vm11, %vm8930_vm10 }
 0xc8b   :  { %10080 = vmatmul.msk.f32.vlgmr.msrb.gmra.mxu1 %vm9298_vm9, %v9273_v44  ;;  %v8925_v5 = vmul.f32 %v10901_v24, %v8924_v10  ;;  %v8733_v23 = vmul.f32 %v16352_v54, %v16352_v54  ;;  %vm8940_vm12 = vweird.f32 %v10903_v58  ;;  %vm8949_vm2 = vweird.f32 %v16342_v19 }
 0xc8c   :  { %v8935_v40 = vmul.f32 %v10903_v58, %v8934_v47  ;;  %v8783_v16 = vsel %vm68_vm0, %v8732_v11, 0.0  ;;  %10066 = vmatmul.msk.f32.gmra.mxu0 %vm68_vm0, %v9110_v63  ;;  %vm8941_vm15 = vmor %vm8939_vm14, %vm8940_vm12 }
 0xc8d   :  { %v8657_v3 = vpop.xlane.xlu1 %8656  ;;  %v8926_v12 = vmul.f32 0.5, %v8925_v5  ;;  %8784 = vadd.xlane.f32.xlu2 %v8783_v16  ;;  %v8773_v49 = vpop.xlane.xlu0 %8772  ;;  %v8786_v22 = vsel %vm68_vm0, %v8733_v23, 0.0 }
 0xc8e   :  { %v8692_v30 = vmul.f32 %v15987_v15, %v8657_v3  ;;  %v8936_v21 = vmul.f32 0.5, %v8935_v40  ;;  %v8812_v6 = vmul.f32 %v8773_v49, %v15987_v15  ;;  %v8776_v9 = vpop.xlane.xlu2 %8775  ;;  %8787 = vadd.xlane.f32.xlu0 %v8786_v22 }
 0xc8f   :  { %v8927_v48 = vsub.f32 1.5, %v8926_v12  ;;  %v8813_v55 = vmul.f32 %v8776_v9, %v15987_v15 }
 0xc90   :  { %v16365_v20 = vpop.eup %10904  ;;  %v16368_v32 = vsub.f32 %v16216_v25, %v8692_v30  ;;  %v8937_v43 = vsub.f32 1.5, %v8936_v21  ;;  %v16373_v53 = vadd.f32 1e-05, %v8812_v6 }
 0xc91   :  { %v8944_v62 = vmul.f32 %v16365_v20, %v16342_v19  ;;  %v8928_v46 = vmul.f32 %v10901_v24, %v8927_v48  ;;  %v16375_v44 = vadd.f32 1e-05, %v8813_v55  ;;  %vm8950_vm1 = vweird.f32 %v16365_v20 }
 0xc92   :  { %v8734_v10 = vmul.f32 %v16368_v32, %v16368_v32  ;;  %v8938_v47 = vmul.f32 %v10903_v58, %v8937_v43  ;;  %10906 = vrsqrt.f32 %v16373_v53  ;;  %vm16411_vm4 = vmor %vm8949_vm2, %vm8950_vm1  ;;  %vm8959_vm6 = vweird.f32 %v16373_v53 }
 0xc93   :  { %v8945_v11 = vmul.f32 %v16365_v20, %v8944_v62  ;;  %v8932_v52 = vsel %vm8931_vm13, %v10901_v24, %v8928_v46  ;;  %10908 = vrsqrt.f32 %v16375_v44  ;;  %vm8969_vm10 = vweird.f32 %v16375_v44 }
 0xc94   :  { %v9213_v5 = vpop.f32.mrf.mxu0  ;;  %v8789_v63 = vsel %vm68_vm0, %v8734_v10, 0.0  ;;  %v9061_v40 = vmul.f32 %v8932_v52, %v16141_v42  ;;  %v8942_v23 = vsel %vm8941_vm15, %v10903_v58, %v8938_v47 }
 0xc95   :  { %v8946_v16 = vmul.f32 0.5, %v8945_v11  ;;  %v9214_v3 = vadd.f32 %v16335_v28, %v9213_v5  ;;  %8790 = vadd.xlane.f32.xlu1 %v8789_v63  ;;  %v8660_v12 = vpop.xlane.xlu0 %8659  ;;  %v9062_v42 = vmul.f32 %v8942_v23, %v16151_v13 }
 0xc96   :  { %v8693_v24 = vmul.f32 %v15987_v15, %v8660_v12  ;;  %v8663_v21 = vpop.xlane.xlu2 %8662  ;;  %v9086_v33 = vmul.f32 %v16124_v2, %v9061_v40 }
 0xc97   :  { %v8947_v49 = vsub.f32 1.5, %v8946_v16  ;;  %v9274_v30 = vmax.f32 %v9214_v3, 0.0  ;;  %v8694_v6 = vmul.f32 %v15987_v15, %v8663_v21  ;;  %v9087_v16 = vmul.f32 %v16124_v2, %v9062_v42 }
 0xc98   :  { %v10907_v9 = vpop.eup %10906  ;;  %v16393_v48 = vsub.f32 %v16261_v27, %v8693_v24  ;;  %v9111_v58 = vadd.f32 %v16130_v18, %v9086_v33 }
 0xc99   :  { %v8948_v22 = vmul.f32 %v16365_v20, %v8947_v49  ;;  %10081 = vmatmul.msk.f32.gmra.mxu1 %vm9298_vm9, %v9274_v30  ;;  %v16397_v55 = vpop.eup %10908  ;;  %v8954_v43 = vmul.f32 %v10907_v9, %v16373_v53  ;;  %v16401_v62 = vsub.f32 %v16266_v35, %v8694_v6  ;;  %v9112_v33 = vadd.f32 %v16130_v18, %v9087_v16 }
 0xc9a   :  { %v8964_v13 = vmul.f32 %v16397_v55, %v16375_v44  ;;  %10067 = vmatmul.msk.f32.gmra.mxu0 %vm68_vm0, %v9111_v58  ;;  %v8735_v46 = vmul.f32 %v16393_v48, %v16393_v48  ;;  %vm8960_vm5 = vweird.f32 %v10907_v9  ;;  %vm8970_vm8 = vweird.f32 %v16397_v55 }
 0xc9b   :  { %v8955_v47 = vmul.f32 %v10907_v9, %v8954_v43  ;;  %v8736_v52 = vmul.f32 %v16401_v62, %v16401_v62  ;;  %v8952_v19 = vsel %vm16411_vm4, %v16365_v20, %v8948_v22  ;;  %vm8961_vm7 = vmor %vm8959_vm6, %vm8960_vm5 }
 0xc9c   :  { %v9216_v11 = vpop.f32.mrf.mxu0  ;;  %v8779_v63 = vpop.xlane.xlu1 %8778  ;;  %v8792_v40 = vsel %vm68_vm0, %v8735_v46, 0.0  ;;  %v8965_v23 = vmul.f32 %v16397_v55, %v8964_v13  ;;  %v9063_v20 = vmul.f32 %v8952_v19, %v16180_v29  ;;  %vm8971_vm11 = vmor %vm8969_vm10, %vm8970_vm8 }
 0xc9d   :  { %v9217_v5 = vadd.f32 %v16335_v28, %v9216_v11  ;;  %v8956_v3 = vmul.f32 0.5, %v8955_v47  ;;  %v8814_v12 = vmul.f32 %v8779_v63, %v15987_v15  ;;  %8793 = vadd.xlane.f32.xlu2 %v8792_v40  ;;  %v8795_v49 = vsel %vm68_vm0, %v8736_v52, 0.0 }
 0xc9e   :  { %8796 = vadd.xlane.f32.xlu0 %v8795_v49  ;;  %v8966_v42 = vmul.f32 0.5, %v8965_v23  ;;  %v9088_v13 = vmul.f32 %v16124_v2, %v9063_v20 }
 0xc9f   :  { %v9275_v30 = vmax.f32 %v9217_v5, 0.0  ;;  %v8957_v24 = vsub.f32 1.5, %v8956_v3  ;;  %v8835_v21 = vadd.f32 1e-05, %v8814_v12 }
 0xca0   :  { %v8967_v46 = vsub.f32 1.5, %v8966_v42  ;;  %v9113_v53 = vadd.f32 %v16130_v18, %v9088_v13 }
 0xca1   :  { %10082 = vmatmul.msk.f32.gmra.mxu1 %vm9298_vm9, %v9275_v30  ;;  %v8958_v6 = vmul.f32 %v10907_v9, %v8957_v24  ;;  %10910 = vrsqrt.f32 %v8835_v21  ;;  %vm8979_vm13 = vweird.f32 %v8835_v21 }
 0xca2   :  { %10068 = vmatmul.msk.f32.gmra.mxu0 %vm68_vm0, %v9112_v33  ;;  %v8968_v63 = vmul.f32 %v16397_v55, %v8967_v46 }
 0xca3   :  { %v8962_v29 = vsel %vm8961_vm7, %v10907_v9, %v8958_v6 }
 0xca4   :  { %v9219_v22 = vpop.f32.mrf.mxu0  ;;  %v8667_v43 = vpop.xlane.xlu1 %8666  ;;  %v9064_v19 = vmul.f32 %v8962_v29, %v16220_v34  ;;  %v8972_v49 = vsel %vm8971_vm11, %v16397_v55, %v8968_v63 }
 0xca5   :  { %v9220_v58 = vadd.f32 %v16335_v28, %v9219_v22  ;;  %v8695_v10 = vmul.f32 %v15987_v15, %v8667_v43  ;;  %v9065_v20 = vmul.f32 %v8972_v49, %v16230_v60 }
 0xca6   :  { %v9089_v12 = vmul.f32 %v16124_v2, %v9064_v19 }
 0xca7   :  { %v9276_v47 = vmax.f32 %v9220_v58, 0.0  ;;  %v10911_v11 = vpop.eup %10910  ;;  %v16435_v52 = vsub.f32 %v16294_v56, %v8695_v10  ;;  %v9090_v22 = vmul.f32 %v16124_v2, %v9065_v20 }
 0xca8   :  { %v8974_v5 = vmul.f32 %v10911_v11, %v8835_v21  ;;  %v9114_v44 = vadd.f32 %v16130_v18, %v9089_v12  ;;  %vm8980_vm12 = vweird.f32 %v10911_v11 }
 0xca9   :  { %10083 = vmatmul.msk.f32.gmra.mxu1 %vm9298_vm9, %v9276_v47  ;;  %v8737_v9 = vmul.f32 %v16435_v52, %v16435_v52  ;;  %vm8981_vm14 = vmor %vm8979_vm13, %vm8980_vm12  ;;  %v9115_v60 = vadd.f32 %v16130_v18, %v9090_v22 }
 0xcaa   :  { %v8975_v40 = vmul.f32 %v10911_v11, %v8974_v5  ;;  %10069 = vmatmul.msk.f32.gmra.mxu0 %vm68_vm0, %v9113_v53 }
 0xcab   :  { %v8798_v34 = vsel %vm8664_vm3, %v8737_v9, 0.0 }
 0xcac   :  { %v9222_v16 = vpop.f32.mrf.mxu0  ;;  %v8976_v3 = vmul.f32 0.5, %v8975_v40  ;;  %8799 = vadd.xlane.f32.xlu1 %v8798_v34 }
 0xcad   :  { %v9223_v23 = vadd.f32 %v16335_v28, %v9222_v16 }
 0xcae   :  { %v8977_v30 = vsub.f32 1.5, %v8976_v3 }
 0xcaf   :  { %v9277_v24 = vmax.f32 %v9223_v23, 0.0 }
 0xcb0   :  { %v8978_v33 = vmul.f32 %v10911_v11, %v8977_v30  ;;  %v16471_v30 = vld [vmem:[%s16696_s11] ss:$0 sm:$0xff] }
 0xcb1   :  { %10084 = vmatmul.msk.f32.gmra.mxu1 %vm9298_vm9, %v9277_v24 }
 0xcb2   :  { %10070 = vmatmul.msk.f32.gmra.mxu0 %vm68_vm0, %v9114_v44  ;;  %v8982_v55 = vsel %vm8981_vm14, %v10911_v11, %v8978_v33 }
 0xcb3   :  { %v9066_v43 = vmul.f32 %v8982_v55, %v16278_v7 }
 0xcb4   :  { %v9225_v6 = vpop.f32.mrf.mxu0 }
 0xcb5   :  { %v9226_v42 = vadd.f32 %v16335_v28, %v9225_v6  ;;  %v9091_v21 = vmul.f32 %v16124_v2, %v9066_v43 }
 0xcb7   :  { %v9278_v58 = vmax.f32 %v9226_v42, 0.0  ;;  %v9116_v10 = vadd.f32 %v16130_v18, %v9091_v21 }
 0xcb9   :  { %10085 = vmatmul.msk.f32.gmra.mxu1 %vm9298_vm9, %v9278_v58 }
 0xcba   :  { %10071 = vmatmul.msk.f32.gmra.mxu0 %vm68_vm0, %v9115_v60 }
 0xcbc   :  { %v9228_v13 = vpop.f32.mrf.mxu0 }
 0xcbd   :  { %v9229_v29 = vadd.f32 %v16335_v28, %v9228_v13 }
 0xcbf   :  { %v9279_v46 = vmax.f32 %v9229_v29, 0.0 }
 0xcc1   :  { %10086 = vmatmul.msk.f32.gmra.mxu1 %vm9298_vm9, %v9279_v46 }
 0xcc2   :  { %10072 = vmatmul.msk.f32.gmra.mxu0 %vm68_vm0, %v9116_v10 }
 0xcf2   :  { %v8782_v47 = vpop.xlane.xlu0 %8781 }
 0xcf3   :  { %v8815_v7 = vmul.f32 %v8782_v47, %v15987_v15 }
 0xcf5   :  { %v8836_v11 = vadd.f32 1e-05, %v8815_v7 }
 0xcf7   :  { %10912 = vrsqrt.f32 %v8836_v11  ;;  %vm8989_vm1 = vweird.f32 %v8836_v11 }
 0xcfd   :  { %v10913_v19 = vpop.eup %10912 }
 0xcfe   :  { %v8984_v5 = vmul.f32 %v10913_v19, %v8836_v11  ;;  %vm8990_vm15 = vweird.f32 %v10913_v19 }
 0xcff   :  { %vm8991_vm2 = vmor %vm8989_vm1, %vm8990_vm15 }
 0xd00   :  { %v8985_v53 = vmul.f32 %v10913_v19, %v8984_v5  ;;  %v8785_v63 = vpop.xlane.xlu2 %8784 }
 0xd01   :  { %v8816_v40 = vmul.f32 %v8785_v63, %v15987_v15  ;;  %v8788_v16 = vpop.xlane.xlu0 %8787 }
 0xd02   :  { %v8986_v9 = vmul.f32 0.5, %v8985_v53  ;;  %v8817_v23 = vmul.f32 %v8788_v16, %v15987_v15 }
 0xd03   :  { %v8837_v3 = vadd.f32 1e-05, %v8816_v40 }
 0xd04   :  { %v8987_v34 = vsub.f32 1.5, %v8986_v9  ;;  %v8838_v49 = vadd.f32 1e-05, %v8817_v23 }
 0xd05   :  { %10914 = vrsqrt.f32 %v8837_v3  ;;  %vm8999_vm5 = vweird.f32 %v8837_v3 }
 0xd06   :  { %v8988_v12 = vmul.f32 %v10913_v19, %v8987_v34  ;;  %10916 = vrsqrt.f32 %v8838_v49  ;;  %vm9009_vm8 = vweird.f32 %v8838_v49 }
 0xd08   :  { %v8992_v24 = vsel %vm8991_vm2, %v10913_v19, %v8988_v12  ;;  %v8791_v20 = vpop.xlane.xlu1 %8790  ;;  %v9379_v44 = vpop.f32.mrf.mxu1 }
 0xd09   :  { %v9067_v33 = vmul.f32 %v8992_v24, %v16323_v37  ;;  %v8818_v6 = vmul.f32 %v8791_v20, %v15987_v15  ;;  %v9442_v42 = vadd.f32 %v9379_v44, %v15867_v4  ;;  %v9231_v58 = vpop.f32.mrf.mxu0 }
 0xd0a   :  { %v9232_v13 = vadd.f32 %v16335_v28, %v9231_v58 }
 0xd0b   :  { %v16476_v22 = vadd.f32 1e-05, %v8818_v6  ;;  %v9467_v55 = vadd.f32 %v16471_v30, %v9442_v42  ;;  %v9092_v43 = vmul.f32 %v16124_v2, %v9067_v33  ;;  %v10915_v60 = vpop.eup %10914 }
 0xd0c   :  { %v8994_v29 = vmul.f32 %v10915_v60, %v8837_v3  ;;  %v10917_v37 = vpop.eup %10916  ;;  %v9280_v4 = vmax.f32 %v9232_v13, 0.0  ;;  %vm9000_vm4 = vweird.f32 %v10915_v60 }
 0xd0d   :  { %10918 = vrsqrt.f32 %v16476_v22  ;;  %9488 = vst.msk [vmem:[%s16697_s12] sm:$0xff] %vm68_vm0, %v9467_v55  ;;  %v9117_v21 = vadd.f32 %v16130_v18, %v9092_v43  ;;  %v9004_v10 = vmul.f32 %v10917_v37, %v8838_v49  ;;  %vm9010_vm6 = vweird.f32 %v10917_v37  ;;  %vm9001_vm7 = vmor %vm8999_vm5, %vm9000_vm4 }
 0xd0e   :  { %v8995_v46 = vmul.f32 %v10915_v60, %v8994_v29  ;;  %10087 = vmatmul.msk.f32.gmra.mxu1 %vm9298_vm9, %v9280_v4  ;;  %vm9011_vm10 = vmor %vm9009_vm8, %vm9010_vm6  ;;  %vm9019_vm12 = vweird.f32 %v16476_v22 }
 0xd0f   :  { %10073 = vmatmul.msk.f32.gmra.mxu0 %vm68_vm0, %v9117_v21  ;;  %v9005_v7 = vmul.f32 %v10917_v37, %v9004_v10 }
 0xd10   :  { %v8996_v47 = vmul.f32 0.5, %v8995_v46  ;;  %v8794_v11 = vpop.xlane.xlu2 %8793 }
 0xd11   :  { %v8819_v19 = vmul.f32 %v8794_v11, %v15987_v15  ;;  %v8797_v5 = vpop.xlane.xlu0 %8796  ;;  %v9006_v9 = vmul.f32 0.5, %v9005_v7 }
 0xd12   :  { %v8997_v63 = vsub.f32 1.5, %v8996_v47  ;;  %v8820_v40 = vmul.f32 %v8797_v5, %v15987_v15 }
 0xd13   :  { %v10919_v53 = vpop.eup %10918  ;;  %v16492_v34 = vadd.f32 1e-05, %v8819_v19  ;;  %v9007_v12 = vsub.f32 1.5, %v9006_v9 }
 0xd14   :  { %v9014_v16 = vmul.f32 %v10919_v53, %v16476_v22  ;;  %v8998_v23 = vmul.f32 %v10915_v60, %v8997_v63  ;;  %v16494_v24 = vadd.f32 1e-05, %v8820_v40  ;;  %vm9020_vm11 = vweird.f32 %v10919_v53 }
 0xd15   :  { %10920 = vrsqrt.f32 %v16492_v34  ;;  %v9008_v6 = vmul.f32 %v10917_v37, %v9007_v12  ;;  %vm16517_vm13 = vmor %vm9019_vm12, %vm9020_vm11  ;;  %vm9029_vm15 = vweird.f32 %v16492_v34 }
 0xd16   :  { %v9015_v20 = vmul.f32 %v10919_v53, %v9014_v16  ;;  %v9382_v44 = vpop.f32.mrf.mxu1  ;;  %v9002_v33 = vsel %vm9001_vm7, %v10915_v60, %v8998_v23  ;;  %10922 = vrsqrt.f32 %v16494_v24  ;;  %vm9039_vm4 = vweird.f32 %v16494_v24 }
 0xd17   :  { %v9068_v3 = vmul.f32 %v9002_v33, %v16347_v41  ;;  %v9443_v55 = vadd.f32 %v9382_v44, %v15886_v39  ;;  %v9234_v58 = vpop.f32.mrf.mxu0  ;;  %v9012_v43 = vsel %vm9011_vm10, %v10917_v37, %v9008_v6 }
 0xd18   :  { %v9016_v42 = vmul.f32 0.5, %v9015_v20  ;;  %v9235_v13 = vadd.f32 %v16335_v28, %v9234_v58  ;;  %v9069_v49 = vmul.f32 %v9012_v43, %v16352_v54 }
 0xd19   :  { %v9468_v4 = vadd.f32 %v16471_v30, %v9443_v55  ;;  %v9093_v21 = vmul.f32 %v16124_v2, %v9068_v3 }
 0xd1a   :  { %v9017_v29 = vsub.f32 1.5, %v9016_v42  ;;  %v9281_v60 = vmax.f32 %v9235_v13, 0.0  ;;  %v9094_v40 = vmul.f32 %v16124_v2, %v9069_v49 }
 0xd1b   :  { %v10921_v46 = vpop.eup %10920  ;;  %9489 = vst.msk [vmem:[%s16697_s12 + $0x8] sm:$0xff] %vm68_vm0, %v9468_v4  ;;  %v9118_v39 = vadd.f32 %v16130_v18, %v9093_v21 }
 0xd1c   :  { %v9018_v10 = vmul.f32 %v10919_v53, %v9017_v29  ;;  %v16509_v41 = vpop.eup %10922  ;;  %v9024_v37 = vmul.f32 %v10921_v46, %v16492_v34  ;;  %10088 = vmatmul.msk.f32.gmra.mxu1 %vm9298_vm9, %v9281_v60  ;;  %v9119_v6 = vadd.f32 %v16130_v18, %v9094_v40  ;;  %vm9030_vm14 = vweird.f32 %v10921_v46  ;;  %v10948_v60 = vld [vmem:[%s16692_s7] ss:$0 sm:$0xff] }
 0xd1d   :  { %v9034_v54 = vmul.f32 %v16509_v41, %v16494_v24  ;;  %10074 = vmatmul.msk.f32.gmra.mxu0 %vm68_vm0, %v9118_v39  ;;  %vm9031_vm1 = vmor %vm9029_vm15, %vm9030_vm14  ;;  %vm9040_vm2 = vweird.f32 %v16509_v41 }
 0xd1e   :  { %v9385_v47 = vpop.f32.mrf.mxu1  ;;  %v9025_v11 = vmul.f32 %v10921_v46, %v9024_v37  ;;  %v9022_v5 = vsel %vm16517_vm13, %v10919_v53, %v9018_v10  ;;  %vm9041_vm5 = vmor %vm9039_vm4, %vm9040_vm2 }
 0xd1f   :  { %v9444_v19 = vadd.f32 %v9385_v47, %v15893_v57  ;;  %v9035_v63 = vmul.f32 %v16509_v41, %v9034_v54  ;;  %v9237_v9 = vpop.f32.mrf.mxu0  ;;  %v8800_v22 = vpop.xlane.xlu1 %8799  ;;  %v9070_v33 = vmul.f32 %v9022_v5, %v16368_v32  ;;  %v10947_v32 = vld [vmem:[%s16691_s6] ss:$0 sm:$0xff] }
 0xd20   :  { %v9026_v16 = vmul.f32 0.5, %v9025_v11  ;;  %v9238_v12 = vadd.f32 %v16335_v28, %v9237_v9  ;;  %v8821_v20 = vmul.f32 %v8800_v22, %v15987_v15 }
 0xd21   :  { %v9469_v23 = vadd.f32 %v16471_v30, %v9444_v19  ;;  %v9036_v3 = vmul.f32 0.5, %v9035_v63  ;;  %v9095_v18 = vmul.f32 %v10947_v32, %v9070_v33 }
 0xd22   :  { %v9027_v44 = vsub.f32 1.5, %v9026_v16  ;;  %v9282_v57 = vmax.f32 %v9238_v12, 0.0  ;;  %v8842_v53 = vadd.f32 1e-05, %v8821_v20 }
 0xd23   :  { %9490 = vst.msk [vmem:[%s16697_s12 + $0x10] sm:$0xff] %vm68_vm0, %v9469_v23  ;;  %v9037_v43 = vsub.f32 1.5, %v9036_v3 }
 0xd24   :  { %v9028_v2 = vmul.f32 %v10921_v46, %v9027_v44  ;;  %10924 = vrsqrt.f32 %v8842_v53  ;;  %10089 = vmatmul.msk.f32.gmra.mxu1 %vm9298_vm9, %v9282_v57  ;;  %vm9049_vm7 = vweird.f32 %v8842_v53 }
 0xd25   :  { %10075 = vmatmul.msk.f32.gmra.mxu0 %vm68_vm0, %v9119_v6  ;;  %v9038_v49 = vmul.f32 %v16509_v41, %v9037_v43 }
 0xd26   :  { %v9388_v15 = vpop.f32.mrf.mxu1  ;;  %v9032_v58 = vsel %vm9031_vm1, %v10921_v46, %v9028_v2  ;;  %v9120_v46 = vadd.f32 %v10948_v60, %v9095_v18 }
 0xd27   :  { %v9445_v42 = vadd.f32 %v9388_v15, %v15914_v51  ;;  %v9240_v55 = vpop.f32.mrf.mxu0  ;;  %v9071_v34 = vmul.f32 %v9032_v58, %v16393_v48  ;;  %v9042_v7 = vsel %vm9041_vm5, %v16509_v41, %v9038_v49 }
 0xd28   :  { %v9241_v29 = vadd.f32 %v16335_v28, %v9240_v55  ;;  %v9072_v24 = vmul.f32 %v9042_v7, %v16401_v62 }
 0xd29   :  { %v9470_v13 = vadd.f32 %v16471_v30, %v9445_v42  ;;  %v9096_v47 = vmul.f32 %v10947_v32, %v9071_v34 }
 0xd2a   :  { %v10925_v4 = vpop.eup %10924  ;;  %v9283_v51 = vmax.f32 %v9241_v29, 0.0  ;;  %v9097_v16 = vmul.f32 %v10947_v32, %v9072_v24 }
 0xd2b   :  { %9491 = vst.msk [vmem:[%s16697_s12 + $0x18] sm:$0xff] %vm68_vm0, %v9470_v13  ;;  %v9044_v21 = vmul.f32 %v10925_v4, %v8842_v53  ;;  %vm9050_vm6 = vweird.f32 %v10925_v4 }
 0xd2c   :  { %10090 = vmatmul.msk.f32.gmra.mxu1 %vm9298_vm9, %v9283_v51  ;;  %vm9051_vm8 = vmor %vm9049_vm7, %vm9050_vm6  ;;  %v9122_v57 = vadd.f32 %v10948_v60, %v9097_v16 }
 0xd2d   :  { %v9045_v10 = vmul.f32 %v10925_v4, %v9044_v21  ;;  %10076 = vmatmul.msk.f32.gmra.mxu0 %vm68_vm0, %v9120_v46 }
 0xd2e   :  { %v9391_v39 = vpop.f32.mrf.mxu1 }
 0xd2f   :  { %v9446_v48 = vadd.f32 %v9391_v39, %v15898_v61  ;;  %v9046_v37 = vmul.f32 0.5, %v9045_v10  ;;  %v9243_v54 = vpop.f32.mrf.mxu0  ;;  %v9121_v61 = vadd.f32 %v10948_v60, %v9096_v47 }
 0xd30   :  { %v9244_v19 = vadd.f32 %v16335_v28, %v9243_v54 }
 0xd31   :  { %v9471_v11 = vadd.f32 %v16471_v30, %v9446_v48  ;;  %v9047_v5 = vsub.f32 1.5, %v9046_v37 }
 0xd32   :  { %v9284_v63 = vmax.f32 %v9244_v19, 0.0 }
 0xd33   :  { %9492 = vst.msk [vmem:[%s16697_s12 + $0x20] sm:$0xff] %vm68_vm0, %v9471_v11  ;;  %v9048_v9 = vmul.f32 %v10925_v4, %v9047_v5 }
 0xd34   :  { %10091 = vmatmul.msk.f32.gmra.mxu1 %vm9298_vm9, %v9284_v63 }
 0xd35   :  { %10077 = vmatmul.msk.f32.gmra.mxu0 %vm68_vm0, %v9121_v61  ;;  %v9052_v23 = vsel %vm9051_vm8, %v10925_v4, %v9048_v9 }
 0xd36   :  { %v9394_v41 = vpop.f32.mrf.mxu1  ;;  %v9073_v44 = vmul.f32 %v9052_v23, %v16435_v52 }
 0xd37   :  { %v9447_v22 = vadd.f32 %v9394_v41, %v15929_v26  ;;  %v9246_v40 = vpop.f32.mrf.mxu0 }
 0xd38   :  { %v9247_v20 = vadd.f32 %v16335_v28, %v9246_v40  ;;  %v9098_v6 = vmul.f32 %v10947_v32, %v9073_v44 }
 0xd39   :  { %v9472_v12 = vadd.f32 %v16471_v30, %v9447_v22 }
 0xd3a   :  { %v9285_v62 = vmax.f32 %v9247_v20, 0.0  ;;  %v9123_v15 = vadd.f32 %v10948_v60, %v9098_v6 }
 0xd3b   :  { %9493 = vst.msk [vmem:[%s16697_s12 + $0x28] sm:$0xff] %vm68_vm0, %v9472_v12 }
 0xd3c   :  { %10092 = vmatmul.msk.f32.gmra.mxu1 %vm9298_vm9, %v9285_v62 }
 0xd3d   :  { %10078 = vmatmul.msk.f32.gmra.mxu0 %vm68_vm0, %v9122_v57 }
 0xd3e   :  { %v9397_v26 = vpop.f32.mrf.mxu1 }
 0xd3f   :  { %v9448_v53 = vadd.f32 %v9397_v26, %v15948_v45  ;;  %v9249_v33 = vpop.f32.mrf.mxu0 }
 0xd40   :  { %v9250_v3 = vadd.f32 %v16335_v28, %v9249_v33 }
 0xd41   :  { %v9473_v2 = vadd.f32 %v16471_v30, %v9448_v53 }
 0xd42   :  { %v9286_v52 = vmax.f32 %v9250_v3, 0.0 }
 0xd43   :  { %9494 = vst.msk [vmem:[%s16697_s12 + $0x30] sm:$0xff] %vm68_vm0, %v9473_v2 }
 0xd44   :  { %10093 = vmatmul.msk.f32.gmra.mxu1 %vm9298_vm9, %v9286_v52 }
 0xd45   :  { %10079 = vmatmul.msk.f32.gmra.mxu0 %vm68_vm0, %v9123_v15 }
 0xd8b   :  { %v9400_v42 = vpop.f32.mrf.mxu1 }
 0xd8c   :  { %v9252_v55 = vpop.f32.mrf.mxu0  ;;  %v9449_v45 = vadd.f32 %v9400_v42, %v16000_v14 }
 0xd8d   :  { %v9253_v32 = vadd.f32 %v16335_v28, %v9252_v55 }
 0xd8e   :  { %v9474_v18 = vadd.f32 %v16471_v30, %v9449_v45 }
 0xd8f   :  { %v9287_v58 = vmax.f32 %v9253_v32, 0.0 }
 0xd90   :  { %9495 = vst.msk [vmem:[%s16697_s12 + $0x38] sm:$0xff] %vm68_vm0, %v9474_v18 }
 0xd91   :  { %10094 = vmatmul.msk.f32.gmra.mxu1 %vm9298_vm9, %v9287_v58 }
 0xd99   :  { %v9403_v43 = vpop.f32.mrf.mxu1 }
 0xd9a   :  { %v9450_v13 = vadd.f32 %v9403_v43, %v16024_v17  ;;  %v9255_v29 = vpop.f32.mrf.mxu0 }
 0xd9b   :  { %v9256_v4 = vadd.f32 %v16335_v28, %v9255_v29 }
 0xd9c   :  { %v9475_v14 = vadd.f32 %v16471_v30, %v9450_v13 }
 0xd9d   :  { %v9288_v51 = vmax.f32 %v9256_v4, 0.0 }
 0xd9e   :  { %9496 = vst.msk [vmem:[%s16697_s12 + $0x40] sm:$0xff] %vm68_vm0, %v9475_v14 }
 0xd9f   :  { %10095 = vmatmul.msk.f32.vlgmr.msra.gmra.mxu2 %vm9298_vm9, %v9288_v51 }
 0xda1   :  { %v9406_v34 = vpop.f32.mrf.mxu1 }
 0xda2   :  { %v9451_v21 = vadd.f32 %v9406_v34, %v16033_v1  ;;  %v9258_v60 = vpop.f32.mrf.mxu0 }
 0xda3   :  { %v9259_v46 = vadd.f32 %v16335_v28, %v9258_v60 }
 0xda4   :  { %v9476_v17 = vadd.f32 %v16471_v30, %v9451_v21 }
 0xda5   :  { %v9289_v49 = vmax.f32 %v9259_v46, 0.0 }
 0xda6   :  { %9497 = vst.msk [vmem:[%s16697_s12 + $0x48] sm:$0xff] %vm68_vm0, %v9476_v17 }
 0xda7   :  { %10096 = vmatmul.msk.f32.gmra.mxu2 %vm9298_vm9, %v9289_v49 }
 0xda9   :  { %v9409_v10 = vpop.f32.mrf.mxu1 }
 0xdaa   :  { %v9452_v39 = vadd.f32 %v9409_v10, %v16050_v59  ;;  %v9261_v48 = vpop.f32.mrf.mxu0 }
 0xdab   :  { %v9262_v37 = vadd.f32 %v16335_v28, %v9261_v48 }
 0xdac   :  { %v9477_v1 = vadd.f32 %v16471_v30, %v9452_v39 }
 0xdad   :  { %v9290_v54 = vmax.f32 %v9262_v37, 0.0 }
 0xdae   :  { %9498 = vst.msk [vmem:[%s16697_s12 + $0x50] sm:$0xff] %vm68_vm0, %v9477_v1 }
 0xdaf   :  { %10097 = vmatmul.msk.f32.gmra.mxu2 %vm9298_vm9, %v9290_v54 }
 0xdb1   :  { %v9412_v47 = vpop.f32.mrf.mxu1 }
 0xdb2   :  { %v9453_v7 = vadd.f32 %v9412_v47, %v16068_v8  ;;  %v9264_v11 = vpop.f32.mrf.mxu0 }
 0xdb3   :  { %v9265_v19 = vadd.f32 %v16335_v28, %v9264_v11 }
 0xdb4   :  { %v9478_v59 = vadd.f32 %v16471_v30, %v9453_v7 }
 0xdb5   :  { %v9291_v5 = vmax.f32 %v9265_v19, 0.0 }
 0xdb6   :  { %9499 = vst.msk [vmem:[%s16697_s12 + $0x58] sm:$0xff] %vm68_vm0, %v9478_v59 }
 0xdb7   :  { %10098 = vmatmul.msk.f32.gmra.mxu2 %vm9298_vm9, %v9291_v5 }
 0xdb9   :  { %v9415_v63 = vpop.f32.mrf.mxu1 }
 0xdba   :  { %v9454_v24 = vadd.f32 %v9415_v63, %v16073_v50  ;;  %v9267_v61 = vpop.f32.mrf.mxu0 }
 0xdbb   :  { %v9268_v9 = vadd.f32 %v16335_v28, %v9267_v61 }
 0xdbc   :  { %v9479_v8 = vadd.f32 %v16471_v30, %v9454_v24 }
 0xdbd   :  { %v9292_v41 = vmax.f32 %v9268_v9, 0.0 }
 0xdbe   :  { %9500 = vst.msk [vmem:[%s16697_s12 + $0x60] sm:$0xff] %vm68_vm0, %v9479_v8 }
 0xdbf   :  { %10099 = vmatmul.msk.f32.gmra.mxu2 %vm9298_vm9, %v9292_v41 }
 0xdc1   :  { %v9418_v22 = vpop.f32.mrf.mxu1 }
 0xdc2   :  { %v9455_v40 = vadd.f32 %v9418_v22, %v16090_v36  ;;  %v9270_v16 = vpop.f32.mrf.mxu0 }
 0xdc3   :  { %v9271_v23 = vadd.f32 %v16335_v28, %v9270_v16 }
 0xdc4   :  { %v9480_v50 = vadd.f32 %v16471_v30, %v9455_v40 }
 0xdc5   :  { %v9293_v12 = vmax.f32 %v9271_v23, 0.0 }
 0xdc6   :  { %9501 = vst.msk [vmem:[%s16697_s12 + $0x68] sm:$0xff] %vm68_vm0, %v9480_v50 }
 0xdc7   :  { %10100 = vmatmul.msk.f32.gmra.mxu2 %vm9298_vm9, %v9293_v12 }
 0xe0e   :  { %v9421_v20 = vpop.f32.mrf.mxu1 }
 0xe0f   :  { %v9456_v62 = vadd.f32 %v9421_v20, %v16116_v38 }
 0xe11   :  { %v9481_v44 = vadd.f32 %v16471_v30, %v9456_v62 }
 0xe13   :  { %9502 = vst.msk [vmem:[%s16697_s12 + $0x70] sm:$0xff] %vm68_vm0, %v9481_v44 }
 0xe22   :  { %v9424_v36 = vpop.f32.mrf.mxu2 }
 0xe23   :  { %v9457_v28 = vadd.f32 %v9424_v36, %v16166_v31 }
 0xe25   :  { %v9482_v57 = vadd.f32 %v16471_v30, %v9457_v28 }
 0xe27   :  { %9503 = vst.msk [vmem:[%s16697_s12 + $0x78] sm:$0xff] %vm68_vm0, %v9482_v57 }
 0xe2a   :  { %v9427_v26 = vpop.f32.mrf.mxu2 }
 0xe2b   :  { %v9458_v38 = vadd.f32 %v9427_v26, %v16174_v0 }
 0xe2d   :  { %v9483_v53 = vadd.f32 %v16471_v30, %v9458_v38 }
 0xe2f   :  { %9504 = vst.msk [vmem:[%s16697_s12 + $0x80] sm:$0xff] %vm68_vm0, %v9483_v53 }
 0xe32   :  { %v9430_v33 = vpop.f32.mrf.mxu2 }
 0xe33   :  { %v9459_v31 = vadd.f32 %v9430_v33, %v16216_v25 }
 0xe35   :  { %v9484_v6 = vadd.f32 %v16471_v30, %v9459_v31 }
 0xe37   :  { %9505 = vst.msk [vmem:[%s16697_s12 + $0x88] sm:$0xff] %vm68_vm0, %v9484_v6 }
 0xe3a   :  { %v9433_v2 = vpop.f32.mrf.mxu2 }
 0xe3b   :  { %v9460_v0 = vadd.f32 %v9433_v2, %v16261_v27 }
 0xe3d   :  { %v9485_v3 = vadd.f32 %v16471_v30, %v9460_v0 }
 0xe3f   :  { %9506 = vst.msk [vmem:[%s16697_s12 + $0x90] sm:$0xff] %vm68_vm0, %v9485_v3 }
 0xe42   :  { %v9436_v52 = vpop.f32.mrf.mxu2 }
 0xe43   :  { %v9461_v25 = vadd.f32 %v9436_v52, %v16266_v35 }
 0xe45   :  { %v9486_v15 = vadd.f32 %v16471_v30, %v9461_v25 }
 0xe47   :  { %9507 = vst.msk [vmem:[%s16697_s12 + $0x98] sm:$0xff] %vm68_vm0, %v9486_v15 }
 0xe4a   :  { %v9439_v42 = vpop.f32.mrf.mxu2 }
 0xe4b   :  { %v9462_v27 = vadd.f32 %v9439_v42, %v16294_v56 }
 0xe4d   :  { %v9487_v55 = vadd.f32 %v16471_v30, %v9462_v27 }
 0xe4f   :  { %9508 = vst.msk [vmem:[%s16697_s12 + $0xa0] sm:$0x3] %vm8664_vm3, %v9487_v55 }

</bundles_post_ra>
